<compile_context>
chip_gen: v6e
topology: v6e:2x2x1
jax: 0.10.0
libtpu: 0.0.40
codegen_flags: <defaults>
</compile_context>

<pallas_src>
import functools
import math

import jax
import jax.numpy as jnp
from jax.experimental import pallas as pl
from jax.experimental.pallas import tpu as pltpu


def _layer_norm(x, gamma, beta, eps=1e-5):
    # PyTorch LayerNorm: biased variance over the last axis; rsqrt -> EUP.
    mean = jnp.mean(x, axis=-1, keepdims=True)
    var = jnp.mean((x - mean) ** 2, axis=-1, keepdims=True)
    return (x - mean) * jax.lax.rsqrt(var + eps) * gamma + beta


def transformer_block_kernel(
    x_ref, mask_ref,
    ln1_g_ref, ln1_b_ref,
    wq_ref, bq_ref, wk_ref, bk_ref, wv_ref, bv_ref,
    wo_ref, bo_ref,
    ln2_g_ref, ln2_b_ref,
    w1_ref, b1_ref, w2_ref, b2_ref,
    out_ref,
    q_s, k_s, v_s, ctx_s,          # VMEM scratch, each (BT*S, D) bf16
    *, batch_tile, seq_len, num_heads, inv_scale, exact_gelu,
):
    BT, S, H = batch_tile, seq_len, num_heads
    x = x_ref[...]                 # (BT*S, D) f32
    D = x.shape[-1]
    hd = D // H

    # ---------------- attention sub-block (pre-LayerNorm) -----------------
    xn = _layer_norm(x, ln1_g_ref[0], ln1_b_ref[0]).astype(jnp.bfloat16)

    # Each projection: dot (M=BT*S rows) + bias, scale folded into q, cast to
    # bf16 immediately and parked in VMEM (keeps vregs free for the softmax).
    q_s[...] = ((jnp.dot(xn, wq_ref[...], preferred_element_type=jnp.float32)
                 + bq_ref[0]) * inv_scale).astype(jnp.bfloat16)
    k_s[...] = (jnp.dot(xn, wk_ref[...], preferred_element_type=jnp.float32)
                + bk_ref[0]).astype(jnp.bfloat16)
    v_s[...] = (jnp.dot(xn, wv_ref[...], preferred_element_type=jnp.float32)
                + bv_ref[0]).astype(jnp.bfloat16)

    mask_add = mask_ref[...]       # (S, S) f32 additive causal mask (hoisted)

    # Attention core: per (batch-in-tile, head).  Small static unroll
    # (BT*H = 8 in the demo); each head's live values die after its store.
    for b in range(BT):
        r0 = b * S
        for h in range(H):
            c0 = h * hd
            qh = q_s[r0:r0 + S, c0:c0 + hd]
            kh = k_s[r0:r0 + S, c0:c0 + hd]
            vh = v_s[r0:r0 + S, c0:c0 + hd]
            # q @ k^T without an explicit transpose (MXU takes the NT form).
            s = jax.lax.dot_general(
                qh, kh, (((1,), (1,)), ((), ())),
                preferred_element_type=jnp.float32,
            ) + mask_add
            s = s - jnp.max(s, axis=-1, keepdims=True)
            p = jnp.exp(s)
            # attn_drop is identity in eval mode
            p = p * pl.reciprocal(jnp.sum(p, axis=-1, keepdims=True), approx=True)
            ctx_s[r0:r0 + S, c0:c0 + hd] = jnp.dot(
                p.astype(jnp.bfloat16), vh, preferred_element_type=jnp.float32
            ).astype(jnp.bfloat16)

    attn = jnp.dot(ctx_s[...], wo_ref[...],
                   preferred_element_type=jnp.float32) + bo_ref[0]
    # resid_drop is identity in eval mode
    x = x + attn

    # ---------------- MLP sub-block (pre-LayerNorm) ------------------------
    xn2 = _layer_norm(x, ln2_g_ref[0], ln2_b_ref[0]).astype(jnp.bfloat16)
    h1 = jnp.dot(xn2, w1_ref[...], preferred_element_type=jnp.float32) + b1_ref[0]
    # tanh GELU (review): ~1 EUP op vs the erf sequence; exact_gelu=True
    # restores PyTorch nn.GELU()'s exact erf formulation.
    h1 = jax.nn.gelu(h1, approximate=not exact_gelu)
    h2 = jnp.dot(h1.astype(jnp.bfloat16), w2_ref[...],
                 preferred_element_type=jnp.float32) + b2_ref[0]
    # mlp Dropout is identity in eval mode
    out_ref[...] = (x + h2).astype(out_ref.dtype)


def _pick_batch_tile(batch, seq_len, target_rows=128):
    """Smallest batch tile whose rows fill an MXU pass (>=128 rows), preferring
    to keep >=2 grid steps so both v7x TensorCores get work when possible."""
    divisors = [d for d in range(1, batch + 1) if batch % d == 0]
    for need_two_steps in (True, False):
        for d in divisors:
            if d * seq_len >= target_rows and (batch // d >= 2 or not need_two_steps):
                return d
    return batch


def transformer_block(x, params, *, num_heads, block_batch=None, exact_gelu=False):
    B, S, D = x.shape
    assert D % num_heads == 0
    BT = block_batch if block_batch is not None else _pick_batch_tile(B, S)
    assert B % BT == 0
    rows = BT * S
    inv_scale = 1.0 / math.sqrt(D)   # PyTorch module uses sqrt(embed_dim)

    # Additive causal mask, built once on the host and kept VMEM-resident.
    r = jnp.arange(S)[:, None]
    c = jnp.arange(S)[None, :]
    mask_add = jnp.where(r >= c, 0.0, -1e30).astype(jnp.float32)

    param_names = [
        "ln1_g", "ln1_b",
        "wq", "bq", "wk", "bk", "wv", "bv", "wo", "bo",
        "ln2_g", "ln2_b",
        "w1", "b1", "w2", "b2",
    ]
    param_list = [params[n] for n in param_names]

    # Flatten batch into the matmul M dimension; the reshape is metadata-only.
    x2 = x.reshape(B * S, D)

    # Unblocked VMEM-resident specs: one copy in VMEM for the whole grid, no
    # per-step double buffering (review: weight VMEM footprint on v7x).
    resident = lambda: pl.BlockSpec(memory_space=pltpu.MemorySpace.VMEM)
    in_specs = (
        [pl.BlockSpec((rows, D), lambda g: (g, 0))]      # x row-slab
        + [resident()]                                   # causal mask
        + [resident() for _ in param_list]               # weights / biases / LN
    )

    kernel = functools.partial(
        transformer_block_kernel,
        batch_tile=BT, seq_len=S, num_heads=num_heads,
        inv_scale=inv_scale, exact_gelu=exact_gelu,
    )

    # Advisory cost estimate so XLA can schedule surrounding HLO around us.
    flops = 24 * B * S * D * D + 4 * B * S * S * D
    transcendentals = B * num_heads * S * S + 4 * B * S * D + 4 * B * S
    bytes_accessed = (
        2 * B * S * D * 4
        + sum(int(p.size) * p.dtype.itemsize for p in param_list)
        + S * S * 4
    )

    out2 = pl.pallas_call(
        kernel,
        out_shape=jax.ShapeDtypeStruct((B * S, D), x.dtype),
        grid=(B // BT,),
        in_specs=in_specs,
        out_specs=pl.BlockSpec((rows, D), lambda g: (g, 0)),
        scratch_shapes=[pltpu.VMEM((rows, D), jnp.bfloat16) for _ in range(4)],
        compiler_params=pltpu.CompilerParams(
            dimension_semantics=("parallel",),
            # Tiny footprint at demo shapes; raise toward ~100 MiB on v5e/v6e
            # (128 MiB physical) for production D; keep <=64 MiB on v7x.
            vmem_limit_bytes=32 * 1024 * 1024,
        ),
        cost_estimate=pl.CostEstimate(
            flops=flops,
            transcendentals=transcendentals,
            bytes_accessed=bytes_accessed,
        ),
    )(x2, mask_add, *param_list)
    return out2.reshape(B, S, D)


def init_params(key, embed_dim):
    """Deterministic synthetic parameters matching the module's shapes.

    Matmul weights are stored as bf16 (in, out); biases / LN params stay f32.
    """
    D, F = embed_dim, 4 * embed_dim
    ks = jax.random.split(key, 16)

    def w(k, shape):
        return (0.02 * jax.random.normal(k, shape, dtype=jnp.float32)).astype(jnp.bfloat16)

    def b(k, shape):
        return (0.01 * jax.random.normal(k, shape, dtype=jnp.float32)).astype(jnp.float32)

    return {
        "ln1_g": (1.0 + 0.1 * jax.random.normal(ks[0], (1, D))).astype(jnp.float32),
        "ln1_b": b(ks[1], (1, D)),
        # weights stored as (in, out) = W.T of the PyTorch (out, in) layout
        "wq": w(ks[2], (D, D)), "bq": b(ks[3], (1, D)),
        "wk": w(ks[4], (D, D)), "bk": b(ks[5], (1, D)),
        "wv": w(ks[6], (D, D)), "bv": b(ks[7], (1, D)),
        "wo": w(ks[8], (D, D)), "bo": b(ks[9], (1, D)),
        "ln2_g": (1.0 + 0.1 * jax.random.normal(ks[10], (1, D))).astype(jnp.float32),
        "ln2_b": b(ks[11], (1, D)),
        "w1": w(ks[12], (D, F)), "b1": b(ks[13], (1, F)),
        "w2": w(ks[14], (F, D)), "b2": b(ks[15], (1, D)),
    }


def reference_block(x, p, *, num_heads):
    """Pure-JAX f32 reference of the PyTorch forward (eval mode, exact GELU)."""
    f32 = lambda a: a.astype(jnp.float32)
    B, S, D = x.shape
    hd = D // num_heads
    scale = math.sqrt(D)

    xn = _layer_norm(x, f32(p["ln1_g"][0]), f32(p["ln1_b"][0]))
    q = xn @ f32(p["wq"]) + f32(p["bq"][0])
    k = xn @ f32(p["wk"]) + f32(p["bk"][0])
    v = xn @ f32(p["wv"]) + f32(p["bv"][0])
    q = q.reshape(B, S, num_heads, hd).transpose(0, 2, 1, 3)
    k = k.reshape(B, S, num_heads, hd).transpose(0, 2, 1, 3)
    v = v.reshape(B, S, num_heads, hd).transpose(0, 2, 1, 3)
    s = jnp.einsum("bhqd,bhkd->bhqk", q, k) / scale
    mask = jnp.tril(jnp.ones((S, S)))[None, None]
    s = jnp.where(mask == 0, -jnp.inf, s)
    a = jax.nn.softmax(s, axis=-1)
    o = jnp.einsum("bhqk,bhkd->bhqd", a, v).transpose(0, 2, 1, 3).reshape(B, S, D)
    x = x + (o @ f32(p["wo"]) + f32(p["bo"][0]))

    xn2 = _layer_norm(x, f32(p["ln2_g"][0]), f32(p["ln2_b"][0]))
    h = jax.nn.gelu(xn2 @ f32(p["w1"]) + f32(p["b1"][0]), approximate=False)
    return x + (h @ f32(p["w2"]) + f32(p["b2"][0]))


if __name__ == "__main__":
    # Lane-dense demo shapes: D multiple of 128; B=4 so the default tiling
    # gives BT=2 (128 matmul rows per step) AND 2 parallel grid steps (v7x).
    batch, seq_len, embed_dim, num_heads = 4, 64, 128, 4

    key = jax.random.PRNGKey(0)
    k_x, k_p = jax.random.split(key)
    x = jax.random.normal(k_x, (batch, seq_len, embed_dim), dtype=jnp.float32)
    params = init_params(k_p, embed_dim)

    out = transformer_block(x, params, num_heads=num_heads)
    out = jax.block_until_ready(out)

    ref = reference_block(x, params, num_heads=num_heads)
    assert out.shape == (batch, seq_len, embed_dim)
    assert jnp.all(jnp.isfinite(out))
    # bf16 matmuls + approx reciprocal + tanh GELU vs f32/erf reference.
    assert jnp.allclose(out, ref, atol=5e-2, rtol=5e-2)

    print("KERNEL_OK")
</pallas_src>

<mosaic_0001>
module attributes {stable_mosaic.version = 11 : i64} {
  func.func @transformer_block_kernel(%arg0: i32, %arg1: memref<128x128xf32, #tpu.memory_space<vmem>>, %arg2: memref<64x64xf32, #tpu.memory_space<vmem>>, %arg3: memref<1x128xf32, #tpu.memory_space<vmem>>, %arg4: memref<1x128xf32, #tpu.memory_space<vmem>>, %arg5: memref<128x128xbf16, #tpu.memory_space<vmem>>, %arg6: memref<1x128xf32, #tpu.memory_space<vmem>>, %arg7: memref<128x128xbf16, #tpu.memory_space<vmem>>, %arg8: memref<1x128xf32, #tpu.memory_space<vmem>>, %arg9: memref<128x128xbf16, #tpu.memory_space<vmem>>, %arg10: memref<1x128xf32, #tpu.memory_space<vmem>>, %arg11: memref<128x128xbf16, #tpu.memory_space<vmem>>, %arg12: memref<1x128xf32, #tpu.memory_space<vmem>>, %arg13: memref<1x128xf32, #tpu.memory_space<vmem>>, %arg14: memref<1x128xf32, #tpu.memory_space<vmem>>, %arg15: memref<128x512xbf16, #tpu.memory_space<vmem>>, %arg16: memref<1x512xf32, #tpu.memory_space<vmem>>, %arg17: memref<512x128xbf16, #tpu.memory_space<vmem>>, %arg18: memref<1x128xf32, #tpu.memory_space<vmem>>, %arg19: memref<128x128xf32, #tpu.memory_space<vmem>>, %arg20: memref<128x128xbf16, #tpu.memory_space<vmem>>, %arg21: memref<128x128xbf16, #tpu.memory_space<vmem>>, %arg22: memref<128x128xbf16, #tpu.memory_space<vmem>>, %arg23: memref<128x128xbf16, #tpu.memory_space<vmem>>) attributes {dimension_semantics = [#tpu.dimension_semantics<parallel>], iteration_bounds = array<i64: 2>, scalar_prefetch = 0 : i64, scratch_operands = 4 : i64, tpu.core_type = #tpu.core_type<tc>, window_params = [{transform_indices = @transform_0, window_bounds = array<i64: 128, 128>}, {pipeline_mode = #tpu.pipeline_mode<synchronous>, transform_indices = @transform_1, window_bounds = array<i64: 64, 64>}, {pipeline_mode = #tpu.pipeline_mode<synchronous>, transform_indices = @transform_2, window_bounds = array<i64: 1, 128>}, {pipeline_mode = #tpu.pipeline_mode<synchronous>, transform_indices = @transform_3, window_bounds = array<i64: 1, 128>}, {pipeline_mode = #tpu.pipeline_mode<synchronous>, transform_indices = @transform_4, window_bounds = array<i64: 128, 128>}, {pipeline_mode = #tpu.pipeline_mode<synchronous>, transform_indices = @transform_5, window_bounds = array<i64: 1, 128>}, {pipeline_mode = #tpu.pipeline_mode<synchronous>, transform_indices = @transform_6, window_bounds = array<i64: 128, 128>}, {pipeline_mode = #tpu.pipeline_mode<synchronous>, transform_indices = @transform_7, window_bounds = array<i64: 1, 128>}, {pipeline_mode = #tpu.pipeline_mode<synchronous>, transform_indices = @transform_8, window_bounds = array<i64: 128, 128>}, {pipeline_mode = #tpu.pipeline_mode<synchronous>, transform_indices = @transform_9, window_bounds = array<i64: 1, 128>}, {pipeline_mode = #tpu.pipeline_mode<synchronous>, transform_indices = @transform_10, window_bounds = array<i64: 128, 128>}, {pipeline_mode = #tpu.pipeline_mode<synchronous>, transform_indices = @transform_11, window_bounds = array<i64: 1, 128>}, {pipeline_mode = #tpu.pipeline_mode<synchronous>, transform_indices = @transform_12, window_bounds = array<i64: 1, 128>}, {pipeline_mode = #tpu.pipeline_mode<synchronous>, transform_indices = @transform_13, window_bounds = array<i64: 1, 128>}, {pipeline_mode = #tpu.pipeline_mode<synchronous>, transform_indices = @transform_14, window_bounds = array<i64: 128, 512>}, {pipeline_mode = #tpu.pipeline_mode<synchronous>, transform_indices = @transform_15, window_bounds = array<i64: 1, 512>}, {pipeline_mode = #tpu.pipeline_mode<synchronous>, transform_indices = @transform_16, window_bounds = array<i64: 512, 128>}, {pipeline_mode = #tpu.pipeline_mode<synchronous>, transform_indices = @transform_17, window_bounds = array<i64: 1, 128>}, {transform_indices = @transform_18, window_bounds = array<i64: 128, 128>}]} {
    %c0 = arith.constant 0 : index
    %c0_0 = arith.constant 0 : index
    %0 = vector.load %arg1[%c0, %c0_0] : memref<128x128xf32, #tpu.memory_space<vmem>>, vector<128x128xf32>
    %c0_1 = arith.constant 0 : index
    %c0_2 = arith.constant 0 : index
    %1 = vector.load %arg3[%c0_1, %c0_2] : memref<1x128xf32, #tpu.memory_space<vmem>>, vector<1x128xf32>
    %2 = vector.shape_cast %1 : vector<1x128xf32> to vector<128xf32>
    %c0_3 = arith.constant 0 : index
    %c0_4 = arith.constant 0 : index
    %3 = vector.load %arg4[%c0_3, %c0_4] : memref<1x128xf32, #tpu.memory_space<vmem>>, vector<1x128xf32>
    %4 = vector.shape_cast %3 : vector<1x128xf32> to vector<128xf32>
    %cst = arith.constant dense<0.000000e+00> : vector<128xf32>
    %5 = vector.multi_reduction <add>, %0, %cst [1] : vector<128x128xf32> to vector<128xf32>
    %6 = vector.shape_cast %5 : vector<128xf32> to vector<128x1xf32>
    %cst_5 = arith.constant 1.280000e+02 : f32
    %7 = vector.broadcast %cst_5 : f32 to vector<128x1xf32>
    %8 = arith.divf %6, %7 : vector<128x1xf32>
    %9 = vector.broadcast %8 : vector<128x1xf32> to vector<128x128xf32>
    %10 = arith.subf %0, %9 : vector<128x128xf32>
    %11 = arith.mulf %10, %10 : vector<128x128xf32>
    %cst_6 = arith.constant dense<0.000000e+00> : vector<128xf32>
    %12 = vector.multi_reduction <add>, %11, %cst_6 [1] : vector<128x128xf32> to vector<128xf32>
    %13 = vector.shape_cast %12 : vector<128xf32> to vector<128x1xf32>
    %cst_7 = arith.constant 1.280000e+02 : f32
    %14 = vector.broadcast %cst_7 : f32 to vector<128x1xf32>
    %15 = arith.divf %13, %14 : vector<128x1xf32>
    %16 = vector.broadcast %8 : vector<128x1xf32> to vector<128x128xf32>
    %17 = arith.subf %0, %16 : vector<128x128xf32>
    %cst_8 = arith.constant 9.99999974E-6 : f32
    %18 = vector.broadcast %cst_8 : f32 to vector<128x1xf32>
    %19 = arith.addf %15, %18 : vector<128x1xf32>
    %20 = math.rsqrt %19 : vector<128x1xf32>
    %21 = vector.broadcast %20 : vector<128x1xf32> to vector<128x128xf32>
    %22 = arith.mulf %17, %21 : vector<128x128xf32>
    %23 = vector.shape_cast %2 : vector<128xf32> to vector<1x128xf32>
    %24 = vector.broadcast %23 : vector<1x128xf32> to vector<128x128xf32>
    %25 = arith.mulf %22, %24 : vector<128x128xf32>
    %26 = vector.shape_cast %4 : vector<128xf32> to vector<1x128xf32>
    %27 = vector.broadcast %26 : vector<1x128xf32> to vector<128x128xf32>
    %28 = arith.addf %25, %27 : vector<128x128xf32>
    %29 = arith.truncf %28 : vector<128x128xf32> to vector<128x128xbf16>
    %c0_9 = arith.constant 0 : index
    %c0_10 = arith.constant 0 : index
    %30 = vector.load %arg5[%c0_9, %c0_10] : memref<128x128xbf16, #tpu.memory_space<vmem>>, vector<128x128xbf16>
    %cst_11 = arith.constant dense<0.000000e+00> : vector<128x128xf32>
    %31 = tpu.matmul %29, %30, %cst_11 {dimension_numbers = #tpu.dot_dimension_numbers<[1], [0], [0], [1], [0, 0, 1, 1], [], []>} : vector<128x128xbf16>, vector<128x128xbf16>, vector<128x128xf32> -> vector<128x128xf32>
    %c0_12 = arith.constant 0 : index
    %c0_13 = arith.constant 0 : index
    %32 = vector.load %arg6[%c0_12, %c0_13] : memref<1x128xf32, #tpu.memory_space<vmem>>, vector<1x128xf32>
    %33 = vector.shape_cast %32 : vector<1x128xf32> to vector<128xf32>
    %34 = vector.shape_cast %33 : vector<128xf32> to vector<1x128xf32>
    %35 = vector.broadcast %34 : vector<1x128xf32> to vector<128x128xf32>
    %36 = arith.addf %31, %35 : vector<128x128xf32>
    %cst_14 = arith.constant 0.0883883461 : f32
    %37 = vector.broadcast %cst_14 : f32 to vector<128x128xf32>
    %38 = arith.mulf %36, %37 : vector<128x128xf32>
    %39 = arith.truncf %38 : vector<128x128xf32> to vector<128x128xbf16>
    %c0_15 = arith.constant 0 : index
    %c0_16 = arith.constant 0 : index
    %40 = vector.load %arg20[%c0_15, %c0_16] : memref<128x128xbf16, #tpu.memory_space<vmem>>, vector<128x128xbf16>
    tpu.vector_store %arg20[%c0_15, %c0_16], %39 {strides = array<i32>} : memref<128x128xbf16, #tpu.memory_space<vmem>>, vector<128x128xbf16>,
    %c0_17 = arith.constant 0 : index
    %c0_18 = arith.constant 0 : index
    %41 = vector.load %arg7[%c0_17, %c0_18] : memref<128x128xbf16, #tpu.memory_space<vmem>>, vector<128x128xbf16>
    %cst_19 = arith.constant dense<0.000000e+00> : vector<128x128xf32>
    %42 = tpu.matmul %29, %41, %cst_19 {dimension_numbers = #tpu.dot_dimension_numbers<[1], [0], [0], [1], [0, 0, 1, 1], [], []>} : vector<128x128xbf16>, vector<128x128xbf16>, vector<128x128xf32> -> vector<128x128xf32>
    %c0_20 = arith.constant 0 : index
    %c0_21 = arith.constant 0 : index
    %43 = vector.load %arg8[%c0_20, %c0_21] : memref<1x128xf32, #tpu.memory_space<vmem>>, vector<1x128xf32>
    %44 = vector.shape_cast %43 : vector<1x128xf32> to vector<128xf32>
    %45 = vector.shape_cast %44 : vector<128xf32> to vector<1x128xf32>
    %46 = vector.broadcast %45 : vector<1x128xf32> to vector<128x128xf32>
    %47 = arith.addf %42, %46 : vector<128x128xf32>
    %48 = arith.truncf %47 : vector<128x128xf32> to vector<128x128xbf16>
    %c0_22 = arith.constant 0 : index
    %c0_23 = arith.constant 0 : index
    %49 = vector.load %arg21[%c0_22, %c0_23] : memref<128x128xbf16, #tpu.memory_space<vmem>>, vector<128x128xbf16>
    tpu.vector_store %arg21[%c0_22, %c0_23], %48 {strides = array<i32>} : memref<128x128xbf16, #tpu.memory_space<vmem>>, vector<128x128xbf16>,
    %c0_24 = arith.constant 0 : index
    %c0_25 = arith.constant 0 : index
    %50 = vector.load %arg9[%c0_24, %c0_25] : memref<128x128xbf16, #tpu.memory_space<vmem>>, vector<128x128xbf16>
    %cst_26 = arith.constant dense<0.000000e+00> : vector<128x128xf32>
    %51 = tpu.matmul %29, %50, %cst_26 {dimension_numbers = #tpu.dot_dimension_numbers<[1], [0], [0], [1], [0, 0, 1, 1], [], []>} : vector<128x128xbf16>, vector<128x128xbf16>, vector<128x128xf32> -> vector<128x128xf32>
    %c0_27 = arith.constant 0 : index
    %c0_28 = arith.constant 0 : index
    %52 = vector.load %arg10[%c0_27, %c0_28] : memref<1x128xf32, #tpu.memory_space<vmem>>, vector<1x128xf32>
    %53 = vector.shape_cast %52 : vector<1x128xf32> to vector<128xf32>
    %54 = vector.shape_cast %53 : vector<128xf32> to vector<1x128xf32>
    %55 = vector.broadcast %54 : vector<1x128xf32> to vector<128x128xf32>
    %56 = arith.addf %51, %55 : vector<128x128xf32>
    %57 = arith.truncf %56 : vector<128x128xf32> to vector<128x128xbf16>
    %c0_29 = arith.constant 0 : index
    %c0_30 = arith.constant 0 : index
    %58 = vector.load %arg22[%c0_29, %c0_30] : memref<128x128xbf16, #tpu.memory_space<vmem>>, vector<128x128xbf16>
    tpu.vector_store %arg22[%c0_29, %c0_30], %57 {strides = array<i32>} : memref<128x128xbf16, #tpu.memory_space<vmem>>, vector<128x128xbf16>,
    %c0_31 = arith.constant 0 : index
    %c0_32 = arith.constant 0 : index
    %59 = vector.load %arg2[%c0_31, %c0_32] : memref<64x64xf32, #tpu.memory_space<vmem>>, vector<64x64xf32>
    %c0_33 = arith.constant 0 : index
    %c0_34 = arith.constant 0 : index
    %60 = vector.load %arg20[%c0_33, %c0_34] : memref<128x128xbf16, #tpu.memory_space<vmem>>, vector<64x32xbf16>
    %c0_35 = arith.constant 0 : index
    %c0_36 = arith.constant 0 : index
    %61 = vector.load %arg21[%c0_35, %c0_36] : memref<128x128xbf16, #tpu.memory_space<vmem>>, vector<64x32xbf16>
    %c0_37 = arith.constant 0 : index
    %c0_38 = arith.constant 0 : index
    %62 = vector.load %arg22[%c0_37, %c0_38] : memref<128x128xbf16, #tpu.memory_space<vmem>>, vector<64x32xbf16>
    %cst_39 = arith.constant dense<0.000000e+00> : vector<64x64xf32>
    %63 = tpu.matmul %60, %61, %cst_39 {dimension_numbers = #tpu.dot_dimension_numbers<[1], [1], [0], [0], [0, 0, 1, 0], [], []>} : vector<64x32xbf16>, vector<64x32xbf16>, vector<64x64xf32> -> vector<64x64xf32>
    %64 = arith.addf %63, %59 : vector<64x64xf32>
    %cst_40 = arith.constant dense<0xFF800000> : vector<64xf32>
    %65 = vector.multi_reduction <maximumf>, %64, %cst_40 [1] : vector<64x64xf32> to vector<64xf32>
    %66 = vector.shape_cast %65 : vector<64xf32> to vector<64x1xf32>
    %67 = vector.broadcast %66 : vector<64x1xf32> to vector<64x64xf32>
    %68 = arith.subf %64, %67 : vector<64x64xf32>
    %69 = math.exp %68 : vector<64x64xf32>
    %cst_41 = arith.constant dense<0.000000e+00> : vector<64xf32>
    %70 = vector.multi_reduction <add>, %69, %cst_41 [1] : vector<64x64xf32> to vector<64xf32>
    %71 = vector.shape_cast %70 : vector<64xf32> to vector<64x1xf32>
    %72 = tpu.reciprocal %71 {approx = true} : vector<64x1xf32> -> vector<64x1xf32>
    %73 = vector.broadcast %72 : vector<64x1xf32> to vector<64x64xf32>
    %74 = arith.mulf %69, %73 : vector<64x64xf32>
    %75 = arith.truncf %74 : vector<64x64xf32> to vector<64x64xbf16>
    %cst_42 = arith.constant dense<0.000000e+00> : vector<64x32xf32>
    %76 = tpu.matmul %75, %62, %cst_42 {dimension_numbers = #tpu.dot_dimension_numbers<[1], [0], [0], [1], [0, 0, 1, 1], [], []>} : vector<64x64xbf16>, vector<64x32xbf16>, vector<64x32xf32> -> vector<64x32xf32>
    %77 = arith.truncf %76 : vector<64x32xf32> to vector<64x32xbf16>
    %c0_43 = arith.constant 0 : index
    %c0_44 = arith.constant 0 : index
    %78 = vector.load %arg23[%c0_43, %c0_44] : memref<128x128xbf16, #tpu.memory_space<vmem>>, vector<64x32xbf16>
    tpu.vector_store %arg23[%c0_43, %c0_44], %77 {strides = array<i32>} : memref<128x128xbf16, #tpu.memory_space<vmem>>, vector<64x32xbf16>,
    %c0_45 = arith.constant 0 : index
    %c32 = arith.constant 32 : index
    %79 = vector.load %arg20[%c0_45, %c32] : memref<128x128xbf16, #tpu.memory_space<vmem>>, vector<64x32xbf16>
    %c0_46 = arith.constant 0 : index
    %c32_47 = arith.constant 32 : index
    %80 = vector.load %arg21[%c0_46, %c32_47] : memref<128x128xbf16, #tpu.memory_space<vmem>>, vector<64x32xbf16>
    %c0_48 = arith.constant 0 : index
    %c32_49 = arith.constant 32 : index
    %81 = vector.load %arg22[%c0_48, %c32_49] : memref<128x128xbf16, #tpu.memory_space<vmem>>, vector<64x32xbf16>
    %cst_50 = arith.constant dense<0.000000e+00> : vector<64x64xf32>
    %82 = tpu.matmul %79, %80, %cst_50 {dimension_numbers = #tpu.dot_dimension_numbers<[1], [1], [0], [0], [0, 0, 1, 0], [], []>} : vector<64x32xbf16>, vector<64x32xbf16>, vector<64x64xf32> -> vector<64x64xf32>
    %83 = arith.addf %82, %59 : vector<64x64xf32>
    %cst_51 = arith.constant dense<0xFF800000> : vector<64xf32>
    %84 = vector.multi_reduction <maximumf>, %83, %cst_51 [1] : vector<64x64xf32> to vector<64xf32>
    %85 = vector.shape_cast %84 : vector<64xf32> to vector<64x1xf32>
    %86 = vector.broadcast %85 : vector<64x1xf32> to vector<64x64xf32>
    %87 = arith.subf %83, %86 : vector<64x64xf32>
    %88 = math.exp %87 : vector<64x64xf32>
    %cst_52 = arith.constant dense<0.000000e+00> : vector<64xf32>
    %89 = vector.multi_reduction <add>, %88, %cst_52 [1] : vector<64x64xf32> to vector<64xf32>
    %90 = vector.shape_cast %89 : vector<64xf32> to vector<64x1xf32>
    %91 = tpu.reciprocal %90 {approx = true} : vector<64x1xf32> -> vector<64x1xf32>
    %92 = vector.broadcast %91 : vector<64x1xf32> to vector<64x64xf32>
    %93 = arith.mulf %88, %92 : vector<64x64xf32>
    %94 = arith.truncf %93 : vector<64x64xf32> to vector<64x64xbf16>
    %cst_53 = arith.constant dense<0.000000e+00> : vector<64x32xf32>
    %95 = tpu.matmul %94, %81, %cst_53 {dimension_numbers = #tpu.dot_dimension_numbers<[1], [0], [0], [1], [0, 0, 1, 1], [], []>} : vector<64x64xbf16>, vector<64x32xbf16>, vector<64x32xf32> -> vector<64x32xf32>
    %96 = arith.truncf %95 : vector<64x32xf32> to vector<64x32xbf16>
    %c0_54 = arith.constant 0 : index
    %c32_55 = arith.constant 32 : index
    %97 = vector.load %arg23[%c0_54, %c32_55] : memref<128x128xbf16, #tpu.memory_space<vmem>>, vector<64x32xbf16>
    tpu.vector_store %arg23[%c0_54, %c32_55], %96 {strides = array<i32>} : memref<128x128xbf16, #tpu.memory_space<vmem>>, vector<64x32xbf16>,
    %c0_56 = arith.constant 0 : index
    %c64 = arith.constant 64 : index
    %98 = vector.load %arg20[%c0_56, %c64] : memref<128x128xbf16, #tpu.memory_space<vmem>>, vector<64x32xbf16>
    %c0_57 = arith.constant 0 : index
    %c64_58 = arith.constant 64 : index
    %99 = vector.load %arg21[%c0_57, %c64_58] : memref<128x128xbf16, #tpu.memory_space<vmem>>, vector<64x32xbf16>
    %c0_59 = arith.constant 0 : index
    %c64_60 = arith.constant 64 : index
    %100 = vector.load %arg22[%c0_59, %c64_60] : memref<128x128xbf16, #tpu.memory_space<vmem>>, vector<64x32xbf16>
    %cst_61 = arith.constant dense<0.000000e+00> : vector<64x64xf32>
    %101 = tpu.matmul %98, %99, %cst_61 {dimension_numbers = #tpu.dot_dimension_numbers<[1], [1], [0], [0], [0, 0, 1, 0], [], []>} : vector<64x32xbf16>, vector<64x32xbf16>, vector<64x64xf32> -> vector<64x64xf32>
    %102 = arith.addf %101, %59 : vector<64x64xf32>
    %cst_62 = arith.constant dense<0xFF800000> : vector<64xf32>
    %103 = vector.multi_reduction <maximumf>, %102, %cst_62 [1] : vector<64x64xf32> to vector<64xf32>
    %104 = vector.shape_cast %103 : vector<64xf32> to vector<64x1xf32>
    %105 = vector.broadcast %104 : vector<64x1xf32> to vector<64x64xf32>
    %106 = arith.subf %102, %105 : vector<64x64xf32>
    %107 = math.exp %106 : vector<64x64xf32>
    %cst_63 = arith.constant dense<0.000000e+00> : vector<64xf32>
    %108 = vector.multi_reduction <add>, %107, %cst_63 [1] : vector<64x64xf32> to vector<64xf32>
    %109 = vector.shape_cast %108 : vector<64xf32> to vector<64x1xf32>
    %110 = tpu.reciprocal %109 {approx = true} : vector<64x1xf32> -> vector<64x1xf32>
    %111 = vector.broadcast %110 : vector<64x1xf32> to vector<64x64xf32>
    %112 = arith.mulf %107, %111 : vector<64x64xf32>
    %113 = arith.truncf %112 : vector<64x64xf32> to vector<64x64xbf16>
    %cst_64 = arith.constant dense<0.000000e+00> : vector<64x32xf32>
    %114 = tpu.matmul %113, %100, %cst_64 {dimension_numbers = #tpu.dot_dimension_numbers<[1], [0], [0], [1], [0, 0, 1, 1], [], []>} : vector<64x64xbf16>, vector<64x32xbf16>, vector<64x32xf32> -> vector<64x32xf32>
    %115 = arith.truncf %114 : vector<64x32xf32> to vector<64x32xbf16>
    %c0_65 = arith.constant 0 : index
    %c64_66 = arith.constant 64 : index
    %116 = vector.load %arg23[%c0_65, %c64_66] : memref<128x128xbf16, #tpu.memory_space<vmem>>, vector<64x32xbf16>
    tpu.vector_store %arg23[%c0_65, %c64_66], %115 {strides = array<i32>} : memref<128x128xbf16, #tpu.memory_space<vmem>>, vector<64x32xbf16>,
    %c0_67 = arith.constant 0 : index
    %c96 = arith.constant 96 : index
    %117 = vector.load %arg20[%c0_67, %c96] : memref<128x128xbf16, #tpu.memory_space<vmem>>, vector<64x32xbf16>
    %c0_68 = arith.constant 0 : index
    %c96_69 = arith.constant 96 : index
    %118 = vector.load %arg21[%c0_68, %c96_69] : memref<128x128xbf16, #tpu.memory_space<vmem>>, vector<64x32xbf16>
    %c0_70 = arith.constant 0 : index
    %c96_71 = arith.constant 96 : index
    %119 = vector.load %arg22[%c0_70, %c96_71] : memref<128x128xbf16, #tpu.memory_space<vmem>>, vector<64x32xbf16>
    %cst_72 = arith.constant dense<0.000000e+00> : vector<64x64xf32>
    %120 = tpu.matmul %117, %118, %cst_72 {dimension_numbers = #tpu.dot_dimension_numbers<[1], [1], [0], [0], [0, 0, 1, 0], [], []>} : vector<64x32xbf16>, vector<64x32xbf16>, vector<64x64xf32> -> vector<64x64xf32>
    %121 = arith.addf %120, %59 : vector<64x64xf32>
    %cst_73 = arith.constant dense<0xFF800000> : vector<64xf32>
    %122 = vector.multi_reduction <maximumf>, %121, %cst_73 [1] : vector<64x64xf32> to vector<64xf32>
    %123 = vector.shape_cast %122 : vector<64xf32> to vector<64x1xf32>
    %124 = vector.broadcast %123 : vector<64x1xf32> to vector<64x64xf32>
    %125 = arith.subf %121, %124 : vector<64x64xf32>
    %126 = math.exp %125 : vector<64x64xf32>
    %cst_74 = arith.constant dense<0.000000e+00> : vector<64xf32>
    %127 = vector.multi_reduction <add>, %126, %cst_74 [1] : vector<64x64xf32> to vector<64xf32>
    %128 = vector.shape_cast %127 : vector<64xf32> to vector<64x1xf32>
    %129 = tpu.reciprocal %128 {approx = true} : vector<64x1xf32> -> vector<64x1xf32>
    %130 = vector.broadcast %129 : vector<64x1xf32> to vector<64x64xf32>
    %131 = arith.mulf %126, %130 : vector<64x64xf32>
    %132 = arith.truncf %131 : vector<64x64xf32> to vector<64x64xbf16>
    %cst_75 = arith.constant dense<0.000000e+00> : vector<64x32xf32>
    %133 = tpu.matmul %132, %119, %cst_75 {dimension_numbers = #tpu.dot_dimension_numbers<[1], [0], [0], [1], [0, 0, 1, 1], [], []>} : vector<64x64xbf16>, vector<64x32xbf16>, vector<64x32xf32> -> vector<64x32xf32>
    %134 = arith.truncf %133 : vector<64x32xf32> to vector<64x32xbf16>
    %c0_76 = arith.constant 0 : index
    %c96_77 = arith.constant 96 : index
    %135 = vector.load %arg23[%c0_76, %c96_77] : memref<128x128xbf16, #tpu.memory_space<vmem>>, vector<64x32xbf16>
    tpu.vector_store %arg23[%c0_76, %c96_77], %134 {strides = array<i32>} : memref<128x128xbf16, #tpu.memory_space<vmem>>, vector<64x32xbf16>,
    %c64_78 = arith.constant 64 : index
    %c0_79 = arith.constant 0 : index
    %136 = vector.load %arg20[%c64_78, %c0_79] : memref<128x128xbf16, #tpu.memory_space<vmem>>, vector<64x32xbf16>
    %c64_80 = arith.constant 64 : index
    %c0_81 = arith.constant 0 : index
    %137 = vector.load %arg21[%c64_80, %c0_81] : memref<128x128xbf16, #tpu.memory_space<vmem>>, vector<64x32xbf16>
    %c64_82 = arith.constant 64 : index
    %c0_83 = arith.constant 0 : index
    %138 = vector.load %arg22[%c64_82, %c0_83] : memref<128x128xbf16, #tpu.memory_space<vmem>>, vector<64x32xbf16>
    %cst_84 = arith.constant dense<0.000000e+00> : vector<64x64xf32>
    %139 = tpu.matmul %136, %137, %cst_84 {dimension_numbers = #tpu.dot_dimension_numbers<[1], [1], [0], [0], [0, 0, 1, 0], [], []>} : vector<64x32xbf16>, vector<64x32xbf16>, vector<64x64xf32> -> vector<64x64xf32>
    %140 = arith.addf %139, %59 : vector<64x64xf32>
    %cst_85 = arith.constant dense<0xFF800000> : vector<64xf32>
    %141 = vector.multi_reduction <maximumf>, %140, %cst_85 [1] : vector<64x64xf32> to vector<64xf32>
    %142 = vector.shape_cast %141 : vector<64xf32> to vector<64x1xf32>
    %143 = vector.broadcast %142 : vector<64x1xf32> to vector<64x64xf32>
    %144 = arith.subf %140, %143 : vector<64x64xf32>
    %145 = math.exp %144 : vector<64x64xf32>
    %cst_86 = arith.constant dense<0.000000e+00> : vector<64xf32>
    %146 = vector.multi_reduction <add>, %145, %cst_86 [1] : vector<64x64xf32> to vector<64xf32>
    %147 = vector.shape_cast %146 : vector<64xf32> to vector<64x1xf32>
    %148 = tpu.reciprocal %147 {approx = true} : vector<64x1xf32> -> vector<64x1xf32>
    %149 = vector.broadcast %148 : vector<64x1xf32> to vector<64x64xf32>
    %150 = arith.mulf %145, %149 : vector<64x64xf32>
    %151 = arith.truncf %150 : vector<64x64xf32> to vector<64x64xbf16>
    %cst_87 = arith.constant dense<0.000000e+00> : vector<64x32xf32>
    %152 = tpu.matmul %151, %138, %cst_87 {dimension_numbers = #tpu.dot_dimension_numbers<[1], [0], [0], [1], [0, 0, 1, 1], [], []>} : vector<64x64xbf16>, vector<64x32xbf16>, vector<64x32xf32> -> vector<64x32xf32>
    %153 = arith.truncf %152 : vector<64x32xf32> to vector<64x32xbf16>
    %c64_88 = arith.constant 64 : index
    %c0_89 = arith.constant 0 : index
    %154 = vector.load %arg23[%c64_88, %c0_89] : memref<128x128xbf16, #tpu.memory_space<vmem>>, vector<64x32xbf16>
    tpu.vector_store %arg23[%c64_88, %c0_89], %153 {strides = array<i32>} : memref<128x128xbf16, #tpu.memory_space<vmem>>, vector<64x32xbf16>,
    %c64_90 = arith.constant 64 : index
    %c32_91 = arith.constant 32 : index
    %155 = vector.load %arg20[%c64_90, %c32_91] : memref<128x128xbf16, #tpu.memory_space<vmem>>, vector<64x32xbf16>
    %c64_92 = arith.constant 64 : index
    %c32_93 = arith.constant 32 : index
    %156 = vector.load %arg21[%c64_92, %c32_93] : memref<128x128xbf16, #tpu.memory_space<vmem>>, vector<64x32xbf16>
    %c64_94 = arith.constant 64 : index
    %c32_95 = arith.constant 32 : index
    %157 = vector.load %arg22[%c64_94, %c32_95] : memref<128x128xbf16, #tpu.memory_space<vmem>>, vector<64x32xbf16>
    %cst_96 = arith.constant dense<0.000000e+00> : vector<64x64xf32>
    %158 = tpu.matmul %155, %156, %cst_96 {dimension_numbers = #tpu.dot_dimension_numbers<[1], [1], [0], [0], [0, 0, 1, 0], [], []>} : vector<64x32xbf16>, vector<64x32xbf16>, vector<64x64xf32> -> vector<64x64xf32>
    %159 = arith.addf %158, %59 : vector<64x64xf32>
    %cst_97 = arith.constant dense<0xFF800000> : vector<64xf32>
    %160 = vector.multi_reduction <maximumf>, %159, %cst_97 [1] : vector<64x64xf32> to vector<64xf32>
    %161 = vector.shape_cast %160 : vector<64xf32> to vector<64x1xf32>
    %162 = vector.broadcast %161 : vector<64x1xf32> to vector<64x64xf32>
    %163 = arith.subf %159, %162 : vector<64x64xf32>
    %164 = math.exp %163 : vector<64x64xf32>
    %cst_98 = arith.constant dense<0.000000e+00> : vector<64xf32>
    %165 = vector.multi_reduction <add>, %164, %cst_98 [1] : vector<64x64xf32> to vector<64xf32>
    %166 = vector.shape_cast %165 : vector<64xf32> to vector<64x1xf32>
    %167 = tpu.reciprocal %166 {approx = true} : vector<64x1xf32> -> vector<64x1xf32>
    %168 = vector.broadcast %167 : vector<64x1xf32> to vector<64x64xf32>
    %169 = arith.mulf %164, %168 : vector<64x64xf32>
    %170 = arith.truncf %169 : vector<64x64xf32> to vector<64x64xbf16>
    %cst_99 = arith.constant dense<0.000000e+00> : vector<64x32xf32>
    %171 = tpu.matmul %170, %157, %cst_99 {dimension_numbers = #tpu.dot_dimension_numbers<[1], [0], [0], [1], [0, 0, 1, 1], [], []>} : vector<64x64xbf16>, vector<64x32xbf16>, vector<64x32xf32> -> vector<64x32xf32>
    %172 = arith.truncf %171 : vector<64x32xf32> to vector<64x32xbf16>
    %c64_100 = arith.constant 64 : index
    %c32_101 = arith.constant 32 : index
    %173 = vector.load %arg23[%c64_100, %c32_101] : memref<128x128xbf16, #tpu.memory_space<vmem>>, vector<64x32xbf16>
    tpu.vector_store %arg23[%c64_100, %c32_101], %172 {strides = array<i32>} : memref<128x128xbf16, #tpu.memory_space<vmem>>, vector<64x32xbf16>,
    %c64_102 = arith.constant 64 : index
    %c64_103 = arith.constant 64 : index
    %174 = vector.load %arg20[%c64_102, %c64_103] : memref<128x128xbf16, #tpu.memory_space<vmem>>, vector<64x32xbf16>
    %c64_104 = arith.constant 64 : index
    %c64_105 = arith.constant 64 : index
    %175 = vector.load %arg21[%c64_104, %c64_105] : memref<128x128xbf16, #tpu.memory_space<vmem>>, vector<64x32xbf16>
    %c64_106 = arith.constant 64 : index
    %c64_107 = arith.constant 64 : index
    %176 = vector.load %arg22[%c64_106, %c64_107] : memref<128x128xbf16, #tpu.memory_space<vmem>>, vector<64x32xbf16>
    %cst_108 = arith.constant dense<0.000000e+00> : vector<64x64xf32>
    %177 = tpu.matmul %174, %175, %cst_108 {dimension_numbers = #tpu.dot_dimension_numbers<[1], [1], [0], [0], [0, 0, 1, 0], [], []>} : vector<64x32xbf16>, vector<64x32xbf16>, vector<64x64xf32> -> vector<64x64xf32>
    %178 = arith.addf %177, %59 : vector<64x64xf32>
    %cst_109 = arith.constant dense<0xFF800000> : vector<64xf32>
    %179 = vector.multi_reduction <maximumf>, %178, %cst_109 [1] : vector<64x64xf32> to vector<64xf32>
    %180 = vector.shape_cast %179 : vector<64xf32> to vector<64x1xf32>
    %181 = vector.broadcast %180 : vector<64x1xf32> to vector<64x64xf32>
    %182 = arith.subf %178, %181 : vector<64x64xf32>
    %183 = math.exp %182 : vector<64x64xf32>
    %cst_110 = arith.constant dense<0.000000e+00> : vector<64xf32>
    %184 = vector.multi_reduction <add>, %183, %cst_110 [1] : vector<64x64xf32> to vector<64xf32>
    %185 = vector.shape_cast %184 : vector<64xf32> to vector<64x1xf32>
    %186 = tpu.reciprocal %185 {approx = true} : vector<64x1xf32> -> vector<64x1xf32>
    %187 = vector.broadcast %186 : vector<64x1xf32> to vector<64x64xf32>
    %188 = arith.mulf %183, %187 : vector<64x64xf32>
    %189 = arith.truncf %188 : vector<64x64xf32> to vector<64x64xbf16>
    %cst_111 = arith.constant dense<0.000000e+00> : vector<64x32xf32>
    %190 = tpu.matmul %189, %176, %cst_111 {dimension_numbers = #tpu.dot_dimension_numbers<[1], [0], [0], [1], [0, 0, 1, 1], [], []>} : vector<64x64xbf16>, vector<64x32xbf16>, vector<64x32xf32> -> vector<64x32xf32>
    %191 = arith.truncf %190 : vector<64x32xf32> to vector<64x32xbf16>
    %c64_112 = arith.constant 64 : index
    %c64_113 = arith.constant 64 : index
    %192 = vector.load %arg23[%c64_112, %c64_113] : memref<128x128xbf16, #tpu.memory_space<vmem>>, vector<64x32xbf16>
    tpu.vector_store %arg23[%c64_112, %c64_113], %191 {strides = array<i32>} : memref<128x128xbf16, #tpu.memory_space<vmem>>, vector<64x32xbf16>,
    %c64_114 = arith.constant 64 : index
    %c96_115 = arith.constant 96 : index
    %193 = vector.load %arg20[%c64_114, %c96_115] : memref<128x128xbf16, #tpu.memory_space<vmem>>, vector<64x32xbf16>
    %c64_116 = arith.constant 64 : index
    %c96_117 = arith.constant 96 : index
    %194 = vector.load %arg21[%c64_116, %c96_117] : memref<128x128xbf16, #tpu.memory_space<vmem>>, vector<64x32xbf16>
    %c64_118 = arith.constant 64 : index
    %c96_119 = arith.constant 96 : index
    %195 = vector.load %arg22[%c64_118, %c96_119] : memref<128x128xbf16, #tpu.memory_space<vmem>>, vector<64x32xbf16>
    %cst_120 = arith.constant dense<0.000000e+00> : vector<64x64xf32>
    %196 = tpu.matmul %193, %194, %cst_120 {dimension_numbers = #tpu.dot_dimension_numbers<[1], [1], [0], [0], [0, 0, 1, 0], [], []>} : vector<64x32xbf16>, vector<64x32xbf16>, vector<64x64xf32> -> vector<64x64xf32>
    %197 = arith.addf %196, %59 : vector<64x64xf32>
    %cst_121 = arith.constant dense<0xFF800000> : vector<64xf32>
    %198 = vector.multi_reduction <maximumf>, %197, %cst_121 [1] : vector<64x64xf32> to vector<64xf32>
    %199 = vector.shape_cast %198 : vector<64xf32> to vector<64x1xf32>
    %200 = vector.broadcast %199 : vector<64x1xf32> to vector<64x64xf32>
    %201 = arith.subf %197, %200 : vector<64x64xf32>
    %202 = math.exp %201 : vector<64x64xf32>
    %cst_122 = arith.constant dense<0.000000e+00> : vector<64xf32>
    %203 = vector.multi_reduction <add>, %202, %cst_122 [1] : vector<64x64xf32> to vector<64xf32>
    %204 = vector.shape_cast %203 : vector<64xf32> to vector<64x1xf32>
    %205 = tpu.reciprocal %204 {approx = true} : vector<64x1xf32> -> vector<64x1xf32>
    %206 = vector.broadcast %205 : vector<64x1xf32> to vector<64x64xf32>
    %207 = arith.mulf %202, %206 : vector<64x64xf32>
    %208 = arith.truncf %207 : vector<64x64xf32> to vector<64x64xbf16>
    %cst_123 = arith.constant dense<0.000000e+00> : vector<64x32xf32>
    %209 = tpu.matmul %208, %195, %cst_123 {dimension_numbers = #tpu.dot_dimension_numbers<[1], [0], [0], [1], [0, 0, 1, 1], [], []>} : vector<64x64xbf16>, vector<64x32xbf16>, vector<64x32xf32> -> vector<64x32xf32>
    %210 = arith.truncf %209 : vector<64x32xf32> to vector<64x32xbf16>
    %c64_124 = arith.constant 64 : index
    %c96_125 = arith.constant 96 : index
    %211 = vector.load %arg23[%c64_124, %c96_125] : memref<128x128xbf16, #tpu.memory_space<vmem>>, vector<64x32xbf16>
    tpu.vector_store %arg23[%c64_124, %c96_125], %210 {strides = array<i32>} : memref<128x128xbf16, #tpu.memory_space<vmem>>, vector<64x32xbf16>,
    %c0_126 = arith.constant 0 : index
    %c0_127 = arith.constant 0 : index
    %212 = vector.load %arg23[%c0_126, %c0_127] : memref<128x128xbf16, #tpu.memory_space<vmem>>, vector<128x128xbf16>
    %c0_128 = arith.constant 0 : index
    %c0_129 = arith.constant 0 : index
    %213 = vector.load %arg11[%c0_128, %c0_129] : memref<128x128xbf16, #tpu.memory_space<vmem>>, vector<128x128xbf16>
    %cst_130 = arith.constant dense<0.000000e+00> : vector<128x128xf32>
    %214 = tpu.matmul %212, %213, %cst_130 {dimension_numbers = #tpu.dot_dimension_numbers<[1], [0], [0], [1], [0, 0, 1, 1], [], []>} : vector<128x128xbf16>, vector<128x128xbf16>, vector<128x128xf32> -> vector<128x128xf32>
    %c0_131 = arith.constant 0 : index
    %c0_132 = arith.constant 0 : index
    %215 = vector.load %arg12[%c0_131, %c0_132] : memref<1x128xf32, #tpu.memory_space<vmem>>, vector<1x128xf32>
    %216 = vector.shape_cast %215 : vector<1x128xf32> to vector<128xf32>
    %217 = vector.shape_cast %216 : vector<128xf32> to vector<1x128xf32>
    %218 = vector.broadcast %217 : vector<1x128xf32> to vector<128x128xf32>
    %219 = arith.addf %214, %218 : vector<128x128xf32>
    %220 = arith.addf %0, %219 : vector<128x128xf32>
    %c0_133 = arith.constant 0 : index
    %c0_134 = arith.constant 0 : index
    %221 = vector.load %arg13[%c0_133, %c0_134] : memref<1x128xf32, #tpu.memory_space<vmem>>, vector<1x128xf32>
    %222 = vector.shape_cast %221 : vector<1x128xf32> to vector<128xf32>
    %c0_135 = arith.constant 0 : index
    %c0_136 = arith.constant 0 : index
    %223 = vector.load %arg14[%c0_135, %c0_136] : memref<1x128xf32, #tpu.memory_space<vmem>>, vector<1x128xf32>
    %224 = vector.shape_cast %223 : vector<1x128xf32> to vector<128xf32>
    %cst_137 = arith.constant dense<0.000000e+00> : vector<128xf32>
    %225 = vector.multi_reduction <add>, %220, %cst_137 [1] : vector<128x128xf32> to vector<128xf32>
    %226 = vector.shape_cast %225 : vector<128xf32> to vector<128x1xf32>
    %cst_138 = arith.constant 1.280000e+02 : f32
    %227 = vector.broadcast %cst_138 : f32 to vector<128x1xf32>
    %228 = arith.divf %226, %227 : vector<128x1xf32>
    %229 = vector.broadcast %228 : vector<128x1xf32> to vector<128x128xf32>
    %230 = arith.subf %220, %229 : vector<128x128xf32>
    %231 = arith.mulf %230, %230 : vector<128x128xf32>
    %cst_139 = arith.constant dense<0.000000e+00> : vector<128xf32>
    %232 = vector.multi_reduction <add>, %231, %cst_139 [1] : vector<128x128xf32> to vector<128xf32>
    %233 = vector.shape_cast %232 : vector<128xf32> to vector<128x1xf32>
    %cst_140 = arith.constant 1.280000e+02 : f32
    %234 = vector.broadcast %cst_140 : f32 to vector<128x1xf32>
    %235 = arith.divf %233, %234 : vector<128x1xf32>
    %236 = vector.broadcast %228 : vector<128x1xf32> to vector<128x128xf32>
    %237 = arith.subf %220, %236 : vector<128x128xf32>
    %cst_141 = arith.constant 9.99999974E-6 : f32
    %238 = vector.broadcast %cst_141 : f32 to vector<128x1xf32>
    %239 = arith.addf %235, %238 : vector<128x1xf32>
    %240 = math.rsqrt %239 : vector<128x1xf32>
    %241 = vector.broadcast %240 : vector<128x1xf32> to vector<128x128xf32>
    %242 = arith.mulf %237, %241 : vector<128x128xf32>
    %243 = vector.shape_cast %222 : vector<128xf32> to vector<1x128xf32>
    %244 = vector.broadcast %243 : vector<1x128xf32> to vector<128x128xf32>
    %245 = arith.mulf %242, %244 : vector<128x128xf32>
    %246 = vector.shape_cast %224 : vector<128xf32> to vector<1x128xf32>
    %247 = vector.broadcast %246 : vector<1x128xf32> to vector<128x128xf32>
    %248 = arith.addf %245, %247 : vector<128x128xf32>
    %249 = arith.truncf %248 : vector<128x128xf32> to vector<128x128xbf16>
    %c0_142 = arith.constant 0 : index
    %c0_143 = arith.constant 0 : index
    %250 = vector.load %arg15[%c0_142, %c0_143] : memref<128x512xbf16, #tpu.memory_space<vmem>>, vector<128x512xbf16>
    %cst_144 = arith.constant dense<0.000000e+00> : vector<128x512xf32>
    %251 = tpu.matmul %249, %250, %cst_144 {dimension_numbers = #tpu.dot_dimension_numbers<[1], [0], [0], [1], [0, 0, 1, 1], [], []>} : vector<128x128xbf16>, vector<128x512xbf16>, vector<128x512xf32> -> vector<128x512xf32>
    %c0_145 = arith.constant 0 : index
    %c0_146 = arith.constant 0 : index
    %252 = vector.load %arg16[%c0_145, %c0_146] : memref<1x512xf32, #tpu.memory_space<vmem>>, vector<1x512xf32>
    %253 = vector.shape_cast %252 : vector<1x512xf32> to vector<512xf32>
    %254 = vector.shape_cast %253 : vector<512xf32> to vector<1x512xf32>
    %255 = vector.broadcast %254 : vector<1x512xf32> to vector<128x512xf32>
    %256 = arith.addf %251, %255 : vector<128x512xf32>
    %257 = arith.mulf %256, %256 : vector<128x512xf32>
    %258 = arith.mulf %256, %257 : vector<128x512xf32>
    %cst_147 = arith.constant 4.471500e-02 : f32
    %259 = vector.broadcast %cst_147 : f32 to vector<128x512xf32>
    %260 = arith.mulf %259, %258 : vector<128x512xf32>
    %261 = arith.addf %256, %260 : vector<128x512xf32>
    %cst_148 = arith.constant 0.797884583 : f32
    %262 = vector.broadcast %cst_148 : f32 to vector<128x512xf32>
    %263 = arith.mulf %262, %261 : vector<128x512xf32>
    %264 = math.tanh %263 : vector<128x512xf32>
    %cst_149 = arith.constant 1.000000e+00 : f32
    %265 = vector.broadcast %cst_149 : f32 to vector<128x512xf32>
    %266 = arith.addf %265, %264 : vector<128x512xf32>
    %cst_150 = arith.constant 5.000000e-01 : f32
    %267 = vector.broadcast %cst_150 : f32 to vector<128x512xf32>
    %268 = arith.mulf %267, %266 : vector<128x512xf32>
    %269 = arith.mulf %256, %268 : vector<128x512xf32>
    %270 = arith.truncf %269 : vector<128x512xf32> to vector<128x512xbf16>
    %c0_151 = arith.constant 0 : index
    %c0_152 = arith.constant 0 : index
    %271 = vector.load %arg17[%c0_151, %c0_152] : memref<512x128xbf16, #tpu.memory_space<vmem>>, vector<512x128xbf16>
    %cst_153 = arith.constant dense<0.000000e+00> : vector<128x128xf32>
    %272 = tpu.matmul %270, %271, %cst_153 {dimension_numbers = #tpu.dot_dimension_numbers<[1], [0], [0], [1], [0, 0, 1, 1], [], []>} : vector<128x512xbf16>, vector<512x128xbf16>, vector<128x128xf32> -> vector<128x128xf32>
    %c0_154 = arith.constant 0 : index
    %c0_155 = arith.constant 0 : index
    %273 = vector.load %arg18[%c0_154, %c0_155] : memref<1x128xf32, #tpu.memory_space<vmem>>, vector<1x128xf32>
    %274 = vector.shape_cast %273 : vector<1x128xf32> to vector<128xf32>
    %275 = vector.shape_cast %274 : vector<128xf32> to vector<1x128xf32>
    %276 = vector.broadcast %275 : vector<1x128xf32> to vector<128x128xf32>
    %277 = arith.addf %272, %276 : vector<128x128xf32>
    %278 = arith.addf %220, %277 : vector<128x128xf32>
    %c0_156 = arith.constant 0 : index
    %c0_157 = arith.constant 0 : index
    %279 = vector.load %arg19[%c0_156, %c0_157] : memref<128x128xf32, #tpu.memory_space<vmem>>, vector<128x128xf32>
    tpu.vector_store %arg19[%c0_156, %c0_157], %278 {strides = array<i32>} : memref<128x128xf32, #tpu.memory_space<vmem>>, vector<128x128xf32>,
    return
  }
  func.func @transform_0(%arg0: i32) -> (i32, i32) {
    %c0_i32 = arith.constant 0 : i32
    %c0_i32_0 = arith.constant 0 : i32
    return %arg0, %c0_i32 : i32, i32
  }
  func.func @transform_1(%arg0: i32) -> (i32, i32) {
    %c0_i32 = arith.constant 0 : i32
    %c0_i32_0 = arith.constant 0 : i32
    %c0_i32_1 = arith.constant 0 : i32
    return %c0_i32, %c0_i32_0 : i32, i32
  }
  func.func @transform_2(%arg0: i32) -> (i32, i32) {
    %c0_i32 = arith.constant 0 : i32
    %c0_i32_0 = arith.constant 0 : i32
    %c0_i32_1 = arith.constant 0 : i32
    return %c0_i32, %c0_i32_0 : i32, i32
  }
  func.func @transform_3(%arg0: i32) -> (i32, i32) {
    %c0_i32 = arith.constant 0 : i32
    %c0_i32_0 = arith.constant 0 : i32
    %c0_i32_1 = arith.constant 0 : i32
    return %c0_i32, %c0_i32_0 : i32, i32
  }
  func.func @transform_4(%arg0: i32) -> (i32, i32) {
    %c0_i32 = arith.constant 0 : i32
    %c0_i32_0 = arith.constant 0 : i32
    %c0_i32_1 = arith.constant 0 : i32
    return %c0_i32, %c0_i32_0 : i32, i32
  }
  func.func @transform_5(%arg0: i32) -> (i32, i32) {
    %c0_i32 = arith.constant 0 : i32
    %c0_i32_0 = arith.constant 0 : i32
    %c0_i32_1 = arith.constant 0 : i32
    return %c0_i32, %c0_i32_0 : i32, i32
  }
  func.func @transform_6(%arg0: i32) -> (i32, i32) {
    %c0_i32 = arith.constant 0 : i32
    %c0_i32_0 = arith.constant 0 : i32
    %c0_i32_1 = arith.constant 0 : i32
    return %c0_i32, %c0_i32_0 : i32, i32
  }
  func.func @transform_7(%arg0: i32) -> (i32, i32) {
    %c0_i32 = arith.constant 0 : i32
    %c0_i32_0 = arith.constant 0 : i32
    %c0_i32_1 = arith.constant 0 : i32
    return %c0_i32, %c0_i32_0 : i32, i32
  }
  func.func @transform_8(%arg0: i32) -> (i32, i32) {
    %c0_i32 = arith.constant 0 : i32
    %c0_i32_0 = arith.constant 0 : i32
    %c0_i32_1 = arith.constant 0 : i32
    return %c0_i32, %c0_i32_0 : i32, i32
  }
  func.func @transform_9(%arg0: i32) -> (i32, i32) {
    %c0_i32 = arith.constant 0 : i32
    %c0_i32_0 = arith.constant 0 : i32
    %c0_i32_1 = arith.constant 0 : i32
    return %c0_i32, %c0_i32_0 : i32, i32
  }
  func.func @transform_10(%arg0: i32) -> (i32, i32) {
    %c0_i32 = arith.constant 0 : i32
    %c0_i32_0 = arith.constant 0 : i32
    %c0_i32_1 = arith.constant 0 : i32
    return %c0_i32, %c0_i32_0 : i32, i32
  }
  func.func @transform_11(%arg0: i32) -> (i32, i32) {
    %c0_i32 = arith.constant 0 : i32
    %c0_i32_0 = arith.constant 0 : i32
    %c0_i32_1 = arith.constant 0 : i32
    return %c0_i32, %c0_i32_0 : i32, i32
  }
  func.func @transform_12(%arg0: i32) -> (i32, i32) {
    %c0_i32 = arith.constant 0 : i32
    %c0_i32_0 = arith.constant 0 : i32
    %c0_i32_1 = arith.constant 0 : i32
    return %c0_i32, %c0_i32_0 : i32, i32
  }
  func.func @transform_13(%arg0: i32) -> (i32, i32) {
    %c0_i32 = arith.constant 0 : i32
    %c0_i32_0 = arith.constant 0 : i32
    %c0_i32_1 = arith.constant 0 : i32
    return %c0_i32, %c0_i32_0 : i32, i32
  }
  func.func @transform_14(%arg0: i32) -> (i32, i32) {
    %c0_i32 = arith.constant 0 : i32
    %c0_i32_0 = arith.constant 0 : i32
    %c0_i32_1 = arith.constant 0 : i32
    return %c0_i32, %c0_i32_0 : i32, i32
  }
  func.func @transform_15(%arg0: i32) -> (i32, i32) {
    %c0_i32 = arith.constant 0 : i32
    %c0_i32_0 = arith.constant 0 : i32
    %c0_i32_1 = arith.constant 0 : i32
    return %c0_i32, %c0_i32_0 : i32, i32
  }
  func.func @transform_16(%arg0: i32) -> (i32, i32) {
    %c0_i32 = arith.constant 0 : i32
    %c0_i32_0 = arith.constant 0 : i32
    %c0_i32_1 = arith.constant 0 : i32
    return %c0_i32, %c0_i32_0 : i32, i32
  }
  func.func @transform_17(%arg0: i32) -> (i32, i32) {
    %c0_i32 = arith.constant 0 : i32
    %c0_i32_0 = arith.constant 0 : i32
    %c0_i32_1 = arith.constant 0 : i32
    return %c0_i32, %c0_i32_0 : i32, i32
  }
  func.func @transform_18(%arg0: i32) -> (i32, i32) {
    %c0_i32 = arith.constant 0 : i32
    %c0_i32_0 = arith.constant 0 : i32
    return %arg0, %c0_i32 : i32, i32
  }
}

</mosaic_0001>

<bundles_post_ra>
// kernel: tpu_custom_call.1
= control target key start
LH: loop header
LB: loop body
LE: loop exit
PB: predicated region body
PF: predicated region fallthrough
CT: control target
= control target key end

     0   :  { %s12447_s0 = inlined_call_operand.hbm [shape: f32[256,128], index: 0, kind: input, shape index: {}]   ;;  %s12448_s1 = inlined_call_operand.hbm [shape: f32[64,64], index: 1, kind: input, shape index: {}]   ;;  %s12449_s2 = inlined_call_operand.vmem [shape: f32[1,128], index: 2, kind: input, shape index: {}]   ;;  %s12450_s3 = inlined_call_operand.vmem [shape: f32[1,128], index: 3, kind: input, shape index: {}]   ;;  %s12451_s4 = inlined_call_operand.hbm [shape: bf16[128,128], index: 4, kind: input, shape index: {}]   ;;  %s12452_s5 = inlined_call_operand.vmem [shape: f32[1,128], index: 5, kind: input, shape index: {}]   ;;  %s12453_s6 = inlined_call_operand.hbm [shape: bf16[128,128], index: 6, kind: input, shape index: {}]   ;;  %s12454_s7 = inlined_call_operand.vmem [shape: f32[1,128], index: 7, kind: input, shape index: {}]   ;;  %s12455_s8 = inlined_call_operand.hbm [shape: bf16[128,128], index: 8, kind: input, shape index: {}]   ;;  %s12456_s9 = inlined_call_operand.vmem [shape: f32[1,128], index: 9, kind: input, shape index: {}]   ;;  %s12457_s10 = inlined_call_operand.hbm [shape: bf16[128,128], index: 10, kind: input, shape index: {}]   ;;  %s12458_s11 = inlined_call_operand.vmem [shape: f32[1,128], index: 11, kind: input, shape index: {}]   ;;  %s12459_s12 = inlined_call_operand.vmem [shape: f32[1,128], index: 12, kind: input, shape index: {}]   ;;  %s12460_s13 = inlined_call_operand.vmem [shape: f32[1,128], index: 13, kind: input, shape index: {}]   ;;  %s12461_s14 = inlined_call_operand.hbm [shape: bf16[128,512], index: 14, kind: input, shape index: {}]   ;;  %s12462_s15 = inlined_call_operand.vmem [shape: f32[1,512], index: 15, kind: input, shape index: {}]   ;;  %s12463_s16 = inlined_call_operand.hbm [shape: bf16[512,128], index: 16, kind: input, shape index: {}]   ;;  %s12464_s17 = inlined_call_operand.vmem [shape: f32[1,128], index: 17, kind: input, shape index: {}]   ;;  %s12465_s18 = inlined_call_operand.hbm [shape: f32[256,128], index: 18, kind: output, shape index: {}]  }
   0x1   :  { %12502 = sst [smem:[#allocation48_spill]] %s12447_s0 }
   0x2   :  { %12503 = sst [smem:[#allocation49_spill]] %s12448_s1 }
   0x3   :  { %12504 = sst [smem:[#allocation50_spill]] %s12449_s2 }
   0x4   :  { %12505 = sst [smem:[#allocation51_spill]] %s12451_s4 }
   0x5   :  { %12506 = sst [smem:[#allocation52_spill]] %s12453_s6 }
   0x6   :  { %12507 = sst [smem:[#allocation53_spill]] %s12455_s8 }
   0x7   :  { %12508 = sst [smem:[#allocation54_spill]] %s12457_s10 }
   0x8   :  { %12509 = sst [smem:[#allocation55_spill]] %s12460_s13 }
   0x9   :  { %12510 = sst [smem:[#allocation56_spill]] %s12461_s14 }
   0xa   :  { %12511 = sst [smem:[#allocation57_spill]] %s12462_s15 }
   0xb   :  { %12512 = sst [smem:[#allocation58_spill]] %s12463_s16 }
   0xc   :  { %12513 = sst [smem:[#allocation59_spill]] %s12464_s17 }
   0xd   :  { %12514 = sst [smem:[#allocation60_spill]] %s12465_s18 }
   0xe   :  { %23 = vsyncpa [#allocation7], 0 }
   0xf   :  { %25 = vsyncpa [#allocation7 + $0x1], 0 }
  0x10   :  { %26 = vsyncpa [#allocation10], 0 }
  0x11   :  { %27 = vsyncpa [#allocation13], 0 }
  0x12   :  { %28 = vsyncpa [#allocation16], 0 }
  0x13   :  { %29 = vsyncpa [#allocation19], 0 }
  0x14   :  { %30 = vsyncpa [#allocation8], 0 }
  0x15   :  { %32 = vsyncpa [#allocation8 + $0x1], 0  ;;  %s9853_s27 = smov 0   ;;  %s9855_s28 = smov 0  }
  0x16   :  { %s9857_s29 = smov 0   ;;  %s9859_s30 = smov 0  }
  0x17 LB: > { %s9737_s0 = smov [#allocation9]   ;;  %s9874_s1 = sadd.s32 4294967295, %s9735_s30   ;;  %s9735_s30 = sphi %s9859_s30, %s12607_s30   ;;  %s9731_s29 = sphi %s9857_s29, %s12606_s29   ;;  %s9727_s28 = sphi %s9855_s28, %s12605_s28   ;;  %s9723_s27 = sphi %s9853_s27, %s12604_s27  }
  0x18   : > { %s464_s19 = sshll.u32 %s9737_s0, 4  ;;  %p7218_p0 = scmp.ge.s32.totalorder %s9735_s30, 1  ;;  %s465_s19 = int_to_ptr.vmem [resolvable:$true] %s464_s19 }
  0x19   : > { %p12470_p1 = scmp.eq.s32.totalorder %s9874_s1, 0  ;;  %p452_p2 = scmp.lt.s32.totalorder %s9735_s30, 3 }
  0x1a   : > { %s9738_s22 = smov [#allocation12]   ;;  %s9739_s23 = smov [#allocation15]  }
  0x1b   : > { %p9879_p3 = pnand %p7218_p0, %p452_p2  ;;  %s499_s2 = sshll.u32 %s9738_s22, 4  ;;  %s9892_s2 = int_to_ptr.vmem [resolvable:$true] %s499_s2 }
  0x1c   : > { %s9894_s24 = sshll.u32 %s9739_s23, 4  ;;  %s9456_s26 = scalar_lea.vmem %s465_s19, 1024  ;;  %s532_s24 = int_to_ptr.vmem [resolvable:$true] %s9894_s24 }
  0x1d   : > { %s12515_s20 = scalar_select %p9879_p3, 1, 0 }
  0x1e   : > { %p8653_p5 = pneg %p9879_p3  ;;  %p9457_p8 = scmp.ne.s32.totalorder %s465_s19, %s9456_s26 }
  0x1f   : > { %p9464_p11 = scmp.lt.s32.totalorder %s465_s19, %s465_s19  ;;  %p9465_p12 = scmp.lt.s32.totalorder %s9456_s26, %s9456_s26 }
  0x20   : > { %p9888_p6 = pnand %p8653_p5, %p12470_p1 }
  0x21   : > { %p9466_p13 = por %p9465_p12, %p9464_p11 }
  0x22   : > { %p9898_p7 = pneg %p9888_p6 }
  0x24   : > { %p9459_p9 = pnand %p9457_p8, %p9898_p7 }
  0x26   : > { %p9460_p10 = pneg %p9459_p9 }
  0x28   : > { %p9467_p0 = pnand %p9466_p13, %p9460_p10 }
  0x2a   : > { %9470 = shalt.err (!%p9467_p0)
}
  0x2b   : > { %s12468_s0 = smov 128   ;;  %s12469_s22 = smov 8  }
  0x2c   : > { %s12518_s17 = sld [smem:[#allocation49_spill]]  ;;  %s9482_s15 = scalar_lea.vmem %s9892_s2, 1024 }
  0x2d   : > { %p9483_p2 = scmp.ne.s32.totalorder %s9892_s2, %s9482_s15  ;;  %p9490_p9 = scmp.lt.s32.totalorder %s9892_s2, %s9892_s2 }
  0x2e   : > { %p9491_p10 = scmp.lt.s32.totalorder %s9482_s15, %s9482_s15 }
  0x2f   : > { %p9485_p5 = pnand %p9483_p2, %p9898_p7 }
  0x30   : > { %p9492_p11 = por %p9491_p10, %p9490_p9 }
  0x31   : > { %p9486_p8 = pneg %p9485_p5 }
  0x32   : > { %8656 = dma.hbm_to_vmem [thread:$0]  (!%p9888_p6), %s12518_s17, 1024, %s465_s19, [#allocation10], %s12468_s0, %s12468_s0, %s12469_s22  }
  0x33   : > { %p9493_p12 = pnand %p9492_p11, %p9486_p8 }
  0x35   : > { %9496 = shalt.err (!%p9493_p12)
}
  0x36   : > { %s9742_s26 = smov 64   ;;  %s9743_s13 = smov 4  }
  0x37   : > { %s12519_s6 = sld [smem:[#allocation52_spill]]  ;;  %s9508_s19 = scalar_lea.vmem %s532_s24, 1024 }
  0x38   : > { %p9509_p13 = scmp.ne.s32.totalorder %s532_s24, %s9508_s19  ;;  %p9516_p5 = scmp.lt.s32.totalorder %s532_s24, %s532_s24 }
  0x39   : > { %p9517_p8 = scmp.lt.s32.totalorder %s9508_s19, %s9508_s19 }
  0x3a   : > { %p9511_p0 = pnand %p9509_p13, %p9898_p7 }
  0x3b   : > { %p9518_p9 = por %p9517_p8, %p9516_p5 }
  0x3c   : > { %p9512_p2 = pneg %p9511_p0 }
  0x3d   : > { %8662 = dma.hbm_to_vmem [thread:$0]  (!%p9888_p6), %s12519_s6, 1024, %s9892_s2, [#allocation13], %s9742_s26, %s9742_s26, %s9743_s13  }
  0x3e   : > { %p9519_p10 = pnand %p9518_p9, %p9512_p2 }
  0x40   : > { %9522 = shalt.err (!%p9519_p10)
}
  0x41   : > { %s12520_s10 = sld [smem:[#allocation54_spill]]  ;;  %s9744_s2 = smov [#allocation11]  }
  0x42   : > { %s483_s17 = sshll.u32 %s9744_s2, 4  ;;  %s9745_s18 = smov [#allocation14]   ;;  %s484_s17 = int_to_ptr.vmem [resolvable:$true] %s483_s17 }
  0x43   : > { %s515_s0 = sshll.u32 %s9745_s18, 4  ;;  %s9534_s22 = scalar_lea.vmem %s484_s17, 1024  ;;  %s516_s0 = int_to_ptr.vmem [resolvable:$true] %s515_s0 }
  0x44   : > { %p9535_p11 = scmp.ne.s32.totalorder %s484_s17, %s9534_s22  ;;  %p9542_p0 = scmp.lt.s32.totalorder %s484_s17, %s484_s17 }
  0x45   : > { %p9543_p2 = scmp.lt.s32.totalorder %s9534_s22, %s9534_s22 }
  0x46   : > { %p9537_p12 = pnand %p9535_p11, %p9898_p7 }
  0x47   : > { %8668 = dma.hbm_to_vmem [thread:$0]  (!%p9888_p6), %s12520_s10, 1024, %s532_s24, [#allocation16], %s9742_s26, %s9742_s26, %s9743_s13  }
  0x48   : > { %p9538_p13 = pneg %p9537_p12  ;;  %p9544_p5 = por %p9543_p2, %p9542_p0 }
  0x4a   : > { %p9545_p8 = pnand %p9544_p5, %p9538_p13 }
  0x4c   : > { %9548 = shalt.err (!%p9545_p8)
}
  0x4d   : > { %s12521_s4 = sld [smem:[#allocation51_spill]]  ;;  %s9560_s15 = scalar_lea.vmem %s516_s0, 1024 }
  0x4e   : > { %p9561_p9 = scmp.ne.s32.totalorder %s516_s0, %s9560_s15  ;;  %p9568_p12 = scmp.lt.s32.totalorder %s516_s0, %s516_s0 }
  0x4f   : > { %p9569_p0 = scmp.lt.s32.totalorder %s9560_s15, %s9560_s15 }
  0x50   : > { %p9563_p10 = pnand %p9561_p9, %p9898_p7 }
  0x51   : > { %p9570_p13 = por %p9569_p0, %p9568_p12 }
  0x52   : > { %p9564_p11 = pneg %p9563_p10 }
  0x53   : > { %8659 = dma.hbm_to_vmem [thread:$0]  (!%p9888_p6), %s12521_s4, 1024, %s484_s17, [#allocation10], %s9742_s26, %s9742_s26, %s9743_s13  }
  0x54   : > { %p9571_p2 = pnand %p9570_p13, %p9564_p11 }
  0x56   : > { %9574 = shalt.err (!%p9571_p2)
}
  0x57   : > { %s12522_s8 = sld [smem:[#allocation53_spill]]  ;;  %s9746_s2 = smov [#allocation17]  }
  0x58   : > { %s553_s17 = sshll.u32 %s9746_s2, 4  ;;  %s554_s17 = int_to_ptr.vmem [resolvable:$true] %s553_s17 }
  0x59   : > { %s9586_s18 = scalar_lea.vmem %s554_s17, 4096  ;;  %p9594_p10 = scmp.lt.s32.totalorder %s554_s17, %s554_s17 }
  0x5a   : > { %p9587_p5 = scmp.ne.s32.totalorder %s554_s17, %s9586_s18  ;;  %p9595_p11 = scmp.lt.s32.totalorder %s9586_s18, %s9586_s18 }
  0x5c   : > { %p9589_p8 = pnand %p9587_p5, %p9898_p7  ;;  %p9596_p12 = por %p9595_p11, %p9594_p10 }
  0x5d   : > { %8665 = dma.hbm_to_vmem [thread:$0]  (!%p9888_p6), %s12522_s8, 1024, %s516_s0, [#allocation13], %s9742_s26, %s9742_s26, %s9743_s13  }
  0x5e   : > { %p9590_p9 = pneg %p9589_p8 }
  0x60   : > { %p9597_p0 = pnand %p9596_p12, %p9590_p9 }
  0x62   : > { %9600 = shalt.err (!%p9597_p0)
}
  0x63   : > { %s9747_s24 = smov 256   ;;  %s9748_s19 = smov 16  }
  0x64   : > { %s12523_s14 = sld [smem:[#allocation56_spill]]  ;;  %s9749_s22 = smov [#allocation18]  }
  0x65   : > { %s569_s23 = sshll.u32 %s9749_s22, 4  ;;  %s570_s23 = int_to_ptr.vmem [resolvable:$true] %s569_s23 }
  0x66   : > { %s9612_s2 = scalar_lea.vmem %s570_s23, 4096  ;;  %p9620_p8 = scmp.lt.s32.totalorder %s570_s23, %s570_s23 }
  0x67   : > { %p9613_p13 = scmp.ne.s32.totalorder %s570_s23, %s9612_s2  ;;  %p9621_p9 = scmp.lt.s32.totalorder %s9612_s2, %s9612_s2 }
  0x69   : > { %p9615_p2 = pnand %p9613_p13, %p9898_p7  ;;  %p9622_p10 = por %p9621_p9, %p9620_p8 }
  0x6a   : > { %8671 = dma.hbm_to_vmem [thread:$0]  (!%p9888_p6), %s12523_s14, 4096, %s554_s17, [#allocation16], %s9747_s24, %s9747_s24, %s9748_s19  }
  0x6b   : > { %p9616_p5 = pneg %p9615_p2 }
  0x6d   : > { %p9623_p11 = pnand %p9622_p10, %p9616_p5 }
  0x6f   : > { %9626 = shalt.err (!%p9623_p11)
}
  0x70   : > { %s12524_s16 = sld [smem:[#allocation58_spill]]  ;;  %s7217_s21 = sadd.s32 4294967294, %s9735_s30  }
  0x71   : > { %s9977_s25 = sadd.s32 1, %s9735_s30   ;;  %s45_s24 = sadd.s32 1, %s9731_s29 }
  0x72   : > { %s42_s19 = ssub.s32 %s9735_s30, %s9977_s25  ;;  %p52_p7 = scmp.ne.s32.totalorder %s9731_s29, %s9727_s28 }
  0x73   : > { %p43_p12 = scmp.eq.s32.totalorder %s42_s19, 0  ;;  %p53_p0 = scmp.eq.s32.totalorder %s9735_s30, 0 }
  0x74   : > { %p58_p13 = scmp.ne.s32.totalorder %s9727_s28, %s9723_s27  ;;  %p439_p2 = scmp.eq.s32.totalorder %s9874_s1, 1 }
  0x75   : > { %s9989_s15 = scalar_select %p43_p12, %s9731_s29, %s45_s24  }
  0x76   : > { %8674 = dma.hbm_to_vmem [thread:$0]  (!%p9888_p6), %s12524_s16, 4096, %s570_s23, [#allocation19], %s9742_s26, %s9742_s26, %s9743_s13  }
  0x77   : > { %p54_p5 = por %p53_p0, %p52_p7  ;;  %p9993_p8 = por %p12470_p1, %p58_p13 }
  0x78   : > { %p9997_p6 = por %p439_p2, %p52_p7  ;;  %p445_p9 = scmp.eq.s32.totalorder %s7217_s21, 1 }
  0x79   : > { %s12525_s0 = scalar_select %p9993_p8, 1, 0 }
  0x7a   : > { %s12526_s13 = scalar_select %p9997_p6, 1, 0 }
  0x7b   : > { %p8690_p10 = scmp.lt.s32.totalorder %s9735_s30, 2  ;;  %s586_s26 = sand.u32 1, %s9731_s29  }
  0x7c   : > { %p10003_p11 = por %p445_p9, %p58_p13  ;;  %s7227_s23 = sshll.u32 %s586_s26, 7 }
  0x7d   : > { %s7630_s2 = sshll.u32 %s9735_s30, 11  ;;  %s12528_s24 = sld [smem:[#allocation48_spill]] }
  0x7e   : > { %s12527_s22 = scalar_select %p10003_p11, 1, 0 }
  0x7f   : > { %s590_s4 = scalar_lea.vmem [#allocation6], %s7227_s23  ;;  %p10013_p7 = pnand %p8690_p10, %p54_p5 }
  0x80   : > { %s597_s6 = sshll.u32 %s590_s4, 4  ;;  %s10019_s8 = scalar_lea.sflag [#allocation7], %s586_s26  ;;  %s10017_s6 = int_to_ptr.vmem [resolvable:$true] %s597_s6 }
  0x81   : > { %p9629_p0 = pneg %p10013_p7 }
  0x83   : > { %s10011_s19 = scalar_lea.hbm %s12528_s24, %s7630_s2  ;;  %s9632_s23 = scalar_lea.hbm %s12528_s24, 4096 }
  0x84   : > { %s9627_s10 = scalar_lea.hbm %s10011_s19, 2048  ;;  %p9633_p5 = scmp.lt.s32.totalorder %s10011_s19, %s12528_s24 }
  0x85   : > { %p9628_p12 = scmp.ne.s32.totalorder %s10011_s19, %s9627_s10  ;;  %p9634_p9 = scmp.lt.s32.totalorder %s9632_s23, %s9627_s10 }
  0x87   : > { %p9630_p13 = pnand %p9629_p0, %p9628_p12  ;;  %p9635_p10 = por %p9634_p9, %p9633_p5 }
  0x89   : > { %p9631_p2 = pneg %p9630_p13 }
  0x8b   : > { %p9636_p4 = pnand %p9635_p10, %p9631_p2 }
  0x8d   : > { %9639 = shalt.err (!%p9636_p4)
}
  0x8e   : > { %s9640_s26 = scalar_lea.vmem %s10017_s6, 2048  ;;  %s9750_s14 = smov [#allocation6]  }
  0x8f   : > { %p9641_p1 = scmp.ne.s32.totalorder %s10017_s6, %s9640_s26  ;;  %s9645_s16 = sshll.u32 %s9750_s14, 4  ;;  %s9646_s16 = int_to_ptr.vmem [resolvable:$false] %s9645_s16 }
  0x90   : > { %s9647_s2 = scalar_lea.vmem %s9646_s16, 4096  ;;  %p9648_p13 = scmp.lt.s32.totalorder %s10017_s6, %s9646_s16 }
  0x91   : > { %p9643_p11 = pnand %p9641_p1, %p9629_p0  ;;  %p9649_p6 = scmp.lt.s32.totalorder %s9647_s2, %s9640_s26 }
  0x93   : > { %p9644_p12 = pneg %p9643_p11  ;;  %p9650_p8 = por %p9649_p6, %p9648_p13 }
  0x95   : > { %p9651_p3 = pnand %p9650_p8, %p9644_p12 }
  0x97   : > { %9654 = shalt.err (!%p9651_p3)
}
  0x98   : > { %s12530_s10 = smov 8   ;;  %s12531_s18 = smov 128  }
  0x99   : > { %8678 = dma.hbm_to_vmem [thread:$0]  (!%p10013_p7), %s10011_s19, 2048, %s10017_s6, %s10019_s8, %s12531_s18, %s12531_s18, %s12530_s10  }
  0x9a   : > { %p12532_p1 = scmp.ne.s32.totalorder %s12515_s20, 0 }
  0x9c   : > { %609 = sbr.rel (%p12532_p1) target bundleno = 5058 (0x13c2), region = 92 }
  0xa1   : > { %s10046_s14 = sand.u32 1, %s9727_s28   ;;  %p12533_p3 = scmp.ne.s32.totalorder %s12525_s0, 0 }
  0xa2   : > { %s7231_s16 = sshll.u32 %s10046_s14, 7  ;;  %s612_s23 = scalar_lea.sflag [#allocation7], %s10046_s14 }
  0xa3   : > { %s10052_s21 = scalar_lea.vmem [#allocation6], %s7231_s16 }
  0xa4   : > { %9698 = dma.done.wait (%p12533_p3), %s612_s23, 2048  }
  0xa5   : > { %9700 = vsyncadd (%p12533_p3), %s612_s23, 4294965248  ;;  %p12534_p4 = scmp.eq.s32.totalorder %s9874_s1, 0 }
  0xa7   : > { %9702 = dma.done.wait (%p12534_p4), [#allocation10], 2048   ;;  %p12535_p8 = pmov %p12534_p4 }
  0xa8   : > { %p12536_p6 = pmov %p12534_p4 }
  0xa9   : > { %9704 = vsyncadd (%p12535_p8), [#allocation10], 4294965248 }
  0xaa   : > { %9706 = dma.done.wait (%p12536_p6), [#allocation13], 2048   ;;  %p12537_p11 = pmov %p12534_p4 }
  0xab   : > { %p12538_p7 = pmov %p12534_p4 }
  0xac   : > { %9708 = vsyncadd (%p12537_p11), [#allocation13], 4294965248 }
  0xad   : > { %9710 = dma.done.wait (%p12538_p7), [#allocation16], 5120   ;;  %p12539_p0 = pmov %p12534_p4 }
  0xaf   : > { %9712 = vsyncadd (%p12539_p0), [#allocation16], 4294962176  ;;  %p12540_p2 = pmov %p12539_p0 }
  0xb0   : > { %p12541_p5 = pmov %p12539_p0 }
  0xb1   : > { %9714 = dma.done.wait (%p12540_p2), [#allocation19], 4096  }
  0xb2   : > { %9716 = vsyncadd (%p12541_p5), [#allocation19], 4294963200  ;;  %v699_v0 = vld [vmem:[%s10052_s21] sm:$0xff]  ;;  %v701_v1 = vld [vmem:[%s10052_s21 + $0x10] sm:$0xff]  ;;  %s12542_s20 = sld [smem:[#allocation50_spill]]  ;;  %vm1778_vm0 = vcmask 261120  }
  0xb3   : > { %717 = vadd.xlane.f32.xlu0 %v699_v0  ;;  %721 = vadd.xlane.f32.xlu1 %v701_v1  ;;  %v700_v2 = vld [vmem:[%s10052_s21 + $0x8] sm:$0xff]  ;;  %v702_v3 = vld [vmem:[%s10052_s21 + $0x18] sm:$0xff]  ;;  %v703_v4 = vld [vmem:[%s10052_s21 + $0x20] sm:$0xff]  ;;  %s9751_s10 = smov 96   ;;  %s9752_s18 = smov 64   ;;  %vm1868_vm1 = vcmask 523264  }
  0xb4   : > { %v704_v5 = vld [vmem:[%s10052_s21 + $0x28] sm:$0xff]  ;;  %v705_v6 = vld [vmem:[%s10052_s21 + $0x30] sm:$0xff]  ;;  %v706_v7 = vld [vmem:[%s10052_s21 + $0x38] sm:$0xff]  ;;  %s9753_s8 = smov 32   ;;  %vm2094_vm2 = vcmask 257024   ;;  %vm2521_vm3 = vcmask 519424  }
  0xb5   : > { %v8750_v39 = vld [vmem:[#allocation11 + $0x38] sm:$0xff]   ;;  %v10115_v42 = vld [vmem:[%s10052_s21 + $0x40] sm:$0xff]  ;;  %v8752_v43 = vld [vmem:[#allocation11 + $0x30] sm:$0xff]   ;;  %vm2948_vm4 = vcmask 781824   ;;  %vm3375_vm5 = vcmask 1044224   ;;  %s12563_s26 = sld [smem:[#allocation55_spill]] }
  0xb6   : > { %v8751_v40 = vld [vmem:[#allocation12 + $0x38] sm:$0xff]   ;;  %8205 = vmatprep.subr.bf16.mxu0 %v8750_v39  ;;  %v8753_v44 = vld [vmem:[#allocation12 + $0x30] sm:$0xff]   ;;  %v10119_v45 = vld [vmem:[%s10052_s21 + $0x48] sm:$0xff]  ;;  %s12599_s4 = sld [smem:[#allocation60_spill]]  ;;  %p12601_p10 = scmp.ne.s32.totalorder %s12526_s13, 0 }
  0xb7   : > { %719 = vadd.xlane.f32.xlu0 %v700_v2  ;;  %723 = vadd.xlane.f32.xlu1 %v702_v3  ;;  %v10122_v46 = vld [vmem:[%s10052_s21 + $0x50] sm:$0xff]  ;;  %v8754_v47 = vld [vmem:[#allocation11 + $0x28] sm:$0xff]   ;;  %v10127_v49 = vld [vmem:[%s10052_s21 + $0x58] sm:$0xff] }
  0xb8   : > { %8237 = vmatprep.subr.bf16.mxu1 %v8751_v40  ;;  %8206 = vmatpush3.bf16.msra.mxu0 %v8750_v39  ;;  %v8755_v48 = vld [vmem:[#allocation12 + $0x28] sm:$0xff]   ;;  %v10130_v50 = vld [vmem:[%s10052_s21 + $0x60] sm:$0xff]  ;;  %v10138_v54 = vld [vmem:[%s10052_s21 + $0x70] sm:$0xff] }
  0xb9   : > { %8238 = vmatpush3.bf16.msra.mxu1 %v8751_v40  ;;  %8207 = vmatprep.subr.bf16.mxu0 %v8752_v43  ;;  %v8756_v51 = vld [vmem:[#allocation11 + $0x20] sm:$0xff]   ;;  %v10135_v53 = vld [vmem:[%s10052_s21 + $0x68] sm:$0xff]  ;;  %v8758_v55 = vld [vmem:[#allocation11 + $0x18] sm:$0xff]  }
  0xba   : > { %8239 = vmatprep.subr.bf16.mxu1 %v8753_v44  ;;  %v8757_v52 = vld [vmem:[#allocation12 + $0x20] sm:$0xff]   ;;  %v8759_v56 = vld [vmem:[#allocation12 + $0x18] sm:$0xff]   ;;  %v8760_v58 = vld [vmem:[#allocation11 + $0x10] sm:$0xff]  }
  0xbb   : > { %725 = vadd.xlane.f32.xlu0 %v703_v4  ;;  %727 = vadd.xlane.f32.xlu1 %v704_v5  ;;  %v10143_v57 = vld [vmem:[%s10052_s21 + $0x78] sm:$0xff]  ;;  %v8761_v59 = vld [vmem:[#allocation12 + $0x10] sm:$0xff]   ;;  %v8762_v60 = vld [vmem:[#allocation11 + $0x8] sm:$0xff]  }
  0xbc   : > { %8208 = vmatpush3.bf16.msra.mxu0 %v8752_v43  ;;  %v8763_v61 = vld [vmem:[#allocation12 + $0x8] sm:$0xff]   ;;  %v8764_v62 = vld [vmem:[#allocation11] sm:$0xff]  }
  0xbd   : > { %8240 = vmatpush3.bf16.msra.mxu1 %v8753_v44  ;;  %8209 = vmatprep.subr.bf16.mxu0 %v8754_v47  ;;  %v8765_v63 = vld [vmem:[#allocation12] sm:$0xff]  }
  0xbe   : > { %8241 = vmatprep.subr.bf16.mxu1 %v8755_v48  ;;  %v10155_v43 = vld [vmem:[%s12542_s20] ss:$0 sm:$0xff]  ;;  %s12350_s20 = scalar_lea.vmem [#allocation20], %s7231_s16  ;;  %s7743_s16 = sshll.u32 %s9874_s1, 11 }
  0xbf   : > { %729 = vadd.xlane.f32.xlu0 %v705_v6  ;;  %731 = vadd.xlane.f32.xlu1 %v706_v7  ;;  %s7077_s0 = sshll.u32 %s12350_s20, 4  ;;  %s12400_s17 = scalar_lea.hbm %s12599_s4, %s7743_s16  ;;  %s12402_s0 = int_to_ptr.vmem [resolvable:$true] %s7077_s0 }
  0xc0   : > { %8210 = vmatpush3.bf16.msra.mxu0 %v8754_v47  ;;  %s9655_s2 = scalar_lea.vmem %s12402_s0, 2048  ;;  %s9755_s1 = smov [#allocation20]  }
  0xc1   : > { %8242 = vmatpush3.bf16.msra.mxu1 %v8755_v48  ;;  %8211 = vmatprep.subr.bf16.mxu0 %v8756_v51  ;;  %p9656_p9 = scmp.ne.s32.totalorder %s12402_s0, %s9655_s2 }
  0xc2   : > { %8243 = vmatprep.subr.bf16.mxu1 %v8757_v52 }
  0xc3   : > { %p9657_p12 = pnand %p9656_p9, %p12601_p10 }
  0xc4   : > { %8212 = vmatpush3.bf16.msra.mxu0 %v8756_v51 }
  0xc5   : > { %8244 = vmatpush3.bf16.msra.mxu1 %v8757_v52  ;;  %8213 = vmatprep.subr.bf16.mxu0 %v8758_v55  ;;  %p9658_p13 = pneg %p9657_p12 }
  0xc6   : > { %8245 = vmatprep.subr.bf16.mxu1 %v8759_v56 }
  0xc8   : > { %8214 = vmatpush3.bf16.msra.mxu0 %v8758_v55 }
  0xc9   : > { %8246 = vmatpush3.bf16.msra.mxu1 %v8759_v56  ;;  %8215 = vmatprep.subr.bf16.mxu0 %v8760_v58 }
  0xca   : > { %8247 = vmatprep.subr.bf16.mxu1 %v8761_v59 }
  0xcc   : > { %8216 = vmatpush3.bf16.msra.mxu0 %v8760_v58 }
  0xcd   : > { %8248 = vmatpush3.bf16.msra.mxu1 %v8761_v59  ;;  %8217 = vmatprep.subr.bf16.mxu0 %v8762_v60 }
  0xce   : > { %8249 = vmatprep.subr.bf16.mxu1 %v8763_v61 }
  0xd0   : > { %8218 = vmatpush3.bf16.msra.mxu0 %v8762_v60 }
  0xd1   : > { %8250 = vmatpush3.bf16.msra.mxu1 %v8763_v61  ;;  %8219 = vmatprep.subr.bf16.mxu0 %v8764_v62 }
  0xd2   : > { %8251 = vmatprep.subr.bf16.mxu1 %v8765_v63 }
  0xd4   : > { %8220 = vmatpush3.bf16.msra.mxu0 %v8764_v62 }
  0xd5   : > { %8252 = vmatpush3.bf16.msra.mxu1 %v8765_v63 }
 0x13c   : > { %v718_v8 = vpop.xlane.xlu0 %717  ;;  %v722_v9 = vpop.xlane.xlu1 %721 }
 0x13d   : > { %v750_v10 = vmul.f32 0.0078125, %v718_v8  ;;  %v752_v11 = vmul.f32 0.0078125, %v722_v9 }
 0x13f   : > { %v10082_v12 = vsub.f32 %v699_v0, %v750_v10  ;;  %v10084_v13 = vsub.f32 %v701_v1, %v752_v11 }
 0x140   : > { %v720_v14 = vpop.xlane.xlu0 %719  ;;  %v724_v15 = vpop.xlane.xlu1 %723 }
 0x141   : > { %v751_v16 = vmul.f32 0.0078125, %v720_v14  ;;  %v782_v17 = vmul.f32 %v10082_v12, %v10082_v12  ;;  %v753_v18 = vmul.f32 0.0078125, %v724_v15  ;;  %v784_v19 = vmul.f32 %v10084_v13, %v10084_v13 }
 0x143   : > { %798 = vadd.xlane.f32.xlu0 %v782_v17  ;;  %v10090_v20 = vsub.f32 %v700_v2, %v751_v16  ;;  %v10092_v21 = vsub.f32 %v702_v3, %v753_v18 }
 0x144   : > { %v726_v22 = vpop.xlane.xlu0 %725  ;;  %v728_v23 = vpop.xlane.xlu1 %727 }
 0x145   : > { %v754_v24 = vmul.f32 0.0078125, %v726_v22  ;;  %v783_v25 = vmul.f32 %v10090_v20, %v10090_v20  ;;  %v755_v26 = vmul.f32 0.0078125, %v728_v23  ;;  %v785_v27 = vmul.f32 %v10092_v21, %v10092_v21 }
 0x147   : > { %802 = vadd.xlane.f32.xlu0 %v784_v19  ;;  %800 = vadd.xlane.f32.xlu1 %v783_v25  ;;  %v10098_v28 = vsub.f32 %v703_v4, %v754_v24  ;;  %v10100_v29 = vsub.f32 %v704_v5, %v755_v26 }
 0x148   : > { %v730_v30 = vpop.xlane.xlu0 %729  ;;  %v732_v31 = vpop.xlane.xlu1 %731 }
 0x149   : > { %v756_v32 = vmul.f32 0.0078125, %v730_v30  ;;  %v786_v33 = vmul.f32 %v10098_v28, %v10098_v28  ;;  %v757_v34 = vmul.f32 0.0078125, %v732_v31  ;;  %v787_v35 = vmul.f32 %v10100_v29, %v10100_v29 }
 0x14b   : > { %804 = vadd.xlane.f32.xlu1 %v785_v27  ;;  %806 = vadd.xlane.f32.xlu0 %v786_v33  ;;  %v10106_v36 = vsub.f32 %v705_v6, %v756_v32  ;;  %v10108_v37 = vsub.f32 %v706_v7, %v757_v34 }
 0x14d   : > { %v788_v38 = vmul.f32 %v10106_v36, %v10106_v36  ;;  %v789_v41 = vmul.f32 %v10108_v37, %v10108_v37 }
 0x14f   : > { %808 = vadd.xlane.f32.xlu1 %v787_v35  ;;  %810 = vadd.xlane.f32.xlu0 %v788_v38 }
 0x153   : > { %812 = vadd.xlane.f32.xlu1 %v789_v41  ;;  %733 = vadd.xlane.f32.xlu0 %v10115_v42 }
 0x157   : > { %735 = vadd.xlane.f32.xlu1 %v10119_v45  ;;  %737 = vadd.xlane.f32.xlu0 %v10122_v46 }
 0x15b   : > { %739 = vadd.xlane.f32.xlu1 %v10127_v49  ;;  %741 = vadd.xlane.f32.xlu0 %v10130_v50 }
 0x15f   : > { %743 = vadd.xlane.f32.xlu1 %v10135_v53  ;;  %745 = vadd.xlane.f32.xlu0 %v10138_v54 }
 0x163   : > { %747 = vadd.xlane.f32.xlu1 %v10143_v57 }
 0x1cc   : > { %v799_v0 = vpop.xlane.xlu0 %798 }
 0x1cd   : > { %v830_v1 = vmul.f32 0.0078125, %v799_v0 }
 0x1cf   : > { %v846_v2 = vadd.f32 1e-05, %v830_v1 }
 0x1d0   : > { %v801_v3 = vpop.xlane.xlu1 %800  ;;  %v803_v4 = vpop.xlane.xlu0 %802 }
 0x1d1   : > { %8966 = vrsqrt.f32 %v846_v2  ;;  %v831_v5 = vmul.f32 0.0078125, %v801_v3  ;;  %v832_v6 = vmul.f32 0.0078125, %v803_v4 }
 0x1d3   : > { %v847_v7 = vadd.f32 1e-05, %v831_v5  ;;  %v848_v8 = vadd.f32 1e-05, %v832_v6 }
 0x1d4   : > { %v805_v9 = vpop.xlane.xlu1 %804  ;;  %v807_v10 = vpop.xlane.xlu0 %806 }
 0x1d5   : > { %8968 = vrsqrt.f32 %v847_v7  ;;  %v833_v11 = vmul.f32 0.0078125, %v805_v9  ;;  %v834_v14 = vmul.f32 0.0078125, %v807_v10 }
 0x1d6   : > { %8970 = vrsqrt.f32 %v848_v8 }
 0x1d7   : > { %v849_v15 = vadd.f32 1e-05, %v833_v11  ;;  %v850_v16 = vadd.f32 1e-05, %v834_v14 }
 0x1d8   : > { %v809_v17 = vpop.xlane.xlu1 %808  ;;  %v811_v18 = vpop.xlane.xlu0 %810 }
 0x1d9   : > { %8972 = vrsqrt.f32 %v849_v15  ;;  %v835_v19 = vmul.f32 0.0078125, %v809_v17  ;;  %v836_v22 = vmul.f32 0.0078125, %v811_v18 }
 0x1da   : > { %8974 = vrsqrt.f32 %v850_v16 }
 0x1db   : > { %v851_v23 = vadd.f32 1e-05, %v835_v19  ;;  %v852_v24 = vadd.f32 1e-05, %v836_v22 }
 0x1dc   : > { %v813_v25 = vpop.xlane.xlu1 %812  ;;  %v734_v26 = vpop.xlane.xlu0 %733 }
 0x1dd   : > { %8976 = vrsqrt.f32 %v851_v23  ;;  %v837_v27 = vmul.f32 0.0078125, %v813_v25  ;;  %v758_v30 = vmul.f32 0.0078125, %v734_v26 }
 0x1de   : > { %v8967_v31 = vpop.eup %8966  ;;  %8978 = vrsqrt.f32 %v852_v24 }
 0x1df   : > { %v853_v32 = vadd.f32 1e-05, %v837_v27  ;;  %v10147_v33 = vsub.f32 %v10115_v42, %v758_v30  ;;  %v878_v38 = vmul.f32 %v8967_v31, %v10082_v12 }
 0x1e0   : > { %v736_v34 = vpop.xlane.xlu1 %735  ;;  %v738_v35 = vpop.xlane.xlu0 %737 }
 0x1e1   : > { %8980 = vrsqrt.f32 %v853_v32  ;;  %v759_v39 = vmul.f32 0.0078125, %v736_v34  ;;  %v760_v40 = vmul.f32 0.0078125, %v738_v35  ;;  %v790_v41 = vmul.f32 %v10147_v33, %v10147_v33 }
 0x1e2   : > { %v8969_v44 = vpop.eup %8968  ;;  %v900_v55 = vmul.f32 %v10155_v43, %v878_v38 }
 0x1e3   : > { %v8971_v47 = vpop.eup %8970  ;;  %814 = vadd.xlane.f32.xlu0 %v790_v41  ;;  %v10158_v42 = vsub.f32 %v10119_v45, %v759_v39  ;;  %v10161_v48 = vsub.f32 %v10122_v46, %v760_v40  ;;  %v879_v12 = vmul.f32 %v8969_v44, %v10090_v20  ;;  %v10173_v46 = vld [vmem:[%s12450_s3] ss:$0 sm:$0xff]  ;;  %v8766_v39 = vld [vmem:[#allocation14 + $0x38] sm:$0xff]   ;;  %v8767_v40 = vld [vmem:[#allocation14 + $0x30] sm:$0xff]  }
 0x1e4   : > { %v740_v51 = vpop.xlane.xlu1 %739  ;;  %v742_v52 = vpop.xlane.xlu0 %741  ;;  %v880_v56 = vmul.f32 %v8971_v47, %v10084_v13  ;;  %v922_v3 = vadd.f32 %v10173_v46, %v900_v55  ;;  %8269 = vmatprep.subr.bf16.mxu0 %v8766_v39  ;;  %v8768_v41 = vld [vmem:[#allocation14 + $0x28] sm:$0xff]   ;;  %v8769_v44 = vld [vmem:[#allocation14 + $0x20] sm:$0xff]   ;;  %v8770_v47 = vld [vmem:[#allocation14 + $0x18] sm:$0xff]  }
 0x1e5   : > { %v761_v58 = vmul.f32 0.0078125, %v740_v51  ;;  %v762_v59 = vmul.f32 0.0078125, %v742_v52  ;;  %v791_v60 = vmul.f32 %v10158_v42, %v10158_v42  ;;  %v792_v45 = vmul.f32 %v10161_v48, %v10161_v48  ;;  %v8772_v51 = vld [vmem:[#allocation14 + $0x8] sm:$0xff]   ;;  %v8773_v52 = vld [vmem:[#allocation14] sm:$0xff]  }
 0x1e6   : > { %v8973_v20 = vpop.eup %8972  ;;  %v901_v61 = vmul.f32 %v10155_v43, %v879_v12  ;;  %v902_v5 = vmul.f32 %v10155_v43, %v880_v56  ;;  %v8771_v12 = vld [vmem:[#allocation14 + $0x10] sm:$0xff]  }
 0x1e7   : > { %v8975_v62 = vpop.eup %8974  ;;  %816 = vadd.xlane.f32.xlu1 %v791_v60  ;;  %818 = vadd.xlane.f32.xlu0 %v792_v45  ;;  %v10177_v13 = vsub.f32 %v10127_v49, %v761_v58  ;;  %v10180_v63 = vsub.f32 %v10130_v50, %v762_v59  ;;  %v881_v0 = vmul.f32 %v8973_v20, %v10092_v21 }
 0x1e8   : > { %v744_v1 = vpop.xlane.xlu1 %743  ;;  %v746_v2 = vpop.xlane.xlu0 %745  ;;  %v923_v4 = vadd.f32 %v10173_v46, %v901_v61  ;;  %v882_v6 = vmul.f32 %v8975_v62, %v10098_v28  ;;  %v924_v18 = vadd.f32 %v10173_v46, %v902_v5 }
 0x1e9   : > { %v763_v7 = vmul.f32 0.0078125, %v744_v1  ;;  %v764_v8 = vmul.f32 0.0078125, %v746_v2  ;;  %v793_v49 = vmul.f32 %v10177_v13, %v10177_v13  ;;  %v794_v50 = vmul.f32 %v10180_v63, %v10180_v63 }
 0x1ea   : > { %v8977_v9 = vpop.eup %8976  ;;  %v10191_v21 = vpack.c.bf16 %v923_v4, %v922_v3  ;;  %v903_v10 = vmul.f32 %v10155_v43, %v881_v0  ;;  %v904_v11 = vmul.f32 %v10155_v43, %v882_v6 }
 0x1eb   : > { %v8979_v14 = vpop.eup %8978  ;;  %820 = vadd.xlane.f32.xlu1 %v793_v49  ;;  %822 = vadd.xlane.f32.xlu0 %v794_v50  ;;  %v10196_v28 = vsub.f32 %v10135_v53, %v763_v7  ;;  %v10199_v15 = vsub.f32 %v10138_v54, %v764_v8  ;;  %v883_v16 = vmul.f32 %v8977_v9, %v10100_v29 }
 0x1ec   : > { %8221 = vmatprep.mubr.bf16.mxu0 %v10191_v21  ;;  %8253 = vmatprep.mubr.bf16.mxu1 %v10191_v21  ;;  %v748_v17 = vpop.xlane.xlu1 %747  ;;  %v925_v19 = vadd.f32 %v10173_v46, %v903_v10  ;;  %v884_v22 = vmul.f32 %v8979_v14, %v10106_v36  ;;  %v926_v26 = vadd.f32 %v10173_v46, %v904_v11 }
 0x1ed   : > { %v765_v23 = vmul.f32 0.0078125, %v748_v17  ;;  %v795_v53 = vmul.f32 %v10196_v28, %v10196_v28  ;;  %v796_v54 = vmul.f32 %v10199_v15, %v10199_v15  ;;  %v905_v29 = vmul.f32 %v10155_v43, %v883_v16 }
 0x1ee   : > { %v8981_v24 = vpop.eup %8980  ;;  %v10212_v25 = vpack.c.bf16 %v925_v19, %v924_v18  ;;  %v906_v27 = vmul.f32 %v10155_v43, %v884_v22 }
 0x1ef   : > { %824 = vadd.xlane.f32.xlu1 %v795_v53  ;;  %826 = vadd.xlane.f32.xlu0 %v796_v54  ;;  %v10217_v36 = vsub.f32 %v10143_v57, %v765_v23  ;;  %v927_v30 = vadd.f32 %v10173_v46, %v905_v29  ;;  %v885_v31 = vmul.f32 %v8981_v24, %v10108_v37 }
 0x1f0   : > { %8222 = vmatmul.mubr.bf16.vlgmr.msra.gmra.mxu0 %v10212_v25  ;;  %8254 = vmatmul.mubr.bf16.vlgmr.msra.gmra.mxu1 %v10212_v25  ;;  %v928_v57 = vadd.f32 %v10173_v46, %v906_v27 }
 0x1f1   : > { %v797_v32 = vmul.f32 %v10217_v36, %v10217_v36  ;;  %v10225_v34 = vpack.c.bf16 %v927_v30, %v926_v26  ;;  %v907_v35 = vmul.f32 %v10155_v43, %v885_v31  ;;  %8270 = vmatpush3.bf16.msra.mxu0 %v8766_v39 }
 0x1f2   : > { %8271 = vmatprep.subr.bf16.mxu0 %v8767_v40 }
 0x1f3   : > { %828 = vadd.xlane.f32.xlu1 %v797_v32  ;;  %8225 = vmatprep.mubr.bf16.mxu0 %v10225_v34  ;;  %v929_v38 = vadd.f32 %v10173_v46, %v907_v35 }
 0x1f4   : > { %8257 = vmatprep.mubr.bf16.mxu1 %v10225_v34 }
 0x1f5   : > { %v10232_v37 = vpack.c.bf16 %v929_v38, %v928_v57  ;;  %8272 = vmatpush3.bf16.msra.mxu0 %v8767_v40 }
 0x1f6   : > { %8273 = vmatprep.subr.bf16.mxu0 %v8768_v41 }
 0x1f8   : > { %8226 = vmatmul.mubr.bf16.gmra.mxu0 %v10232_v37  ;;  %8258 = vmatmul.mubr.bf16.gmra.mxu1 %v10232_v37 }
 0x1f9   : > { %8274 = vmatpush3.bf16.msra.mxu0 %v8768_v41 }
 0x1fa   : > { %8275 = vmatprep.subr.bf16.mxu0 %v8769_v44 }
 0x1fd   : > { %8276 = vmatpush3.bf16.msra.mxu0 %v8769_v44 }
 0x1fe   : > { %8277 = vmatprep.subr.bf16.mxu0 %v8770_v47 }
 0x201   : > { %8278 = vmatpush3.bf16.msra.mxu0 %v8770_v47 }
 0x202   : > { %8279 = vmatprep.subr.bf16.mxu0 %v8771_v12 }
 0x205   : > { %8280 = vmatpush3.bf16.msra.mxu0 %v8771_v12 }
 0x206   : > { %8281 = vmatprep.subr.bf16.mxu0 %v8772_v51 }
 0x209   : > { %8282 = vmatpush3.bf16.msra.mxu0 %v8772_v51 }
 0x20a   : > { %8283 = vmatprep.subr.bf16.mxu0 %v8773_v52 }
 0x20d   : > { %8284 = vmatpush3.bf16.msra.mxu0 %v8773_v52 }
 0x26c   : > { %v815_v55 = vpop.xlane.xlu0 %814 }
 0x26d   : > { %v838_v56 = vmul.f32 0.0078125, %v815_v55 }
 0x26f   : > { %v854_v58 = vadd.f32 1e-05, %v838_v56 }
 0x270   : > { %v817_v59 = vpop.xlane.xlu1 %816  ;;  %v819_v60 = vpop.xlane.xlu0 %818 }
 0x271   : > { %8982 = vrsqrt.f32 %v854_v58  ;;  %v839_v45 = vmul.f32 0.0078125, %v817_v59  ;;  %v840_v20 = vmul.f32 0.0078125, %v819_v60 }
 0x273   : > { %v855_v61 = vadd.f32 1e-05, %v839_v45  ;;  %v856_v62 = vadd.f32 1e-05, %v840_v20 }
 0x274   : > { %v821_v0 = vpop.xlane.xlu1 %820  ;;  %v823_v1 = vpop.xlane.xlu0 %822 }
 0x275   : > { %8984 = vrsqrt.f32 %v855_v61  ;;  %v841_v2 = vmul.f32 0.0078125, %v821_v0  ;;  %v842_v3 = vmul.f32 0.0078125, %v823_v1 }
 0x276   : > { %8986 = vrsqrt.f32 %v856_v62 }
 0x277   : > { %v857_v4 = vadd.f32 1e-05, %v841_v2  ;;  %v858_v5 = vadd.f32 1e-05, %v842_v3 }
 0x278   : > { %v825_v6 = vpop.xlane.xlu1 %824  ;;  %v827_v7 = vpop.xlane.xlu0 %826 }
 0x279   : > { %8988 = vrsqrt.f32 %v857_v4  ;;  %v843_v8 = vmul.f32 0.0078125, %v825_v6  ;;  %v844_v49 = vmul.f32 0.0078125, %v827_v7 }
 0x27a   : > { %8990 = vrsqrt.f32 %v858_v5 }
 0x27b   : > { %v859_v50 = vadd.f32 1e-05, %v843_v8  ;;  %v860_v9 = vadd.f32 1e-05, %v844_v49 }
 0x27c   : > { %v829_v10 = vpop.xlane.xlu1 %828 }
 0x27d   : > { %8992 = vrsqrt.f32 %v859_v50  ;;  %v845_v11 = vmul.f32 0.0078125, %v829_v10 }
 0x27e   : > { %v8983_v14 = vpop.eup %8982  ;;  %8994 = vrsqrt.f32 %v860_v9 }
 0x27f   : > { %v861_v16 = vadd.f32 1e-05, %v845_v11  ;;  %v886_v17 = vmul.f32 %v8983_v14, %v10147_v33 }
 0x281   : > { %8996 = vrsqrt.f32 %v861_v16  ;;  %v908_v23 = vmul.f32 %v10155_v43, %v886_v17 }
 0x282   : > { %v8985_v18 = vpop.eup %8984 }
 0x283   : > { %v8987_v19 = vpop.eup %8986  ;;  %v887_v22 = vmul.f32 %v8985_v18, %v10158_v42  ;;  %v930_v26 = vadd.f32 %v10173_v46, %v908_v23 }
 0x284   : > { %v888_v53 = vmul.f32 %v8987_v19, %v10161_v48 }
 0x285   : > { %v909_v54 = vmul.f32 %v10155_v43, %v887_v22 }
 0x286   : > { %v8989_v29 = vpop.eup %8988  ;;  %v910_v33 = vmul.f32 %v10155_v43, %v888_v53 }
 0x287   : > { %v8991_v24 = vpop.eup %8990  ;;  %v931_v27 = vadd.f32 %v10173_v46, %v909_v54  ;;  %v889_v30 = vmul.f32 %v8989_v29, %v10177_v13 }
 0x288   : > { %v890_v31 = vmul.f32 %v8991_v24, %v10180_v63  ;;  %v932_v38 = vadd.f32 %v10173_v46, %v910_v33 }
 0x289   : > { %v942_v32 = vpack.c.bf16 %v931_v27, %v930_v26  ;;  %v911_v42 = vmul.f32 %v10155_v43, %v889_v30 }
 0x28a   : > { %v8993_v35 = vpop.eup %8992  ;;  %v912_v48 = vmul.f32 %v10155_v43, %v890_v31 }
 0x28b   : > { %v8995_v57 = vpop.eup %8994  ;;  %8229 = vmatprep.mubr.bf16.mxu0 %v942_v32  ;;  %8261 = vmatprep.mubr.bf16.mxu1 %v942_v32  ;;  %v933_v39 = vadd.f32 %v10173_v46, %v911_v42  ;;  %v891_v40 = vmul.f32 %v8993_v35, %v10196_v28 }
 0x28c   : > { %v892_v13 = vmul.f32 %v8995_v57, %v10199_v15  ;;  %v934_v47 = vadd.f32 %v10173_v46, %v912_v48 }
 0x28d   : > { %v943_v41 = vpack.c.bf16 %v933_v39, %v932_v38  ;;  %v913_v63 = vmul.f32 %v10155_v43, %v891_v40 }
 0x28e   : > { %v8997_v44 = vpop.eup %8996  ;;  %v914_v52 = vmul.f32 %v10155_v43, %v892_v13 }
 0x28f   : > { %8230 = vmatmul.mubr.bf16.gmra.mxu0 %v943_v41  ;;  %8262 = vmatmul.mubr.bf16.gmra.mxu1 %v943_v41  ;;  %v935_v12 = vadd.f32 %v10173_v46, %v913_v63  ;;  %v893_v51 = vmul.f32 %v8997_v44, %v10217_v36 }
 0x290   : > { %v936_v28 = vadd.f32 %v10173_v46, %v914_v52 }
 0x291   : > { %v944_v55 = vpack.c.bf16 %v935_v12, %v934_v47  ;;  %v915_v56 = vmul.f32 %v10155_v43, %v893_v51  ;;  %v10267_v43 = vld [vmem:[%s12452_s5] ss:$0 sm:$0xff] }
 0x293   : > { %8233 = vmatprep.mubr.bf16.mxu0 %v944_v55  ;;  %8265 = vmatprep.mubr.bf16.mxu1 %v944_v55  ;;  %v937_v15 = vadd.f32 %v10173_v46, %v915_v56 }
 0x295   : > { %v945_v58 = vpack.c.bf16 %v937_v15, %v936_v28 }
 0x297   : > { %8234 = vmatmul.mubr.bf16.gmra.mxu0 %v945_v58  ;;  %8266 = vmatmul.mubr.bf16.gmra.mxu1 %v945_v58 }
 0x298   : > { %8285 = vmatprep.mubr.bf16.mxu0 %v10191_v21  ;;  %v10273_v21 = vld [vmem:[%s12454_s7] ss:$0 sm:$0xff] }
 0x29f   : > { %8286 = vmatmul.mubr.bf16.vlgmr.msra.gmra.mxu0 %v10212_v25 }
 0x2a0   : > { %8289 = vmatprep.mubr.bf16.mxu0 %v10225_v34 }
 0x2a7   : > { %8290 = vmatmul.mubr.bf16.gmra.mxu0 %v10232_v37 }
 0x2a8   : > { %8293 = vmatprep.mubr.bf16.mxu0 %v942_v32 }
 0x2af   : > { %8294 = vmatmul.mubr.bf16.gmra.mxu0 %v943_v41 }
 0x2b0   : > { %v8223_v36 = vpop.f32.mrf.mxu0  ;;  %v8255_v46 = vpop.f32.mrf.mxu1  ;;  %8297 = vmatprep.mubr.bf16.mxu0 %v944_v55 }
 0x2b1   : > { %v1060_v59 = vadd.f32 %v8223_v36, %v10267_v43  ;;  %v1324_v45 = vadd.f32 %v8255_v46, %v10273_v21 }
 0x2b2   : > { %v1051_v25 = vpop.f32.mrf.mxu0  ;;  %v1315_v34 = vpop.f32.mrf.mxu1 }
 0x2b3   : > { %v1052_v20 = vadd.f32 %v10267_v43, %v1051_v25  ;;  %v1116_v0 = vmul.f32 0.088388346, %v1060_v59  ;;  %v1316_v1 = vadd.f32 %v10273_v21, %v1315_v34 }
 0x2b4   : > { %v8224_v37 = vpop.f32.mrf.mxu0  ;;  %v8256_v60 = vpop.f32.mrf.mxu1 }
 0x2b5   : > { %v1063_v61 = vadd.f32 %v8224_v37, %v10267_v43  ;;  %v1327_v62 = vadd.f32 %v8256_v60, %v10273_v21  ;;  %v1114_v50 = vmul.f32 0.088388346, %v1052_v20 }
 0x2b6   : > { %v1054_v2 = vpop.f32.mrf.mxu0  ;;  %v1318_v3 = vpop.f32.mrf.mxu1 }
 0x2b7   : > { %v1117_v4 = vmul.f32 0.088388346, %v1063_v61  ;;  %v7792_v5 = vpack.c.bf16 %v1327_v62, %v1324_v45  ;;  %v1055_v6 = vadd.f32 %v10267_v43, %v1054_v2  ;;  %v1319_v7 = vadd.f32 %v10273_v21, %v1318_v3  ;;  %8298 = vmatmul.mubr.bf16.gmra.mxu0 %v945_v58 }
 0x2b8   : > { %v8227_v8 = vpop.f32.mrf.mxu0  ;;  %v8259_v49 = vpop.f32.mrf.mxu1 }
 0x2b9   : > { %v7752_v9 = vpack.c.bf16 %v1117_v4, %v1116_v0  ;;  %7871 = vst [vmem:[#allocation3 + $0x8] sm:$0xff] %v7792_v5   ;;  %v1115_v10 = vmul.f32 0.088388346, %v1055_v6  ;;  %v7787_v11 = vpack.c.bf16 %v1319_v7, %v1316_v1  ;;  %v1076_v14 = vadd.f32 %v8227_v8, %v10267_v43 }
 0x2ba   : > { %v1067_v16 = vpop.f32.mrf.mxu0  ;;  %v1331_v17 = vpop.f32.mrf.mxu1  ;;  %v1340_v53 = vadd.f32 %v8259_v49, %v10273_v21 }
 0x2bb   : > { %7864 = vst [vmem:[#allocation2 + $0x8] sm:$0xff] %v7752_v9   ;;  %v7747_v18 = vpack.c.bf16 %v1115_v10, %v1114_v50  ;;  %7788 = vst [vmem:[#allocation3] sm:$0xff] %v7787_v11   ;;  %v1068_v19 = vadd.f32 %v10267_v43, %v1067_v16  ;;  %v1120_v24 = vmul.f32 0.088388346, %v1076_v14  ;;  %v1332_v26 = vadd.f32 %v10273_v21, %v1331_v17 }
 0x2bc   : > { %v8228_v22 = vpop.f32.mrf.mxu0  ;;  %v8260_v23 = vpop.f32.mrf.mxu1 }
 0x2bd   : > { %7748 = vst [vmem:[#allocation2] sm:$0xff] %v7747_v18   ;;  %v1079_v54 = vadd.f32 %v8228_v22, %v10267_v43  ;;  %v1343_v29 = vadd.f32 %v8260_v23, %v10273_v21  ;;  %v1118_v35 = vmul.f32 0.088388346, %v1068_v19 }
 0x2be   : > { %v1070_v27 = vpop.f32.mrf.mxu0  ;;  %v1334_v30 = vpop.f32.mrf.mxu1 }
 0x2bf   : > { %v1121_v33 = vmul.f32 0.088388346, %v1079_v54  ;;  %v7802_v31 = vpack.c.bf16 %v1343_v29, %v1340_v53  ;;  %v1071_v32 = vadd.f32 %v10267_v43, %v1070_v27  ;;  %v1335_v42 = vadd.f32 %v10273_v21, %v1334_v30 }
 0x2c0   : > { %v8780_v51 = vld [vmem:[#allocation3 + $0x8] sm:$0xff]  }
 0x2c1   : > { %v7762_v48 = vpack.c.bf16 %v1121_v33, %v1120_v24  ;;  %7873 = vst [vmem:[#allocation3 + $0x18] sm:$0xff] %v7802_v31   ;;  %v1119_v57 = vmul.f32 0.088388346, %v1071_v32  ;;  %v7797_v38 = vpack.c.bf16 %v1335_v42, %v1332_v26  ;;  %v8783_v28 = vld [vmem:[#allocation3 + $0x8] sm:$0xff]  }
 0x2c2   : > { %v8781_v52 = vld [vmem:[#allocation2 + $0x8] sm:$0xff]   ;;  %v8782_v55 = vld [vmem:[#allocation3] sm:$0xff]   ;;  %v1795_v59 = vsel %vm1778_vm0, %v8783_v28, 0 }
 0x2c3   : > { %7866 = vst [vmem:[#allocation2 + $0x18] sm:$0xff] %v7762_v48   ;;  %v7757_v39 = vpack.c.bf16 %v1119_v57, %v1118_v35  ;;  %7872 = vst [vmem:[#allocation3 + $0x10] sm:$0xff] %v7797_v38   ;;  %v8784_v15 = vld [vmem:[#allocation3 + $0x8] sm:$0xff]   ;;  %v8788_v25 = vld [vmem:[#allocation3] sm:$0xff]  }
 0x2c4   : > { %v8774_v40 = vld [vmem:[#allocation2] sm:$0xff]   ;;  %v1792_v45 = vsel %vm1778_vm0, %v8788_v25, 0  ;;  %v8793_v61 = vld [vmem:[#allocation2 + $0x8] sm:$0xff]  }
 0x2c5   : > { %7865 = vst [vmem:[#allocation2 + $0x10] sm:$0xff] %v7757_v39   ;;  %8309 = vmatprep.mubr.msk.bf16.mxu1 %vm1778_vm0, %v8774_v40  ;;  %v8779_v12 = vld [vmem:[#allocation2] sm:$0xff]   ;;  %v8794_v62 = vld [vmem:[#allocation2 + $0x8] sm:$0xff]  }
 0x2c6   : > { %v8789_v34 = vld [vmem:[#allocation2] sm:$0xff]  }
 0x2c7   : > { %v8792_v20 = vld [vmem:[#allocation3] sm:$0xff]  }
 0x2c8   : > { %v8775_v13 = vld [vmem:[#allocation3 + $0x18] sm:$0xff]  }
 0x2c9   : > { %v8776_v41 = vld [vmem:[#allocation3 + $0x18] sm:$0xff]   ;;  %8589 = vmatprep.subr.msk.bf16.mxu1 %vm1778_vm0, %v8775_v13  ;;  %v1801_v63 = vsel %vm1778_vm0, %v8775_v13, 0 }
 0x2ca   : > { %v8777_v44 = vld [vmem:[#allocation3 + $0x10] sm:$0xff]   ;;  %2181 = vrot.lane.b32.xlu0 %v8776_v41, %s9751_s10  ;;  %8302 = vmatpush3.bf16.xpose.msra.mxu1 %v1801_v63  ;;  %v8785_v58 = vld [vmem:[#allocation3 + $0x18] sm:$0xff]  }
 0x2cb   : > { %v8778_v47 = vld [vmem:[#allocation3 + $0x10] sm:$0xff]   ;;  %2179 = vrot.lane.b32.xlu1 %v8777_v44, %s9751_s10  ;;  %v8786_v36 = vld [vmem:[#allocation2 + $0x18] sm:$0xff]  }
 0x2cc   : > { %8590 = vmatprep.subr.msk.bf16.mxu1 %vm1778_vm0, %v8778_v47  ;;  %v1798_v56 = vsel %vm1778_vm0, %v8778_v47, 0  ;;  %v8787_v46 = vld [vmem:[#allocation3 + $0x10] sm:$0xff]   ;;  %v8796_v1 = vld [vmem:[#allocation2 + $0x18] sm:$0xff]  }
 0x2cd   : > { %v8790_v37 = vld [vmem:[#allocation2 + $0x10] sm:$0xff]   ;;  %v8797_v2 = vld [vmem:[#allocation2 + $0x18] sm:$0xff]  }
 0x2ce   : > { %2147 = vrot.lane.b32.xlu0 %v8779_v12, %s9751_s10  ;;  %v8791_v60 = vld [vmem:[#allocation2 + $0x10] sm:$0xff]  }
 0x2cf   : > { %2177 = vrot.lane.b32.xlu1 %v8780_v51, %s9751_s10  ;;  %v8795_v0 = vld [vmem:[#allocation2 + $0x10] sm:$0xff]  }
 0x2d2   : > { %2149 = vrot.lane.b32.xlu0 %v8781_v52, %s9751_s10  ;;  %8304 = vmatpush3.bf16.xpose.msra.mxu1 %v1798_v56 }
 0x2d3   : > { %2175 = vrot.lane.b32.xlu1 %v8782_v55, %s9751_s10  ;;  %8591 = vmatprep.subr.msk.bf16.mxu1 %vm1778_vm0, %v8783_v28 }
 0x2d6   : > { %2604 = vrot.lane.b32.xlu0 %v8784_v15, %s9752_s18 }
 0x2d7   : > { %2608 = vrot.lane.b32.xlu1 %v8785_v58, %s9752_s18 }
 0x2da   : > { %2153 = vrot.lane.b32.xlu0 %v8786_v36, %s9751_s10  ;;  %8306 = vmatpush3.bf16.xpose.msra.mxu1 %v1795_v59 }
 0x2db   : > { %2606 = vrot.lane.b32.xlu1 %v8787_v46, %s9752_s18  ;;  %8592 = vmatprep.subr.msk.bf16.mxu1 %vm1778_vm0, %v8788_v25 }
 0x2de   : > { %2574 = vrot.lane.b32.xlu0 %v8789_v34, %s9752_s18 }
 0x2df   : > { %2151 = vrot.lane.b32.xlu1 %v8790_v37, %s9751_s10 }
 0x2e2   : > { %2578 = vrot.lane.b32.xlu0 %v8791_v60, %s9752_s18  ;;  %8308 = vmatpush3.bf16.xpose.msra.mxu1 %v1792_v45 }
 0x2e3   : > { %2602 = vrot.lane.b32.xlu1 %v8792_v20, %s9752_s18 }
 0x2e7   : > { %2576 = vrot.lane.b32.xlu1 %v8793_v61, %s9752_s18 }
 0x2e9   : > { %8310 = vmatmul.mubr.msk.bf16.vlgmr.msra.gmra.mxu1 %vm1778_vm0, %v8794_v62 }
 0x2ea   : > { %8313 = vmatprep.mubr.msk.bf16.mxu1 %vm1778_vm0, %v8795_v0 }
 0x2eb   : > { %2580 = vrot.lane.b32.xlu1 %v8796_v1, %s9752_s18 }
 0x2f1   : > { %8314 = vmatmul.mubr.msk.bf16.gmra.mxu1 %vm1778_vm0, %v8797_v2 }
 0x33c   : > { %v2182_v3 = vpop.permute.xlu0 %2181 }
 0x33d   : > { %8593 = vmatprep.subr.msk.bf16.mxu0 %vm1778_vm0, %v2182_v3  ;;  %v2180_v4 = vpop.permute.xlu1 %2179  ;;  %v2205_v5 = vsel %vm1778_vm0, %v2182_v3, 0 }
 0x33e   : > { %8334 = vmatpush3.bf16.xpose.msra.mxu0 %v2205_v5  ;;  %v2202_v8 = vsel %vm1778_vm0, %v2180_v4, 0 }
 0x33f   : > { %8594 = vmatprep.subr.msk.bf16.mxu0 %vm1778_vm0, %v2180_v4  ;;  %v10353_v4 = vld [vmem:[%s12456_s9] ss:$0 sm:$0xff] }
 0x340   : > { %v2148_v6 = vpop.permute.xlu0 %2147 }
 0x341   : > { %8341 = vmatprep.mubr.msk.bf16.mxu0 %vm1778_vm0, %v2148_v6  ;;  %v2178_v7 = vpop.permute.xlu1 %2177 }
 0x342   : > { %v2199_v50 = vsel %vm1778_vm0, %v2178_v7, 0 }
 0x344   : > { %v2150_v19 = vpop.permute.xlu0 %2149 }
 0x345   : > { %v2176_v49 = vpop.permute.xlu1 %2175 }
 0x346   : > { %8336 = vmatpush3.bf16.xpose.msra.mxu0 %v2202_v8  ;;  %v2196_v31 = vsel %vm1778_vm0, %v2176_v49, 0 }
 0x347   : > { %8595 = vmatprep.subr.msk.bf16.mxu0 %vm1778_vm0, %v2178_v7 }
 0x348   : > { %v10336_v44 = vpop.permute.xlu0 %2604 }
 0x349   : > { %v2609_v14 = vpop.permute.xlu1 %2608 }
 0x34a   : > { %v2632_v60 = vsel %vm1778_vm0, %v2609_v14, 0 }
 0x34c   : > { %v2154_v1 = vpop.permute.xlu0 %2153 }
 0x34d   : > { %v2607_v57 = vpop.permute.xlu1 %2606 }
 0x34e   : > { %8338 = vmatpush3.bf16.xpose.msra.mxu0 %v2199_v50 }
 0x34f   : > { %v8231_v9 = vpop.f32.mrf.mxu0  ;;  %v8263_v10 = vpop.f32.mrf.mxu1  ;;  %8596 = vmatprep.subr.msk.bf16.mxu0 %vm1778_vm0, %v2176_v49 }
 0x350   : > { %v1092_v16 = vadd.f32 %v8231_v9, %v10267_v43  ;;  %v1356_v54 = vadd.f32 %v8263_v10, %v10273_v21  ;;  %v2575_v50 = vpop.permute.xlu0 %2574 }
 0x351   : > { %v1083_v11 = vpop.f32.mrf.mxu0  ;;  %v1347_v17 = vpop.f32.mrf.mxu1 }
 0x352   : > { %v1084_v22 = vadd.f32 %v10267_v43, %v1083_v11  ;;  %v1124_v26 = vmul.f32 0.088388346, %v1092_v16  ;;  %v1348_v32 = vadd.f32 %v10273_v21, %v1347_v17  ;;  %v2152_v46 = vpop.permute.xlu1 %2151 }
 0x353   : > { %v8232_v18 = vpop.f32.mrf.mxu0  ;;  %v8264_v53 = vpop.f32.mrf.mxu1 }
 0x354   : > { %v1095_v23 = vadd.f32 %v8232_v18, %v10267_v43  ;;  %v1359_v29 = vadd.f32 %v8264_v53, %v10273_v21  ;;  %v1122_v38 = vmul.f32 0.088388346, %v1084_v22 }
 0x355   : > { %v1086_v24 = vpop.f32.mrf.mxu0  ;;  %v1350_v33 = vpop.f32.mrf.mxu1 }
 0x356   : > { %v1125_v27 = vmul.f32 0.088388346, %v1095_v23  ;;  %v1087_v30 = vadd.f32 %v10267_v43, %v1086_v24  ;;  %v7812_v42 = vpack.c.bf16 %v1359_v29, %v1356_v54  ;;  %v1351_v35 = vadd.f32 %v10273_v21, %v1350_v33  ;;  %8340 = vmatpush3.bf16.xpose.msra.mxu0 %v2196_v31 }
 0x357   : > { %v8235_v48 = vpop.f32.mrf.mxu0  ;;  %v8267_v13 = vpop.f32.mrf.mxu1  ;;  %8597 = vmatprep.subr.msk.bf16.mxu0 %vm1778_vm0, %v2609_v14  ;;  %v2629_v14 = vsel %vm1778_vm0, %v2607_v57, 0 }
 0x358   : > { %v7772_v39 = vpack.c.bf16 %v1125_v27, %v1124_v26  ;;  %v1123_v40 = vmul.f32 0.088388346, %v1087_v30  ;;  %7875 = vst [vmem:[#allocation3 + $0x28] sm:$0xff] %v7812_v42   ;;  %v7807_v41 = vpack.c.bf16 %v1351_v35, %v1348_v32  ;;  %v1108_v12 = vadd.f32 %v8235_v48, %v10267_v43  ;;  %v2603_v27 = vpop.permute.xlu1 %2602 }
 0x359   : > { %v1099_v63 = vpop.f32.mrf.mxu0  ;;  %v1363_v51 = vpop.f32.mrf.mxu1  ;;  %v1372_v15 = vadd.f32 %v8267_v13, %v10273_v21  ;;  %v2626_v26 = vsel %vm1778_vm0, %v10336_v44, 0 }
 0x35a   : > { %7868 = vst [vmem:[#allocation2 + $0x28] sm:$0xff] %v7772_v39   ;;  %v7767_v47 = vpack.c.bf16 %v1123_v40, %v1122_v38  ;;  %7874 = vst [vmem:[#allocation3 + $0x20] sm:$0xff] %v7807_v41   ;;  %v1100_v52 = vadd.f32 %v10267_v43, %v1099_v63  ;;  %v1128_v59 = vmul.f32 0.088388346, %v1108_v12  ;;  %v1364_v20 = vadd.f32 %v10273_v21, %v1363_v51 }
 0x35b   : > { %v8236_v55 = vpop.f32.mrf.mxu0  ;;  %v8268_v28 = vpop.f32.mrf.mxu1  ;;  %v2623_v41 = vsel %vm1778_vm0, %v2603_v27, 0 }
 0x35c   : > { %7867 = vst [vmem:[#allocation2 + $0x20] sm:$0xff] %v7767_v47   ;;  %v1111_v56 = vadd.f32 %v8236_v55, %v10267_v43  ;;  %v1375_v58 = vadd.f32 %v8268_v28, %v10273_v21  ;;  %v1126_v45 = vmul.f32 0.088388346, %v1100_v52 }
 0x35d   : > { %v1102_v36 = vpop.f32.mrf.mxu0  ;;  %v1366_v37 = vpop.f32.mrf.mxu1  ;;  %8342 = vmatmul.mubr.msk.bf16.vlgmr.msra.gmra.mxu0 %vm1778_vm0, %v2150_v19 }
 0x35e   : > { %v1129_v25 = vmul.f32 0.088388346, %v1111_v56  ;;  %v1103_v34 = vadd.f32 %v10267_v43, %v1102_v36  ;;  %v7822_v61 = vpack.c.bf16 %v1375_v58, %v1372_v15  ;;  %v1367_v62 = vadd.f32 %v10273_v21, %v1366_v37  ;;  %8345 = vmatprep.mubr.msk.bf16.mxu0 %vm1778_vm0, %v2152_v46  ;;  %8366 = vmatpush3.bf16.xpose.msra.mxu0 %v2632_v60  ;;  %v2577_v46 = vpop.permute.xlu1 %2576 }
 0x35f   : > { %v8287_v0 = vpop.f32.mrf.mxu0  ;;  %8598 = vmatprep.subr.msk.bf16.mxu0 %vm1778_vm0, %v2607_v57 }
 0x360   : > { %v7782_v2 = vpack.c.bf16 %v1129_v25, %v1128_v59  ;;  %v1127_v3 = vmul.f32 0.088388346, %v1103_v34  ;;  %7877 = vst [vmem:[#allocation3 + $0x38] sm:$0xff] %v7822_v61   ;;  %v7817_v43 = vpack.c.bf16 %v1367_v62, %v1364_v20  ;;  %v1572_v7 = vadd.f32 %v8287_v0, %v10353_v4  ;;  %v2579_v34 = vpop.permute.xlu0 %2578 }
 0x361   : > { %v1563_v5 = vpop.f32.mrf.mxu0 }
 0x362   : > { %7870 = vst [vmem:[#allocation2 + $0x38] sm:$0xff] %v7782_v2   ;;  %v7777_v6 = vpack.c.bf16 %v1127_v3, %v1126_v45  ;;  %7876 = vst [vmem:[#allocation3 + $0x30] sm:$0xff] %v7817_v43   ;;  %v1564_v9 = vadd.f32 %v10353_v4, %v1563_v5  ;;  %v2581_v2 = vpop.permute.xlu1 %2580 }
 0x363   : > { %v8288_v21 = vpop.f32.mrf.mxu0  ;;  %v8810_v3 = vld [vmem:[#allocation2 + $0x20] sm:$0xff]  }
 0x364   : > { %7869 = vst [vmem:[#allocation2 + $0x30] sm:$0xff] %v7777_v6   ;;  %v1575_v8 = vadd.f32 %v8288_v21, %v10353_v4  ;;  %v8812_v6 = vld [vmem:[#allocation3 + $0x20] sm:$0xff]  }
 0x365   : > { %v1566_v49 = vpop.f32.mrf.mxu0  ;;  %8346 = vmatmul.mubr.msk.bf16.gmra.mxu0 %vm1778_vm0, %v2154_v1  ;;  %v3461_v21 = vsel %vm1778_vm0, %v8812_v6, 0 }
 0x366   : > { %v7832_v10 = vpack.c.bf16 %v1575_v8, %v1572_v7  ;;  %v1567_v11 = vadd.f32 %v10353_v4, %v1566_v49  ;;  %8368 = vmatpush3.bf16.xpose.msra.mxu0 %v2629_v14  ;;  %8373 = vmatprep.mubr.msk.bf16.mxu0 %vm1778_vm0, %v2575_v50  ;;  %v8813_v7 = vld [vmem:[#allocation2 + $0x28] sm:$0xff]   ;;  %v10401_v50 = vld [vmem:[#allocation9 + $0x10] sm:$0xff] }
 0x367   : > { %v8291_v16 = vpop.f32.mrf.mxu0  ;;  %8599 = vmatprep.subr.msk.bf16.mxu0 %vm1778_vm0, %v10336_v44  ;;  %v8800_v63 = vld [vmem:[#allocation3 + $0x38] sm:$0xff]  }
 0x368   : > { %7878 = vst [vmem:[#allocation4 + $0x8] sm:$0xff] %v7832_v10   ;;  %v7827_v17 = vpack.c.bf16 %v1567_v11, %v1564_v9  ;;  %v1588_v22 = vadd.f32 %v8291_v16, %v10353_v4  ;;  %v3470_v20 = vsel %vm1778_vm0, %v8800_v63, 0  ;;  %v10403_v10 = vld [vmem:[#allocation9] sm:$0xff] }
 0x369   : > { %v1579_v18 = vpop.f32.mrf.mxu0  ;;  %v8806_v25 = vld [vmem:[#allocation3 + $0x30] sm:$0xff]   ;;  %v8815_v49 = vld [vmem:[#allocation2 + $0x38] sm:$0xff]  }
 0x36a   : > { %7828 = vst [vmem:[#allocation4] sm:$0xff] %v7827_v17   ;;  %v1580_v54 = vadd.f32 %v10353_v4, %v1579_v18  ;;  %v3467_v43 = vsel %vm1778_vm0, %v8806_v25, 0  ;;  %v10413_v18 = vld [vmem:[#allocation9 + $0x18] sm:$0xff] }
 0x36b   : > { %v8292_v19 = vpop.f32.mrf.mxu0  ;;  %v8814_v8 = vld [vmem:[#allocation2 + $0x30] sm:$0xff]  }
 0x36c   : > { %v1591_v23 = vadd.f32 %v8292_v19, %v10353_v4 }
 0x36d   : > { %v1582_v53 = vpop.f32.mrf.mxu0 }
 0x36e   : > { %v7842_v29 = vpack.c.bf16 %v1591_v23, %v1588_v22  ;;  %v1583_v24 = vadd.f32 %v10353_v4, %v1582_v53  ;;  %8370 = vmatpush3.bf16.xpose.msra.mxu0 %v2626_v26  ;;  %v10415_v22 = vld [vmem:[#allocation9 + $0x8] sm:$0xff] }
 0x36f   : > { %v8295_v30 = vpop.f32.mrf.mxu0  ;;  %v8798_v33 = vld [vmem:[#allocation4 + $0x8] sm:$0xff]   ;;  %8600 = vmatprep.subr.msk.bf16.mxu0 %vm1778_vm0, %v2603_v27 }
 0x370   : > { %7880 = vst [vmem:[#allocation4 + $0x18] sm:$0xff] %v7842_v29   ;;  %v7837_v31 = vpack.c.bf16 %v1583_v24, %v1580_v54  ;;  %2386 = vrot.lane.b32.xlu0 %v8798_v33, %s9751_s10  ;;  %v1604_v48 = vadd.f32 %v8295_v30, %v10353_v4  ;;  %v8808_v61 = vld [vmem:[#allocation4 + $0x8] sm:$0xff]   ;;  %v10425_v24 = vld [vmem:[#allocation9 + $0x30] sm:$0xff]  ;;  %v10429_v33 = vld [vmem:[#allocation9 + $0x38] sm:$0xff] }
 0x371   : > { %v1595_v32 = vpop.f32.mrf.mxu0  ;;  %v8799_v35 = vld [vmem:[#allocation4] sm:$0xff]  }
 0x372   : > { %7879 = vst [vmem:[#allocation4 + $0x10] sm:$0xff] %v7837_v31   ;;  %v1596_v39 = vadd.f32 %v10353_v4, %v1595_v32  ;;  %v8809_v1 = vld [vmem:[#allocation4] sm:$0xff]  }
 0x373   : > { %v8296_v42 = vpop.f32.mrf.mxu0 }
 0x374   : > { %v1607_v57 = vadd.f32 %v8296_v42, %v10353_v4  ;;  %2384 = vrot.lane.b32.xlu0 %v8799_v35, %s9751_s10  ;;  %v10436_v42 = vld [vmem:[#allocation9 + $0x20] sm:$0xff] }
 0x375   : > { %v1598_v38 = vpop.f32.mrf.mxu0 }
 0x376   : > { %v7852_v40 = vpack.c.bf16 %v1607_v57, %v1604_v48  ;;  %v1599_v13 = vadd.f32 %v10353_v4, %v1598_v38  ;;  %8372 = vmatpush3.bf16.xpose.msra.mxu0 %v2623_v41  ;;  %v10438_v48 = vld [vmem:[#allocation9 + $0x28] sm:$0xff] }
 0x377   : > { %v8299_v44 = vpop.f32.mrf.mxu0  ;;  %v8801_v47 = vld [vmem:[#allocation4 + $0x18] sm:$0xff]   ;;  %8605 = vmatprep.subr.msk.bf16.mxu0 %vm1778_vm0, %v8800_v63 }
 0x378   : > { %7882 = vst [vmem:[#allocation4 + $0x28] sm:$0xff] %v7852_v40   ;;  %v7847_v12 = vpack.c.bf16 %v1599_v13, %v1596_v39  ;;  %v8802_v51 = vld [vmem:[#allocation4 + $0x18] sm:$0xff]   ;;  %8317 = vmatprep.subr.bf16.mxu1 %v8801_v47  ;;  %v1620_v15 = vadd.f32 %v8299_v44, %v10353_v4 }
 0x379   : > { %v1611_v52 = vpop.f32.mrf.mxu0  ;;  %v8803_v55 = vld [vmem:[#allocation4 + $0x10] sm:$0xff]   ;;  %2390 = vrot.lane.b32.xlu0 %v8802_v51, %s9751_s10  ;;  %8318 = vmatpush3.bf16.msra.mxu1 %v8801_v47  ;;  %v8805_v36 = vld [vmem:[#allocation4 + $0x18] sm:$0xff]  }
 0x37a   : > { %7881 = vst [vmem:[#allocation4 + $0x20] sm:$0xff] %v7847_v12   ;;  %v8804_v56 = vld [vmem:[#allocation4 + $0x10] sm:$0xff]   ;;  %2388 = vrot.lane.b32.xlu1 %v8803_v55, %s9751_s10  ;;  %v1612_v37 = vadd.f32 %v10353_v4, %v1611_v52 }
 0x37b   : > { %v8300_v28 = vpop.f32.mrf.mxu0  ;;  %8319 = vmatprep.subr.bf16.mxu1 %v8804_v56  ;;  %v8807_v62 = vld [vmem:[#allocation4 + $0x10] sm:$0xff]  }
 0x37c   : > { %v1623_v58 = vadd.f32 %v8300_v28, %v10353_v4 }
 0x37d   : > { %v1614_v59 = vpop.f32.mrf.mxu0  ;;  %8374 = vmatmul.mubr.msk.bf16.vlgmr.msra.gmra.mxu0 %vm1778_vm0, %v2577_v46  ;;  %2817 = vrot.lane.b32.xlu0 %v8805_v36, %s9752_s18 }
 0x37e   : > { %v7862_v60 = vpack.c.bf16 %v1623_v58, %v1620_v15  ;;  %v1615_v45 = vadd.f32 %v10353_v4, %v1614_v59  ;;  %8377 = vmatprep.mubr.msk.bf16.mxu0 %vm1778_vm0, %v2579_v34  ;;  %8430 = vmatpush3.bf16.xpose.msra.mxu0 %v3470_v20  ;;  %v8811_v4 = vld [vmem:[#allocation3 + $0x28] sm:$0xff]  }
 0x37f   : > { %8320 = vmatpush3.bf16.msra.mxu1 %v8804_v56  ;;  %8606 = vmatprep.subr.msk.bf16.mxu0 %vm1778_vm0, %v8806_v25  ;;  %v3464_v5 = vsel %vm1778_vm0, %v8811_v4, 0 }
 0x380   : > { %7884 = vst [vmem:[#allocation4 + $0x38] sm:$0xff] %v7862_v60   ;;  %v7857_v0 = vpack.c.bf16 %v1615_v45, %v1612_v37  ;;  %2815 = vrot.lane.b32.xlu1 %v8807_v62, %s9752_s18  ;;  %8321 = vmatprep.subr.bf16.mxu1 %v8808_v61 }
 0x382   : > { %7883 = vst [vmem:[#allocation4 + $0x30] sm:$0xff] %v7857_v0  }
 0x383   : > { %8322 = vmatpush3.bf16.msra.mxu1 %v8808_v61 }
 0x384   : > { %8323 = vmatprep.subr.bf16.mxu1 %v8809_v1 }
 0x385   : > { %8378 = vmatmul.mubr.msk.bf16.gmra.mxu0 %vm1778_vm0, %v2581_v2 }
 0x386   : > { %8432 = vmatpush3.bf16.xpose.msra.mxu0 %v3467_v43  ;;  %8437 = vmatprep.mubr.msk.bf16.mxu0 %vm1778_vm0, %v8810_v3 }
 0x387   : > { %8324 = vmatpush3.bf16.msra.mxu1 %v8809_v1  ;;  %8607 = vmatprep.subr.msk.bf16.mxu0 %vm1778_vm0, %v8811_v4 }
 0x38e   : > { %8434 = vmatpush3.bf16.xpose.msra.mxu0 %v3464_v5 }
 0x38f   : > { %8608 = vmatprep.subr.msk.bf16.mxu0 %vm1778_vm0, %v8812_v6 }
 0x396   : > { %8436 = vmatpush3.bf16.xpose.msra.mxu0 %v3461_v21 }
 0x39d   : > { %8438 = vmatmul.mubr.msk.bf16.vlgmr.msra.gmra.mxu0 %vm1778_vm0, %v8813_v7 }
 0x39e   : > { %8441 = vmatprep.mubr.msk.bf16.mxu0 %vm1778_vm0, %v8814_v8 }
 0x3a5   : > { %8442 = vmatmul.mubr.msk.bf16.gmra.mxu0 %vm1778_vm0, %v8815_v49 }
 0x3a9   : > { %v8311_v9 = vpop.f32.mrf.mxu1 }
 0x3aa   : > { %v10406_v11 = vadd.f32 %v8311_v9, %v10401_v50 }
 0x3ab   : > { %v1837_v14 = vpop.f32.mrf.mxu1 }
 0x3ac   : > { %v10409_v16 = vadd.f32 %v1837_v14, %v10403_v10  ;;  %v1875_v17 = vsel %vm1868_vm1, %v10406_v11, -inf }
 0x3ad   : > { %v8312_v19 = vpop.f32.mrf.mxu1  ;;  %1876 = vmax.xlane.f32.xlu0 %v1875_v17 }
 0x3ae   : > { %v10418_v53 = vadd.f32 %v8312_v19, %v10413_v18  ;;  %v1869_v29 = vsel %vm1868_vm1, %v10409_v16, -inf }
 0x3af   : > { %v1840_v23 = vpop.f32.mrf.mxu1 }
 0x3b0   : > { %v10421_v54 = vadd.f32 %v1840_v23, %v10415_v22  ;;  %v1878_v32 = vsel %vm1868_vm1, %v10418_v53, -inf }
 0x3b1   : > { %v8315_v26 = vpop.f32.mrf.mxu1  ;;  %1870 = vmax.xlane.f32.xlu0 %v1869_v29 }
 0x3b2   : > { %v1872_v27 = vsel %vm1868_vm1, %v10421_v54, -inf  ;;  %v10432_v31 = vadd.f32 %v8315_v26, %v10425_v24 }
 0x3b3   : > { %v1853_v30 = vpop.f32.mrf.mxu1  ;;  %1873 = vmax.xlane.f32.xlu1 %v1872_v27 }
 0x3b4   : > { %v10444_v39 = vadd.f32 %v1853_v30, %v10436_v42  ;;  %v1887_v41 = vsel %vm1868_vm1, %v10432_v31, -inf }
 0x3b5   : > { %v8316_v35 = vpop.f32.mrf.mxu1  ;;  %1879 = vmax.xlane.f32.xlu0 %v1878_v32 }
 0x3b6   : > { %v10441_v57 = vadd.f32 %v8316_v35, %v10429_v33  ;;  %v1881_v44 = vsel %vm1868_vm1, %v10444_v39, -inf }
 0x3b7   : > { %v1856_v38 = vpop.f32.mrf.mxu1 }
 0x3b8   : > { %v10447_v40 = vadd.f32 %v1856_v38, %v10438_v48  ;;  %v1890_v13 = vsel %vm1868_vm1, %v10441_v57, -inf }
 0x3b9   : > { %1891 = vmax.xlane.f32.xlu1 %v1890_v13  ;;  %1888 = vmax.xlane.f32.xlu0 %v1887_v41 }
 0x3ba   : > { %v1884_v63 = vsel %vm1868_vm1, %v10447_v40, -inf }
 0x3bd   : > { %1885 = vmax.xlane.f32.xlu1 %v1884_v63  ;;  %1882 = vmax.xlane.f32.xlu0 %v1881_v44 }
 0x3e2   : > { %v10457_v47 = vpop.permute.xlu0 %2386 }
 0x3e6   : > { %v10459_v12 = vpop.permute.xlu0 %2384 }
 0x3eb   : > { %v10461_v51 = vpop.permute.xlu0 %2390 }
 0x3ec   : > { %8349 = vmatprep.subr.bf16.mxu1 %v10461_v51 }
 0x41d   : > { %v8343_v52 = vpop.f32.mrf.mxu0 }
 0x41e   : > { %v10465_v55 = vadd.f32 %v8343_v52, %v10401_v50 }
 0x41f   : > { %v2241_v56 = vpop.f32.mrf.mxu0 }
 0x420   : > { %v10468_v28 = vadd.f32 %v2241_v56, %v10403_v10  ;;  %v2278_v15 = vsel %vm1868_vm1, %v10465_v55, -inf }
 0x421   : > { %2279 = vmax.xlane.f32.xlu0 %v2278_v15  ;;  %v8344_v58 = vpop.f32.mrf.mxu0 }
 0x422   : > { %v10473_v36 = vadd.f32 %v8344_v58, %v10413_v18  ;;  %v2272_v34 = vsel %vm1868_vm1, %v10468_v28, -inf  ;;  %v10544_v58 = vpop.permute.xlu0 %2817 }
 0x423   : > { %v2244_v46 = vpop.f32.mrf.mxu0 }
 0x424   : > { %v10476_v59 = vadd.f32 %v2244_v46, %v10415_v22  ;;  %v2281_v25 = vsel %vm1868_vm1, %v10473_v36, -inf }
 0x425   : > { %2282 = vmax.xlane.f32.xlu1 %v2281_v25  ;;  %2273 = vmax.xlane.f32.xlu0 %v2272_v34  ;;  %v8347_v37 = vpop.f32.mrf.mxu0  ;;  %v8816_v34 = vld [vmem:[#allocation4] sm:$0xff]  }
 0x426   : > { %v10483_v60 = vadd.f32 %v8347_v37, %v10425_v24  ;;  %v2275_v61 = vsel %vm1868_vm1, %v10476_v59, -inf  ;;  %v8817_v37 = vld [vmem:[#allocation4 + $0x8] sm:$0xff]  }
 0x427   : > { %v2257_v45 = vpop.f32.mrf.mxu0 }
 0x428   : > { %v10486_v20 = vadd.f32 %v2257_v45, %v10436_v42  ;;  %v2290_v62 = vsel %vm1868_vm1, %v10483_v60, -inf  ;;  %v10546_v45 = vpop.permute.xlu1 %2388 }
 0x429   : > { %2276 = vmax.xlane.f32.xlu1 %v2275_v61  ;;  %2291 = vmax.xlane.f32.xlu0 %v2290_v62  ;;  %v8348_v0 = vpop.f32.mrf.mxu0 }
 0x42a   : > { %v10493_v1 = vadd.f32 %v8348_v0, %v10429_v33  ;;  %v2284_v4 = vsel %vm1868_vm1, %v10486_v20, -inf }
 0x42b   : > { %v2260_v2 = vpop.f32.mrf.mxu0 }
 0x42c   : > { %v10496_v3 = vadd.f32 %v2260_v2, %v10438_v48  ;;  %v2293_v43 = vsel %vm1868_vm1, %v10493_v1, -inf  ;;  %v10550_v62 = vpop.permute.xlu1 %2815 }
 0x42d   : > { %2294 = vmax.xlane.f32.xlu1 %v2293_v43  ;;  %2285 = vmax.xlane.f32.xlu0 %v2284_v4 }
 0x42e   : > { %v2287_v5 = vsel %vm1868_vm1, %v10496_v3, -inf }
 0x431   : > { %2288 = vmax.xlane.f32.xlu1 %v2287_v5 }
 0x436   : > { %v1877_v46 = vpop.xlane.xlu0 %1876 }
 0x437   : > { %v1895_v0 = vsub.f32 %v10406_v11, %v1877_v46 }
 0x439   : > { %v1905_v5 = vmul.f32 1.442695, %v1895_v0 }
 0x43a   : > { %v1871_v25 = vpop.xlane.xlu0 %1870 }
 0x43b   : > { %v1893_v2 = vsub.f32 %v10409_v16, %v1871_v25  ;;  %8998 = vpow2.f32 %v1905_v5 }
 0x43c   : > { %v1874_v43 = vpop.xlane.xlu1 %1873 }
 0x43d   : > { %v8375_v6 = vpop.f32.mrf.mxu0 }
 0x43e   : > { %v10505_v21 = vadd.f32 %v8375_v6, %v10401_v50  ;;  %v1880_v61 = vpop.xlane.xlu0 %1879 }
 0x43f   : > { %v2668_v7 = vpop.f32.mrf.mxu0  ;;  %v1896_v6 = vsub.f32 %v10418_v53, %v1880_v61 }
 0x440   : > { %v10508_v8 = vadd.f32 %v2668_v7, %v10403_v10  ;;  %v2705_v49 = vsel %vm1868_vm1, %v10505_v21, -inf  ;;  %v1901_v7 = vmul.f32 1.442695, %v1893_v2 }
 0x441   : > { %2706 = vmax.xlane.f32.xlu0 %v2705_v49  ;;  %v8376_v9 = vpop.f32.mrf.mxu0  ;;  %v1894_v49 = vsub.f32 %v10421_v54, %v1874_v43 }
 0x442   : > { %v10513_v14 = vadd.f32 %v8376_v9, %v10413_v18  ;;  %v2699_v29 = vsel %vm1868_vm1, %v10508_v8, -inf  ;;  %v1889_v4 = vpop.xlane.xlu0 %1888  ;;  %v1892_v9 = vpop.xlane.xlu1 %1891  ;;  %9000 = vpow2.f32 %v1901_v7 }
 0x443   : > { %v2671_v17 = vpop.f32.mrf.mxu0  ;;  %v1900_v11 = vsub.f32 %v10441_v57, %v1892_v9 }
 0x444   : > { %v10516_v19 = vadd.f32 %v2671_v17, %v10415_v22  ;;  %v2708_v23 = vsel %vm1868_vm1, %v10513_v14, -inf  ;;  %v1907_v17 = vmul.f32 1.442695, %v1896_v6 }
 0x445   : > { %2709 = vmax.xlane.f32.xlu1 %v2708_v23  ;;  %2700 = vmax.xlane.f32.xlu0 %v2699_v29  ;;  %v8379_v26 = vpop.f32.mrf.mxu0  ;;  %v1899_v23 = vsub.f32 %v10432_v31, %v1889_v4  ;;  %v1915_v53 = vmul.f32 1.442695, %v1900_v11 }
 0x446   : > { %v10523_v27 = vadd.f32 %v8379_v26, %v10425_v24  ;;  %v2702_v35 = vsel %vm1868_vm1, %v10516_v19, -inf  ;;  %v1883_v29 = vpop.xlane.xlu0 %1882  ;;  %v1903_v26 = vmul.f32 1.442695, %v1894_v49  ;;  %9002 = vpow2.f32 %v1907_v17 }
 0x447   : > { %v2684_v30 = vpop.f32.mrf.mxu0  ;;  %v1913_v16 = vmul.f32 1.442695, %v1899_v23 }
 0x448   : > { %v10526_v32 = vadd.f32 %v2684_v30, %v10436_v42  ;;  %v2717_v38 = vsel %vm1868_vm1, %v10523_v27, -inf  ;;  %v1897_v30 = vsub.f32 %v10444_v39, %v1883_v29  ;;  %9004 = vpow2.f32 %v1903_v26  ;;  %v10560_v31 = vpop.eup %8998 }
 0x449   : > { %2703 = vmax.xlane.f32.xlu1 %v2702_v35  ;;  %2718 = vmax.xlane.f32.xlu0 %v2717_v38  ;;  %v8380_v13 = vpop.f32.mrf.mxu0  ;;  %v1886_v35 = vpop.xlane.xlu1 %1885  ;;  %9006 = vpow2.f32 %v1913_v16  ;;  %v1923_v57 = vsel %vm1868_vm1, %v10560_v31, 0.0 }
 0x44a   : > { %v10533_v41 = vadd.f32 %v8380_v13, %v10429_v33  ;;  %v2711_v56 = vsel %vm1868_vm1, %v10526_v32, -inf  ;;  %v1898_v54 = vsub.f32 %v10447_v40, %v1886_v35  ;;  %v1909_v38 = vmul.f32 1.442695, %v1897_v30 }
 0x44b   : > { %v2687_v63 = vpop.f32.mrf.mxu0  ;;  %9008 = vpow2.f32 %v1915_v53 }
 0x44c   : > { %v10536_v44 = vadd.f32 %v2687_v63, %v10438_v48  ;;  %v2720_v52 = vsel %vm1868_vm1, %v10533_v41, -inf  ;;  %v1911_v13 = vmul.f32 1.442695, %v1898_v54  ;;  %9010 = vpow2.f32 %v1909_v38 }
 0x44d   : > { %2721 = vmax.xlane.f32.xlu1 %v2720_v52  ;;  %2712 = vmax.xlane.f32.xlu0 %v2711_v56 }
 0x44e   : > { %v2714_v15 = vsel %vm1868_vm1, %v10536_v44, -inf  ;;  %9012 = vpow2.f32 %v1911_v13 }
 0x44f   : > { %v10562_v63 = vpop.eup %9000 }
 0x450   : > { %v1917_v40 = vsel %vm1868_vm1, %v10562_v63, 0.0 }
 0x451   : > { %2715 = vmax.xlane.f32.xlu1 %v2714_v15 }
 0x453   : > { %v10566_v52 = vpop.eup %9002 }
 0x454   : > { %v1926_v56 = vsel %vm1868_vm1, %v10566_v52, 0.0 }
 0x455   : > { %v10568_v39 = vpop.eup %9004 }
 0x456   : > { %v10574_v15 = vpop.eup %9006  ;;  %v1920_v25 = vsel %vm1868_vm1, %v10568_v39, 0.0 }
 0x458   : > { %v10576_v46 = vpop.eup %9008 }
 0x459   : > { %v1938_v61 = vsel %vm1868_vm1, %v10576_v46, 0.0 }
 0x462   : > { %2811 = vrot.lane.b32.xlu1 %v8816_v34, %s9752_s18  ;;  %v1935_v34 = vsel %vm1868_vm1, %v10574_v15, 0.0 }
 0x463   : > { %2813 = vrot.lane.b32.xlu0 %v8817_v37, %s9752_s18  ;;  %v10582_v37 = vpop.eup %9010 }
 0x464   : > { %v1929_v0 = vsel %vm1868_vm1, %v10582_v37, 0.0  ;;  %v10588_v2 = vpop.eup %9012 }
 0x465   : > { %v1932_v43 = vsel %vm1868_vm1, %v10588_v2, 0.0 }
 0x482   : > { %1924 = vadd.xlane.f32.xlu0 %v1923_v57 }
 0x486   : > { %1918 = vadd.xlane.f32.xlu0 %v1917_v40  ;;  %1927 = vadd.xlane.f32.xlu1 %v1926_v56 }
 0x48a   : > { %1921 = vadd.xlane.f32.xlu1 %v1920_v25  ;;  %1936 = vadd.xlane.f32.xlu0 %v1935_v34 }
 0x48e   : > { %1939 = vadd.xlane.f32.xlu1 %v1938_v61  ;;  %1930 = vadd.xlane.f32.xlu0 %v1929_v0 }
 0x492   : > { %1933 = vadd.xlane.f32.xlu1 %v1932_v43 }
 0x4aa   : > { %v2280_v4 = vpop.xlane.xlu0 %2279 }
 0x4ab   : > { %v2298_v5 = vsub.f32 %v10465_v55, %v2280_v4 }
 0x4ad   : > { %v2308_v6 = vmul.f32 1.442695, %v2298_v5 }
 0x4ae   : > { %v2283_v7 = vpop.xlane.xlu1 %2282  ;;  %v2274_v49 = vpop.xlane.xlu0 %2273 }
 0x4af   : > { %9014 = vpow2.f32 %v2308_v6  ;;  %v2299_v9 = vsub.f32 %v10473_v36, %v2283_v7  ;;  %v2296_v17 = vsub.f32 %v10468_v28, %v2274_v49 }
 0x4b1   : > { %v2310_v23 = vmul.f32 1.442695, %v2299_v9  ;;  %v2304_v29 = vmul.f32 1.442695, %v2296_v17 }
 0x4b2   : > { %v2277_v26 = vpop.xlane.xlu1 %2276  ;;  %v2292_v11 = vpop.xlane.xlu0 %2291 }
 0x4b3   : > { %9016 = vpow2.f32 %v2310_v23  ;;  %v2297_v16 = vsub.f32 %v10476_v59, %v2277_v26  ;;  %v2302_v30 = vsub.f32 %v10483_v60, %v2292_v11 }
 0x4b4   : > { %9018 = vpow2.f32 %v2304_v29 }
 0x4b5   : > { %v2306_v35 = vmul.f32 1.442695, %v2297_v16  ;;  %v2316_v55 = vmul.f32 1.442695, %v2302_v30 }
 0x4b6   : > { %v2295_v53 = vpop.xlane.xlu1 %2294  ;;  %v2286_v54 = vpop.xlane.xlu0 %2285 }
 0x4b7   : > { %9020 = vpow2.f32 %v2306_v35  ;;  %v2303_v38 = vsub.f32 %v10493_v1, %v2295_v53  ;;  %v2300_v36 = vsub.f32 %v10486_v20, %v2286_v54 }
 0x4b8   : > { %9022 = vpow2.f32 %v2316_v55 }
 0x4b9   : > { %v2318_v28 = vmul.f32 1.442695, %v2303_v38  ;;  %v2312_v13 = vmul.f32 1.442695, %v2300_v36 }
 0x4ba   : > { %v2289_v57 = vpop.xlane.xlu1 %2288 }
 0x4bb   : > { %9024 = vpow2.f32 %v2318_v28  ;;  %v2301_v40 = vsub.f32 %v10496_v3, %v2289_v57 }
 0x4bc   : > { %v10600_v59 = vpop.eup %9014  ;;  %9026 = vpow2.f32 %v2312_v13 }
 0x4bd   : > { %v2314_v60 = vmul.f32 1.442695, %v2301_v40  ;;  %v2326_v56 = vsel %vm1868_vm1, %v10600_v59, 0.0 }
 0x4be   : > { %2327 = vadd.xlane.f32.xlu0 %v2326_v56 }
 0x4bf   : > { %9028 = vpow2.f32 %v2314_v60 }
 0x4c0   : > { %v10604_v25 = vpop.eup %9016 }
 0x4c1   : > { %v10606_v1 = vpop.eup %9018  ;;  %v2329_v20 = vsel %vm1868_vm1, %v10604_v25, 0.0 }
 0x4c2   : > { %2330 = vadd.xlane.f32.xlu1 %v2329_v20  ;;  %v2320_v3 = vsel %vm1868_vm1, %v10606_v1, 0.0 }
 0x4c3   : > { %2321 = vadd.xlane.f32.xlu0 %v2320_v3 }
 0x4c4   : > { %v10612_v34 = vpop.eup %9020 }
 0x4c5   : > { %v10614_v61 = vpop.eup %9022  ;;  %v2323_v0 = vsel %vm1868_vm1, %v10612_v34, 0.0 }
 0x4c6   : > { %2324 = vadd.xlane.f32.xlu1 %v2323_v0  ;;  %v2338_v43 = vsel %vm1868_vm1, %v10614_v61, 0.0 }
 0x4c7   : > { %2339 = vadd.xlane.f32.xlu0 %v2338_v43 }
 0x4c8   : > { %v10620_v4 = vpop.eup %9024 }
 0x4c9   : > { %v10622_v5 = vpop.eup %9026  ;;  %v2341_v6 = vsel %vm1868_vm1, %v10620_v4, 0.0 }
 0x4ca   : > { %2342 = vadd.xlane.f32.xlu1 %v2341_v6  ;;  %v2332_v7 = vsel %vm1868_vm1, %v10622_v5, 0.0  ;;  %v2707_v49 = vpop.xlane.xlu0 %2706 }
 0x4cb   : > { %2333 = vadd.xlane.f32.xlu0 %v2332_v7  ;;  %v2725_v9 = vsub.f32 %v10505_v21, %v2707_v49 }
 0x4cc   : > { %v10629_v17 = vpop.eup %9028 }
 0x4cd   : > { %v2735_v23 = vmul.f32 1.442695, %v2725_v9  ;;  %v2335_v29 = vsel %vm1868_vm1, %v10629_v17, 0.0 }
 0x4ce   : > { %v2710_v26 = vpop.xlane.xlu1 %2709  ;;  %2336 = vadd.xlane.f32.xlu1 %v2335_v29  ;;  %v2701_v11 = vpop.xlane.xlu0 %2700 }
 0x4cf   : > { %9030 = vpow2.f32 %v2735_v23  ;;  %v2726_v16 = vsub.f32 %v10513_v14, %v2710_v26  ;;  %v2723_v30 = vsub.f32 %v10508_v8, %v2701_v11 }
 0x4d1   : > { %v2731_v35 = vmul.f32 1.442695, %v2723_v30  ;;  %v2737_v55 = vmul.f32 1.442695, %v2726_v16  ;;  %v8818_v30 = vld [vmem:[#allocation3 + $0x10] sm:$0xff]  }
 0x4d2   : > { %v2704_v53 = vpop.xlane.xlu1 %2703  ;;  %v2719_v54 = vpop.xlane.xlu0 %2718 }
 0x4d3   : > { %v2724_v21 = vsub.f32 %v10516_v19, %v2704_v53  ;;  %v2729_v38 = vsub.f32 %v10523_v27, %v2719_v54  ;;  %9032 = vpow2.f32 %v2731_v35  ;;  %v8819_v35 = vld [vmem:[#allocation3 + $0x8] sm:$0xff]   ;;  %v8821_v53 = vld [vmem:[#allocation3] sm:$0xff]  }
 0x4d4   : > { %9034 = vpow2.f32 %v2737_v55  ;;  %v8820_v55 = vld [vmem:[#allocation3 + $0x18] sm:$0xff]  }
 0x4d5   : > { %v2743_v36 = vmul.f32 1.442695, %v2729_v38  ;;  %v2733_v28 = vmul.f32 1.442695, %v2724_v21  ;;  %v8822_v21 = vld [vmem:[#allocation2] sm:$0xff]   ;;  %v8823_v38 = vld [vmem:[#allocation2 + $0x8] sm:$0xff]  }
 0x4d6   : > { %v2722_v13 = vpop.xlane.xlu1 %2721  ;;  %v2713_v57 = vpop.xlane.xlu0 %2712 }
 0x4d7   : > { %v2730_v40 = vsub.f32 %v10533_v41, %v2722_v13  ;;  %v2727_v14 = vsub.f32 %v10526_v32, %v2713_v57  ;;  %9036 = vpow2.f32 %v2743_v36  ;;  %v8824_v13 = vld [vmem:[#allocation2 + $0x10] sm:$0xff]   ;;  %v8825_v57 = vld [vmem:[#allocation2 + $0x18] sm:$0xff]  }
 0x4d8   : > { %9038 = vpow2.f32 %v2733_v28 }
 0x4d9   : > { %v2745_v8 = vmul.f32 1.442695, %v2730_v40  ;;  %v2739_v60 = vmul.f32 1.442695, %v2727_v14 }
 0x4da   : > { %v2716_v56 = vpop.xlane.xlu1 %2715  ;;  %v10675_v54 = vpop.permute.xlu0 %2813 }
 0x4db   : > { %9040 = vpow2.f32 %v2745_v8  ;;  %v2728_v19 = vsub.f32 %v10536_v44, %v2716_v56 }
 0x4dc   : > { %v10640_v20 = vpop.eup %9030  ;;  %9042 = vpow2.f32 %v2739_v60 }
 0x4dd   : > { %v2741_v27 = vmul.f32 1.442695, %v2728_v19  ;;  %v2753_v3 = vsel %vm1868_vm1, %v10640_v20, 0.0 }
 0x4de   : > { %2754 = vadd.xlane.f32.xlu1 %v2753_v3  ;;  %v10679_v36 = vpop.permute.xlu1 %2811 }
 0x4df   : > { %9044 = vpow2.f32 %v2741_v27 }
 0x4e0   : > { %v10644_v41 = vpop.eup %9032 }
 0x4e1   : > { %v2747_v32 = vsel %vm1868_vm1, %v10644_v41, 0.0  ;;  %v10648_v0 = vpop.eup %9034 }
 0x4e2   : > { %2748 = vadd.xlane.f32.xlu1 %v2747_v32  ;;  %v2756_v44 = vsel %vm1868_vm1, %v10648_v0, 0.0 }
 0x4e4   : > { %v10650_v43 = vpop.eup %9036 }
 0x4e5   : > { %v2765_v6 = vsel %vm1868_vm1, %v10650_v43, 0.0  ;;  %v10656_v7 = vpop.eup %9038 }
 0x4e6   : > { %2757 = vadd.xlane.f32.xlu1 %v2756_v44  ;;  %2766 = vadd.xlane.f32.xlu0 %v2765_v6  ;;  %v2750_v23 = vsel %vm1868_vm1, %v10656_v7, 0.0  ;;  %v10684_v6 = vpop.f32.mrf.mxu0 }
 0x4e8   : > { %v10658_v49 = vpop.eup %9040 }
 0x4e9   : > { %v2768_v9 = vsel %vm1868_vm1, %v10658_v49, 0.0  ;;  %v10664_v29 = vpop.eup %9042 }
 0x4ea   : > { %2751 = vadd.xlane.f32.xlu1 %v2750_v23  ;;  %2769 = vadd.xlane.f32.xlu0 %v2768_v9  ;;  %v2759_v16 = vsel %vm1868_vm1, %v10664_v29, 0.0 }
 0x4ec   : > { %v10666_v26 = vpop.eup %9044 }
 0x4ed   : > { %v2762_v11 = vsel %vm1868_vm1, %v10666_v26, 0.0 }
 0x4ee   : > { %2763 = vadd.xlane.f32.xlu0 %v2762_v11  ;;  %2760 = vadd.xlane.f32.xlu1 %v2759_v16 }
 0x4ff   : > { %3033 = vrot.lane.b32.xlu1 %v8818_v30, %s9753_s8 }
 0x503   : > { %3031 = vrot.lane.b32.xlu1 %v8819_v35, %s9753_s8  ;;  %v3506_v35 = vpop.f32.mrf.mxu0 }
 0x504   : > { %3035 = vrot.lane.b32.xlu0 %v8820_v55, %s9753_s8 }
 0x507   : > { %3029 = vrot.lane.b32.xlu1 %v8821_v53, %s9753_s8 }
 0x508   : > { %3001 = vrot.lane.b32.xlu0 %v8822_v21, %s9753_s8 }
 0x50b   : > { %v1925_v28 = vpop.xlane.xlu0 %1924  ;;  %3003 = vrot.lane.b32.xlu1 %v8823_v38, %s9753_s8 }
 0x50c   : > { %3005 = vrot.lane.b32.xlu0 %v8824_v13, %s9753_s8 }
 0x50f   : > { %v1928_v40 = vpop.xlane.xlu1 %1927  ;;  %v1919_v14 = vpop.xlane.xlu0 %1918  ;;  %3007 = vrot.lane.b32.xlu1 %v8825_v57, %s9753_s8 }
 0x510   : > { %9046 = vrcp.f32 %v1928_v40 }
 0x511   : > { %9048 = vrcp.f32 %v1919_v14 }
 0x512   : > { %9050 = vrcp.f32 %v1925_v28  ;;  %v10692_v28 = vadd.f32 %v3506_v35, %v10403_v10 }
 0x513   : > { %v1922_v8 = vpop.xlane.xlu1 %1921  ;;  %v1937_v60 = vpop.xlane.xlu0 %1936 }
 0x514   : > { %9052 = vrcp.f32 %v1922_v8  ;;  %v3537_v57 = vsel %vm1868_vm1, %v10692_v28, -inf }
 0x517   : > { %v1940_v56 = vpop.xlane.xlu1 %1939  ;;  %v1931_v19 = vpop.xlane.xlu0 %1930 }
 0x518   : > { %9054 = vrcp.f32 %v1940_v56 }
 0x519   : > { %9056 = vrcp.f32 %v1931_v19 }
 0x51a   : > { %9058 = vrcp.f32 %v1937_v60 }
 0x51b   : > { %v1934_v27 = vpop.xlane.xlu1 %1933 }
 0x51c   : > { %9060 = vrcp.f32 %v1934_v27 }
 0x51d   : > { %v9047_v3 = vpop.eup %9046 }
 0x51e   : > { %v9049_v32 = vpop.eup %9048  ;;  %v1952_v23 = vmul.f32 %v9047_v3, %v10566_v52 }
 0x51f   : > { %v9051_v44 = vpop.eup %9050  ;;  %v1949_v11 = vmul.f32 %v9049_v32, %v10562_v63 }
 0x520   : > { %v1951_v30 = vmul.f32 %v9051_v44, %v10560_v31 }
 0x521   : > { %v9053_v9 = vpop.eup %9052 }
 0x522   : > { %v1950_v16 = vmul.f32 %v9053_v9, %v10568_v39  ;;  %v1958_v53 = vpack.c.bf16 %v1952_v23, %v1951_v30 }
 0x524   : > { %v1957_v55 = vpack.c.bf16 %v1950_v16, %v1949_v11 }
 0x525   : > { %v9055_v21 = vpop.eup %9054 }
 0x526   : > { %8325 = vmatprep.mubr.msk.bf16.mxu1 %vm1868_vm1, %v1957_v55  ;;  %v9057_v38 = vpop.eup %9056  ;;  %v1956_v31 = vmul.f32 %v9055_v21, %v10576_v46 }
 0x527   : > { %8326 = vmatmul.mubr.msk.bf16.vlgmr.msra.gmra.mxu1 %vm1868_vm1, %v1958_v53  ;;  %v9059_v13 = vpop.eup %9058  ;;  %v1953_v52 = vmul.f32 %v9057_v38, %v10582_v37 }
 0x528   : > { %8350 = vmatpush3.bf16.msra.mxu1 %v10461_v51  ;;  %v1955_v40 = vmul.f32 %v9059_v13, %v10574_v15 }
 0x529   : > { %v9061_v63 = vpop.eup %9060  ;;  %8351 = vmatprep.subr.bf16.mxu1 %v10546_v45 }
 0x52a   : > { %v1954_v39 = vmul.f32 %v9061_v63, %v10588_v2  ;;  %v1960_v51 = vpack.c.bf16 %v1956_v31, %v1955_v40 }
 0x52b   : > { %3538 = vmax.xlane.f32.xlu0 %v3537_v57 }
 0x52c   : > { %8352 = vmatpush3.bf16.msra.mxu1 %v10546_v45  ;;  %v1959_v14 = vpack.c.bf16 %v1954_v39, %v1953_v52 }
 0x52d   : > { %8353 = vmatprep.subr.bf16.mxu1 %v10457_v47 }
 0x52e   : > { %8329 = vmatprep.mubr.msk.bf16.mxu1 %vm1868_vm1, %v1959_v14 }
 0x52f   : > { %8330 = vmatmul.mubr.msk.bf16.gmra.mxu1 %vm1868_vm1, %v1960_v51 }
 0x530   : > { %8354 = vmatpush3.bf16.msra.mxu1 %v10457_v47 }
 0x531   : > { %8355 = vmatprep.subr.bf16.mxu1 %v10459_v12 }
 0x534   : > { %8356 = vmatpush3.bf16.msra.mxu1 %v10459_v12 }
 0x535   : > { %8381 = vmatprep.subr.bf16.mxu1 %v10544_v58 }
 0x547   : > { %v2328_v15 = vpop.xlane.xlu0 %2327 }
 0x54b   : > { %v2331_v46 = vpop.xlane.xlu1 %2330 }
 0x54c   : > { %v2322_v37 = vpop.xlane.xlu0 %2321  ;;  %9062 = vrcp.f32 %v2331_v46 }
 0x54d   : > { %9064 = vrcp.f32 %v2322_v37 }
 0x54e   : > { %9066 = vrcp.f32 %v2328_v15 }
 0x54f   : > { %v2325_v45 = vpop.xlane.xlu1 %2324 }
 0x550   : > { %9068 = vrcp.f32 %v2325_v45  ;;  %v2340_v2 = vpop.xlane.xlu0 %2339 }
 0x553   : > { %v2343_v8 = vpop.xlane.xlu1 %2342 }
 0x554   : > { %v2334_v60 = vpop.xlane.xlu0 %2333  ;;  %9070 = vrcp.f32 %v2343_v8 }
 0x555   : > { %9072 = vrcp.f32 %v2334_v60 }
 0x556   : > { %9074 = vrcp.f32 %v2340_v2 }
 0x557   : > { %v2337_v47 = vpop.xlane.xlu1 %2336 }
 0x558   : > { %9076 = vrcp.f32 %v2337_v47 }
 0x559   : > { %v9063_v56 = vpop.eup %9062 }
 0x55a   : > { %v9065_v12 = vpop.eup %9064  ;;  %v2355_v3 = vmul.f32 %v9063_v56, %v10604_v25 }
 0x55b   : > { %v9067_v19 = vpop.eup %9066  ;;  %v2352_v32 = vmul.f32 %v9065_v12, %v10606_v1 }
 0x55c   : > { %v2354_v9 = vmul.f32 %v9067_v19, %v10600_v59 }
 0x55d   : > { %v9069_v27 = vpop.eup %9068 }
 0x55e   : > { %v2353_v44 = vmul.f32 %v9069_v27, %v10612_v34  ;;  %v2361_v11 = vpack.c.bf16 %v2355_v3, %v2354_v9 }
 0x560   : > { %v2360_v23 = vpack.c.bf16 %v2353_v44, %v2352_v32 }
 0x561   : > { %v9071_v16 = vpop.eup %9070 }
 0x562   : > { %8357 = vmatprep.mubr.msk.bf16.mxu1 %vm1868_vm1, %v2360_v23  ;;  %v9073_v30 = vpop.eup %9072  ;;  %v2359_v25 = vmul.f32 %v9071_v16, %v10620_v4 }
 0x563   : > { %8358 = vmatmul.mubr.msk.bf16.vlgmr.msra.gmra.mxu1 %vm1868_vm1, %v2361_v11  ;;  %v9075_v35 = vpop.eup %9074  ;;  %v2356_v1 = vmul.f32 %v9073_v30, %v10622_v5 }
 0x564   : > { %8382 = vmatpush3.bf16.msra.mxu1 %v10544_v58  ;;  %v2358_v53 = vmul.f32 %v9075_v35, %v10614_v61 }
 0x565   : > { %v9077_v55 = vpop.eup %9076  ;;  %8383 = vmatprep.subr.bf16.mxu1 %v10550_v62 }
 0x566   : > { %v2357_v59 = vmul.f32 %v9077_v55, %v10629_v17  ;;  %v2363_v38 = vpack.c.bf16 %v2359_v25, %v2358_v53 }
 0x567   : > { %v2755_v34 = vpop.xlane.xlu1 %2754 }
 0x568   : > { %8384 = vmatpush3.bf16.msra.mxu1 %v10550_v62  ;;  %v2362_v21 = vpack.c.bf16 %v2357_v59, %v2356_v1 }
 0x569   : > { %8385 = vmatprep.subr.bf16.mxu1 %v10675_v54 }
 0x56a   : > { %8361 = vmatprep.mubr.msk.bf16.mxu1 %vm1868_vm1, %v2362_v21 }
 0x56b   : > { %8362 = vmatmul.mubr.msk.bf16.gmra.mxu1 %vm1868_vm1, %v2363_v38  ;;  %v2749_v58 = vpop.xlane.xlu1 %2748 }
 0x56c   : > { %8386 = vmatpush3.bf16.msra.mxu1 %v10675_v54 }
 0x56d   : > { %8387 = vmatprep.subr.bf16.mxu1 %v10679_v36 }
 0x56f   : > { %v2758_v4 = vpop.xlane.xlu1 %2757  ;;  %v2767_v5 = vpop.xlane.xlu0 %2766 }
 0x570   : > { %8388 = vmatpush3.bf16.msra.mxu1 %v10679_v36  ;;  %9078 = vrcp.f32 %v2758_v4 }
 0x571   : > { %9080 = vrcp.f32 %v2749_v58 }
 0x572   : > { %9082 = vrcp.f32 %v2755_v34 }
 0x573   : > { %v2752_v62 = vpop.xlane.xlu1 %2751  ;;  %v2770_v61 = vpop.xlane.xlu0 %2769 }
 0x574   : > { %9084 = vrcp.f32 %v2752_v62 }
 0x575   : > { %9086 = vrcp.f32 %v2770_v61 }
 0x577   : > { %v2761_v17 = vpop.xlane.xlu1 %2760  ;;  %v2764_v13 = vpop.xlane.xlu0 %2763 }
 0x578   : > { %9088 = vrcp.f32 %v2761_v17 }
 0x579   : > { %9090 = vrcp.f32 %v2764_v13 }
 0x57a   : > { %9092 = vrcp.f32 %v2767_v5 }
 0x57b   : > { %v3036_v63 = vpop.permute.xlu0 %3035  ;;  %v3034_v60 = vpop.permute.xlu1 %3033 }
 0x57c   : > { %8601 = vmatprep.subr.msk.bf16.mxu1 %vm1778_vm0, %v3036_v63  ;;  %v3059_v8 = vsel %vm1778_vm0, %v3036_v63, 0  ;;  %v3056_v12 = vsel %vm1778_vm0, %v3034_v60, 0 }
 0x57d   : > { %v9079_v54 = vpop.eup %9078 }
 0x57e   : > { %v9081_v31 = vpop.eup %9080  ;;  %v2782_v39 = vmul.f32 %v9079_v54, %v10648_v0 }
 0x57f   : > { %v9083_v52 = vpop.eup %9082  ;;  %v2779_v57 = vmul.f32 %v9081_v31, %v10644_v41  ;;  %v3032_v19 = vpop.permute.xlu1 %3031 }
 0x580   : > { %v2781_v14 = vmul.f32 %v9083_v52, %v10640_v20 }
 0x581   : > { %v9085_v36 = vpop.eup %9084 }
 0x582   : > { %v2780_v40 = vmul.f32 %v9085_v36, %v10656_v7  ;;  %v9087_v51 = vpop.eup %9086  ;;  %v2788_v37 = vpack.c.bf16 %v2782_v39, %v2781_v14 }
 0x583   : > { %v2786_v7 = vmul.f32 %v9087_v51, %v10658_v49  ;;  %v3030_v27 = vpop.permute.xlu1 %3029 }
 0x584   : > { %v2787_v15 = vpack.c.bf16 %v2780_v40, %v2779_v57 }
 0x585   : > { %v9089_v46 = vpop.eup %9088 }
 0x586   : > { %v9091_v45 = vpop.eup %9090  ;;  %8389 = vmatprep.mubr.msk.bf16.mxu1 %vm1868_vm1, %v2787_v15  ;;  %v2783_v2 = vmul.f32 %v9089_v46, %v10664_v29  ;;  %v3002_v29 = vpop.permute.xlu0 %3001 }
 0x587   : > { %8390 = vmatmul.mubr.msk.bf16.vlgmr.msra.gmra.mxu1 %vm1868_vm1, %v2788_v37  ;;  %v2784_v0 = vmul.f32 %v9091_v45, %v10666_v26  ;;  %v9093_v41 = vpop.eup %9092  ;;  %v3053_v26 = vsel %vm1778_vm0, %v3032_v19, 0  ;;  %v3004_v49 = vpop.permute.xlu1 %3003 }
 0x588   : > { %8398 = vmatpush3.bf16.xpose.msra.mxu1 %v3059_v8  ;;  %v2785_v47 = vmul.f32 %v9093_v41, %v10650_v43  ;;  %v3050_v43 = vsel %vm1778_vm0, %v3030_v27, 0  ;;  %v8440_v8 = vpop.f32.mrf.mxu0 }
 0x589   : > { %8602 = vmatprep.subr.msk.bf16.mxu1 %vm1778_vm0, %v3034_v60  ;;  %v2789_v20 = vpack.c.bf16 %v2784_v0, %v2783_v2 }
 0x58a   : > { %v2790_v56 = vpack.c.bf16 %v2786_v7, %v2785_v47  ;;  %v3006_v3 = vpop.permute.xlu0 %3005  ;;  %v3509_v7 = vpop.f32.mrf.mxu0 }
 0x58b   : > { %8393 = vmatprep.mubr.msk.bf16.mxu1 %vm1868_vm1, %v2789_v20  ;;  %v3008_v32 = vpop.permute.xlu1 %3007 }
 0x58f   : > { %8394 = vmatmul.mubr.msk.bf16.gmra.mxu1 %vm1868_vm1, %v2790_v56 }
 0x590   : > { %8400 = vmatpush3.bf16.xpose.msra.mxu1 %v3056_v12  ;;  %8405 = vmatprep.mubr.msk.bf16.mxu1 %vm1778_vm0, %v3002_v29 }
 0x591   : > { %8603 = vmatprep.subr.msk.bf16.mxu1 %vm1778_vm0, %v3032_v19 }
 0x598   : > { %8402 = vmatpush3.bf16.xpose.msra.mxu1 %v3053_v26 }
 0x599   : > { %8604 = vmatprep.subr.msk.bf16.mxu1 %vm1778_vm0, %v3030_v27 }
 0x5a0   : > { %8404 = vmatpush3.bf16.xpose.msra.mxu1 %v3050_v43 }
 0x5a7   : > { %8406 = vmatmul.mubr.msk.bf16.vlgmr.msra.gmra.mxu1 %vm1778_vm0, %v3004_v49 }
 0x5a8   : > { %8409 = vmatprep.mubr.msk.bf16.mxu1 %vm1778_vm0, %v3006_v3 }
 0x5af   : > { %8410 = vmatmul.mubr.msk.bf16.gmra.mxu1 %vm1778_vm0, %v3008_v32 }
 0x5b4   : > { %v3539_v29 = vpop.xlane.xlu0 %3538 }
 0x5b5   : > { %v3561_v27 = vsub.f32 %v10692_v28, %v3539_v29 }
 0x5e7   : > { %v8327_v44 = vpop.f32.mrf.mxu1 }
 0x5e8   : > { %v7681_v9 = vpack.c.bf16 %v8327_v44, %v8327_v44 }
 0x5e9   : > { %v2031_v23 = vpop.f32.mrf.mxu1 }
 0x5ea   : > { %2097 = vst.msk [vmem:[#allocation5 + $0x8] sm:$0xf] %vm2094_vm2, %v7681_v9  ;;  %v7679_v11 = vpack.c.bf16 %v2031_v23, %v2031_v23  ;;  %v3569_v9 = vmul.f32 1.442695, %v3561_v27 }
 0x5eb   : > { %v8328_v16 = vpop.f32.mrf.mxu1 }
 0x5ec   : > { %2095 = vst.msk [vmem:[#allocation5] sm:$0xf] %vm2094_vm2, %v7679_v11  ;;  %v7682_v30 = vpack.c.bf16 %v8328_v16, %v8328_v16  ;;  %9094 = vpow2.f32 %v3569_v9 }
 0x5ed   : > { %v2034_v35 = vpop.f32.mrf.mxu1 }
 0x5ee   : > { %2098 = vst.msk [vmem:[#allocation5 + $0xc] sm:$0xf] %vm2094_vm2, %v7682_v30  ;;  %v7680_v55 = vpack.c.bf16 %v2034_v35, %v2034_v35 }
 0x5ef   : > { %v8331_v25 = vpop.f32.mrf.mxu1 }
 0x5f0   : > { %2096 = vst.msk [vmem:[#allocation5 + $0x4] sm:$0xf] %vm2094_vm2, %v7680_v55  ;;  %v7685_v1 = vpack.c.bf16 %v8331_v25, %v8331_v25  ;;  %v10853_v55 = vld [vmem:[#allocation9 + $0x20] sm:$0xff] }
 0x5f1   : > { %v2047_v59 = vpop.f32.mrf.mxu1 }
 0x5f2   : > { %2101 = vst.msk [vmem:[#allocation5 + $0x18] sm:$0xf] %vm2094_vm2, %v7685_v1  ;;  %v7683_v34 = vpack.c.bf16 %v2047_v59, %v2047_v59 }
 0x5f3   : > { %v8332_v53 = vpop.f32.mrf.mxu1 }
 0x5f4   : > { %2099 = vst.msk [vmem:[#allocation5 + $0x10] sm:$0xf] %vm2094_vm2, %v7683_v34  ;;  %v7686_v21 = vpack.c.bf16 %v8332_v53, %v8332_v53  ;;  %v10860_v34 = vld [vmem:[#allocation9 + $0x30] sm:$0xff] }
 0x5f5   : > { %v2050_v38 = vpop.f32.mrf.mxu1 }
 0x5f6   : > { %2102 = vst.msk [vmem:[#allocation5 + $0x1c] sm:$0xf] %vm2094_vm2, %v7686_v21  ;;  %v7684_v58 = vpack.c.bf16 %v2050_v38, %v2050_v38  ;;  %v10865_v21 = vld [vmem:[#allocation9 + $0x28] sm:$0xff] }
 0x5f8   : > { %2100 = vst.msk [vmem:[#allocation5 + $0x14] sm:$0xf] %vm2094_vm2, %v7684_v58 }
 0x623   : > { %v10762_v4 = vpop.f32.mrf.mxu1 }
 0x625   : > { %v10764_v5 = vpop.f32.mrf.mxu1 }
 0x627   : > { %v10766_v62 = vpop.f32.mrf.mxu1 }
 0x629   : > { %v10768_v61 = vpop.f32.mrf.mxu1 }
 0x62b   : > { %v10770_v17 = vpop.f32.mrf.mxu1 }
 0x62d   : > { %v10772_v13 = vpop.f32.mrf.mxu1 }
 0x62f   : > { %v10774_v63 = vpop.f32.mrf.mxu1 }
 0x631   : > { %v10776_v54 = vpop.f32.mrf.mxu1 }
 0x647   : > { %v10778_v31 = vpop.f32.mrf.mxu1 }
 0x649   : > { %v10780_v52 = vpop.f32.mrf.mxu1 }
 0x64b   : > { %v10782_v36 = vpop.f32.mrf.mxu1 }
 0x64d   : > { %v10784_v39 = vpop.f32.mrf.mxu1 }
 0x64f   : > { %v10786_v57 = vpop.f32.mrf.mxu1 }
 0x651   : > { %v10788_v40 = vpop.f32.mrf.mxu1 }
 0x653   : > { %v10790_v14 = vpop.f32.mrf.mxu1 }
 0x655   : > { %v10792_v51 = vpop.f32.mrf.mxu1 }
 0x667   : > { %v8407_v15 = vpop.f32.mrf.mxu1 }
 0x668   : > { %v10795_v46 = vadd.f32 %v8407_v15, %v10401_v50 }
 0x669   : > { %v3095_v37 = vpop.f32.mrf.mxu1 }
 0x66a   : > { %v10798_v45 = vadd.f32 %v3095_v37, %v10403_v10  ;;  %v3132_v2 = vsel %vm1868_vm1, %v10795_v46, -inf  ;;  %v10874_v37 = vld [vmem:[#allocation9 + $0x38] sm:$0xff] }
 0x66b   : > { %3133 = vmax.xlane.f32.xlu0 %v3132_v2  ;;  %v8408_v0 = vpop.f32.mrf.mxu1 }
 0x66c   : > { %v10803_v60 = vadd.f32 %v8408_v0, %v10413_v18  ;;  %v3126_v50 = vsel %vm1868_vm1, %v10798_v45, -inf }
 0x66d   : > { %v3098_v41 = vpop.f32.mrf.mxu1 }
 0x66e   : > { %v10806_v20 = vadd.f32 %v3098_v41, %v10415_v22  ;;  %v3135_v18 = vsel %vm1868_vm1, %v10803_v60, -inf  ;;  %v8443_v22 = vpop.f32.mrf.mxu0 }
 0x66f   : > { %3127 = vmax.xlane.f32.xlu0 %v3126_v50  ;;  %v8411_v10 = vpop.f32.mrf.mxu1  ;;  %v10863_v53 = vadd.f32 %v10860_v34, %v8443_v22  ;;  %v10885_v50 = vpop.eup %9094 }
 0x670   : > { %v3129_v47 = vsel %vm1868_vm1, %v10806_v20, -inf  ;;  %v10813_v12 = vadd.f32 %v8411_v10, %v10425_v24  ;;  %v3522_v44 = vpop.f32.mrf.mxu0  ;;  %v8826_v10 = vld [vmem:[#allocation4 + $0x18] sm:$0xff]  }
 0x671   : > { %3130 = vmax.xlane.f32.xlu1 %v3129_v47  ;;  %v3111_v56 = vpop.f32.mrf.mxu1  ;;  %v10856_v25 = vadd.f32 %v10853_v55, %v3522_v44  ;;  %v3555_v0 = vsel %vm1868_vm1, %v10863_v53, -inf }
 0x672   : > { %v10822_v49 = vadd.f32 %v3111_v56, %v10436_v42  ;;  %v3144_v24 = vsel %vm1868_vm1, %v10813_v12, -inf  ;;  %v10837_v42 = vld [vmem:[#allocation9 + $0x8] sm:$0xff]  ;;  %v8444_v16 = vpop.f32.mrf.mxu0 }
 0x673   : > { %3136 = vmax.xlane.f32.xlu0 %v3135_v18  ;;  %v8412_v19 = vpop.f32.mrf.mxu1  ;;  %v3549_v15 = vsel %vm1868_vm1, %v10856_v25, -inf  ;;  %v10877_v2 = vadd.f32 %v10874_v37, %v8444_v16 }
 0x674   : > { %v10818_v26 = vadd.f32 %v8412_v19, %v10429_v33  ;;  %v10831_v33 = vld [vmem:[#allocation9 + $0x10] sm:$0xff]  ;;  %v3138_v11 = vsel %vm1868_vm1, %v10822_v49, -inf  ;;  %v3525_v59 = vpop.f32.mrf.mxu0 }
 0x675   : > { %v3114_v43 = vpop.f32.mrf.mxu1  ;;  %v10835_v28 = vadd.f32 %v10831_v33, %v10684_v6  ;;  %v10848_v6 = vld [vmem:[#allocation9 + $0x18] sm:$0xff]  ;;  %v10868_v38 = vadd.f32 %v10865_v21, %v3525_v59  ;;  %v3558_v41 = vsel %vm1868_vm1, %v10877_v2, -inf }
 0x676   : > { %v10825_v3 = vadd.f32 %v3114_v43, %v10438_v48  ;;  %v3147_v32 = vsel %vm1868_vm1, %v10818_v26, -inf  ;;  %v10840_v48 = vadd.f32 %v10837_v42, %v3509_v7  ;;  %v10851_v35 = vadd.f32 %v10848_v6, %v8440_v8 }
 0x677   : > { %3145 = vmax.xlane.f32.xlu0 %v3144_v24  ;;  %3148 = vmax.xlane.f32.xlu1 %v3147_v32  ;;  %v3543_v30 = vsel %vm1868_vm1, %v10835_v28, -inf  ;;  %v3552_v8 = vsel %vm1868_vm1, %v10868_v38, -inf  ;;  %v3585_v7 = vsel %vm1868_vm1, %v10885_v50, 0.0 }
 0x678   : > { %v3141_v23 = vsel %vm1868_vm1, %v10825_v3, -inf  ;;  %v3540_v1 = vsel %vm1868_vm1, %v10840_v48, -inf  ;;  %v3546_v58 = vsel %vm1868_vm1, %v10851_v35, -inf }
 0x67b   : > { %3142 = vmax.xlane.f32.xlu1 %v3141_v23  ;;  %3139 = vmax.xlane.f32.xlu0 %v3138_v11 }
 0x67f   : > { %3541 = vmax.xlane.f32.xlu1 %v3540_v1  ;;  %3544 = vmax.xlane.f32.xlu0 %v3543_v30 }
 0x683   : > { %3547 = vmax.xlane.f32.xlu1 %v3546_v58  ;;  %3550 = vmax.xlane.f32.xlu0 %v3549_v15 }
 0x687   : > { %3553 = vmax.xlane.f32.xlu1 %v3552_v8  ;;  %3556 = vmax.xlane.f32.xlu0 %v3555_v0 }
 0x68b   : > { %3559 = vmax.xlane.f32.xlu1 %v3558_v41 }
 0x68f   : > { %3586 = vadd.xlane.f32.xlu1 %v3585_v7 }
 0x69d   : > { %3244 = vrot.lane.b32.xlu0 %v8826_v10, %s9753_s8 }
 0x6f4   : > { %v3134_v47 = vpop.xlane.xlu0 %3133 }
 0x6f5   : > { %v3152_v56 = vsub.f32 %v10795_v46, %v3134_v47 }
 0x6f7   : > { %v3162_v29 = vmul.f32 1.442695, %v3152_v56 }
 0x6f8   : > { %v3128_v18 = vpop.xlane.xlu0 %3127 }
 0x6f9   : > { %9096 = vpow2.f32 %v3162_v29  ;;  %v3150_v22 = vsub.f32 %v10798_v45, %v3128_v18 }
 0x6fa   : > { %v3131_v27 = vpop.xlane.xlu1 %3130 }
 0x6fb   : > { %v3158_v19 = vmul.f32 1.442695, %v3150_v22  ;;  %v3151_v29 = vsub.f32 %v10806_v20, %v3131_v27 }
 0x6fc   : > { %v3137_v43 = vpop.xlane.xlu0 %3136 }
 0x6fd   : > { %9098 = vpow2.f32 %v3158_v19  ;;  %v3153_v47 = vsub.f32 %v10803_v60, %v3137_v43 }
 0x6ff   : > { %v3164_v18 = vmul.f32 1.442695, %v3153_v47 }
 0x700   : > { %v3149_v24 = vpop.xlane.xlu1 %3148  ;;  %v3146_v32 = vpop.xlane.xlu0 %3145 }
 0x701   : > { %v3156_v44 = vsub.f32 %v10813_v12, %v3146_v32  ;;  %v3157_v60 = vsub.f32 %v10818_v26, %v3149_v24 }
 0x703   : > { %v3170_v9 = vmul.f32 1.442695, %v3156_v44  ;;  %v3172_v27 = vmul.f32 1.442695, %v3157_v60 }
 0x704   : > { %v3143_v23 = vpop.xlane.xlu1 %3142  ;;  %v3140_v11 = vpop.xlane.xlu0 %3139 }
 0x705   : > { %v3154_v16 = vsub.f32 %v10822_v49, %v3140_v11  ;;  %9100 = vpow2.f32 %v3170_v9  ;;  %v3155_v44 = vsub.f32 %v10825_v3, %v3143_v23 }
 0x706   : > { %v10894_v30 = vpop.eup %9096 }
 0x707   : > { %v3166_v46 = vmul.f32 1.442695, %v3154_v16  ;;  %v3180_v45 = vsel %vm1868_vm1, %v10894_v30, 0.0  ;;  %v3168_v16 = vmul.f32 1.442695, %v3155_v44 }
 0x708   : > { %v3542_v1 = vpop.xlane.xlu1 %3541  ;;  %3181 = vadd.xlane.f32.xlu0 %v3180_v45  ;;  %v3545_v59 = vpop.xlane.xlu0 %3544 }
 0x709   : > { %v3562_v58 = vsub.f32 %v10840_v48, %v3542_v1  ;;  %v3563_v15 = vsub.f32 %v10835_v28, %v3545_v59  ;;  %9102 = vpow2.f32 %v3166_v46 }
 0x70a   : > { %v10900_v12 = vpop.eup %9098 }
 0x70b   : > { %v3571_v8 = vmul.f32 1.442695, %v3562_v58  ;;  %v3573_v0 = vmul.f32 1.442695, %v3563_v15  ;;  %v3174_v49 = vsel %vm1868_vm1, %v10900_v12, 0.0  ;;  %v8827_v58 = vld [vmem:[#allocation4 + $0x8] sm:$0xff]  }
 0x70c   : > { %v3548_v41 = vpop.xlane.xlu1 %3547  ;;  %3175 = vadd.xlane.f32.xlu0 %v3174_v49  ;;  %v3551_v7 = vpop.xlane.xlu0 %3550 }
 0x70d   : > { %9104 = vpow2.f32 %v3571_v8  ;;  %v3564_v10 = vsub.f32 %v10851_v35, %v3548_v41  ;;  %v3160_v35 = vmul.f32 1.442695, %v3151_v29 }
 0x70e   : > { %9106 = vpow2.f32 %v3573_v0  ;;  %v8828_v0 = vld [vmem:[#allocation4] sm:$0xff]  }
 0x70f   : > { %v3575_v48 = vmul.f32 1.442695, %v3564_v10  ;;  %v3565_v10 = vsub.f32 %v10856_v25, %v3551_v7 }
 0x710   : > { %v3557_v56 = vpop.xlane.xlu0 %3556  ;;  %v3554_v41 = vpop.xlane.xlu1 %3553 }
 0x711   : > { %9108 = vpow2.f32 %v3575_v48  ;;  %v3577_v47 = vmul.f32 1.442695, %v3565_v10  ;;  %v3567_v48 = vsub.f32 %v10863_v53, %v3557_v56 }
 0x712   : > { %v10906_v28 = vpop.eup %9100  ;;  %9110 = vpow2.f32 %v3164_v18 }
 0x713   : > { %v3192_v22 = vsel %vm1868_vm1, %v10906_v28, 0.0  ;;  %9112 = vpow2.f32 %v3160_v35  ;;  %v3581_v18 = vmul.f32 1.442695, %v3567_v48 }
 0x714   : > { %v3245_v19 = vpop.permute.xlu0 %3244  ;;  %3193 = vadd.xlane.f32.xlu0 %v3192_v22  ;;  %9114 = vpow2.f32 %v3172_v27  ;;  %v3560_v29 = vpop.xlane.xlu1 %3559 }
 0x715   : > { %8413 = vmatprep.subr.bf16.mxu1 %v3245_v19  ;;  %9116 = vpow2.f32 %v3168_v16  ;;  %v3568_v22 = vsub.f32 %v10877_v2, %v3560_v29  ;;  %v8831_v16 = vld [vmem:[#allocation2 + $0x20] sm:$0xff]  }
 0x716   : > { %8414 = vmatpush3.bf16.msra.mxu1 %v3245_v19  ;;  %v10911_v32 = vpop.eup %9102  ;;  %9118 = vpow2.f32 %v3577_v47  ;;  %v8829_v19 = vld [vmem:[#allocation4 + $0x10] sm:$0xff]  }
 0x717   : > { %v3186_v43 = vsel %vm1868_vm1, %v10911_v32, 0.0  ;;  %9120 = vpow2.f32 %v3581_v18  ;;  %v3583_v35 = vmul.f32 1.442695, %v3568_v22 }
 0x718   : > { %3187 = vadd.xlane.f32.xlu0 %v3186_v43  ;;  %v3566_v43 = vsub.f32 %v10868_v38, %v3554_v41 }
 0x719   : > { %9122 = vpow2.f32 %v3583_v35 }
 0x71a   : > { %v10916_v20 = vpop.eup %9104  ;;  %v3579_v53 = vmul.f32 1.442695, %v3566_v43 }
 0x71b   : > { %v3588_v9 = vsel %vm1868_vm1, %v10916_v20, 0.0  ;;  %v10921_v11 = vpop.eup %9106 }
 0x71c   : > { %3589 = vadd.xlane.f32.xlu1 %v3588_v9  ;;  %v3591_v26 = vsel %vm1868_vm1, %v10921_v11, 0.0  ;;  %9124 = vpow2.f32 %v3579_v53  ;;  %v8830_v9 = vld [vmem:[#allocation3 + $0x38] sm:$0xff]  }
 0x71e   : > { %v10925_v24 = vpop.eup %9108 }
 0x71f   : > { %v3594_v46 = vsel %vm1868_vm1, %v10925_v24, 0.0  ;;  %v10929_v45 = vpop.eup %9110 }
 0x720   : > { %3592 = vadd.xlane.f32.xlu1 %v3591_v26  ;;  %v3183_v3 = vsel %vm1868_vm1, %v10929_v45, 0.0  ;;  %v10933_v23 = vpop.eup %9112  ;;  %v8832_v26 = vld [vmem:[#allocation2 + $0x30] sm:$0xff]  }
 0x721   : > { %v3177_v1 = vsel %vm1868_vm1, %v10933_v23, 0.0  ;;  %v10937_v59 = vpop.eup %9114 }
 0x722   : > { %v3195_v15 = vsel %vm1868_vm1, %v10937_v59, 0.0  ;;  %v10942_v8 = vpop.eup %9116 }
 0x723   : > { %v3189_v49 = vsel %vm1868_vm1, %v10942_v8, 0.0  ;;  %v10951_v60 = vpop.eup %9118 }
 0x724   : > { %3595 = vadd.xlane.f32.xlu1 %v3594_v46  ;;  %v3597_v25 = vsel %vm1868_vm1, %v10951_v60, 0.0  ;;  %v10956_v7 = vpop.eup %9120  ;;  %v8833_v46 = vld [vmem:[#allocation3 + $0x30] sm:$0xff]  }
 0x725   : > { %v3603_v2 = vsel %vm1868_vm1, %v10956_v7, 0.0 }
 0x726   : > { %v10960_v56 = vpop.eup %9122 }
 0x727   : > { %v3606_v27 = vsel %vm1868_vm1, %v10960_v56, 0.0 }
 0x728   : > { %3184 = vadd.xlane.f32.xlu1 %v3183_v3  ;;  %v8834_v3 = vld [vmem:[#allocation3 + $0x28] sm:$0xff]  }
 0x729   : > { %v10964_v44 = vpop.eup %9124 }
 0x72a   : > { %v3600_v38 = vsel %vm1868_vm1, %v10964_v44, 0.0 }
 0x72c   : > { %3178 = vadd.xlane.f32.xlu1 %v3177_v1  ;;  %v8835_v1 = vld [vmem:[#allocation3 + $0x20] sm:$0xff]  }
 0x72e   : > { %3240 = vrot.lane.b32.xlu0 %v8827_v58, %s9753_s8  ;;  %v8836_v58 = vld [vmem:[#allocation2 + $0x28] sm:$0xff]  }
 0x730   : > { %3196 = vadd.xlane.f32.xlu1 %v3195_v15  ;;  %v8837_v15 = vld [vmem:[#allocation2 + $0x38] sm:$0xff]  }
 0x732   : > { %3238 = vrot.lane.b32.xlu0 %v8828_v0, %s9753_s8  ;;  %v3587_v0 = vpop.xlane.xlu1 %3586 }
 0x734   : > { %3190 = vadd.xlane.f32.xlu1 %v3189_v49 }
 0x745   : > { %3242 = vrot.lane.b32.xlu1 %v8829_v19, %s9753_s8 }
 0x751   : > { %3598 = vadd.xlane.f32.xlu0 %v3597_v25 }
 0x755   : > { %3604 = vadd.xlane.f32.xlu0 %v3603_v2 }
 0x759   : > { %3607 = vadd.xlane.f32.xlu0 %v3606_v27 }
 0x769   : > { %3601 = vadd.xlane.f32.xlu1 %v3600_v38 }
 0x76f   : > { %3848 = vrot.lane.b32.xlu0 %v8830_v9, %s9751_s10 }
 0x773   : > { %3814 = vrot.lane.b32.xlu0 %v8831_v16, %s9751_s10 }
 0x777   : > { %3818 = vrot.lane.b32.xlu0 %v8832_v26, %s9751_s10 }
 0x77a   : > { %3846 = vrot.lane.b32.xlu1 %v8833_v46, %s9751_s10 }
 0x77e   : > { %3844 = vrot.lane.b32.xlu1 %v8834_v3, %s9751_s10 }
 0x782   : > { %3842 = vrot.lane.b32.xlu1 %v8835_v1, %s9751_s10 }
 0x786   : > { %3816 = vrot.lane.b32.xlu1 %v8836_v58, %s9751_s10 }
 0x78a   : > { %3820 = vrot.lane.b32.xlu1 %v8837_v15, %s9751_s10 }
 0x791   : > { %v3182_v41 = vpop.xlane.xlu0 %3181 }
 0x795   : > { %v3176_v48 = vpop.xlane.xlu0 %3175 }
 0x796   : > { %9126 = vrcp.f32 %v3176_v48 }
 0x79d   : > { %v3194_v18 = vpop.xlane.xlu0 %3193 }
 0x7a1   : > { %v3188_v19 = vpop.xlane.xlu0 %3187 }
 0x7a3   : > { %v9127_v25 = vpop.eup %9126 }
 0x7a4   : > { %v3206_v38 = vmul.f32 %v9127_v25, %v10900_v12 }
 0x7a5   : > { %v3590_v49 = vpop.xlane.xlu1 %3589  ;;  %v3241_v53 = vpop.permute.xlu0 %3240 }
 0x7a9   : > { %v3593_v10 = vpop.xlane.xlu1 %3592  ;;  %v3239_v3 = vpop.permute.xlu0 %3238 }
 0x7ad   : > { %v3596_v47 = vpop.xlane.xlu1 %3595 }
 0x7b1   : > { %v3185_v29 = vpop.xlane.xlu1 %3184 }
 0x7b5   : > { %v3179_v22 = vpop.xlane.xlu1 %3178 }
 0x7b6   : > { %9128 = vrcp.f32 %v3179_v22 }
 0x7b7   : > { %9130 = vrcp.f32 %v3185_v29  ;;  %v8839_v29 = vld [vmem:[#allocation4 + $0x30] sm:$0xff]  }
 0x7b8   : > { %9132 = vrcp.f32 %v3182_v41 }
 0x7b9   : > { %v3197_v35 = vpop.xlane.xlu1 %3196  ;;  %9134 = vrcp.f32 %v3188_v19  ;;  %v8840_v19 = vld [vmem:[#allocation4 + $0x28] sm:$0xff]  }
 0x7bd   : > { %v3191_v43 = vpop.xlane.xlu1 %3190 }
 0x7be   : > { %9136 = vrcp.f32 %v3191_v43 }
 0x7bf   : > { %9138 = vrcp.f32 %v3197_v35 }
 0x7c0   : > { %9140 = vrcp.f32 %v3590_v49 }
 0x7c1   : > { %v3243_v2 = vpop.permute.xlu1 %3242  ;;  %9142 = vrcp.f32 %v3194_v18 }
 0x7c2   : > { %8415 = vmatprep.subr.bf16.mxu1 %v3243_v2  ;;  %9144 = vrcp.f32 %v3587_v0  ;;  %v8838_v0 = vld [vmem:[#allocation4 + $0x38] sm:$0xff]  }
 0x7c3   : > { %v9129_v27 = vpop.eup %9128  ;;  %8416 = vmatpush3.bf16.msra.mxu1 %v3243_v2  ;;  %9146 = vrcp.f32 %v3596_v47 }
 0x7c4   : > { %8417 = vmatprep.subr.bf16.mxu1 %v3241_v53  ;;  %v3207_v9 = vmul.f32 %v9129_v27, %v10933_v23  ;;  %v9131_v16 = vpop.eup %9130  ;;  %9148 = vrcp.f32 %v3593_v10 }
 0x7c5   : > { %v9133_v46 = vpop.eup %9132  ;;  %v3209_v1 = vmul.f32 %v9131_v16, %v10929_v45 }
 0x7c6   : > { %v3214_v26 = vpack.c.bf16 %v3207_v9, %v3206_v38  ;;  %v9135_v58 = vpop.eup %9134  ;;  %v3208_v15 = vmul.f32 %v9133_v46, %v10894_v30 }
 0x7c7   : > { %8418 = vmatpush3.bf16.msra.mxu1 %v3241_v53  ;;  %v3210_v23 = vmul.f32 %v9135_v58, %v10911_v32  ;;  %v8841_v53 = vld [vmem:[#allocation4 + $0x20] sm:$0xff]  }
 0x7c8   : > { %8419 = vmatprep.subr.bf16.mxu1 %v3239_v3  ;;  %8421 = vmatprep.mubr.msk.bf16.mxu1 %vm1868_vm1, %v3214_v26  ;;  %v3215_v12 = vpack.c.bf16 %v3209_v1, %v3208_v15 }
 0x7cb   : > { %v9137_v49 = vpop.eup %9136  ;;  %8420 = vmatpush3.bf16.msra.mxu1 %v3239_v3 }
 0x7cc   : > { %8445 = vmatprep.subr.bf16.mxu1 %v8838_v0  ;;  %v3211_v41 = vmul.f32 %v9137_v49, %v10942_v8  ;;  %v9139_v48 = vpop.eup %9138 }
 0x7cd   : > { %v9141_v47 = vpop.eup %9140  ;;  %v3213_v30 = vmul.f32 %v9139_v48, %v10937_v59 }
 0x7ce   : > { %8422 = vmatmul.mubr.msk.bf16.vlgmr.msra.gmra.mxu1 %vm1868_vm1, %v3215_v12  ;;  %v3216_v45 = vpack.c.bf16 %v3211_v41, %v3210_v23  ;;  %v9143_v18 = vpop.eup %9142  ;;  %v3618_v10 = vmul.f32 %v9141_v47, %v10916_v20 }
 0x7cf   : > { %8446 = vmatpush3.bf16.msra.mxu1 %v8838_v0  ;;  %v9145_v22 = vpop.eup %9144  ;;  %v3212_v32 = vmul.f32 %v9143_v18, %v10906_v28 }
 0x7d0   : > { %8425 = vmatprep.mubr.msk.bf16.mxu1 %vm1868_vm1, %v3216_v45  ;;  %8447 = vmatprep.subr.bf16.mxu1 %v8839_v29  ;;  %v3617_v8 = vmul.f32 %v9145_v22, %v10885_v50  ;;  %v9147_v43 = vpop.eup %9146 }
 0x7d1   : > { %v3217_v35 = vpack.c.bf16 %v3213_v30, %v3212_v32  ;;  %v9149_v2 = vpop.eup %9148  ;;  %v3620_v59 = vmul.f32 %v9147_v43, %v10925_v24 }
 0x7d2   : > { %v3625_v25 = vpack.c.bf16 %v3618_v10, %v3617_v8  ;;  %v3619_v20 = vmul.f32 %v9149_v2, %v10921_v11 }
 0x7d3   : > { %8448 = vmatpush3.bf16.msra.mxu1 %v8839_v29 }
 0x7d4   : > { %8449 = vmatprep.subr.bf16.mxu1 %v8840_v19  ;;  %v3626_v27 = vpack.c.bf16 %v3620_v59, %v3619_v20 }
 0x7d6   : > { %8426 = vmatmul.mubr.msk.bf16.gmra.mxu1 %vm1868_vm1, %v3217_v35 }
 0x7d7   : > { %8450 = vmatpush3.bf16.msra.mxu1 %v8840_v19  ;;  %8453 = vmatprep.mubr.msk.bf16.mxu1 %vm1868_vm1, %v3625_v25 }
 0x7d8   : > { %8451 = vmatprep.subr.bf16.mxu1 %v8841_v53 }
 0x7da   : > { %v3599_v28 = vpop.xlane.xlu0 %3598 }
 0x7db   : > { %8452 = vmatpush3.bf16.msra.mxu1 %v8841_v53 }
 0x7de   : > { %8454 = vmatmul.mubr.msk.bf16.vlgmr.msra.gmra.mxu1 %vm1868_vm1, %v3626_v27  ;;  %v3605_v50 = vpop.xlane.xlu0 %3604 }
 0x7e2   : > { %v3608_v38 = vpop.xlane.xlu0 %3607 }
 0x7e3   : > { %9150 = vrcp.f32 %v3608_v38 }
 0x7e4   : > { %9152 = vrcp.f32 %v3599_v28 }
 0x7e5   : > { %9154 = vrcp.f32 %v3605_v50 }
 0x7e6   : > { %v3849_v9 = vpop.permute.xlu0 %3848 }
 0x7e7   : > { %8609 = vmatprep.subr.msk.bf16.mxu1 %vm1778_vm0, %v3849_v9  ;;  %v3872_v16 = vsel %vm1778_vm0, %v3849_v9, 0 }
 0x7e8   : > { %8462 = vmatpush3.bf16.xpose.msra.mxu1 %v3872_v16 }
 0x7ea   : > { %v3815_v29 = vpop.permute.xlu0 %3814 }
 0x7ee   : > { %v3819_v22 = vpop.permute.xlu0 %3818 }
 0x7f0   : > { %v9151_v3 = vpop.eup %9150 }
 0x7f1   : > { %v9153_v1 = vpop.eup %9152  ;;  %v3624_v12 = vmul.f32 %v9151_v3, %v10960_v56 }
 0x7f2   : > { %v3602_v24 = vpop.xlane.xlu1 %3601  ;;  %v9155_v58 = vpop.eup %9154  ;;  %v3621_v23 = vmul.f32 %v9153_v1, %v10951_v60 }
 0x7f3   : > { %9156 = vrcp.f32 %v3602_v24  ;;  %v3623_v48 = vmul.f32 %v9155_v58, %v10956_v7  ;;  %v11036_v58 = vld [vmem:[#allocation9] sm:$0xff] }
 0x7f5   : > { %v3628_v45 = vpack.c.bf16 %v3624_v12, %v3623_v48 }
 0x7f6   : > { %v3847_v26 = vpop.permute.xlu1 %3846 }
 0x7f7   : > { %8610 = vmatprep.subr.msk.bf16.mxu1 %vm1778_vm0, %v3847_v26  ;;  %v3869_v11 = vsel %vm1778_vm0, %v3847_v26, 0 }
 0x7f8   : > { %8464 = vmatpush3.bf16.xpose.msra.mxu1 %v3869_v11 }
 0x7fa   : > { %v3845_v46 = vpop.permute.xlu1 %3844 }
 0x7fb   : > { %8611 = vmatprep.subr.msk.bf16.mxu1 %vm1778_vm0, %v3845_v46  ;;  %v3866_v15 = vsel %vm1778_vm0, %v3845_v46, 0 }
 0x7fe   : > { %v3843_v49 = vpop.permute.xlu1 %3842 }
 0x7ff   : > { %v3863_v18 = vsel %vm1778_vm0, %v3843_v49, 0 }
 0x800   : > { %v9157_v0 = vpop.eup %9156  ;;  %8466 = vmatpush3.bf16.xpose.msra.mxu1 %v3866_v15 }
 0x801   : > { %8612 = vmatprep.subr.msk.bf16.mxu1 %vm1778_vm0, %v3843_v49  ;;  %v3622_v41 = vmul.f32 %v9157_v0, %v10964_v44 }
 0x802   : > { %v3817_v56 = vpop.permute.xlu1 %3816 }
 0x803   : > { %v3627_v47 = vpack.c.bf16 %v3622_v41, %v3621_v23 }
 0x805   : > { %8457 = vmatprep.mubr.msk.bf16.mxu1 %vm1868_vm1, %v3627_v47 }
 0x806   : > { %8458 = vmatmul.mubr.msk.bf16.gmra.mxu1 %vm1868_vm1, %v3628_v45  ;;  %v3821_v60 = vpop.permute.xlu1 %3820 }
 0x807   : > { %8469 = vmatprep.mubr.msk.bf16.mxu1 %vm1778_vm0, %v3815_v29 }
 0x808   : > { %8468 = vmatpush3.bf16.xpose.msra.mxu1 %v3863_v18 }
 0x80f   : > { %8470 = vmatmul.mubr.msk.bf16.vlgmr.msra.gmra.mxu1 %vm1778_vm0, %v3817_v56 }
 0x810   : > { %8473 = vmatprep.mubr.msk.bf16.mxu1 %vm1778_vm0, %v3819_v22 }
 0x817   : > { %8474 = vmatmul.mubr.msk.bf16.gmra.mxu1 %vm1778_vm0, %v3821_v60 }
 0x88e   : > { %v11012_v7 = vpop.f32.mrf.mxu1 }
 0x890   : > { %v11014_v44 = vpop.f32.mrf.mxu1 }
 0x892   : > { %v11016_v30 = vpop.f32.mrf.mxu1 }
 0x894   : > { %v11018_v10 = vpop.f32.mrf.mxu1 }
 0x896   : > { %v11020_v19 = vpop.f32.mrf.mxu1 }
 0x898   : > { %v11022_v32 = vpop.f32.mrf.mxu1 }
 0x89a   : > { %v11024_v8 = vpop.f32.mrf.mxu1 }
 0x89c   : > { %v11026_v35 = vpop.f32.mrf.mxu1 }
 0x89e   : > { %v8455_v43 = vpop.f32.mrf.mxu1 }
 0x89f   : > { %v7713_v25 = vpack.c.bf16 %v8455_v43, %v8455_v43 }
 0x8a0   : > { %v3699_v53 = vpop.f32.mrf.mxu1 }
 0x8a1   : > { %3764 = vst.msk [vmem:[#allocation5 + $0x28] sm:$0xf] %vm2094_vm2, %v7713_v25  ;;  %v7711_v2 = vpack.c.bf16 %v3699_v53, %v3699_v53 }
 0x8a2   : > { %v8456_v59 = vpop.f32.mrf.mxu1 }
 0x8a3   : > { %3762 = vst.msk [vmem:[#allocation5 + $0x20] sm:$0xf] %vm2094_vm2, %v7711_v2  ;;  %v7714_v20 = vpack.c.bf16 %v8456_v59, %v8456_v59  ;;  %v8843_v59 = vld [vmem:[#allocation4 + $0x28] sm:$0xff]  }
 0x8a4   : > { %v3702_v28 = vpop.f32.mrf.mxu1 }
 0x8a5   : > { %3765 = vst.msk [vmem:[#allocation5 + $0x2c] sm:$0xf] %vm2094_vm2, %v7714_v20  ;;  %v7712_v27 = vpack.c.bf16 %v3702_v28, %v3702_v28  ;;  %v8845_v20 = vld [vmem:[#allocation4 + $0x20] sm:$0xff]  }
 0x8a7   : > { %3763 = vst.msk [vmem:[#allocation5 + $0x24] sm:$0xf] %vm2094_vm2, %v7712_v27 }
 0x8c6   : > { %v8459_v50 = vpop.f32.mrf.mxu1 }
 0x8c7   : > { %v7717_v38 = vpack.c.bf16 %v8459_v50, %v8459_v50 }
 0x8c8   : > { %v3715_v9 = vpop.f32.mrf.mxu1 }
 0x8c9   : > { %3768 = vst.msk [vmem:[#allocation5 + $0x38] sm:$0xf] %vm2094_vm2, %v7717_v38  ;;  %v7715_v16 = vpack.c.bf16 %v3715_v9, %v3715_v9 }
 0x8ca   : > { %v8460_v24 = vpop.f32.mrf.mxu1 }
 0x8cb   : > { %3766 = vst.msk [vmem:[#allocation5 + $0x30] sm:$0xf] %vm2094_vm2, %v7715_v16  ;;  %v7718_v26 = vpack.c.bf16 %v8460_v24, %v8460_v24 }
 0x8cc   : > { %v3718_v11 = vpop.f32.mrf.mxu1 }
 0x8cd   : > { %3769 = vst.msk [vmem:[#allocation5 + $0x3c] sm:$0xf] %vm2094_vm2, %v7718_v26  ;;  %v7716_v46 = vpack.c.bf16 %v3718_v11, %v3718_v11 }
 0x8cf   : > { %3767 = vst.msk [vmem:[#allocation5 + $0x34] sm:$0xf] %vm2094_vm2, %v7716_v46  ;;  %v8471_v3 = vpop.f32.mrf.mxu1 }
 0x8d0   : > { %v3917_v49 = vadd.f32 %v10831_v33, %v8471_v3 }
 0x8d1   : > { %v3908_v1 = vpop.f32.mrf.mxu1 }
 0x8d2   : > { %v3909_v15 = vadd.f32 %v11036_v58, %v3908_v1  ;;  %v3945_v29 = vsel %vm1868_vm1, %v3917_v49, -inf }
 0x8d3   : > { %v8472_v0 = vpop.f32.mrf.mxu1 }
 0x8d4   : > { %v3939_v12 = vsel %vm1868_vm1, %v3909_v15, -inf  ;;  %v3920_v47 = vadd.f32 %v10848_v6, %v8472_v0 }
 0x8d5   : > { %v3911_v23 = vpop.f32.mrf.mxu1  ;;  %3940 = vmax.xlane.f32.xlu0 %v3939_v12 }
 0x8d6   : > { %v3912_v41 = vadd.f32 %v10837_v42, %v3911_v23  ;;  %v3948_v60 = vsel %vm1868_vm1, %v3920_v47, -inf }
 0x8d7   : > { %v8475_v48 = vpop.f32.mrf.mxu1 }
 0x8d8   : > { %v3942_v45 = vsel %vm1868_vm1, %v3912_v41, -inf  ;;  %v3933_v22 = vadd.f32 %v10860_v34, %v8475_v48 }
 0x8d9   : > { %3943 = vmax.xlane.f32.xlu1 %v3942_v45  ;;  %3946 = vmax.xlane.f32.xlu0 %v3945_v29  ;;  %v3924_v18 = vpop.f32.mrf.mxu1 }
 0x8da   : > { %v3925_v25 = vadd.f32 %v10853_v55, %v3924_v18  ;;  %v3957_v53 = vsel %vm1868_vm1, %v3933_v22, -inf }
 0x8db   : > { %v8476_v56 = vpop.f32.mrf.mxu1 }
 0x8dc   : > { %v3936_v33 = vadd.f32 %v10874_v37, %v8476_v56  ;;  %v3951_v34 = vsel %vm1868_vm1, %v3925_v25, -inf  ;;  %v8842_v37 = vld [vmem:[#allocation4 + $0x30] sm:$0xff]  }
 0x8dd   : > { %3949 = vmax.xlane.f32.xlu0 %v3948_v60  ;;  %v3927_v43 = vpop.f32.mrf.mxu1 }
 0x8de   : > { %v3928_v42 = vadd.f32 %v10865_v21, %v3927_v43  ;;  %v3960_v6 = vsel %vm1868_vm1, %v3936_v33, -inf  ;;  %v8844_v21 = vld [vmem:[#allocation4 + $0x38] sm:$0xff]  }
 0x8df   : > { %3961 = vmax.xlane.f32.xlu1 %v3960_v6 }
 0x8e0   : > { %v3954_v2 = vsel %vm1868_vm1, %v3928_v42, -inf }
 0x8e1   : > { %3958 = vmax.xlane.f32.xlu0 %v3957_v53 }
 0x8e3   : > { %3955 = vmax.xlane.f32.xlu1 %v3954_v2 }
 0x8e5   : > { %3952 = vmax.xlane.f32.xlu0 %v3951_v34 }
 0x8f4   : > { %4055 = vrot.lane.b32.xlu1 %v8842_v37, %s9751_s10 }
 0x8f8   : > { %4053 = vrot.lane.b32.xlu1 %v8843_v59, %s9751_s10 }
 0x8fb   : > { %4057 = vrot.lane.b32.xlu0 %v8844_v21, %s9751_s10 }
 0x8fc   : > { %4051 = vrot.lane.b32.xlu1 %v8845_v20, %s9751_s10 }
 0x95e   : > { %v3941_v55 = vpop.xlane.xlu0 %3940 }
 0x95f   : > { %v3963_v28 = vsub.f32 %v3909_v15, %v3941_v55 }
 0x961   : > { %v3971_v24 = vmul.f32 1.442695, %v3963_v28 }
 0x962   : > { %v3944_v27 = vpop.xlane.xlu1 %3943  ;;  %v3947_v50 = vpop.xlane.xlu0 %3946 }
 0x963   : > { %v3965_v38 = vsub.f32 %v3917_v49, %v3947_v50  ;;  %v3964_v9 = vsub.f32 %v3912_v41, %v3944_v27 }
 0x965   : > { %v3975_v16 = vmul.f32 1.442695, %v3965_v38  ;;  %v3973_v3 = vmul.f32 1.442695, %v3964_v9  ;;  %v8846_v9 = vld [vmem:[#allocation3 + $0x30] sm:$0xff]  }
 0x966   : > { %v3950_v26 = vpop.xlane.xlu0 %3949 }
 0x967   : > { %v3966_v11 = vsub.f32 %v3920_v47, %v3950_v26  ;;  %9158 = vpow2.f32 %v3975_v16  ;;  %v8847_v16 = vld [vmem:[#allocation3 + $0x28] sm:$0xff]   ;;  %v8849_v26 = vld [vmem:[#allocation3 + $0x38] sm:$0xff]  }
 0x968   : > { %v3962_v46 = vpop.xlane.xlu1 %3961  ;;  %9160 = vpow2.f32 %v3971_v24  ;;  %v8848_v24 = vld [vmem:[#allocation3 + $0x20] sm:$0xff]  }
 0x969   : > { %v3977_v1 = vmul.f32 1.442695, %v3966_v11  ;;  %v3970_v0 = vsub.f32 %v3936_v33, %v3962_v46  ;;  %v8850_v11 = vld [vmem:[#allocation2 + $0x28] sm:$0xff]   ;;  %v8851_v46 = vld [vmem:[#allocation2 + $0x20] sm:$0xff]  }
 0x96a   : > { %v3959_v12 = vpop.xlane.xlu0 %3958 }
 0x96b   : > { %9162 = vpow2.f32 %v3977_v1  ;;  %v3969_v23 = vsub.f32 %v3933_v22, %v3959_v12  ;;  %v3985_v45 = vmul.f32 1.442695, %v3970_v0  ;;  %v8853_v1 = vld [vmem:[#allocation2 + $0x30] sm:$0xff]  }
 0x96c   : > { %v3956_v48 = vpop.xlane.xlu1 %3955  ;;  %9164 = vpow2.f32 %v3973_v3  ;;  %v8852_v3 = vld [vmem:[#allocation2 + $0x38] sm:$0xff]  }
 0x96d   : > { %v3983_v15 = vmul.f32 1.442695, %v3969_v23  ;;  %v3968_v29 = vsub.f32 %v3928_v42, %v3956_v48 }
 0x96e   : > { %v3953_v49 = vpop.xlane.xlu0 %3952 }
 0x96f   : > { %9166 = vpow2.f32 %v3983_v15  ;;  %v3967_v41 = vsub.f32 %v3925_v25, %v3953_v49  ;;  %v3981_v47 = vmul.f32 1.442695, %v3968_v29 }
 0x970   : > { %v4056_v18 = vpop.permute.xlu1 %4055  ;;  %9168 = vpow2.f32 %v3985_v45 }
 0x971   : > { %v3979_v56 = vmul.f32 1.442695, %v3967_v41 }
 0x972   : > { %v4058_v60 = vpop.permute.xlu0 %4057 }
 0x973   : > { %9170 = vpow2.f32 %v3979_v56  ;;  %8477 = vmatprep.subr.bf16.mxu0 %v4058_v60 }
 0x974   : > { %8478 = vmatpush3.bf16.msra.mxu0 %v4058_v60  ;;  %v11058_v33 = vpop.eup %9158  ;;  %9172 = vpow2.f32 %v3981_v47  ;;  %v4054_v22 = vpop.permute.xlu1 %4053 }
 0x975   : > { %8479 = vmatprep.subr.bf16.mxu0 %v4056_v18  ;;  %v3993_v43 = vsel %vm1868_vm1, %v11058_v33, 0.0  ;;  %v11062_v42 = vpop.eup %9160 }
 0x976   : > { %3994 = vadd.xlane.f32.xlu0 %v3993_v43  ;;  %v3987_v2 = vsel %vm1868_vm1, %v11062_v42, 0.0 }
 0x978   : > { %v11064_v6 = vpop.eup %9162  ;;  %8480 = vmatpush3.bf16.msra.mxu0 %v4056_v18  ;;  %v4052_v37 = vpop.permute.xlu1 %4051 }
 0x979   : > { %8481 = vmatprep.subr.bf16.mxu0 %v4054_v22  ;;  %v3996_v25 = vsel %vm1868_vm1, %v11064_v6, 0.0  ;;  %v9165_v53 = vpop.eup %9164 }
 0x97a   : > { %3997 = vadd.xlane.f32.xlu1 %v3996_v25  ;;  %3988 = vadd.xlane.f32.xlu0 %v3987_v2  ;;  %v3990_v59 = vsel %vm1868_vm1, %v9165_v53, 0.0 }
 0x97c   : > { %v11070_v34 = vpop.eup %9166  ;;  %8482 = vmatpush3.bf16.msra.mxu0 %v4054_v22 }
 0x97d   : > { %8483 = vmatprep.subr.bf16.mxu0 %v4052_v37  ;;  %v4005_v21 = vsel %vm1868_vm1, %v11070_v34, 0.0  ;;  %v11075_v20 = vpop.eup %9168 }
 0x97e   : > { %3991 = vadd.xlane.f32.xlu1 %v3990_v59  ;;  %4006 = vadd.xlane.f32.xlu0 %v4005_v21  ;;  %v4008_v27 = vsel %vm1868_vm1, %v11075_v20, 0.0 }
 0x980   : > { %v11077_v55 = vpop.eup %9170  ;;  %8484 = vmatpush3.bf16.msra.mxu0 %v4052_v37 }
 0x981   : > { %v3999_v28 = vsel %vm1868_vm1, %v11077_v55, 0.0  ;;  %v9173_v50 = vpop.eup %9172 }
 0x982   : > { %4000 = vadd.xlane.f32.xlu1 %v3999_v28  ;;  %4009 = vadd.xlane.f32.xlu0 %v4008_v27  ;;  %v4002_v38 = vsel %vm1868_vm1, %v9173_v50, 0.0 }
 0x986   : > { %4003 = vadd.xlane.f32.xlu0 %v4002_v38 }
 0x993   : > { %4272 = vrot.lane.b32.xlu1 %v8846_v9, %s9752_s18 }
 0x997   : > { %4270 = vrot.lane.b32.xlu1 %v8847_v16, %s9752_s18 }
 0x99b   : > { %4268 = vrot.lane.b32.xlu1 %v8848_v24, %s9752_s18 }
 0x99c   : > { %4274 = vrot.lane.b32.xlu0 %v8849_v26, %s9752_s18 }
 0x99f   : > { %4242 = vrot.lane.b32.xlu1 %v8850_v11, %s9752_s18 }
 0x9a0   : > { %4240 = vrot.lane.b32.xlu0 %v8851_v46, %s9752_s18 }
 0x9a3   : > { %4246 = vrot.lane.b32.xlu1 %v8852_v3, %s9752_s18 }
 0x9a4   : > { %4244 = vrot.lane.b32.xlu0 %v8853_v1, %s9752_s18 }
 0x9ff   : > { %v3995_v0 = vpop.xlane.xlu0 %3994 }
 0xa03   : > { %v3998_v12 = vpop.xlane.xlu1 %3997  ;;  %v3989_v23 = vpop.xlane.xlu0 %3988 }
 0xa04   : > { %9174 = vrcp.f32 %v3998_v12 }
 0xa05   : > { %9176 = vrcp.f32 %v3989_v23 }
 0xa06   : > { %9178 = vrcp.f32 %v3995_v0 }
 0xa07   : > { %v3992_v48 = vpop.xlane.xlu1 %3991  ;;  %v4007_v15 = vpop.xlane.xlu0 %4006 }
 0xa08   : > { %9180 = vrcp.f32 %v3992_v48 }
 0xa0b   : > { %v4001_v45 = vpop.xlane.xlu1 %4000  ;;  %v4010_v29 = vpop.xlane.xlu0 %4009 }
 0xa0c   : > { %9182 = vrcp.f32 %v4010_v29 }
 0xa0d   : > { %9184 = vrcp.f32 %v4001_v45 }
 0xa0e   : > { %9186 = vrcp.f32 %v4007_v15 }
 0xa0f   : > { %v4004_v49 = vpop.xlane.xlu0 %4003  ;;  %v4273_v38 = vpop.permute.xlu1 %4272 }
 0xa10   : > { %9188 = vrcp.f32 %v4004_v49  ;;  %v4295_v46 = vsel %vm1778_vm0, %v4273_v38, 0 }
 0xa11   : > { %v9175_v41 = vpop.eup %9174 }
 0xa12   : > { %v9177_v18 = vpop.eup %9176  ;;  %v4022_v22 = vmul.f32 %v9175_v41, %v11064_v6 }
 0xa13   : > { %v9179_v56 = vpop.eup %9178  ;;  %v4275_v47 = vpop.permute.xlu0 %4274  ;;  %v4019_v43 = vmul.f32 %v9177_v18, %v11062_v42 }
 0xa14   : > { %8613 = vmatprep.subr.msk.bf16.mxu0 %vm1778_vm0, %v4275_v47  ;;  %v4021_v2 = vmul.f32 %v9179_v56, %v11058_v33  ;;  %v4298_v28 = vsel %vm1778_vm0, %v4275_v47, 0  ;;  %v4271_v3 = vpop.permute.xlu1 %4270 }
 0xa15   : > { %v9181_v60 = vpop.eup %9180 }
 0xa16   : > { %v4020_v25 = vmul.f32 %v9181_v60, %v9165_v53  ;;  %v4028_v59 = vpack.c.bf16 %v4022_v22, %v4021_v2  ;;  %v11131_v22 = vld [vmem:[#allocation9 + $0x10] sm:$0xff] }
 0xa17   : > { %v4241_v11 = vpop.permute.xlu0 %4240 }
 0xa18   : > { %v4027_v37 = vpack.c.bf16 %v4020_v25, %v4019_v43 }
 0xa19   : > { %v9183_v21 = vpop.eup %9182 }
 0xa1a   : > { %8485 = vmatprep.mubr.msk.bf16.mxu0 %vm1868_vm1, %v4027_v37  ;;  %v9185_v27 = vpop.eup %9184  ;;  %v4026_v42 = vmul.f32 %v9183_v21, %v11075_v20  ;;  %v4292_v20 = vsel %vm1778_vm0, %v4271_v3, 0  ;;  %v11135_v37 = vld [vmem:[#allocation9 + $0x8] sm:$0xff] }
 0xa1b   : > { %8486 = vmatmul.mubr.msk.bf16.vlgmr.msra.gmra.mxu0 %vm1868_vm1, %v4028_v59  ;;  %v9187_v6 = vpop.eup %9186  ;;  %v4023_v33 = vmul.f32 %v9185_v27, %v11077_v55  ;;  %v4269_v55 = vpop.permute.xlu1 %4268 }
 0xa1c   : > { %8494 = vmatpush3.bf16.xpose.msra.mxu0 %v4298_v28  ;;  %v4025_v16 = vmul.f32 %v9187_v6, %v11070_v34  ;;  %v4289_v34 = vsel %vm1778_vm0, %v4269_v55, 0  ;;  %v4245_v1 = vpop.permute.xlu0 %4244  ;;  %v11138_v28 = vld [vmem:[#allocation9 + $0x18] sm:$0xff] }
 0xa1d   : > { %8614 = vmatprep.subr.msk.bf16.mxu0 %vm1778_vm0, %v4273_v38  ;;  %v9189_v9 = vpop.eup %9188 }
 0xa1e   : > { %v4024_v53 = vmul.f32 %v9189_v9, %v9173_v50  ;;  %v4030_v26 = vpack.c.bf16 %v4026_v42, %v4025_v16  ;;  %v11146_v16 = vld [vmem:[#allocation9 + $0x38] sm:$0xff] }
 0xa1f   : > { %v4243_v50 = vpop.permute.xlu1 %4242 }
 0xa20   : > { %v4029_v24 = vpack.c.bf16 %v4024_v53, %v4023_v33  ;;  %v11143_v33 = vld [vmem:[#allocation9 + $0x30] sm:$0xff] }
 0xa22   : > { %8489 = vmatprep.mubr.msk.bf16.mxu0 %vm1868_vm1, %v4029_v24 }
 0xa23   : > { %8490 = vmatmul.mubr.msk.bf16.gmra.mxu0 %vm1868_vm1, %v4030_v26  ;;  %v4247_v0 = vpop.permute.xlu1 %4246 }
 0xa24   : > { %8496 = vmatpush3.bf16.xpose.msra.mxu0 %v4295_v46  ;;  %8501 = vmatprep.mubr.msk.bf16.mxu0 %vm1778_vm0, %v4241_v11  ;;  %v11150_v46 = vld [vmem:[#allocation9 + $0x28] sm:$0xff] }
 0xa25   : > { %8615 = vmatprep.subr.msk.bf16.mxu0 %vm1778_vm0, %v4271_v3 }
 0xa2c   : > { %8498 = vmatpush3.bf16.xpose.msra.mxu0 %v4292_v20 }
 0xa2d   : > { %8616 = vmatprep.subr.msk.bf16.mxu0 %vm1778_vm0, %v4269_v55  ;;  %v11154_v55 = vld [vmem:[#allocation9 + $0x20] sm:$0xff] }
 0xa34   : > { %8500 = vmatpush3.bf16.xpose.msra.mxu0 %v4289_v34 }
 0xa3b   : > { %8502 = vmatmul.mubr.msk.bf16.vlgmr.msra.gmra.mxu0 %vm1778_vm0, %v4243_v50 }
 0xa3c   : > { %8505 = vmatprep.mubr.msk.bf16.mxu0 %vm1778_vm0, %v4245_v1 }
 0xa43   : > { %8506 = vmatmul.mubr.msk.bf16.gmra.mxu0 %vm1778_vm0, %v4247_v0 }
 0xadb   : > { %v11114_v12 = vpop.f32.mrf.mxu0 }
 0xadd   : > { %v11116_v23 = vpop.f32.mrf.mxu0 }
 0xadf   : > { %v11118_v48 = vpop.f32.mrf.mxu0 }
 0xae1   : > { %v11120_v15 = vpop.f32.mrf.mxu0 }
 0xae3   : > { %v11122_v45 = vpop.f32.mrf.mxu0 }
 0xae4   : > { %12543 = vst [vmem:[#allocation27_spill] sm:$0xff] %v11122_v45 }
 0xae5   : > { %v11124_v29 = vpop.f32.mrf.mxu0 }
 0xae7   : > { %v11126_v49 = vpop.f32.mrf.mxu0 }
 0xae8   : > { %12544 = vst [vmem:[#allocation28_spill] sm:$0xff] %v11126_v49 }
 0xae9   : > { %v11128_v41 = vpop.f32.mrf.mxu0 }
 0xafb   : > { %v8503_v18 = vpop.f32.mrf.mxu0 }
 0xafc   : > { %v4343_v43 = vadd.f32 %v11131_v22, %v8503_v18  ;;  %v8854_v18 = vld [vmem:[#allocation4 + $0x30] sm:$0xff]  }
 0xafd   : > { %v4334_v56 = vpop.f32.mrf.mxu0 }
 0xafe   : > { %v4335_v47 = vadd.f32 %v11036_v58, %v4334_v56  ;;  %v4371_v6 = vsel %vm1868_vm1, %v4343_v43, -inf  ;;  %v8855_v56 = vld [vmem:[#allocation4 + $0x28] sm:$0xff]  }
 0xaff   : > { %v8504_v60 = vpop.f32.mrf.mxu0 }
 0xb00   : > { %v4365_v25 = vsel %vm1868_vm1, %v4335_v47, -inf  ;;  %v4346_v27 = vadd.f32 %v11138_v28, %v8504_v60  ;;  %v8856_v60 = vld [vmem:[#allocation4 + $0x38] sm:$0xff]  }
 0xb01   : > { %v4337_v2 = vpop.f32.mrf.mxu0  ;;  %4366 = vmax.xlane.f32.xlu0 %v4365_v25  ;;  %v8857_v25 = vld [vmem:[#allocation4 + $0x20] sm:$0xff]  }
 0xb02   : > { %v4338_v59 = vadd.f32 %v11135_v37, %v4337_v2  ;;  %v4374_v26 = vsel %vm1868_vm1, %v4346_v27, -inf }
 0xb03   : > { %v8507_v21 = vpop.f32.mrf.mxu0 }
 0xb04   : > { %v4368_v38 = vsel %vm1868_vm1, %v4338_v59, -inf  ;;  %v4359_v53 = vadd.f32 %v11143_v33, %v8507_v21 }
 0xb05   : > { %4369 = vmax.xlane.f32.xlu1 %v4368_v38  ;;  %4372 = vmax.xlane.f32.xlu0 %v4371_v6  ;;  %v4350_v9 = vpop.f32.mrf.mxu0 }
 0xb06   : > { %v4351_v34 = vadd.f32 %v11154_v55, %v4350_v9  ;;  %v4383_v50 = vsel %vm1868_vm1, %v4359_v53, -inf }
 0xb07   : > { %v8508_v42 = vpop.f32.mrf.mxu0 }
 0xb08   : > { %v4362_v24 = vadd.f32 %v11146_v16, %v8508_v42  ;;  %v4377_v0 = vsel %vm1868_vm1, %v4351_v34, -inf }
 0xb09   : > { %4375 = vmax.xlane.f32.xlu0 %v4374_v26  ;;  %v4353_v11 = vpop.f32.mrf.mxu0 }
 0xb0a   : > { %v4354_v3 = vadd.f32 %v11150_v46, %v4353_v11  ;;  %v4386_v20 = vsel %vm1868_vm1, %v4362_v24, -inf }
 0xb0b   : > { %4387 = vmax.xlane.f32.xlu1 %v4386_v20 }
 0xb0c   : > { %v4380_v1 = vsel %vm1868_vm1, %v4354_v3, -inf }
 0xb0d   : > { %4384 = vmax.xlane.f32.xlu0 %v4383_v50 }
 0xb0f   : > { %4381 = vmax.xlane.f32.xlu1 %v4380_v1 }
 0xb11   : > { %4378 = vmax.xlane.f32.xlu0 %v4377_v0 }
 0xb20   : > { %4481 = vrot.lane.b32.xlu1 %v8854_v18, %s9752_s18 }
 0xb24   : > { %4479 = vrot.lane.b32.xlu1 %v8855_v56, %s9752_s18 }
 0xb27   : > { %4483 = vrot.lane.b32.xlu0 %v8856_v60, %s9752_s18 }
 0xb28   : > { %4477 = vrot.lane.b32.xlu1 %v8857_v25, %s9752_s18 }
 0xb8a   : > { %v4367_v2 = vpop.xlane.xlu0 %4366 }
 0xb8b   : > { %v4389_v21 = vsub.f32 %v4335_v47, %v4367_v2 }
 0xb8d   : > { %v4397_v11 = vmul.f32 1.442695, %v4389_v21 }
 0xb8e   : > { %v4370_v38 = vpop.xlane.xlu1 %4369  ;;  %v4373_v6 = vpop.xlane.xlu0 %4372 }
 0xb8f   : > { %v4391_v9 = vsub.f32 %v4343_v43, %v4373_v6  ;;  %v4390_v42 = vsub.f32 %v4338_v59, %v4370_v38 }
 0xb91   : > { %v4401_v26 = vmul.f32 1.442695, %v4391_v9  ;;  %v4399_v0 = vmul.f32 1.442695, %v4390_v42 }
 0xb92   : > { %v4376_v20 = vpop.xlane.xlu0 %4375 }
 0xb93   : > { %v4392_v50 = vsub.f32 %v4346_v27, %v4376_v20  ;;  %9190 = vpow2.f32 %v4401_v26 }
 0xb94   : > { %v4388_v1 = vpop.xlane.xlu1 %4387  ;;  %9192 = vpow2.f32 %v4397_v11 }
 0xb95   : > { %v4403_v18 = vmul.f32 1.442695, %v4392_v50  ;;  %v4396_v56 = vsub.f32 %v4362_v24, %v4388_v1 }
 0xb96   : > { %v4385_v49 = vpop.xlane.xlu0 %4384 }
 0xb97   : > { %9194 = vpow2.f32 %v4403_v18  ;;  %v4395_v60 = vsub.f32 %v4359_v53, %v4385_v49  ;;  %v4411_v2 = vmul.f32 1.442695, %v4396_v56 }
 0xb98   : > { %v4382_v25 = vpop.xlane.xlu1 %4381  ;;  %9196 = vpow2.f32 %v4399_v0 }
 0xb99   : > { %v4409_v47 = vmul.f32 1.442695, %v4395_v60  ;;  %v4394_v45 = vsub.f32 %v4354_v3, %v4382_v25 }
 0xb9a   : > { %v4379_v43 = vpop.xlane.xlu0 %4378 }
 0xb9b   : > { %9198 = vpow2.f32 %v4409_v47  ;;  %v4393_v59 = vsub.f32 %v4351_v34, %v4379_v43  ;;  %v4407_v27 = vmul.f32 1.442695, %v4394_v45  ;;  %v8858_v47 = vld [vmem:[#allocation3 + $0x30] sm:$0xff]   ;;  %v8860_v43 = vld [vmem:[#allocation3 + $0x20] sm:$0xff]  }
 0xb9c   : > { %v4482_v21 = vpop.permute.xlu1 %4481  ;;  %9200 = vpow2.f32 %v4411_v2  ;;  %v8859_v2 = vld [vmem:[#allocation3 + $0x28] sm:$0xff]  }
 0xb9d   : > { %v4405_v38 = vmul.f32 1.442695, %v4393_v59  ;;  %v8861_v59 = vld [vmem:[#allocation3 + $0x38] sm:$0xff]  }
 0xb9e   : > { %v4484_v6 = vpop.permute.xlu0 %4483 }
 0xb9f   : > { %9202 = vpow2.f32 %v4405_v38  ;;  %8509 = vmatprep.subr.bf16.mxu1 %v4484_v6  ;;  %v8863_v38 = vld [vmem:[#allocation2 + $0x20] sm:$0xff]  }
 0xba0   : > { %8510 = vmatpush3.bf16.msra.mxu1 %v4484_v6  ;;  %v11164_v24 = vpop.eup %9190  ;;  %9204 = vpow2.f32 %v4407_v27  ;;  %v4480_v49 = vpop.permute.xlu1 %4479  ;;  %v8864_v27 = vld [vmem:[#allocation2 + $0x38] sm:$0xff]   ;;  %v8865_v6 = vld [vmem:[#allocation2 + $0x30] sm:$0xff]  }
 0xba1   : > { %8511 = vmatprep.subr.bf16.mxu1 %v4482_v21  ;;  %v4419_v53 = vsel %vm1868_vm1, %v11164_v24, 0.0  ;;  %v11168_v3 = vpop.eup %9192 }
 0xba2   : > { %4420 = vadd.xlane.f32.xlu0 %v4419_v53  ;;  %v4413_v42 = vsel %vm1868_vm1, %v11168_v3, 0.0 }
 0xba4   : > { %v11170_v34 = vpop.eup %9194  ;;  %8512 = vmatpush3.bf16.msra.mxu1 %v4482_v21  ;;  %v4478_v11 = vpop.permute.xlu1 %4477  ;;  %v8862_v21 = vld [vmem:[#allocation2 + $0x28] sm:$0xff]  }
 0xba5   : > { %8513 = vmatprep.subr.bf16.mxu1 %v4480_v49  ;;  %v4422_v45 = vsel %vm1868_vm1, %v11170_v34, 0.0  ;;  %v9197_v9 = vpop.eup %9196 }
 0xba6   : > { %4423 = vadd.xlane.f32.xlu1 %v4422_v45  ;;  %4414 = vadd.xlane.f32.xlu0 %v4413_v42  ;;  %v4416_v20 = vsel %vm1868_vm1, %v9197_v9, 0.0 }
 0xba8   : > { %v11176_v26 = vpop.eup %9198  ;;  %8514 = vmatpush3.bf16.msra.mxu1 %v4480_v49 }
 0xba9   : > { %8515 = vmatprep.subr.bf16.mxu1 %v4478_v11  ;;  %v4431_v50 = vsel %vm1868_vm1, %v11176_v26, 0.0  ;;  %v11181_v1 = vpop.eup %9200 }
 0xbaa   : > { %4417 = vadd.xlane.f32.xlu1 %v4416_v20  ;;  %4432 = vadd.xlane.f32.xlu0 %v4431_v50  ;;  %v4434_v56 = vsel %vm1868_vm1, %v11181_v1, 0.0 }
 0xbac   : > { %v11183_v0 = vpop.eup %9202  ;;  %8516 = vmatpush3.bf16.msra.mxu1 %v4478_v11 }
 0xbad   : > { %v4425_v18 = vsel %vm1868_vm1, %v11183_v0, 0.0  ;;  %v9205_v60 = vpop.eup %9204 }
 0xbae   : > { %4426 = vadd.xlane.f32.xlu1 %v4425_v18  ;;  %4435 = vadd.xlane.f32.xlu0 %v4434_v56  ;;  %v4428_v25 = vsel %vm1868_vm1, %v9205_v60, 0.0 }
 0xbb2   : > { %4429 = vadd.xlane.f32.xlu0 %v4428_v25 }
 0xbbf   : > { %4698 = vrot.lane.b32.xlu1 %v8858_v47, %s9753_s8 }
 0xbc3   : > { %4696 = vrot.lane.b32.xlu1 %v8859_v2, %s9753_s8 }
 0xbc7   : > { %4694 = vrot.lane.b32.xlu1 %v8860_v43, %s9753_s8 }
 0xbc8   : > { %4700 = vrot.lane.b32.xlu0 %v8861_v59, %s9753_s8 }
 0xbcb   : > { %4668 = vrot.lane.b32.xlu1 %v8862_v21, %s9753_s8 }
 0xbcc   : > { %4666 = vrot.lane.b32.xlu0 %v8863_v38, %s9753_s8 }
 0xbcf   : > { %4672 = vrot.lane.b32.xlu1 %v8864_v27, %s9753_s8 }
 0xbd0   : > { %4670 = vrot.lane.b32.xlu0 %v8865_v6, %s9753_s8 }
 0xc2b   : > { %v4421_v49 = vpop.xlane.xlu0 %4420 }
 0xc2f   : > { %v4424_v53 = vpop.xlane.xlu1 %4423  ;;  %v4415_v45 = vpop.xlane.xlu0 %4414 }
 0xc30   : > { %9206 = vrcp.f32 %v4424_v53 }
 0xc31   : > { %9208 = vrcp.f32 %v4415_v45 }
 0xc32   : > { %9210 = vrcp.f32 %v4421_v49 }
 0xc33   : > { %v4418_v42 = vpop.xlane.xlu1 %4417  ;;  %v4433_v11 = vpop.xlane.xlu0 %4432 }
 0xc34   : > { %9212 = vrcp.f32 %v4418_v42 }
 0xc37   : > { %v4427_v20 = vpop.xlane.xlu1 %4426  ;;  %v4436_v50 = vpop.xlane.xlu0 %4435 }
 0xc38   : > { %9214 = vrcp.f32 %v4436_v50 }
 0xc39   : > { %9216 = vrcp.f32 %v4427_v20 }
 0xc3a   : > { %9218 = vrcp.f32 %v4433_v11 }
 0xc3b   : > { %v4430_v18 = vpop.xlane.xlu0 %4429  ;;  %v4699_v11 = vpop.permute.xlu1 %4698 }
 0xc3c   : > { %9220 = vrcp.f32 %v4430_v18 }
 0xc3d   : > { %v9207_v56 = vpop.eup %9206 }
 0xc3e   : > { %v9209_v25 = vpop.eup %9208  ;;  %v4448_v59 = vmul.f32 %v9207_v56, %v11170_v34 }
 0xc3f   : > { %v9211_v47 = vpop.eup %9210  ;;  %v4701_v2 = vpop.permute.xlu0 %4700  ;;  %v4445_v21 = vmul.f32 %v9209_v25, %v11168_v3 }
 0xc40   : > { %8617 = vmatprep.subr.msk.bf16.mxu1 %vm1778_vm0, %v4701_v2  ;;  %v4447_v27 = vmul.f32 %v9211_v47, %v11164_v24  ;;  %v4724_v45 = vsel %vm1778_vm0, %v4701_v2, 0  ;;  %v4721_v47 = vsel %vm1778_vm0, %v4699_v11, 0  ;;  %v4697_v2 = vpop.permute.xlu1 %4696 }
 0xc41   : > { %v9213_v43 = vpop.eup %9212 }
 0xc42   : > { %v4446_v38 = vmul.f32 %v9213_v43, %v9197_v9  ;;  %v4454_v49 = vpack.c.bf16 %v4448_v59, %v4447_v27 }
 0xc43   : > { %v4667_v25 = vpop.permute.xlu0 %4666 }
 0xc44   : > { %v4453_v6 = vpack.c.bf16 %v4446_v38, %v4445_v21 }
 0xc45   : > { %v9215_v53 = vpop.eup %9214 }
 0xc46   : > { %8517 = vmatprep.mubr.msk.bf16.mxu1 %vm1868_vm1, %v4453_v6  ;;  %v9217_v42 = vpop.eup %9216  ;;  %v4452_v3 = vmul.f32 %v9215_v53, %v11181_v1  ;;  %v4718_v1 = vsel %vm1778_vm0, %v4697_v2, 0 }
 0xc47   : > { %8518 = vmatmul.mubr.msk.bf16.vlgmr.msra.gmra.mxu1 %vm1868_vm1, %v4454_v49  ;;  %v9219_v34 = vpop.eup %9218  ;;  %v4449_v24 = vmul.f32 %v9217_v42, %v11183_v0  ;;  %v4695_v0 = vpop.permute.xlu1 %4694 }
 0xc48   : > { %8526 = vmatpush3.bf16.xpose.msra.mxu1 %v4724_v45  ;;  %v4451_v50 = vmul.f32 %v9219_v34, %v11176_v26  ;;  %v4715_v26 = vsel %vm1778_vm0, %v4695_v0, 0  ;;  %v4671_v43 = vpop.permute.xlu0 %4670 }
 0xc49   : > { %8618 = vmatprep.subr.msk.bf16.mxu1 %vm1778_vm0, %v4699_v11  ;;  %v9221_v20 = vpop.eup %9220 }
 0xc4a   : > { %v4450_v9 = vmul.f32 %v9221_v20, %v9205_v60  ;;  %v4456_v56 = vpack.c.bf16 %v4452_v3, %v4451_v50 }
 0xc4b   : > { %v4669_v60 = vpop.permute.xlu1 %4668 }
 0xc4c   : > { %v4455_v18 = vpack.c.bf16 %v4450_v9, %v4449_v24 }
 0xc4e   : > { %8521 = vmatprep.mubr.msk.bf16.mxu1 %vm1868_vm1, %v4455_v18 }
 0xc4f   : > { %8522 = vmatmul.mubr.msk.bf16.gmra.mxu1 %vm1868_vm1, %v4456_v56  ;;  %v4673_v59 = vpop.permute.xlu1 %4672 }
 0xc50   : > { %8528 = vmatpush3.bf16.xpose.msra.mxu1 %v4721_v47  ;;  %8533 = vmatprep.mubr.msk.bf16.mxu1 %vm1778_vm0, %v4667_v25 }
 0xc51   : > { %8619 = vmatprep.subr.msk.bf16.mxu1 %vm1778_vm0, %v4697_v2 }
 0xc58   : > { %8530 = vmatpush3.bf16.xpose.msra.mxu1 %v4718_v1 }
 0xc59   : > { %8620 = vmatprep.subr.msk.bf16.mxu1 %vm1778_vm0, %v4695_v0 }
 0xc60   : > { %8532 = vmatpush3.bf16.xpose.msra.mxu1 %v4715_v26 }
 0xc67   : > { %8534 = vmatmul.mubr.msk.bf16.vlgmr.msra.gmra.mxu1 %vm1778_vm0, %v4669_v60 }
 0xc68   : > { %8537 = vmatprep.mubr.msk.bf16.mxu1 %vm1778_vm0, %v4671_v43 }
 0xc6f   : > { %8538 = vmatmul.mubr.msk.bf16.gmra.mxu1 %vm1778_vm0, %v4673_v59 }
 0xd07   : > { %v11220_v21 = vpop.f32.mrf.mxu1 }
 0xd09   : > { %v11222_v38 = vpop.f32.mrf.mxu1 }
 0xd0b   : > { %v11224_v27 = vpop.f32.mrf.mxu1 }
 0xd0d   : > { %v11226_v6 = vpop.f32.mrf.mxu1 }
 0xd0f   : > { %v11228_v49 = vpop.f32.mrf.mxu1 }
 0xd11   : > { %v11230_v53 = vpop.f32.mrf.mxu1 }
 0xd13   : > { %v11232_v45 = vpop.f32.mrf.mxu1 }
 0xd15   : > { %v11234_v42 = vpop.f32.mrf.mxu1 }
 0xd27   : > { %v8535_v11 = vpop.f32.mrf.mxu1 }
 0xd28   : > { %v4769_v24 = vadd.f32 %v11131_v22, %v8535_v11 }
 0xd29   : > { %v4760_v34 = vpop.f32.mrf.mxu1 }
 0xd2a   : > { %v4761_v20 = vadd.f32 %v11036_v58, %v4760_v34  ;;  %v4797_v2 = vsel %vm1868_vm1, %v4769_v24, -inf  ;;  %v8866_v34 = vld [vmem:[#allocation4 + $0x38] sm:$0xff]  }
 0xd2b   : > { %v8536_v3 = vpop.f32.mrf.mxu1 }
 0xd2c   : > { %v4791_v9 = vsel %vm1868_vm1, %v4761_v20, -inf  ;;  %v4772_v25 = vadd.f32 %v11138_v28, %v8536_v3 }
 0xd2d   : > { %v4763_v50 = vpop.f32.mrf.mxu1  ;;  %4792 = vmax.xlane.f32.xlu0 %v4791_v9 }
 0xd2e   : > { %v4764_v18 = vadd.f32 %v11135_v37, %v4763_v50  ;;  %v4800_v22 = vsel %vm1868_vm1, %v4772_v25, -inf }
 0xd2f   : > { %v8539_v56 = vpop.f32.mrf.mxu1 }
 0xd30   : > { %v4794_v47 = vsel %vm1868_vm1, %v4764_v18, -inf  ;;  %v4785_v37 = vadd.f32 %v11143_v33, %v8539_v56 }
 0xd31   : > { %4795 = vmax.xlane.f32.xlu1 %v4794_v47  ;;  %4798 = vmax.xlane.f32.xlu0 %v4797_v2  ;;  %v4776_v1 = vpop.f32.mrf.mxu1 }
 0xd32   : > { %v4777_v0 = vadd.f32 %v11154_v55, %v4776_v1  ;;  %v4809_v55 = vsel %vm1868_vm1, %v4785_v37, -inf }
 0xd33   : > { %v8540_v58 = vpop.f32.mrf.mxu1 }
 0xd34   : > { %v4788_v28 = vadd.f32 %v11146_v16, %v8540_v58  ;;  %v4803_v59 = vsel %vm1868_vm1, %v4777_v0, -inf }
 0xd35   : > { %4801 = vmax.xlane.f32.xlu0 %v4800_v22  ;;  %v4779_v26 = vpop.f32.mrf.mxu1 }
 0xd36   : > { %v4780_v60 = vadd.f32 %v11150_v46, %v4779_v26  ;;  %v4812_v11 = vsel %vm1868_vm1, %v4788_v28, -inf }
 0xd38   : > { %v4806_v43 = vsel %vm1868_vm1, %v4780_v60, -inf }
 0xd39   : > { %4807 = vmax.xlane.f32.xlu1 %v4806_v43  ;;  %4804 = vmax.xlane.f32.xlu0 %v4803_v59 }
 0xd3d   : > { %4813 = vmax.xlane.f32.xlu1 %v4812_v11  ;;  %4810 = vmax.xlane.f32.xlu0 %v4809_v55 }
 0xd53   : > { %4909 = vrot.lane.b32.xlu0 %v8866_v34, %s9753_s8 }
 0xdb6   : > { %v4793_v46 = vpop.xlane.xlu0 %4792 }
 0xdb7   : > { %v4815_v3 = vsub.f32 %v4761_v20, %v4793_v46 }
 0xdb9   : > { %v4823_v47 = vmul.f32 1.442695, %v4815_v3 }
 0xdba   : > { %v4796_v33 = vpop.xlane.xlu1 %4795  ;;  %v4799_v9 = vpop.xlane.xlu0 %4798 }
 0xdbb   : > { %v4817_v16 = vsub.f32 %v4769_v24, %v4799_v9  ;;  %v4816_v50 = vsub.f32 %v4764_v18, %v4796_v33 }
 0xdbd   : > { %v4827_v56 = vmul.f32 1.442695, %v4817_v16  ;;  %v4825_v58 = vmul.f32 1.442695, %v4816_v50 }
 0xdbe   : > { %v4802_v2 = vpop.xlane.xlu0 %4801 }
 0xdbf   : > { %v4818_v1 = vsub.f32 %v4772_v25, %v4802_v2  ;;  %9222 = vpow2.f32 %v4827_v56 }
 0xdc0   : > { %9224 = vpow2.f32 %v4823_v47 }
 0xdc1   : > { %v4829_v22 = vmul.f32 1.442695, %v4818_v1 }
 0xdc2   : > { %v4808_v26 = vpop.xlane.xlu1 %4807  ;;  %v4805_v43 = vpop.xlane.xlu0 %4804 }
 0xdc3   : > { %9226 = vpow2.f32 %v4829_v22  ;;  %v4819_v59 = vsub.f32 %v4777_v0, %v4805_v43  ;;  %v4820_v3 = vsub.f32 %v4780_v60, %v4808_v26 }
 0xdc4   : > { %9228 = vpow2.f32 %v4825_v58 }
 0xdc5   : > { %v4831_v46 = vmul.f32 1.442695, %v4819_v59  ;;  %v4833_v50 = vmul.f32 1.442695, %v4820_v3 }
 0xdc6   : > { %v4811_v11 = vpop.xlane.xlu0 %4810  ;;  %v4814_v55 = vpop.xlane.xlu1 %4813 }
 0xdc7   : > { %v4821_v20 = vsub.f32 %v4785_v37, %v4811_v11  ;;  %v4822_v24 = vsub.f32 %v4788_v28, %v4814_v55  ;;  %v8867_v11 = vld [vmem:[#allocation4 + $0x28] sm:$0xff]   ;;  %v8868_v55 = vld [vmem:[#allocation4 + $0x20] sm:$0xff]  }
 0xdc9   : > { %v4835_v34 = vmul.f32 1.442695, %v4821_v20  ;;  %v4837_v33 = vmul.f32 1.442695, %v4822_v24  ;;  %v7687_v20 = vpack.c.bf16 %v10764_v5, %v10764_v5  ;;  %v7695_v24 = vpack.c.bf16 %v10780_v52, %v10780_v52 }
 0xdca   : > { %v4910_v18 = vpop.permute.xlu0 %4909  ;;  %v7697_v5 = vpack.c.bf16 %v10778_v31, %v10778_v31  ;;  %v7703_v52 = vpack.c.bf16 %v11014_v44, %v11014_v44  ;;  %v7705_v31 = vpack.c.bf16 %v11012_v7, %v11012_v7  ;;  %v7691_v44 = vpack.c.bf16 %v10772_v13, %v10772_v13 }
 0xdcb   : > { %8541 = vmatprep.subr.bf16.mxu0 %v4910_v18  ;;  %9230 = vpow2.f32 %v4835_v34  ;;  %v7689_v34 = vpack.c.bf16 %v10762_v4, %v10762_v4  ;;  %v7690_v4 = vpack.c.bf16 %v10766_v62, %v10766_v62  ;;  %v7698_v62 = vpack.c.bf16 %v10782_v36, %v10782_v36 }
 0xdcc   : > { %8542 = vmatpush3.bf16.msra.mxu0 %v4910_v18  ;;  %v11253_v25 = vpop.eup %9222  ;;  %9232 = vpow2.f32 %v4831_v46  ;;  %v8869_v46 = vld [vmem:[#allocation4 + $0x30] sm:$0xff]   ;;  %v7688_v18 = vpack.c.bf16 %v10768_v61, %v10768_v61  ;;  %v7696_v61 = vpack.c.bf16 %v10784_v39, %v10784_v39  ;;  %v7704_v39 = vpack.c.bf16 %v11018_v10, %v11018_v10 }
 0xdcd   : > { %v4845_v9 = vsel %vm1868_vm1, %v11253_v25, 0.0  ;;  %v11257_v16 = vpop.eup %9224  ;;  %9234 = vpow2.f32 %v4837_v33  ;;  %v7693_v7 = vpack.c.bf16 %v10770_v17, %v10770_v17  ;;  %v7706_v36 = vpack.c.bf16 %v11016_v30, %v11016_v30 }
 0xdce   : > { %4846 = vadd.xlane.f32.xlu0 %v4845_v9  ;;  %v4839_v60 = vsel %vm1868_vm1, %v11257_v16, 0.0  ;;  %9236 = vpow2.f32 %v4833_v50  ;;  %v7699_v13 = vpack.c.bf16 %v10788_v40, %v10788_v40  ;;  %v7692_v10 = vpack.c.bf16 %v10776_v54, %v10776_v54 }
 0xdcf   : > { %v7701_v17 = vpack.c.bf16 %v10786_v57, %v10786_v57  ;;  %v7694_v30 = vpack.c.bf16 %v10774_v63, %v10774_v63  ;;  %v7707_v40 = vpack.c.bf16 %v11022_v32, %v11022_v32  ;;  %v7700_v54 = vpack.c.bf16 %v10792_v51, %v10792_v51 }
 0xdd0   : > { %v11259_v0 = vpop.eup %9226  ;;  %v7709_v57 = vpack.c.bf16 %v11020_v19, %v11020_v19  ;;  %v7702_v63 = vpack.c.bf16 %v10790_v14, %v10790_v14  ;;  %v7719_v32 = vpack.c.bf16 %v11116_v23, %v11116_v23  ;;  %v7708_v51 = vpack.c.bf16 %v11026_v35, %v11026_v35 }
 0xdd1   : > { %v4848_v37 = vsel %vm1868_vm1, %v11259_v0, 0.0  ;;  %v11263_v28 = vpop.eup %9228  ;;  %v7721_v19 = vpack.c.bf16 %v11114_v12, %v11114_v12  ;;  %v7710_v14 = vpack.c.bf16 %v11024_v8, %v11024_v8  ;;  %v7727_v23 = vpack.c.bf16 %v11222_v38, %v11222_v38 }
 0xdd2   : > { %4849 = vadd.xlane.f32.xlu1 %v4848_v37  ;;  %4840 = vadd.xlane.f32.xlu0 %v4839_v60  ;;  %v4842_v56 = vsel %vm1868_vm1, %v11263_v28, 0.0  ;;  %v7720_v35 = vpack.c.bf16 %v11120_v15, %v11120_v15  ;;  %v7729_v12 = vpack.c.bf16 %v11220_v21, %v11220_v21  ;;  %v7722_v8 = vpack.c.bf16 %v11118_v48, %v11118_v48 }
 0xdd3   : > { %v7723_v38 = vpack.c.bf16 %v11124_v29, %v11124_v29  ;;  %v7728_v15 = vpack.c.bf16 %v11226_v6, %v11226_v6  ;;  %v7730_v21 = vpack.c.bf16 %v11224_v27, %v11224_v27  ;;  %v7724_v48 = vpack.c.bf16 %v11128_v41, %v11128_v41 }
 0xdd6   : > { %4843 = vadd.xlane.f32.xlu1 %v4842_v56 }
 0xdd8   : > { %v11269_v47 = vpop.eup %9230 }
 0xdd9   : > { %v4857_v2 = vsel %vm1868_vm1, %v11269_v47, 0.0  ;;  %v11273_v1 = vpop.eup %9232 }
 0xdda   : > { %4858 = vadd.xlane.f32.xlu1 %v4857_v2  ;;  %v4851_v58 = vsel %vm1868_vm1, %v11273_v1, 0.0  ;;  %v11277_v22 = vpop.eup %9234 }
 0xddb   : > { %v4860_v26 = vsel %vm1868_vm1, %v11277_v22, 0.0  ;;  %v11281_v43 = vpop.eup %9236 }
 0xddc   : > { %v4854_v59 = vsel %vm1868_vm1, %v11281_v43, 0.0 }
 0xdde   : > { %4852 = vadd.xlane.f32.xlu1 %v4851_v58 }
 0xde2   : > { %4861 = vadd.xlane.f32.xlu1 %v4860_v26 }
 0xde6   : > { %4855 = vadd.xlane.f32.xlu1 %v4854_v59 }
 0xde8   : > { %4905 = vrot.lane.b32.xlu0 %v8867_v11, %s9753_s8 }
 0xdec   : > { %4903 = vrot.lane.b32.xlu0 %v8868_v55, %s9753_s8 }
 0xdf0   : > { %2497 = vrot.lane.b32.xlu0 %v7687_v20, %s9753_s8 }
 0xdf4   : > { %2501 = vrot.lane.b32.xlu0 %v7689_v34, %s9753_s8 }
 0xdf7   : > { %4907 = vrot.lane.b32.xlu1 %v8869_v46, %s9753_s8 }
 0xdf8   : > { %2924 = vrot.lane.b32.xlu0 %v7695_v24, %s9752_s18 }
 0xdfb   : > { %2499 = vrot.lane.b32.xlu1 %v7688_v18, %s9753_s8 }
 0xdfc   : > { %2928 = vrot.lane.b32.xlu0 %v7697_v5, %s9752_s18 }
 0xdff   : > { %2503 = vrot.lane.b32.xlu1 %v7690_v4, %s9753_s8  ;;  %v8870_v4 = vld [vmem:[#allocation15 + $0x38] sm:$0xff]  }
 0xe00   : > { %3351 = vrot.lane.b32.xlu0 %v7703_v52, %s9751_s10 }
 0xe03   : > { %2926 = vrot.lane.b32.xlu1 %v7696_v61, %s9752_s18 }
 0xe04   : > { %3355 = vrot.lane.b32.xlu0 %v7705_v31, %s9751_s10 }
 0xe07   : > { %2930 = vrot.lane.b32.xlu1 %v7698_v62, %s9752_s18 }
 0xe08   : > { %2505 = vrot.lane.b32.xlu0 %v7691_v44, %s9753_s8 }
 0xe0b   : > { %3353 = vrot.lane.b32.xlu1 %v7704_v39, %s9751_s10 }
 0xe0c   : > { %2509 = vrot.lane.b32.xlu0 %v7693_v7, %s9753_s8 }
 0xe0f   : > { %3357 = vrot.lane.b32.xlu1 %v7706_v36, %s9751_s10 }
 0xe10   : > { %2932 = vrot.lane.b32.xlu0 %v7699_v13, %s9752_s18 }
 0xe13   : > { %2507 = vrot.lane.b32.xlu1 %v7692_v10, %s9753_s8 }
 0xe14   : > { %2936 = vrot.lane.b32.xlu0 %v7701_v17, %s9752_s18 }
 0xe17   : > { %2511 = vrot.lane.b32.xlu1 %v7694_v30, %s9753_s8 }
 0xe18   : > { %3359 = vrot.lane.b32.xlu0 %v7707_v40, %s9751_s10  ;;  %v8872_v40 = vld [vmem:[#allocation15 + $0x28] sm:$0xff]  }
 0xe1b   : > { %2934 = vrot.lane.b32.xlu1 %v7700_v54, %s9752_s18 }
 0xe1c   : > { %3363 = vrot.lane.b32.xlu0 %v7709_v57, %s9751_s10 }
 0xe1f   : > { %2938 = vrot.lane.b32.xlu1 %v7702_v63, %s9752_s18 }
 0xe20   : > { %4164 = vrot.lane.b32.xlu0 %v7719_v32, %s9753_s8  ;;  %v8873_v32 = vld [vmem:[#allocation15 + $0x20] sm:$0xff]  }
 0xe23   : > { %3361 = vrot.lane.b32.xlu1 %v7708_v51, %s9751_s10 }
 0xe24   : > { %4168 = vrot.lane.b32.xlu0 %v7721_v19, %s9753_s8 }
 0xe27   : > { %3365 = vrot.lane.b32.xlu1 %v7710_v14, %s9751_s10 }
 0xe28   : > { %4590 = vrot.lane.b32.xlu0 %v7727_v23, %s9752_s18 }
 0xe2b   : > { %4166 = vrot.lane.b32.xlu1 %v7720_v35, %s9753_s8 }
 0xe2c   : > { %4594 = vrot.lane.b32.xlu0 %v7729_v12, %s9752_s18 }
 0xe2f   : > { %4170 = vrot.lane.b32.xlu1 %v7722_v8, %s9753_s8 }
 0xe30   : > { %4172 = vrot.lane.b32.xlu0 %v7723_v38, %s9753_s8  ;;  %v8877_v38 = vld [vmem:[#allocation15 + $0x8] sm:$0xff]  }
 0xe33   : > { %4592 = vrot.lane.b32.xlu1 %v7728_v15, %s9752_s18 }
 0xe37   : > { %4596 = vrot.lane.b32.xlu1 %v7730_v21, %s9752_s18 }
 0xe3b   : > { %4174 = vrot.lane.b32.xlu1 %v7724_v48, %s9753_s8  ;;  %v8878_v48 = vld [vmem:[#allocation15] sm:$0xff]  }
 0xe57   : > { %v4847_v29 = vpop.xlane.xlu0 %4846 }
 0xe5b   : > { %v4850_v3 = vpop.xlane.xlu1 %4849  ;;  %v4841_v33 = vpop.xlane.xlu0 %4840 }
 0xe5c   : > { %9238 = vrcp.f32 %v4841_v33 }
 0xe5f   : > { %v4844_v9 = vpop.xlane.xlu1 %4843  ;;  %v4906_v37 = vpop.permute.xlu0 %4905 }
 0xe60   : > { %9240 = vrcp.f32 %v4844_v9 }
 0xe61   : > { %9242 = vrcp.f32 %v4850_v3 }
 0xe62   : > { %9244 = vrcp.f32 %v4847_v29 }
 0xe63   : > { %v4859_v6 = vpop.xlane.xlu1 %4858  ;;  %v4904_v50 = vpop.permute.xlu0 %4903 }
 0xe67   : > { %v4853_v60 = vpop.xlane.xlu1 %4852  ;;  %v2498_v56 = vpop.permute.xlu0 %2497 }
 0xe68   : > { %2522 = vst.msk [vmem:[#allocation5] sm:$0xf] %vm2521_vm3, %v2498_v56  ;;  %9246 = vrcp.f32 %v4853_v60 }
 0xe69   : > { %v9239_v27 = vpop.eup %9238 }
 0xe6a   : > { %v4871_v26 = vmul.f32 %v9239_v27, %v11257_v16 }
 0xe6b   : > { %v4862_v2 = vpop.xlane.xlu1 %4861  ;;  %v2502_v41 = vpop.permute.xlu0 %2501 }
 0xe6c   : > { %2524 = vst.msk [vmem:[#allocation5 + $0x8] sm:$0xf] %vm2521_vm3, %v2502_v41 }
 0xe6d   : > { %v9241_v58 = vpop.eup %9240 }
 0xe6e   : > { %v4872_v59 = vmul.f32 %v9241_v58, %v11263_v28  ;;  %v9243_v16 = vpop.eup %9242 }
 0xe6f   : > { %v4856_v11 = vpop.xlane.xlu1 %4855  ;;  %v2925_v55 = vpop.permute.xlu0 %2924  ;;  %v4874_v5 = vmul.f32 %v9243_v16, %v11259_v0  ;;  %v8871_v0 = vld [vmem:[#allocation15 + $0x30] sm:$0xff]  }
 0xe70   : > { %v4879_v20 = vpack.c.bf16 %v4872_v59, %v4871_v26  ;;  %9248 = vrcp.f32 %v4856_v11  ;;  %2949 = vst.msk [vmem:[#allocation5] sm:$0xf] %vm2948_vm4, %v2925_v55  ;;  %v9245_v18 = vpop.eup %9244 }
 0xe71   : > { %9250 = vrcp.f32 %v4862_v2  ;;  %v4873_v62 = vmul.f32 %v9245_v18, %v11253_v25 }
 0xe72   : > { %8549 = vmatprep.mubr.msk.bf16.mxu0 %vm1868_vm1, %v4879_v20  ;;  %9252 = vrcp.f32 %v4859_v6 }
 0xe73   : > { %v4908_v34 = vpop.permute.xlu1 %4907  ;;  %v2929_v46 = vpop.permute.xlu0 %2928  ;;  %v4880_v39 = vpack.c.bf16 %v4874_v5, %v4873_v62  ;;  %v12545_v5 = vld [vmem:[#allocation27_spill] sm:$0xff] }
 0xe74   : > { %2951 = vst.msk [vmem:[#allocation5 + $0x8] sm:$0xf] %vm2948_vm4, %v2929_v46  ;;  %8543 = vmatprep.subr.bf16.mxu0 %v4908_v34 }
 0xe75   : > { %8544 = vmatpush3.bf16.msra.mxu0 %v4908_v34  ;;  %v9247_v52 = vpop.eup %9246 }
 0xe76   : > { %8545 = vmatprep.subr.bf16.mxu0 %v4906_v37  ;;  %v4875_v7 = vmul.f32 %v9247_v52, %v11273_v1 }
 0xe77   : > { %v2500_v28 = vpop.permute.xlu1 %2499  ;;  %v3352_v24 = vpop.permute.xlu0 %3351 }
 0xe78   : > { %2523 = vst.msk [vmem:[#allocation5 + $0x4] sm:$0xf] %vm2521_vm3, %v2500_v28 }
 0xe79   : > { %3376 = vst.msk [vmem:[#allocation5] sm:$0xf] %vm3375_vm5, %v3352_v24  ;;  %8546 = vmatpush3.bf16.msra.mxu0 %v4906_v37 }
 0xe7a   : > { %8547 = vmatprep.subr.bf16.mxu0 %v4904_v50 }
 0xe7b   : > { %v2504_v61 = vpop.permute.xlu1 %2503  ;;  %v3356_v31 = vpop.permute.xlu0 %3355 }
 0xe7c   : > { %2525 = vst.msk [vmem:[#allocation5 + $0xc] sm:$0xf] %vm2521_vm3, %v2504_v61 }
 0xe7d   : > { %3378 = vst.msk [vmem:[#allocation5 + $0x8] sm:$0xf] %vm3375_vm5, %v3356_v31  ;;  %v9249_v44 = vpop.eup %9248  ;;  %8548 = vmatpush3.bf16.msra.mxu0 %v4904_v50  ;;  %v12546_v31 = vld [vmem:[#allocation28_spill] sm:$0xff] }
 0xe7e   : > { %8557 = vmatprep.subr.bf16.mxu0 %v8870_v4  ;;  %v4876_v36 = vmul.f32 %v9249_v44, %v11281_v43  ;;  %v9251_v13 = vpop.eup %9250  ;;  %v7726_v62 = vpack.c.bf16 %v12546_v31, %v12546_v31  ;;  %v7731_v44 = vpack.c.bf16 %v11230_v53, %v11230_v53 }
 0xe7f   : > { %v2927_v10 = vpop.permute.xlu1 %2926  ;;  %v2506_v17 = vpop.permute.xlu0 %2505  ;;  %v4878_v1 = vmul.f32 %v9251_v13, %v11277_v22  ;;  %v8874_v22 = vld [vmem:[#allocation15 + $0x18] sm:$0xff]   ;;  %v7734_v13 = vpack.c.bf16 %v11232_v45, %v11232_v45 }
 0xe80   : > { %2950 = vst.msk [vmem:[#allocation5 + $0x4] sm:$0xf] %vm2948_vm4, %v2927_v10  ;;  %8550 = vmatmul.mubr.msk.bf16.vlgmr.msra.gmra.mxu0 %vm1868_vm1, %v4880_v39  ;;  %v4881_v25 = vpack.c.bf16 %v4876_v36, %v4875_v7  ;;  %v9253_v30 = vpop.eup %9252  ;;  %v7733_v7 = vpack.c.bf16 %v11228_v49, %v11228_v49  ;;  %v7732_v36 = vpack.c.bf16 %v11234_v42, %v11234_v42 }
 0xe81   : > { %2526 = vst.msk [vmem:[#allocation5 + $0x10] sm:$0xf] %vm2521_vm3, %v2506_v17  ;;  %8558 = vmatpush3.bf16.msra.mxu0 %v8870_v4  ;;  %v4877_v57 = vmul.f32 %v9253_v30, %v11269_v47  ;;  %v8876_v47 = vld [vmem:[#allocation15 + $0x10] sm:$0xff]   ;;  %v7725_v4 = vpack.c.bf16 %v12545_v5, %v12545_v5 }
 0xe82   : > { %8553 = vmatprep.mubr.msk.bf16.mxu0 %vm1868_vm1, %v4881_v25  ;;  %8559 = vmatprep.subr.bf16.mxu0 %v8871_v0 }
 0xe83   : > { %v2931_v43 = vpop.permute.xlu1 %2930  ;;  %v2510_v54 = vpop.permute.xlu0 %2509  ;;  %v4882_v63 = vpack.c.bf16 %v4878_v1, %v4877_v57 }
 0xe84   : > { %2952 = vst.msk [vmem:[#allocation5 + $0xc] sm:$0xf] %vm2948_vm4, %v2931_v43  ;;  %v11465_v43 = vld [vmem:[%s12458_s11] ss:$0 sm:$0xff] }
 0xe85   : > { %2528 = vst.msk [vmem:[#allocation5 + $0x18] sm:$0xf] %vm2521_vm3, %v2510_v54  ;;  %8560 = vmatpush3.bf16.msra.mxu0 %v8871_v0 }
 0xe86   : > { %8561 = vmatprep.subr.bf16.mxu0 %v8872_v40 }
 0xe87   : > { %v3354_v51 = vpop.permute.xlu1 %3353  ;;  %v2933_v19 = vpop.permute.xlu0 %2932 }
 0xe88   : > { %3377 = vst.msk [vmem:[#allocation5 + $0x4] sm:$0xf] %vm3375_vm5, %v3354_v51  ;;  %8554 = vmatmul.mubr.msk.bf16.gmra.mxu0 %vm1868_vm1, %v4882_v63 }
 0xe89   : > { %2953 = vst.msk [vmem:[#allocation5 + $0x10] sm:$0xf] %vm2948_vm4, %v2933_v19  ;;  %8562 = vmatpush3.bf16.msra.mxu0 %v8872_v40 }
 0xe8a   : > { %8563 = vmatprep.subr.bf16.mxu0 %v8873_v32 }
 0xe8b   : > { %v3358_v14 = vpop.permute.xlu1 %3357  ;;  %v2937_v23 = vpop.permute.xlu0 %2936 }
 0xe8c   : > { %3379 = vst.msk [vmem:[#allocation5 + $0xc] sm:$0xf] %vm3375_vm5, %v3358_v14 }
 0xe8d   : > { %2955 = vst.msk [vmem:[#allocation5 + $0x18] sm:$0xf] %vm2948_vm4, %v2937_v23  ;;  %8564 = vmatpush3.bf16.msra.mxu0 %v8873_v32  ;;  %v9429_v32 = vld [vmem:[%s10052_s21] sm:$0xff] }
 0xe8e   : > { %8565 = vmatprep.subr.bf16.mxu0 %v8874_v22 }
 0xe8f   : > { %v2508_v35 = vpop.permute.xlu1 %2507  ;;  %v3360_v12 = vpop.permute.xlu0 %3359  ;;  %v8875_v8 = vld [vmem:[#allocation5] sm:$0xff]  }
 0xe90   : > { %2527 = vst.msk [vmem:[#allocation5 + $0x14] sm:$0xf] %vm2521_vm3, %v2508_v35  ;;  %8573 = vmatprep.mubr.bf16.mxu0 %v8875_v8 }
 0xe91   : > { %3380 = vst.msk [vmem:[#allocation5 + $0x10] sm:$0xf] %vm3375_vm5, %v3360_v12  ;;  %8566 = vmatpush3.bf16.msra.mxu0 %v8874_v22  ;;  %v9430_v22 = vld [vmem:[%s10052_s21 + $0x10] sm:$0xff]  ;;  %v9431_v12 = vld [vmem:[%s10052_s21 + $0x18] sm:$0xff] }
 0xe92   : > { %8567 = vmatprep.subr.bf16.mxu0 %v8876_v47 }
 0xe93   : > { %v2512_v15 = vpop.permute.xlu1 %2511  ;;  %v3364_v21 = vpop.permute.xlu0 %3363  ;;  %v8879_v37 = vld [vmem:[#allocation5 + $0x8] sm:$0xff]  }
 0xe94   : > { %2529 = vst.msk [vmem:[#allocation5 + $0x1c] sm:$0xf] %vm2521_vm3, %v2512_v15  ;;  %v9432_v15 = vld [vmem:[%s10052_s21 + $0x8] sm:$0xff] }
 0xe95   : > { %3382 = vst.msk [vmem:[#allocation5 + $0x18] sm:$0xf] %vm3375_vm5, %v3364_v21  ;;  %8568 = vmatpush3.bf16.msra.mxu0 %v8876_v47 }
 0xe96   : > { %8569 = vmatprep.subr.bf16.mxu0 %v8877_v38 }
 0xe97   : > { %v2935_v29 = vpop.permute.xlu1 %2934  ;;  %v4165_v3 = vpop.permute.xlu0 %4164 }
 0xe98   : > { %2954 = vst.msk [vmem:[#allocation5 + $0x14] sm:$0xf] %vm2948_vm4, %v2935_v29 }
 0xe99   : > { %4188 = vst.msk [vmem:[#allocation5 + $0x20] sm:$0xf] %vm2521_vm3, %v4165_v3  ;;  %8570 = vmatpush3.bf16.msra.mxu0 %v8877_v38  ;;  %v9433_v3 = vld [vmem:[%s10052_s21 + $0x20] sm:$0xff] }
 0xe9a   : > { %8571 = vmatprep.subr.bf16.mxu0 %v8878_v48 }
 0xe9b   : > { %v2939_v33 = vpop.permute.xlu1 %2938  ;;  %v4169_v9 = vpop.permute.xlu0 %4168 }
 0xe9c   : > { %2956 = vst.msk [vmem:[#allocation5 + $0x1c] sm:$0xf] %vm2948_vm4, %v2939_v33 }
 0xe9d   : > { %4190 = vst.msk [vmem:[#allocation5 + $0x28] sm:$0xf] %vm2521_vm3, %v4169_v9  ;;  %8572 = vmatpush3.bf16.msra.mxu0 %v8878_v48 }
 0xe9f   : > { %v3362_v6 = vpop.permute.xlu1 %3361  ;;  %v4591_v50 = vpop.permute.xlu0 %4590 }
 0xea0   : > { %3381 = vst.msk [vmem:[#allocation5 + $0x14] sm:$0xf] %vm3375_vm5, %v3362_v6  ;;  %8574 = vmatmul.mubr.bf16.vlgmr.msra.gmra.mxu0 %v8879_v37  ;;  %v9434_v37 = vld [vmem:[%s10052_s21 + $0x28] sm:$0xff] }
 0xea1   : > { %4614 = vst.msk [vmem:[#allocation5 + $0x20] sm:$0xf] %vm2948_vm4, %v4591_v50  ;;  %v9435_v50 = vld [vmem:[%s10052_s21 + $0x30] sm:$0xff] }
 0xea3   : > { %v3366_v60 = vpop.permute.xlu1 %3365  ;;  %v4595_v56 = vpop.permute.xlu0 %4594 }
 0xea4   : > { %3383 = vst.msk [vmem:[#allocation5 + $0x1c] sm:$0xf] %vm3375_vm5, %v3366_v60 }
 0xea5   : > { %4616 = vst.msk [vmem:[#allocation5 + $0x28] sm:$0xf] %vm2948_vm4, %v4595_v56  ;;  %v9436_v56 = vld [vmem:[%s10052_s21 + $0x38] sm:$0xff] }
 0xea7   : > { %v4167_v27 = vpop.permute.xlu1 %4166  ;;  %v4173_v2 = vpop.permute.xlu0 %4172  ;;  %v8880_v41 = vld [vmem:[#allocation5 + $0x10] sm:$0xff]  }
 0xea8   : > { %4189 = vst.msk [vmem:[#allocation5 + $0x24] sm:$0xf] %vm2521_vm3, %v4167_v27  ;;  %4192 = vst.msk [vmem:[#allocation5 + $0x30] sm:$0xf] %vm2521_vm3, %v4173_v2  ;;  %8577 = vmatprep.mubr.bf16.mxu0 %v8880_v41 }
 0xeab   : > { %v4171_v58 = vpop.permute.xlu1 %4170  ;;  %v8881_v26 = vld [vmem:[#allocation5 + $0x18] sm:$0xff]  }
 0xeac   : > { %4191 = vst.msk [vmem:[#allocation5 + $0x2c] sm:$0xf] %vm2521_vm3, %v4171_v58  ;;  %8578 = vmatmul.mubr.bf16.gmra.mxu0 %v8881_v26 }
 0xeaf   : > { %v4593_v59 = vpop.permute.xlu1 %4592 }
 0xeb0   : > { %4615 = vst.msk [vmem:[#allocation5 + $0x24] sm:$0xf] %vm2948_vm4, %v4593_v59 }
 0xeb3   : > { %v4597_v11 = vpop.permute.xlu1 %4596 }
 0xeb4   : > { %4617 = vst.msk [vmem:[#allocation5 + $0x2c] sm:$0xf] %vm2948_vm4, %v4597_v11 }
 0xeb7   : > { %v4175_v55 = vpop.permute.xlu1 %4174 }
 0xeb8   : > { %4193 = vst.msk [vmem:[#allocation5 + $0x34] sm:$0xf] %vm2521_vm3, %v4175_v55 }
 0xf40   : > { %v8551_v20 = vpop.f32.mrf.mxu0 }
 0xf41   : > { %v7737_v34 = vpack.c.bf16 %v8551_v20, %v8551_v20 }
 0xf42   : > { %v4961_v46 = vpop.f32.mrf.mxu0 }
 0xf43   : > { %5020 = vrot.lane.b32.xlu0 %v7737_v34, %s9751_s10  ;;  %v7735_v28 = vpack.c.bf16 %v4961_v46, %v4961_v46 }
 0xf44   : > { %v8552_v16 = vpop.f32.mrf.mxu0 }
 0xf45   : > { %v7738_v24 = vpack.c.bf16 %v8552_v16, %v8552_v16 }
 0xf46   : > { %v4964_v18 = vpop.f32.mrf.mxu0 }
 0xf47   : > { %5016 = vrot.lane.b32.xlu0 %v7735_v28, %s9751_s10  ;;  %5022 = vrot.lane.b32.xlu1 %v7738_v24, %s9751_s10  ;;  %v7736_v52 = vpack.c.bf16 %v4964_v18, %v4964_v18 }
 0xf48   : > { %v8555_v61 = vpop.f32.mrf.mxu0 }
 0xf49   : > { %v7741_v17 = vpack.c.bf16 %v8555_v61, %v8555_v61 }
 0xf4a   : > { %v4977_v39 = vpop.f32.mrf.mxu0 }
 0xf4b   : > { %4176 = vrot.lane.b32.xlu0 %v7725_v4, %s9753_s8  ;;  %5018 = vrot.lane.b32.xlu1 %v7736_v52, %s9751_s10  ;;  %v7739_v53 = vpack.c.bf16 %v4977_v39, %v4977_v39 }
 0xf4c   : > { %v8556_v0 = vpop.f32.mrf.mxu0 }
 0xf4d   : > { %v7742_v42 = vpack.c.bf16 %v8556_v0, %v8556_v0 }
 0xf4e   : > { %v4980_v10 = vpop.f32.mrf.mxu0 }
 0xf4f   : > { %4598 = vrot.lane.b32.xlu0 %v7731_v44, %s9752_s18  ;;  %4178 = vrot.lane.b32.xlu1 %v7726_v62, %s9753_s8  ;;  %v7740_v49 = vpack.c.bf16 %v4980_v10, %v4980_v10  ;;  %s12583_s8 = sld [smem:[#allocation59_spill]] }
 0xf53   : > { %4602 = vrot.lane.b32.xlu0 %v7733_v7, %s9752_s18  ;;  %4600 = vrot.lane.b32.xlu1 %v7732_v36, %s9752_s18  ;;  %v9437_v36 = vld [vmem:[%s10052_s21 + $0x40] sm:$0xff] }
 0xf57   : > { %4604 = vrot.lane.b32.xlu1 %v7734_v13, %s9752_s18  ;;  %5024 = vrot.lane.b32.xlu0 %v7739_v53, %s9751_s10  ;;  %s12564_s18 = sld [smem:[#allocation57_spill]] }
 0xf5b   : > { %5028 = vrot.lane.b32.xlu0 %v7741_v17, %s9751_s10  ;;  %5026 = vrot.lane.b32.xlu1 %v7740_v49, %s9751_s10  ;;  %v9438_v17 = vld [vmem:[%s10052_s21 + $0x50] sm:$0xff] }
 0xf5f   : > { %5030 = vrot.lane.b32.xlu1 %v7742_v42, %s9751_s10  ;;  %s9659_s10 = sshll.u32 %s9755_s1, 4  ;;  %s9660_s10 = int_to_ptr.vmem [resolvable:$false] %s9659_s10 }
 0xf60   : > { %v8575_v25 = vpop.f32.mrf.mxu0  ;;  %p9662_p1 = scmp.lt.s32.totalorder %s12402_s0, %s9660_s10 }
 0xf61   : > { %v5226_v63 = vadd.f32 %v8575_v25, %v11465_v43  ;;  %v9439_v25 = vld [vmem:[%s10052_s21 + $0x48] sm:$0xff] }
 0xf62   : > { %v5217_v30 = vpop.f32.mrf.mxu0 }
 0xf63   : > { %v5218_v54 = vadd.f32 %v11465_v43, %v5217_v30  ;;  %v11474_v14 = vadd.f32 %v9430_v22, %v5226_v63 }
 0xf64   : > { %v8576_v45 = vpop.f32.mrf.mxu0 }
 0xf65   : > { %v11470_v51 = vadd.f32 %v9429_v32, %v5218_v54  ;;  %12548 = vst [vmem:[#allocation28_spill] sm:$0xff] %v11474_v14  ;;  %v5229_v23 = vadd.f32 %v8576_v45, %v11465_v43  ;;  %v9440_v45 = vld [vmem:[%s10052_s21 + $0x58] sm:$0xff] }
 0xf66   : > { %v5220_v1 = vpop.f32.mrf.mxu0 }
 0xf67   : > { %12547 = vst [vmem:[#allocation27_spill] sm:$0xff] %v11470_v51  ;;  %v5221_v47 = vadd.f32 %v11465_v43, %v5220_v1  ;;  %v11480_v8 = vadd.f32 %v9431_v12, %v5229_v23 }
 0xf69   : > { %12549 = vst [vmem:[#allocation29_spill] sm:$0xff] %v11480_v8  ;;  %v11484_v21 = vadd.f32 %v9432_v15, %v5221_v47  ;;  %v9441_v47 = vld [vmem:[%s10052_s21 + $0x60] sm:$0xff] }
 0xf6b   : > { %12550 = vst [vmem:[#allocation30_spill] sm:$0xff] %v11484_v21 }
 0xf6c   : > { %v8579_v40 = vpop.f32.mrf.mxu0 }
 0xf6d   : > { %v5242_v29 = vadd.f32 %v8579_v40, %v11465_v43 }
 0xf6e   : > { %v5233_v57 = vpop.f32.mrf.mxu0 }
 0xf6f   : > { %v5234_v38 = vadd.f32 %v11465_v43, %v5233_v57  ;;  %v11500_v60 = vadd.f32 %v9435_v50, %v5242_v29 }
 0xf70   : > { %v8580_v19 = vpop.f32.mrf.mxu0 }
 0xf71   : > { %v11491_v33 = vadd.f32 %v9433_v3, %v5234_v38  ;;  %v5245_v9 = vadd.f32 %v8580_v19, %v11465_v43  ;;  %12553 = vst [vmem:[#allocation33_spill] sm:$0xff] %v11500_v60 }
 0xf72   : > { %v5236_v35 = vpop.f32.mrf.mxu0 }
 0xf73   : > { %v5237_v48 = vadd.f32 %v11465_v43, %v5236_v35  ;;  %12551 = vst [vmem:[#allocation31_spill] sm:$0xff] %v11491_v33  ;;  %v11503_v27 = vadd.f32 %v9436_v56, %v5245_v9 }
 0xf75   : > { %v11495_v6 = vadd.f32 %v9434_v37, %v5237_v48  ;;  %12554 = vst [vmem:[#allocation34_spill] sm:$0xff] %v11503_v27  ;;  %v9442_v37 = vld [vmem:[%s10052_s21 + $0x70] sm:$0xff] }
 0xf77   : > { %12552 = vst [vmem:[#allocation32_spill] sm:$0xff] %v11495_v6 }
 0xf7a   : > { %5298 = vadd.xlane.f32.xlu0 %v11470_v51 }
 0xf7e   : > { %5302 = vadd.xlane.f32.xlu0 %v11474_v14 }
 0xf82   : > { %5304 = vadd.xlane.f32.xlu0 %v11480_v8 }
 0xf83   : > { %5300 = vadd.xlane.f32.xlu1 %v11484_v21 }
 0xf86   : > { %5306 = vadd.xlane.f32.xlu0 %v11491_v33 }
 0xf87   : > { %5308 = vadd.xlane.f32.xlu1 %v11495_v6 }
 0xf8a   : > { %5310 = vadd.xlane.f32.xlu0 %v11500_v60 }
 0xf8b   : > { %5312 = vadd.xlane.f32.xlu1 %v11503_v27 }
 0xfb5   : > { %v5021_v2 = vpop.permute.xlu0 %5020 }
 0xfb6   : > { %5042 = vst.msk [vmem:[#allocation5 + $0x28] sm:$0xf] %vm3375_vm5, %v5021_v2  ;;  %v9443_v2 = vld [vmem:[%s10052_s21 + $0x68] sm:$0xff] }
 0xfb9   : > { %v5023_v41 = vpop.permute.xlu1 %5022  ;;  %v5017_v58 = vpop.permute.xlu0 %5016 }
 0xfba   : > { %5043 = vst.msk [vmem:[#allocation5 + $0x2c] sm:$0xf] %vm3375_vm5, %v5023_v41  ;;  %5040 = vst.msk [vmem:[#allocation5 + $0x20] sm:$0xf] %vm3375_vm5, %v5017_v58 }
 0xfbd   : > { %v5019_v26 = vpop.permute.xlu1 %5018  ;;  %v4177_v59 = vpop.permute.xlu0 %4176 }
 0xfbe   : > { %5041 = vst.msk [vmem:[#allocation5 + $0x24] sm:$0xf] %vm3375_vm5, %v5019_v26 }
 0xfbf   : > { %4194 = vst.msk [vmem:[#allocation5 + $0x38] sm:$0xf] %vm2521_vm3, %v4177_v59 }
 0xfc1   : > { %v4179_v11 = vpop.permute.xlu1 %4178  ;;  %v4599_v55 = vpop.permute.xlu0 %4598  ;;  %v8883_v16 = vld [vmem:[#allocation5 + $0x28] sm:$0xff]  }
 0xfc2   : > { %4195 = vst.msk [vmem:[#allocation5 + $0x3c] sm:$0xf] %vm2521_vm3, %v4179_v11 }
 0xfc3   : > { %4618 = vst.msk [vmem:[#allocation5 + $0x30] sm:$0xf] %vm2948_vm4, %v4599_v55 }
 0xfc5   : > { %v4601_v20 = vpop.permute.xlu1 %4600  ;;  %v4603_v34 = vpop.permute.xlu0 %4602  ;;  %v8882_v46 = vld [vmem:[#allocation5 + $0x20] sm:$0xff]  }
 0xfc6   : > { %4619 = vst.msk [vmem:[#allocation5 + $0x34] sm:$0xf] %vm2948_vm4, %v4601_v20  ;;  %4620 = vst.msk [vmem:[#allocation5 + $0x38] sm:$0xf] %vm2948_vm4, %v4603_v34  ;;  %8581 = vmatprep.mubr.bf16.mxu0 %v8882_v46  ;;  %v9444_v20 = vld [vmem:[%s10052_s21 + $0x78] sm:$0xff] }
 0xfc7   : > { %8582 = vmatmul.mubr.bf16.gmra.mxu0 %v8883_v16 }
 0xfc9   : > { %v4605_v28 = vpop.permute.xlu1 %4604  ;;  %v5025_v24 = vpop.permute.xlu0 %5024 }
 0xfca   : > { %4621 = vst.msk [vmem:[#allocation5 + $0x3c] sm:$0xf] %vm2948_vm4, %v4605_v28 }
 0xfcb   : > { %5044 = vst.msk [vmem:[#allocation5 + $0x30] sm:$0xf] %vm3375_vm5, %v5025_v24 }
 0xfcd   : > { %v5027_v18 = vpop.permute.xlu1 %5026  ;;  %v5029_v5 = vpop.permute.xlu0 %5028 }
 0xfce   : > { %5045 = vst.msk [vmem:[#allocation5 + $0x34] sm:$0xf] %vm3375_vm5, %v5027_v18  ;;  %5046 = vst.msk [vmem:[#allocation5 + $0x38] sm:$0xf] %vm3375_vm5, %v5029_v5 }
 0xfd1   : > { %v5031_v4 = vpop.permute.xlu1 %5030 }
 0xfd2   : > { %5047 = vst.msk [vmem:[#allocation5 + $0x3c] sm:$0xf] %vm3375_vm5, %v5031_v4 }
 0xfd5   : > { %v8884_v52 = vld [vmem:[#allocation5 + $0x30] sm:$0xff]  }
 0xfd6   : > { %8585 = vmatprep.mubr.bf16.mxu0 %v8884_v52 }
 0xfd9   : > { %v8885_v61 = vld [vmem:[#allocation5 + $0x38] sm:$0xff]  }
 0xfda   : > { %8586 = vmatmul.mubr.bf16.gmra.mxu0 %v8885_v61 }
0x1003   : > { %v5299_v10 = vpop.xlane.xlu0 %5298 }
0x1004   : > { %v5330_v19 = vmul.f32 0.0078125, %v5299_v10 }
0x1006   : > { %v11549_v48 = vsub.f32 %v11470_v51, %v5330_v19  ;;  %v8901_v19 = vld [vmem:[#allocation17 + $0xa8] ss:$16 sps:$4 sm:$0xff]  }
0x1007   : > { %v5303_v40 = vpop.xlane.xlu0 %5302 }
0x1008   : > { %v5332_v29 = vmul.f32 0.0078125, %v5303_v40  ;;  %v8894_v40 = vld [vmem:[#allocation17 + $0xc4] ss:$16 sps:$4 sm:$0xff]  }
0x100a   : > { %v11561_v58 = vsub.f32 %v11474_v14, %v5332_v29  ;;  %v8915_v29 = vld [vmem:[#allocation17 + $0x6c] ss:$16 sps:$4 sm:$0xff]  }
0x100b   : > { %v5305_v57 = vpop.xlane.xlu0 %5304 }
0x100c   : > { %v5301_v12 = vpop.xlane.xlu1 %5300  ;;  %v5333_v26 = vmul.f32 0.0078125, %v5305_v57  ;;  %v5364_v28 = vmul.f32 %v11561_v58, %v11561_v58  ;;  %v8897_v57 = vld [vmem:[#allocation17 + $0xcc] ss:$16 sps:$4 sm:$0xff]  }
0x100d   : > { %v5331_v9 = vmul.f32 0.0078125, %v5301_v12  ;;  %v8904_v12 = vld [vmem:[#allocation17 + $0x80] ss:$16 sps:$4 sm:$0xff]  }
0x100e   : > { %v11573_v16 = vsub.f32 %v11480_v8, %v5333_v26  ;;  %v8916_v26 = vld [vmem:[#allocation17 + $0x40] ss:$16 sps:$4 sm:$0xff]  }
0x100f   : > { %v5307_v3 = vpop.xlane.xlu0 %5306  ;;  %v11564_v11 = vsub.f32 %v11484_v21, %v5331_v9  ;;  %v8913_v9 = vld [vmem:[#allocation17 + $0x68] ss:$16 sps:$4 sm:$0xff]  }
0x1010   : > { %v5309_v59 = vpop.xlane.xlu1 %5308  ;;  %v5334_v55 = vmul.f32 0.0078125, %v5307_v3  ;;  %v5365_v61 = vmul.f32 %v11573_v16, %v11573_v16  ;;  %v8910_v3 = vld [vmem:[#allocation17 + $0x60] ss:$16 sps:$4 sm:$0xff]  }
0x1011   : > { %v5335_v18 = vmul.f32 0.0078125, %v5309_v59  ;;  %v5363_v4 = vmul.f32 %v11564_v11, %v11564_v11  ;;  %v8919_v59 = vld [vmem:[#allocation17 + $0x48] ss:$16 sps:$4 sm:$0xff]  }
0x1012   : > { %v11578_v24 = vsub.f32 %v11491_v33, %v5334_v55  ;;  %v8924_v55 = vld [vmem:[#allocation17 + $0x24] ss:$16 sps:$4 sm:$0xff]  }
0x1013   : > { %v5311_v46 = vpop.xlane.xlu0 %5310 }
0x1014   : > { %v5336_v5 = vmul.f32 0.0078125, %v5311_v46  ;;  %v5313_v52 = vpop.xlane.xlu1 %5312  ;;  %v8925_v46 = vld [vmem:[#allocation17 + $0x28] ss:$16 sps:$4 sm:$0xff]  }
0x1087   : > { %v8583_v31 = vpop.f32.mrf.mxu0 }
0x1088   : > { %v5258_v7 = vadd.f32 %v8583_v31, %v11465_v43  ;;  %v11585_v31 = vsub.f32 %v11495_v6, %v5335_v18  ;;  %v8933_v18 = vld [vmem:[#allocation17 + $0xc] ss:$16 sps:$4 sm:$0xff]  }
0x1089   : > { %v5249_v62 = vpop.f32.mrf.mxu0 }
0x108a   : > { %v5250_v44 = vadd.f32 %v11465_v43, %v5249_v62  ;;  %v11529_v49 = vadd.f32 %v9438_v17, %v5258_v7  ;;  %v11588_v62 = vsub.f32 %v11500_v60, %v5336_v5  ;;  %v8886_v7 = vld [vmem:[#allocation17 + $0xe0] ss:$16 sps:$4 sm:$0xff]   ;;  %v5367_v17 = vmul.f32 %v11585_v31, %v11585_v31 }
0x108b   : > { %v8584_v39 = vpop.f32.mrf.mxu0  ;;  %v8928_v5 = vld [vmem:[#allocation17] ss:$16 sps:$4 sm:$0xff]  }
0x108c   : > { %v11524_v0 = vadd.f32 %v9437_v36, %v5250_v44  ;;  %12556 = vst [vmem:[#allocation36_spill] sm:$0xff] %v11529_v49  ;;  %v5261_v42 = vadd.f32 %v8584_v39, %v11465_v43  ;;  %v5337_v44 = vmul.f32 0.0078125, %v5313_v52  ;;  %v5366_v39 = vmul.f32 %v11578_v24, %v11578_v24  ;;  %v8888_v36 = vld [vmem:[#allocation17 + $0xe4] ss:$16 sps:$4 sm:$0xff]  }
0x108d   : > { %v5252_v13 = vpop.f32.mrf.mxu0  ;;  %5740 = vmatprep.subr.bf16.mxu1 %v8888_v36 }
0x108e   : > { %12555 = vst [vmem:[#allocation35_spill] sm:$0xff] %v11524_v0  ;;  %v5253_v53 = vadd.f32 %v11465_v43, %v5252_v13  ;;  %5314 = vadd.xlane.f32.xlu0 %v11524_v0  ;;  %v11538_v1 = vadd.f32 %v9440_v45, %v5261_v42  ;;  %v8889_v13 = vld [vmem:[#allocation17 + $0xe8] ss:$16 sps:$4 sm:$0xff]   ;;  %v11593_v10 = vsub.f32 %v11503_v27, %v5337_v44  ;;  %v8892_v45 = vld [vmem:[#allocation17 + $0xc0] ss:$16 sps:$4 sm:$0xff]  }
0x108f   : > { %v5368_v42 = vmul.f32 %v11588_v62, %v11588_v62  ;;  %5741 = vmatpush1.bf16.msra.mxu1 %v8886_v7 }
0x1090   : > { %v11533_v30 = vadd.f32 %v9439_v25, %v5253_v53  ;;  %12558 = vst [vmem:[#allocation38_spill] sm:$0xff] %v11538_v1  ;;  %v8891_v53 = vld [vmem:[#allocation17 + $0xec] ss:$16 sps:$4 sm:$0xff]   ;;  %v5369_v25 = vmul.f32 %v11593_v10, %v11593_v10  ;;  %5742 = vmatprep.subr.bf16.mxu1 %v8894_v40 }
0x1091   : > { %5853 = vmatprep.subr.bf16.mxu0 %v8891_v53 }
0x1092   : > { %12557 = vst [vmem:[#allocation37_spill] sm:$0xff] %v11533_v30  ;;  %5316 = vadd.xlane.f32.xlu1 %v11533_v30  ;;  %5318 = vadd.xlane.f32.xlu0 %v11529_v49 }
0x1093   : > { %5854 = vmatpush1.bf16.msra.mxu0 %v8889_v13  ;;  %5743 = vmatpush1.bf16.msra.mxu1 %v8892_v45 }
0x1094   : > { %5855 = vmatprep.subr.bf16.mxu0 %v8897_v57 }
0x1096   : > { %5320 = vadd.xlane.f32.xlu1 %v11538_v1 }
0x109a   : > { %v8587_v54 = vpop.f32.mrf.mxu0 }
0x109b   : > { %v5274_v23 = vadd.f32 %v8587_v54, %v11465_v43  ;;  %v8895_v54 = vld [vmem:[#allocation17 + $0xc8] ss:$16 sps:$4 sm:$0xff]  }
0x109c   : > { %v5265_v63 = vpop.f32.mrf.mxu0  ;;  %5856 = vmatpush1.bf16.msra.mxu0 %v8895_v54 }
0x109d   : > { %v5266_v32 = vadd.f32 %v11465_v43, %v5265_v63  ;;  %v11552_v50 = vadd.f32 %v9442_v37, %v5274_v23  ;;  %v8898_v63 = vld [vmem:[#allocation17 + $0xa0] ss:$16 sps:$4 sm:$0xff]   ;;  %v8906_v23 = vld [vmem:[#allocation17 + $0x84] ss:$16 sps:$4 sm:$0xff]  }
0x109e   : > { %v8588_v22 = vpop.f32.mrf.mxu0  ;;  %v8918_v37 = vld [vmem:[#allocation17 + $0x44] ss:$16 sps:$4 sm:$0xff]  }
0x109f   : > { %v11544_v35 = vadd.f32 %v9441_v47, %v5266_v32  ;;  %12560 = vst [vmem:[#allocation40_spill] sm:$0xff] %v11552_v50  ;;  %v5277_v56 = vadd.f32 %v8588_v22, %v11465_v43  ;;  %v8900_v32 = vld [vmem:[#allocation17 + $0xa4] ss:$16 sps:$4 sm:$0xff]   ;;  %v8903_v22 = vld [vmem:[#allocation17 + $0xac] ss:$16 sps:$4 sm:$0xff]  }
0x10a0   : > { %v5268_v38 = vpop.f32.mrf.mxu0  ;;  %5744 = vmatprep.subr.bf16.mxu1 %v8900_v32  ;;  %v8909_v47 = vld [vmem:[#allocation17 + $0x8c] ss:$16 sps:$4 sm:$0xff]   ;;  %5857 = vmatprep.subr.bf16.mxu0 %v8903_v22 }
0x10a1   : > { %12559 = vst [vmem:[#allocation39_spill] sm:$0xff] %v11544_v35  ;;  %v5269_v15 = vadd.f32 %v11465_v43, %v5268_v38  ;;  %5322 = vadd.xlane.f32.xlu0 %v11544_v35  ;;  %v11567_v34 = vadd.f32 %v9444_v20, %v5277_v56  ;;  %v5362_v43 = vmul.f32 %v11549_v48, %v11549_v48  ;;  %v8907_v38 = vld [vmem:[#allocation17 + $0x88] ss:$16 sps:$4 sm:$0xff]   ;;  %v8921_v56 = vld [vmem:[#allocation17 + $0x4c] ss:$16 sps:$4 sm:$0xff]  }
0x10a2   : > { %5745 = vmatpush1.bf16.msra.mxu1 %v8898_v63  ;;  %5858 = vmatpush1.bf16.msra.mxu0 %v8901_v19  ;;  %v8927_v20 = vld [vmem:[#allocation17 + $0x2c] ss:$16 sps:$4 sm:$0xff]  }
0x10a3   : > { %v11556_v41 = vadd.f32 %v9443_v2, %v5269_v15  ;;  %12562 = vst [vmem:[#allocation42_spill] sm:$0xff] %v11567_v34  ;;  %5746 = vmatprep.subr.bf16.mxu1 %v8906_v23  ;;  %v8912_v15 = vld [vmem:[#allocation17 + $0x64] ss:$16 sps:$4 sm:$0xff]   ;;  %5859 = vmatprep.subr.bf16.mxu0 %v8909_v47  ;;  %v9754_v2 = vmov 0  }
0x10a4   : > { %5772 = vmatprep.mubr.bf16.mxu1 %v9754_v2  ;;  %5885 = vmatprep.mubr.bf16.mxu0 %v9754_v2 }
0x10a5   : > { %12561 = vst [vmem:[#allocation41_spill] sm:$0xff] %v11556_v41  ;;  %5324 = vadd.xlane.f32.xlu1 %v11556_v41  ;;  %5326 = vadd.xlane.f32.xlu0 %v11552_v50 }
0x10a6   : > { %5747 = vmatpush1.bf16.msra.mxu1 %v8904_v12  ;;  %5860 = vmatpush1.bf16.msra.mxu0 %v8907_v38 }
0x10a7   : > { %5748 = vmatprep.subr.bf16.mxu1 %v8912_v15  ;;  %5861 = vmatprep.subr.bf16.mxu0 %v8915_v29 }
0x10a9   : > { %5328 = vadd.xlane.f32.xlu1 %v11567_v34  ;;  %5378 = vadd.xlane.f32.xlu0 %v5362_v43  ;;  %v8922_v43 = vld [vmem:[#allocation17 + $0x20] ss:$16 sps:$4 sm:$0xff]  }
0x10aa   : > { %5749 = vmatpush1.bf16.msra.mxu1 %v8910_v3  ;;  %5862 = vmatpush1.bf16.msra.mxu0 %v8913_v9 }
0x10ab   : > { %5750 = vmatprep.subr.bf16.mxu1 %v8918_v37  ;;  %5863 = vmatprep.subr.bf16.mxu0 %v8921_v56 }
0x10ad   : > { %5380 = vadd.xlane.f32.xlu1 %v5363_v4  ;;  %5382 = vadd.xlane.f32.xlu0 %v5364_v28  ;;  %v8930_v28 = vld [vmem:[#allocation17 + $0x4] ss:$16 sps:$4 sm:$0xff]   ;;  %v8931_v4 = vld [vmem:[#allocation17 + $0x8] ss:$16 sps:$4 sm:$0xff]  }
0x10ae   : > { %5751 = vmatpush1.bf16.msra.mxu1 %v8916_v26  ;;  %5864 = vmatpush1.bf16.msra.mxu0 %v8919_v59 }
0x10af   : > { %5752 = vmatprep.subr.bf16.mxu1 %v8924_v55  ;;  %5865 = vmatprep.subr.bf16.mxu0 %v8927_v20 }
0x10b1   : > { %5384 = vadd.xlane.f32.xlu1 %v5365_v61  ;;  %5386 = vadd.xlane.f32.xlu0 %v5366_v39 }
0x10b2   : > { %5753 = vmatpush1.bf16.msra.mxu1 %v8922_v43  ;;  %5866 = vmatpush1.bf16.msra.mxu0 %v8925_v46 }
0x10b3   : > { %5754 = vmatprep.subr.bf16.mxu1 %v8930_v28  ;;  %5867 = vmatprep.subr.bf16.mxu0 %v8933_v18 }
0x10b5   : > { %5388 = vadd.xlane.f32.xlu1 %v5367_v17  ;;  %5390 = vadd.xlane.f32.xlu0 %v5368_v42 }
0x10b6   : > { %5755 = vmatpush1.bf16.msra.mxu1 %v8928_v5  ;;  %5868 = vmatpush1.bf16.msra.mxu0 %v8931_v4 }
0x10b9   : > { %5392 = vadd.xlane.f32.xlu1 %v5369_v25 }
0x1117   : > { %v5315_v52 = vpop.xlane.xlu0 %5314 }
0x1118   : > { %v5338_v61 = vmul.f32 0.0078125, %v5315_v52 }
0x111a   : > { %v11604_v44 = vsub.f32 %v11524_v0, %v5338_v61 }
0x111b   : > { %v5317_v39 = vpop.xlane.xlu1 %5316  ;;  %v5319_v7 = vpop.xlane.xlu0 %5318 }
0x111c   : > { %v5339_v36 = vmul.f32 0.0078125, %v5317_v39  ;;  %v5340_v13 = vmul.f32 0.0078125, %v5319_v7  ;;  %v5370_v53 = vmul.f32 %v11604_v44, %v11604_v44 }
0x111e   : > { %v11609_v17 = vsub.f32 %v11533_v30, %v5339_v36  ;;  %v11612_v42 = vsub.f32 %v11529_v49, %v5340_v13  ;;  %5394 = vadd.xlane.f32.xlu0 %v5370_v53 }
0x111f   : > { %v5321_v25 = vpop.xlane.xlu1 %5320 }
0x1120   : > { %v5341_v45 = vmul.f32 0.0078125, %v5321_v25  ;;  %v5371_v40 = vmul.f32 %v11609_v17, %v11609_v17  ;;  %v5372_v54 = vmul.f32 %v11612_v42, %v11612_v42 }
0x1122   : > { %v11619_v57 = vsub.f32 %v11538_v1, %v5341_v45  ;;  %5396 = vadd.xlane.f32.xlu1 %v5371_v40  ;;  %5398 = vadd.xlane.f32.xlu0 %v5372_v54 }
0x1124   : > { %v5373_v63 = vmul.f32 %v11619_v57, %v11619_v57 }
0x1126   : > { %5400 = vadd.xlane.f32.xlu1 %v5373_v63 }
0x112a   : > { %v5323_v32 = vpop.xlane.xlu0 %5322 }
0x112b   : > { %v5342_v19 = vmul.f32 0.0078125, %v5323_v32 }
0x112d   : > { %v11624_v22 = vsub.f32 %v11544_v35, %v5342_v19 }
0x112e   : > { %v5325_v23 = vpop.xlane.xlu1 %5324  ;;  %v5327_v47 = vpop.xlane.xlu0 %5326 }
0x112f   : > { %v5343_v12 = vmul.f32 0.0078125, %v5325_v23  ;;  %v5344_v38 = vmul.f32 0.0078125, %v5327_v47  ;;  %v5374_v15 = vmul.f32 %v11624_v22, %v11624_v22 }
0x1131   : > { %v11629_v29 = vsub.f32 %v11556_v41, %v5343_v12  ;;  %v11632_v3 = vsub.f32 %v11552_v50, %v5344_v38  ;;  %5402 = vadd.xlane.f32.xlu0 %v5374_v15  ;;  %v11647_v38 = vld [vmem:[%s12459_s12] ss:$0 sm:$0xff] }
0x1132   : > { %v5329_v9 = vpop.xlane.xlu1 %5328  ;;  %v5379_v37 = vpop.xlane.xlu0 %5378 }
0x1133   : > { %v5345_v56 = vmul.f32 0.0078125, %v5329_v9  ;;  %v5410_v26 = vmul.f32 0.0078125, %v5379_v37  ;;  %v5375_v59 = vmul.f32 %v11629_v29, %v11629_v29  ;;  %v5376_v55 = vmul.f32 %v11632_v3, %v11632_v3 }
0x1135   : > { %v11639_v20 = vsub.f32 %v11567_v34, %v5345_v56  ;;  %v5426_v43 = vadd.f32 1e-05, %v5410_v26  ;;  %5404 = vadd.xlane.f32.xlu1 %v5375_v59  ;;  %5406 = vadd.xlane.f32.xlu0 %v5376_v55  ;;  %v11654_v55 = vld [vmem:[%s12563_s26] ss:$0 sm:$0xff]  ;;  %s7064_s26 = scalar_lea.sflag [#allocation8], %s10046_s14 }
0x1136   : > { %v5381_v46 = vpop.xlane.xlu1 %5380  ;;  %v5383_v28 = vpop.xlane.xlu0 %5382 }
0x1137   : > { %9254 = vrsqrt.f32 %v5426_v43  ;;  %v5411_v18 = vmul.f32 0.0078125, %v5381_v46  ;;  %v5412_v5 = vmul.f32 0.0078125, %v5383_v28  ;;  %v5377_v4 = vmul.f32 %v11639_v20, %v11639_v20 }
0x1139   : > { %v5427_v52 = vadd.f32 1e-05, %v5411_v18  ;;  %v5428_v61 = vadd.f32 1e-05, %v5412_v5  ;;  %5408 = vadd.xlane.f32.xlu1 %v5377_v4 }
0x113a   : > { %v5385_v39 = vpop.xlane.xlu1 %5384  ;;  %v5387_v7 = vpop.xlane.xlu0 %5386 }
0x113b   : > { %9256 = vrsqrt.f32 %v5427_v52  ;;  %v5413_v36 = vmul.f32 0.0078125, %v5385_v39  ;;  %v5414_v53 = vmul.f32 0.0078125, %v5387_v7 }
0x113c   : > { %9258 = vrsqrt.f32 %v5428_v61 }
0x113d   : > { %v5429_v13 = vadd.f32 1e-05, %v5413_v36  ;;  %v5430_v40 = vadd.f32 1e-05, %v5414_v53 }
0x113e   : > { %v5389_v25 = vpop.xlane.xlu1 %5388  ;;  %v5391_v63 = vpop.xlane.xlu0 %5390 }
0x113f   : > { %9260 = vrsqrt.f32 %v5429_v13  ;;  %v5415_v45 = vmul.f32 0.0078125, %v5389_v25  ;;  %v5416_v47 = vmul.f32 0.0078125, %v5391_v63 }
0x1141   : > { %v5431_v54 = vadd.f32 1e-05, %v5415_v45  ;;  %v5432_v37 = vadd.f32 1e-05, %v5416_v47 }
0x1142   : > { %v5393_v32 = vpop.xlane.xlu1 %5392 }
0x1143   : > { %9262 = vrsqrt.f32 %v5431_v54  ;;  %v5417_v19 = vmul.f32 0.0078125, %v5393_v32 }
0x1144   : > { %v9255_v23 = vpop.eup %9254  ;;  %9264 = vrsqrt.f32 %v5430_v40 }
0x1145   : > { %v5458_v12 = vmul.f32 %v9255_v23, %v11549_v48  ;;  %v5433_v15 = vadd.f32 1e-05, %v5417_v19 }
0x1147   : > { %v5480_v26 = vmul.f32 %v11647_v38, %v5458_v12  ;;  %9266 = vrsqrt.f32 %v5433_v15 }
0x1148   : > { %v9257_v9 = vpop.eup %9256  ;;  %9268 = vrsqrt.f32 %v5432_v37 }
0x1149   : > { %v5459_v56 = vmul.f32 %v9257_v9, %v11564_v11  ;;  %v9259_v59 = vpop.eup %9258  ;;  %v5502_v46 = vadd.f32 %v11654_v55, %v5480_v26 }
0x114a   : > { %v5460_v18 = vmul.f32 %v9259_v59, %v11561_v58 }
0x114b   : > { %v5481_v48 = vmul.f32 %v11647_v38, %v5459_v56 }
0x114c   : > { %v9261_v43 = vpop.eup %9260  ;;  %v5482_v61 = vmul.f32 %v11647_v38, %v5460_v18 }
0x114d   : > { %v5503_v28 = vadd.f32 %v11654_v55, %v5481_v48  ;;  %v5461_v11 = vmul.f32 %v9261_v43, %v11573_v16 }
0x114e   : > { %v5504_v58 = vadd.f32 %v11654_v55, %v5482_v61 }
0x114f   : > { %v5518_v5 = vpack.c.bf16 %v5503_v28, %v5502_v46  ;;  %v5483_v4 = vmul.f32 %v11647_v38, %v5461_v11 }
0x1150   : > { %v9263_v52 = vpop.eup %9262 }
0x1151   : > { %5773 = vmatmul.mubr.bf16.vlgmr.msra.gmra.mxu1 %v5518_v5  ;;  %5886 = vmatmul.mubr.bf16.vlgmr.msra.gmra.mxu0 %v5518_v5  ;;  %v9265_v39 = vpop.eup %9264  ;;  %v5505_v7 = vadd.f32 %v11654_v55, %v5483_v4  ;;  %v5463_v36 = vmul.f32 %v9263_v52, %v11585_v31 }
0x1152   : > { %5782 = vmatprep.mubr.bf16.mxu1 %v9754_v2  ;;  %5895 = vmatprep.mubr.bf16.mxu0 %v9754_v2  ;;  %v5462_v16 = vmul.f32 %v9265_v39, %v11578_v24 }
0x1153   : > { %v5519_v13 = vpack.c.bf16 %v5505_v7, %v5504_v58  ;;  %v5485_v53 = vmul.f32 %v11647_v38, %v5463_v36 }
0x1154   : > { %v9267_v25 = vpop.eup %9266  ;;  %v5484_v40 = vmul.f32 %v11647_v38, %v5462_v16 }
0x1155   : > { %v9269_v45 = vpop.eup %9268  ;;  %v5507_v54 = vadd.f32 %v11654_v55, %v5485_v53  ;;  %v5465_v31 = vmul.f32 %v9267_v25, %v11593_v10  ;;  %v8935_v53 = vld [vmem:[#allocation18 + $0xf8] sm:$0xff]  }
0x1156   : > { %v5506_v63 = vadd.f32 %v11654_v55, %v5484_v40  ;;  %v5464_v24 = vmul.f32 %v9269_v45, %v11588_v62  ;;  %v8936_v25 = vld [vmem:[#allocation18 + $0x38] sm:$0xff]   ;;  %8141 = vmatprep.subr.bf16.mxu0 %v8935_v53 }
0x1157   : > { %v5487_v19 = vmul.f32 %v11647_v38, %v5465_v31  ;;  %v8937_v31 = vld [vmem:[#allocation18 + $0xb8] sm:$0xff]  }
0x1158   : > { %v5520_v32 = vpack.c.bf16 %v5507_v54, %v5506_v63  ;;  %v5486_v23 = vmul.f32 %v11647_v38, %v5464_v24  ;;  %8142 = vmatpush3.bf16.msra.mxu0 %v8937_v31 }
0x1159   : > { %5783 = vmatmul.mubr.bf16.gmra.mxu1 %v5519_v13  ;;  %5896 = vmatmul.mubr.bf16.gmra.mxu0 %v5519_v13  ;;  %v5509_v47 = vadd.f32 %v11654_v55, %v5487_v19  ;;  %v8934_v13 = vld [vmem:[#allocation18 + $0x78] sm:$0xff]  }
0x115a   : > { %5792 = vmatprep.mubr.bf16.mxu1 %v9754_v2  ;;  %5905 = vmatprep.mubr.bf16.mxu0 %v9754_v2  ;;  %v5508_v12 = vadd.f32 %v11654_v55, %v5486_v23 }
0x115b   : > { %8077 = vmatprep.subr.bf16.mxu1 %v8934_v13 }
0x115c   : > { %v5521_v10 = vpack.c.bf16 %v5509_v47, %v5508_v12  ;;  %8078 = vmatpush3.bf16.msra.mxu1 %v8936_v25 }
0x1161   : > { %5793 = vmatmul.mubr.bf16.gmra.mxu1 %v5520_v32  ;;  %5906 = vmatmul.mubr.bf16.gmra.mxu0 %v5520_v32 }
0x1162   : > { %5802 = vmatprep.mubr.bf16.mxu1 %v9754_v2  ;;  %5915 = vmatprep.mubr.bf16.mxu0 %v9754_v2 }
0x1169   : > { %5803 = vmatmul.mubr.bf16.gmra.mxu1 %v5521_v10  ;;  %5916 = vmatmul.mubr.bf16.gmra.mxu0 %v5521_v10 }
0x116a   : > { %5812 = vmatprep.mubr.bf16.mxu1 %v9754_v2  ;;  %5925 = vmatprep.mubr.bf16.mxu0 %v9754_v2 }
0x11a7   : > { %v5395_v62 = vpop.xlane.xlu0 %5394 }
0x11a8   : > { %v5418_v15 = vmul.f32 0.0078125, %v5395_v62 }
0x11aa   : > { %v5434_v9 = vadd.f32 1e-05, %v5418_v15 }
0x11ab   : > { %v5397_v37 = vpop.xlane.xlu1 %5396  ;;  %v5399_v56 = vpop.xlane.xlu0 %5398 }
0x11ac   : > { %9270 = vrsqrt.f32 %v5434_v9  ;;  %v5419_v26 = vmul.f32 0.0078125, %v5397_v37  ;;  %v5420_v59 = vmul.f32 0.0078125, %v5399_v56  ;;  %v8938_v9 = vld [vmem:[#allocation18 + $0x70] sm:$0xff]  }
0x11ad   : > { %v8939_v37 = vld [vmem:[#allocation18 + $0xf0] sm:$0xff]   ;;  %8079 = vmatprep.subr.bf16.mxu1 %v8938_v9  ;;  %v8962_v9 = vld [vmem:[#allocation18 + $0x40] sm:$0xff]  }
0x11ae   : > { %v5435_v48 = vadd.f32 1e-05, %v5419_v26  ;;  %v5436_v43 = vadd.f32 1e-05, %v5420_v59  ;;  %v8940_v26 = vld [vmem:[#allocation18 + $0x30] sm:$0xff]   ;;  %8143 = vmatprep.subr.bf16.mxu0 %v8939_v37  ;;  %v8963_v37 = vld [vmem:[#allocation18 + $0xc0] sm:$0xff]  }
0x11af   : > { %v5401_v46 = vpop.xlane.xlu1 %5400  ;;  %v8941_v59 = vld [vmem:[#allocation18 + $0xb0] sm:$0xff]   ;;  %8080 = vmatpush3.bf16.msra.mxu1 %v8940_v26  ;;  %v5560_v26 = vlaneseq }
0x11b0   : > { %9272 = vrsqrt.f32 %v5435_v48  ;;  %v5421_v28 = vmul.f32 0.0078125, %v5401_v46  ;;  %8144 = vmatpush3.bf16.msra.mxu0 %v8941_v59 }
0x11b1   : > { %9274 = vrsqrt.f32 %v5436_v43  ;;  %v5561_v59 = vshrl.u32 %v5560_v26, 7 }
0x11b2   : > { %v5437_v18 = vadd.f32 1e-05, %v5421_v28 }
0x11b4   : > { %9276 = vrsqrt.f32 %v5437_v18 }
0x11b9   : > { %v9271_v11 = vpop.eup %9270 }
0x11ba   : > { %v5403_v5 = vpop.xlane.xlu0 %5402  ;;  %v5466_v4 = vmul.f32 %v9271_v11, %v11604_v44  ;;  %v8942_v11 = vld [vmem:[#allocation18 + $0x68] sm:$0xff]  }
0x11bb   : > { %v5422_v52 = vmul.f32 0.0078125, %v5403_v5  ;;  %v8943_v5 = vld [vmem:[#allocation18 + $0xe8] sm:$0xff]   ;;  %8081 = vmatprep.subr.bf16.mxu1 %v8942_v11 }
0x11bc   : > { %v5488_v16 = vmul.f32 %v11647_v38, %v5466_v4  ;;  %8145 = vmatprep.subr.bf16.mxu0 %v8943_v5 }
0x11bd   : > { %v9273_v61 = vpop.eup %9272  ;;  %v5438_v39 = vadd.f32 1e-05, %v5422_v52 }
0x11be   : > { %v5405_v7 = vpop.xlane.xlu1 %5404  ;;  %v5407_v36 = vpop.xlane.xlu0 %5406  ;;  %v5467_v58 = vmul.f32 %v9273_v61, %v11609_v17  ;;  %v5510_v19 = vadd.f32 %v11654_v55, %v5488_v16  ;;  %v8944_v61 = vld [vmem:[#allocation18 + $0x28] sm:$0xff]   ;;  %v8947_v16 = vld [vmem:[#allocation18 + $0xe0] sm:$0xff]  }
0x11bf   : > { %v9275_v45 = vpop.eup %9274  ;;  %9278 = vrsqrt.f32 %v5438_v39  ;;  %v5423_v40 = vmul.f32 0.0078125, %v5405_v7  ;;  %v5424_v54 = vmul.f32 0.0078125, %v5407_v36  ;;  %v8945_v39 = vld [vmem:[#allocation18 + $0xa8] sm:$0xff]   ;;  %8082 = vmatpush3.bf16.msra.mxu1 %v8944_v61 }
0x11c0   : > { %v5489_v63 = vmul.f32 %v11647_v38, %v5467_v58  ;;  %v5468_v47 = vmul.f32 %v9275_v45, %v11612_v42  ;;  %8146 = vmatpush3.bf16.msra.mxu0 %v8945_v39  ;;  %v8946_v58 = vld [vmem:[#allocation18 + $0x60] sm:$0xff]  }
0x11c1   : > { %v9277_v44 = vpop.eup %9276  ;;  %v5439_v24 = vadd.f32 1e-05, %v5423_v40  ;;  %v5440_v32 = vadd.f32 1e-05, %v5424_v54  ;;  %v8948_v45 = vld [vmem:[#allocation18 + $0x20] sm:$0xff]   ;;  %8083 = vmatprep.subr.bf16.mxu1 %v8946_v58  ;;  %8147 = vmatprep.subr.bf16.mxu0 %v8947_v16 }
0x11c2   : > { %v5409_v17 = vpop.xlane.xlu1 %5408  ;;  %v5511_v23 = vadd.f32 %v11654_v55, %v5489_v63  ;;  %v5469_v12 = vmul.f32 %v9277_v44, %v11619_v57  ;;  %v5490_v48 = vmul.f32 %v11647_v38, %v5468_v47  ;;  %v8949_v40 = vld [vmem:[#allocation18 + $0xa0] sm:$0xff]   ;;  %v8950_v63 = vld [vmem:[#allocation18 + $0x58] sm:$0xff]   ;;  %v8956_v47 = vld [vmem:[#allocation18 + $0x10] sm:$0xff]  }
0x11c3   : > { %9280 = vrsqrt.f32 %v5439_v24  ;;  %v5425_v10 = vmul.f32 0.0078125, %v5409_v17  ;;  %8084 = vmatpush3.bf16.msra.mxu1 %v8948_v45  ;;  %v8951_v44 = vld [vmem:[#allocation18 + $0xd8] sm:$0xff]  }
0x11c4   : > { %v5522_v62 = vpack.c.bf16 %v5511_v23, %v5510_v19  ;;  %v5491_v15 = vmul.f32 %v11647_v38, %v5469_v12  ;;  %9282 = vrsqrt.f32 %v5440_v32  ;;  %v5512_v57 = vadd.f32 %v11654_v55, %v5490_v48  ;;  %8148 = vmatpush3.bf16.msra.mxu0 %v8949_v40  ;;  %v8952_v32 = vld [vmem:[#allocation18 + $0x18] sm:$0xff]   ;;  %8085 = vmatprep.subr.bf16.mxu1 %v8950_v63  ;;  %v8955_v19 = vld [vmem:[#allocation18 + $0xd0] sm:$0xff]  }
0x11c5   : > { %v5441_v56 = vadd.f32 1e-05, %v5425_v10  ;;  %v8953_v17 = vld [vmem:[#allocation18 + $0x98] sm:$0xff]   ;;  %8149 = vmatprep.subr.bf16.mxu0 %v8951_v44  ;;  %v8957_v12 = vld [vmem:[#allocation18 + $0x90] sm:$0xff]   ;;  %v8958_v10 = vld [vmem:[#allocation18 + $0x48] sm:$0xff]   ;;  %v5562_v48 = vsub.s32 0, %v5561_v59 }
0x11c6   : > { %5813 = vmatmul.mubr.bf16.gmra.mxu1 %v5522_v62  ;;  %5926 = vmatmul.mubr.bf16.gmra.mxu0 %v5522_v62  ;;  %v5513_v42 = vadd.f32 %v11654_v55, %v5491_v15  ;;  %v8959_v62 = vld [vmem:[#allocation18 + $0xc8] sm:$0xff]  }
0x11c7   : > { %9284 = vrsqrt.f32 %v5441_v56  ;;  %5822 = vmatprep.mubr.bf16.mxu1 %v9754_v2  ;;  %5935 = vmatprep.mubr.bf16.mxu0 %v9754_v2  ;;  %v8961_v15 = vld [vmem:[#allocation18 + $0x88] sm:$0xff]   ;;  %v8965_v56 = vld [vmem:[#allocation18 + $0x80] sm:$0xff]  }
0x11c8   : > { %v5523_v46 = vpack.c.bf16 %v5513_v42, %v5512_v57  ;;  %8086 = vmatpush3.bf16.msra.mxu1 %v8952_v32  ;;  %8150 = vmatpush3.bf16.msra.mxu0 %v8953_v17  ;;  %v5570_v42 = vsub.s32 2, %v5561_v59  ;;  %v5558_v57 = vld [vmem:[%s12564_s18] sm:$0xf]  ;;  %s9661_s18 = scalar_lea.vmem %s9660_s10, 4096 }
0x11c9   : > { %8151 = vmatprep.subr.bf16.mxu0 %v8955_v19  ;;  %p9663_p3 = scmp.lt.s32.totalorder %s9661_s18, %s9655_s2 }
0x11cb   : > { %p9664_p4 = por %p9663_p3, %p9662_p1 }
0x11cc   : > { %v9279_v43 = vpop.eup %9278  ;;  %8152 = vmatpush3.bf16.msra.mxu0 %v8957_v12 }
0x11cd   : > { %v5470_v28 = vmul.f32 %v9279_v43, %v11624_v22  ;;  %8153 = vmatprep.subr.bf16.mxu0 %v8959_v62  ;;  %v5566_v43 = vsub.s32 1, %v5561_v59  ;;  %p9665_p8 = pnand %p9664_p4, %p9658_p13 }
0x11ce   : > { %5823 = vmatmul.mubr.bf16.gmra.mxu1 %v5523_v46  ;;  %5936 = vmatmul.mubr.bf16.gmra.mxu0 %v5523_v46  ;;  %v5574_v46 = vsub.s32 3, %v5561_v59 }
0x11cf   : > { %5832 = vmatprep.mubr.bf16.mxu1 %v9754_v2  ;;  %5945 = vmatprep.mubr.bf16.mxu0 %v9754_v2  ;;  %v5492_v52 = vmul.f32 %v11647_v38, %v5470_v28  ;;  %v11718_v28 = vrot.slane %v5558_v57, %v5562_v48  ;;  %v11722_v11 = vrot.slane %v5558_v57, %v5566_v43 }
0x11d0   : > { %v9281_v18 = vpop.eup %9280  ;;  %8154 = vmatpush3.bf16.msra.mxu0 %v8961_v15  ;;  %v11724_v5 = vrot.slane %v5558_v57, %v5574_v46 }
0x11d1   : > { %v5471_v4 = vmul.f32 %v9281_v18, %v11629_v29  ;;  %v9283_v7 = vpop.eup %9282  ;;  %v5514_v13 = vadd.f32 %v11654_v55, %v5492_v52  ;;  %8155 = vmatprep.subr.bf16.mxu0 %v8963_v37  ;;  %12565 = vst [vmem:[#allocation43_spill] sm:$0xff] %v11718_v28  ;;  %v11720_v18 = vrot.slane %v5558_v57, %v5570_v42  ;;  %12567 = vst [vmem:[#allocation45_spill] sm:$0xff] %v11722_v11 }
0x11d2   : > { %v5472_v29 = vmul.f32 %v9283_v7, %v11632_v3  ;;  %12568 = vst [vmem:[#allocation46_spill] sm:$0xff] %v11724_v5 }
0x11d3   : > { %v5493_v22 = vmul.f32 %v11647_v38, %v5471_v4  ;;  %12566 = vst [vmem:[#allocation44_spill] sm:$0xff] %v11720_v18 }
0x11d4   : > { %v9285_v36 = vpop.eup %9284  ;;  %v5494_v24 = vmul.f32 %v11647_v38, %v5472_v29  ;;  %8156 = vmatpush3.bf16.msra.mxu0 %v8965_v56 }
0x11d5   : > { %v5515_v53 = vadd.f32 %v11654_v55, %v5493_v22  ;;  %v5473_v25 = vmul.f32 %v9285_v36, %v11639_v20  ;;  %v8954_v20 = vld [vmem:[#allocation18 + $0x50] sm:$0xff]  }
0x11d6   : > { %v5516_v23 = vadd.f32 %v11654_v55, %v5494_v24  ;;  %8087 = vmatprep.subr.bf16.mxu1 %v8954_v20 }
0x11d7   : > { %v5524_v54 = vpack.c.bf16 %v5515_v53, %v5514_v13  ;;  %v5495_v31 = vmul.f32 %v11647_v38, %v5473_v25  ;;  %8088 = vmatpush3.bf16.msra.mxu1 %v8956_v47 }
0x11d8   : > { %8089 = vmatprep.subr.bf16.mxu1 %v8958_v10 }
0x11d9   : > { %5833 = vmatmul.mubr.bf16.gmra.mxu1 %v5524_v54  ;;  %5946 = vmatmul.mubr.bf16.gmra.mxu0 %v5524_v54  ;;  %v5517_v3 = vadd.f32 %v11654_v55, %v5495_v31  ;;  %v8964_v55 = vld [vmem:[#allocation18] sm:$0xff]  }
0x11da   : > { %5842 = vmatprep.mubr.bf16.mxu1 %v9754_v2  ;;  %5955 = vmatprep.mubr.bf16.mxu0 %v9754_v2  ;;  %v8960_v2 = vld [vmem:[#allocation18 + $0x8] sm:$0xff]  }
0x11db   : > { %v5525_v38 = vpack.c.bf16 %v5517_v3, %v5516_v23  ;;  %8090 = vmatpush3.bf16.msra.mxu1 %v8960_v2 }
0x11dc   : > { %8091 = vmatprep.subr.bf16.mxu1 %v8962_v9 }
0x11df   : > { %8092 = vmatpush3.bf16.msra.mxu1 %v8964_v55 }
0x11e1   : > { %5843 = vmatmul.mubr.bf16.gmra.mxu1 %v5525_v38  ;;  %5956 = vmatmul.mubr.bf16.gmra.mxu0 %v5525_v38 }
0x1211   : > { %v5774_v4 = vpop.f32.mrf.mxu1  ;;  %v5887_v52 = vpop.f32.mrf.mxu0 }
0x1212   : > { %v11727_v61 = vadd.f32 %v5774_v4, %v11718_v28  ;;  %v11730_v39 = vadd.f32 %v5887_v52, %v11720_v18 }
0x1213   : > { %v5776_v7 = vpop.f32.mrf.mxu1  ;;  %v5889_v22 = vpop.f32.mrf.mxu0 }
0x1214   : > { %v5966_v36 = vmul.f32 %v11727_v61, %v11727_v61  ;;  %v5968_v58 = vmul.f32 %v11730_v39, %v11730_v39  ;;  %v11737_v16 = vadd.f32 %v5776_v7, %v11722_v11  ;;  %v11740_v13 = vadd.f32 %v5889_v22, %v11724_v5 }
0x1215   : > { %v5778_v53 = vpop.f32.mrf.mxu1  ;;  %v5891_v29 = vpop.f32.mrf.mxu0 }
0x1216   : > { %v6030_v25 = vmul.f32 %v5966_v36, %v11727_v61  ;;  %v6032_v45 = vmul.f32 %v5968_v58, %v11730_v39  ;;  %v5967_v40 = vmul.f32 %v11737_v16, %v11737_v16  ;;  %v11747_v54 = vadd.f32 %v5778_v53, %v11718_v28 }
0x1217   : > { %v11750_v31 = vadd.f32 %v5891_v29, %v11720_v18  ;;  %v5780_v63 = vpop.f32.mrf.mxu1  ;;  %v5893_v44 = vpop.f32.mrf.mxu0  ;;  %v5969_v17 = vmul.f32 %v11740_v13, %v11740_v13 }
0x1218   : > { %v6094_v24 = vmul.f32 0.044715, %v6030_v25  ;;  %v6096_v32 = vmul.f32 0.044715, %v6032_v45  ;;  %v5970_v3 = vmul.f32 %v11747_v54, %v11747_v54  ;;  %v11759_v19 = vadd.f32 %v5780_v63, %v11722_v11 }
0x1219   : > { %v5972_v20 = vmul.f32 %v11750_v31, %v11750_v31  ;;  %v11762_v23 = vadd.f32 %v5893_v44, %v11724_v5  ;;  %v5784_v47 = vpop.f32.mrf.mxu1  ;;  %v5897_v10 = vpop.f32.mrf.mxu0  ;;  %v6031_v62 = vmul.f32 %v5967_v40, %v11737_v16  ;;  %v6033_v59 = vmul.f32 %v5969_v17, %v11740_v13 }
0x121a   : > { %v6158_v12 = vadd.f32 %v6094_v24, %v11727_v61  ;;  %v6160_v38 = vadd.f32 %v6096_v32, %v11730_v39  ;;  %v6034_v2 = vmul.f32 %v5970_v3, %v11747_v54  ;;  %v5971_v9 = vmul.f32 %v11759_v19, %v11759_v19 }
0x121b   : > { %v6036_v15 = vmul.f32 %v5972_v20, %v11750_v31  ;;  %v5973_v55 = vmul.f32 %v11762_v23, %v11762_v23  ;;  %v5786_v56 = vpop.f32.mrf.mxu1  ;;  %v11775_v57 = vadd.f32 %v5784_v47, %v11718_v28  ;;  %v5899_v43 = vpop.f32.mrf.mxu0  ;;  %v6095_v46 = vmul.f32 0.044715, %v6031_v62 }
0x121c   : > { %v6222_v37 = vmul.f32 0.7978846, %v6158_v12  ;;  %v6224_v26 = vmul.f32 0.7978846, %v6160_v38  ;;  %v6098_v48 = vmul.f32 0.044715, %v6034_v2  ;;  %v6035_v7 = vmul.f32 %v5971_v9, %v11759_v19 }
0x121d   : > { %v6100_v42 = vmul.f32 0.044715, %v6036_v15  ;;  %v6037_v22 = vmul.f32 %v5973_v55, %v11762_v23  ;;  %v5974_v36 = vmul.f32 %v11775_v57, %v11775_v57  ;;  %v11784_v58 = vadd.f32 %v5897_v10, %v11720_v18  ;;  %v5788_v53 = vpop.f32.mrf.mxu1  ;;  %v5901_v24 = vpop.f32.mrf.mxu0 }
0x121e   : > { %v6162_v4 = vadd.f32 %v6098_v48, %v11747_v54  ;;  %9286 = vtanh.f32 %v6222_v37  ;;  %v6097_v29 = vmul.f32 0.044715, %v6033_v59  ;;  %v11790_v44 = vadd.f32 %v5786_v56, %v11722_v11 }
0x121f   : > { %v6164_v52 = vadd.f32 %v6100_v42, %v11750_v31  ;;  %9288 = vtanh.f32 %v6224_v26  ;;  %v6038_v40 = vmul.f32 %v5974_v36, %v11775_v57  ;;  %v5976_v63 = vmul.f32 %v11784_v58, %v11784_v58  ;;  %v5790_v38 = vpop.f32.mrf.mxu1  ;;  %v5903_v56 = vpop.f32.mrf.mxu0 }
0x1220   : > { %v6226_v25 = vmul.f32 0.7978846, %v6162_v4  ;;  %v6099_v32 = vmul.f32 0.044715, %v6035_v7  ;;  %v11793_v17 = vadd.f32 %v5899_v43, %v11724_v5  ;;  %v11796_v3 = vadd.f32 %v5788_v53, %v11718_v28 }
0x1221   : > { %v6228_v45 = vmul.f32 0.7978846, %v6164_v52  ;;  %v6159_v20 = vadd.f32 %v6095_v46, %v11737_v16  ;;  %v6101_v47 = vmul.f32 0.044715, %v6037_v22  ;;  %v6040_v12 = vmul.f32 %v5976_v63, %v11784_v58 }
0x1222   : > { %9290 = vtanh.f32 %v6226_v25  ;;  %v6102_v10 = vmul.f32 0.044715, %v6038_v40  ;;  %v5975_v62 = vmul.f32 %v11790_v44, %v11790_v44  ;;  %v5977_v2 = vmul.f32 %v11793_v17, %v11793_v17  ;;  %v5794_v25 = vpop.f32.mrf.mxu1 }
0x1223   : > { %v5978_v15 = vmul.f32 %v11796_v3, %v11796_v3  ;;  %v6161_v9 = vadd.f32 %v6097_v29, %v11740_v13  ;;  %9292 = vtanh.f32 %v6228_v45  ;;  %v6104_v37 = vmul.f32 0.044715, %v6040_v12 }
0x1224   : > { %v11808_v55 = vadd.f32 %v5901_v24, %v11720_v18  ;;  %v6163_v26 = vadd.f32 %v6099_v32, %v11759_v19  ;;  %v6039_v59 = vmul.f32 %v5975_v62, %v11790_v44  ;;  %v6041_v48 = vmul.f32 %v5977_v2, %v11793_v17  ;;  %v5907_v24 = vpop.f32.mrf.mxu0 }
0x1225   : > { %v11814_v42 = vadd.f32 %v5790_v38, %v11722_v11  ;;  %v6165_v43 = vadd.f32 %v6101_v47, %v11762_v23  ;;  %v6042_v46 = vmul.f32 %v5978_v15, %v11796_v3  ;;  %v6223_v52 = vmul.f32 0.7978846, %v6159_v20 }
0x1226   : > { %v5980_v4 = vmul.f32 %v11808_v55, %v11808_v55  ;;  %v6166_v7 = vadd.f32 %v6102_v10, %v11775_v57  ;;  %v11822_v22 = vadd.f32 %v5903_v56, %v11724_v5  ;;  %v6225_v36 = vmul.f32 0.7978846, %v6161_v9 }
0x1227   : > { %v6168_v53 = vadd.f32 %v6104_v37, %v11784_v58  ;;  %v6103_v29 = vmul.f32 0.044715, %v6039_v59  ;;  %v6227_v45 = vmul.f32 0.7978846, %v6163_v26  ;;  %v6105_v40 = vmul.f32 0.044715, %v6041_v48  ;;  %v5796_v59 = vpop.f32.mrf.mxu1  ;;  %v5909_v48 = vpop.f32.mrf.mxu0 }
0x1228   : > { %v5979_v63 = vmul.f32 %v11814_v42, %v11814_v42  ;;  %v6229_v32 = vmul.f32 0.7978846, %v6165_v43  ;;  %v6106_v47 = vmul.f32 0.044715, %v6042_v46  ;;  %v6044_v20 = vmul.f32 %v5980_v4, %v11808_v55 }
0x1229   : > { %9294 = vtanh.f32 %v6223_v52  ;;  %v6230_v38 = vmul.f32 0.7978846, %v6166_v7  ;;  %v5981_v10 = vmul.f32 %v11822_v22, %v11822_v22  ;;  %v11831_v62 = vadd.f32 %v5794_v25, %v11718_v28 }
0x122a   : > { %9296 = vtanh.f32 %v6225_v36  ;;  %v6232_v15 = vmul.f32 0.7978846, %v6168_v53  ;;  %v6167_v9 = vadd.f32 %v6103_v29, %v11790_v44  ;;  %v6169_v37 = vadd.f32 %v6105_v40, %v11793_v17 }
0x122b   : > { %v9287_v12 = vpop.eup %9286  ;;  %9298 = vtanh.f32 %v6227_v45  ;;  %v6043_v56 = vmul.f32 %v5979_v63, %v11814_v42  ;;  %v5982_v26 = vmul.f32 %v11831_v62, %v11831_v62  ;;  %v6170_v46 = vadd.f32 %v6106_v47, %v11796_v3  ;;  %v5798_v47 = vpop.f32.mrf.mxu1 }
0x122c   : > { %v9289_v2 = vpop.eup %9288  ;;  %v6350_v43 = vadd.f32 1.0, %v9287_v12  ;;  %9300 = vtanh.f32 %v6229_v32  ;;  %v6108_v4 = vmul.f32 0.044715, %v6044_v20  ;;  %v6045_v7 = vmul.f32 %v5981_v10, %v11822_v22  ;;  %v5911_v20 = vpop.f32.mrf.mxu0 }
0x122d   : > { %9302 = vtanh.f32 %v6230_v38  ;;  %v6352_v36 = vadd.f32 1.0, %v9289_v2  ;;  %v6231_v53 = vmul.f32 0.7978846, %v6167_v9  ;;  %v6046_v29 = vmul.f32 %v5982_v26, %v11831_v62 }
0x122e   : > { %9304 = vtanh.f32 %v6232_v15  ;;  %v6233_v45 = vmul.f32 0.7978846, %v6169_v37  ;;  %v6107_v40 = vmul.f32 0.044715, %v6043_v56  ;;  %v11842_v63 = vadd.f32 %v5907_v24, %v11720_v18  ;;  %v5913_v34 = vpop.f32.mrf.mxu0 }
0x122f   : > { %v9291_v52 = vpop.eup %9290  ;;  %v11845_v32 = vadd.f32 %v5796_v59, %v11722_v11  ;;  %v6414_v12 = vmul.f32 0.5, %v6350_v43  ;;  %v6234_v38 = vmul.f32 0.7978846, %v6170_v46  ;;  %v6172_v10 = vadd.f32 %v6108_v4, %v11808_v55 }
0x1230   : > { %v9293_v25 = vpop.eup %9292  ;;  %v11849_v2 = vadd.f32 %v5909_v48, %v11724_v5  ;;  %v6354_v15 = vadd.f32 1.0, %v9291_v52  ;;  %v6109_v9 = vmul.f32 0.044715, %v6045_v7  ;;  %v5984_v37 = vmul.f32 %v11842_v63, %v11842_v63  ;;  %v5800_v7 = vpop.f32.mrf.mxu1 }
0x1231   : > { %v5983_v24 = vmul.f32 %v11845_v32, %v11845_v32  ;;  %v6356_v56 = vadd.f32 1.0, %v9293_v25  ;;  %v6110_v26 = vmul.f32 0.044715, %v6046_v29  ;;  %v11858_v43 = vadd.f32 %v5798_v47, %v11718_v28 }
0x1232   : > { %v5985_v59 = vmul.f32 %v11849_v2, %v11849_v2  ;;  %v6416_v46 = vmul.f32 0.5, %v6352_v36  ;;  %v6171_v48 = vadd.f32 %v6107_v40, %v11814_v42  ;;  %v6048_v4 = vmul.f32 %v5984_v37, %v11842_v63 }
0x1233   : > { %v6047_v52 = vmul.f32 %v5983_v24, %v11845_v32  ;;  %v11864_v50 = vmul.f32 %v6414_v12, %v11727_v61  ;;  %9306 = vtanh.f32 %v6231_v53  ;;  %v11868_v25 = vadd.f32 %v5911_v20, %v11720_v18 }
0x1234   : > { %v6049_v29 = vmul.f32 %v5985_v59, %v11849_v2  ;;  %v6418_v47 = vmul.f32 0.5, %v6354_v15  ;;  %v6173_v36 = vadd.f32 %v6109_v9, %v11822_v22  ;;  %v6112_v41 = vmul.f32 0.044715, %v6048_v4  ;;  %v5804_v9 = vpop.f32.mrf.mxu1  ;;  %v5917_v4 = vpop.f32.mrf.mxu0 }
0x1235   : > { %v5986_v40 = vmul.f32 %v11858_v43, %v11858_v43  ;;  %v6420_v24 = vmul.f32 0.5, %v6356_v56  ;;  %9308 = vtanh.f32 %v6233_v45  ;;  %v6236_v35 = vmul.f32 0.7978846, %v6172_v10 }
0x1236   : > { %v11873_v37 = vpop.eup %9294  ;;  %v6174_v61 = vadd.f32 %v6110_v26, %v11831_v62  ;;  %v11879_v12 = vmul.f32 %v6416_v46, %v11730_v39  ;;  %v6235_v20 = vmul.f32 0.7978846, %v6171_v48  ;;  %v6111_v15 = vmul.f32 0.044715, %v6047_v52 }
0x1237   : > { %v11876_v53 = vpop.eup %9296  ;;  %v6113_v59 = vmul.f32 0.044715, %v6049_v29  ;;  %v6176_v49 = vadd.f32 %v6112_v41, %v11842_v63  ;;  %v6050_v56 = vmul.f32 %v5986_v40, %v11858_v43  ;;  %v5988_v45 = vmul.f32 %v11868_v25, %v11868_v25 }
0x1238   : > { %v11881_v1 = vpop.eup %9298  ;;  %v11888_v10 = vadd.f32 %v5800_v7, %v11722_v11  ;;  %v11893_v39 = vmul.f32 %v6418_v47, %v11747_v54  ;;  %9310 = vtanh.f32 %v6234_v38  ;;  %v6237_v46 = vmul.f32 0.7978846, %v6173_v36  ;;  %v5806_v47 = vpop.f32.mrf.mxu1 }
0x1239   : > { %v11890_v26 = vpop.eup %9300  ;;  %v11896_v48 = vadd.f32 %v5913_v34, %v11724_v5  ;;  %v11901_v41 = vmul.f32 %v6420_v24, %v11750_v31  ;;  %9312 = vtanh.f32 %v6236_v35  ;;  %v6238_v29 = vmul.f32 0.7978846, %v6174_v61  ;;  %v5919_v36 = vpop.f32.mrf.mxu0 }
0x123a   : > { %v11898_v52 = vpop.eup %9302  ;;  %v5987_v7 = vmul.f32 %v11888_v10, %v11888_v10  ;;  %9314 = vtanh.f32 %v6235_v20  ;;  %v6175_v54 = vadd.f32 %v6111_v15, %v11845_v32  ;;  %v6177_v38 = vadd.f32 %v6113_v59, %v11849_v2 }
0x123b   : > { %v11905_v40 = vpop.eup %9304  ;;  %v5989_v34 = vmul.f32 %v11896_v48, %v11896_v48  ;;  %v6240_v30 = vmul.f32 0.7978846, %v6176_v49  ;;  %v6114_v31 = vmul.f32 0.044715, %v6050_v56  ;;  %v6052_v35 = vmul.f32 %v5988_v45, %v11868_v25  ;;  %v5921_v60 = vpop.f32.mrf.mxu0 }
0x123c   : > { %v6051_v24 = vmul.f32 %v5987_v7, %v11888_v10  ;;  %9316 = vtanh.f32 %v6237_v46  ;;  %v11919_v0 = vadd.f32 %v5804_v9, %v11718_v28  ;;  %v6239_v49 = vmul.f32 0.7978846, %v6175_v54  ;;  %v5808_v7 = vpop.f32.mrf.mxu1 }
0x123d   : > { %v6053_v20 = vmul.f32 %v5989_v34, %v11896_v48  ;;  %9318 = vtanh.f32 %v6238_v29  ;;  %v6241_v56 = vmul.f32 0.7978846, %v6177_v38  ;;  %v11922_v45 = vadd.f32 %v5917_v4, %v11720_v18 }
0x123e   : > { %v6115_v59 = vmul.f32 0.044715, %v6051_v24  ;;  %12569 = vst [vmem:[#allocation47_spill] sm:$0xff] %v11919_v0  ;;  %9320 = vtanh.f32 %v6240_v30  ;;  %v6178_v46 = vadd.f32 %v6114_v31, %v11858_v43  ;;  %v6116_v34 = vmul.f32 0.044715, %v6052_v35 }
0x123f   : > { %v6117_v27 = vmul.f32 0.044715, %v6053_v20  ;;  %v5990_v15 = vmul.f32 %v11919_v0, %v11919_v0  ;;  %v5992_v54 = vmul.f32 %v11922_v45, %v11922_v45  ;;  %v11933_v38 = vadd.f32 %v5806_v47, %v11722_v11 }
0x1240   : > { %v11927_v29 = vpop.eup %9306  ;;  %v6179_v9 = vadd.f32 %v6115_v59, %v11888_v10  ;;  %v11936_v4 = vadd.f32 %v5919_v36, %v11724_v5  ;;  %v11941_v35 = vadd.f32 %v5808_v7, %v11718_v28  ;;  %v11944_v24 = vadd.f32 %v5921_v60, %v11720_v18  ;;  %v5810_v60 = vpop.f32.mrf.mxu1 }
0x1241   : > { %v6181_v30 = vadd.f32 %v6117_v27, %v11896_v48  ;;  %v6054_v31 = vmul.f32 %v5990_v15, %v11919_v0  ;;  %9322 = vtanh.f32 %v6239_v49  ;;  %v6056_v59 = vmul.f32 %v5992_v54, %v11922_v45 }
0x1242   : > { %v11946_v20 = vpop.eup %9308  ;;  %v5991_v47 = vmul.f32 %v11933_v38, %v11933_v38  ;;  %v5993_v36 = vmul.f32 %v11936_v4, %v11936_v4  ;;  %v6242_v27 = vmul.f32 0.7978846, %v6178_v46  ;;  %v6180_v15 = vadd.f32 %v6116_v34, %v11868_v25 }
0x1243   : > { %v6118_v61 = vmul.f32 0.044715, %v6054_v31  ;;  %v5994_v7 = vmul.f32 %v11941_v35, %v11941_v35  ;;  %9324 = vtanh.f32 %v6241_v56  ;;  %v6243_v6 = vmul.f32 0.7978846, %v6179_v9 }
0x1244   : > { %v6055_v49 = vmul.f32 %v5991_v47, %v11933_v38  ;;  %v6057_v54 = vmul.f32 %v5993_v36, %v11936_v4  ;;  %v6245_v8 = vmul.f32 0.7978846, %v6181_v30  ;;  %v5996_v46 = vmul.f32 %v11944_v24, %v11944_v24 }
0x1245   : > { %v9311_v33 = vpop.eup %9310  ;;  %v6182_v14 = vadd.f32 %v6118_v61, %v11919_v0  ;;  %v6058_v21 = vmul.f32 %v5994_v7, %v11941_v35  ;;  %v6120_v31 = vmul.f32 0.044715, %v6056_v59  ;;  %v11963_v56 = vadd.f32 %v5810_v60, %v11722_v11  ;;  %v5923_v0 = vpop.f32.mrf.mxu0 }
0x1246   : > { %v9313_v34 = vpop.eup %9312  ;;  %v6119_v51 = vmul.f32 0.044715, %v6055_v49  ;;  %v6121_v18 = vmul.f32 0.044715, %v6057_v54  ;;  %v6358_v47 = vadd.f32 1.0, %v11898_v52  ;;  %9326 = vtanh.f32 %v6242_v27 }
0x1247   : > { %v9315_v9 = vpop.eup %9314  ;;  %v6122_v36 = vmul.f32 0.044715, %v6058_v21  ;;  %v6060_v30 = vmul.f32 %v5996_v46, %v11944_v24  ;;  %v6244_v61 = vmul.f32 0.7978846, %v6180_v15  ;;  %9328 = vtanh.f32 %v6243_v6 }
0x1248   : > { %v6183_v7 = vadd.f32 %v6119_v51, %v11933_v38  ;;  %v6185_v28 = vadd.f32 %v6121_v18, %v11936_v4  ;;  %v6246_v49 = vmul.f32 0.7978846, %v6182_v14  ;;  %v5995_v11 = vmul.f32 %v11963_v56, %v11963_v56 }
0x1249   : > { %v9317_v59 = vpop.eup %9316  ;;  %v6186_v54 = vadd.f32 %v6122_v36, %v11941_v35  ;;  %v6124_v60 = vmul.f32 0.044715, %v6060_v30  ;;  %v6362_v21 = vadd.f32 1.0, %v9311_v33  ;;  %9330 = vtanh.f32 %v6245_v8 }
0x124a   : > { %v11972_v52 = vpop.eup %9318  ;;  %v6184_v27 = vadd.f32 %v6120_v31, %v11922_v45  ;;  %v6247_v6 = vmul.f32 0.7978846, %v6183_v7  ;;  %v6249_v15 = vmul.f32 0.7978846, %v6185_v28  ;;  %v6059_v18 = vmul.f32 %v5995_v11, %v11963_v56 }
0x124b   : > { %v6188_v51 = vadd.f32 %v6124_v60, %v11944_v24  ;;  %v11978_v14 = vadd.f32 %v5923_v0, %v11724_v5  ;;  %v11980_v46 = vpop.eup %9320  ;;  %v11982_v36 = vmul.f32 0.5, %v6358_v47  ;;  %9332 = vtanh.f32 %v6244_v61 }
0x124c   : > { %v6250_v30 = vmul.f32 0.7978846, %v6186_v54  ;;  %v6351_v33 = vadd.f32 1.0, %v11873_v37  ;;  %v6364_v8 = vadd.f32 1.0, %v9313_v34  ;;  %9334 = vtanh.f32 %v6246_v49 }
0x124d   : > { %v6252_v31 = vmul.f32 0.7978846, %v6188_v51  ;;  %v6123_v7 = vmul.f32 0.044715, %v6059_v18  ;;  %v6426_v28 = vmul.f32 0.5, %v6362_v21  ;;  %9336 = vtanh.f32 %v6247_v6 }
0x124e   : > { %v5997_v11 = vmul.f32 %v11978_v14, %v11978_v14  ;;  %v6355_v0 = vadd.f32 1.0, %v11881_v1  ;;  %v9323_v60 = vpop.eup %9322  ;;  %v6248_v5 = vmul.f32 0.7978846, %v6184_v27  ;;  %9338 = vtanh.f32 %v6249_v15 }
0x124f   : > { %v6187_v47 = vadd.f32 %v6123_v7, %v11963_v56  ;;  %v6415_v61 = vmul.f32 0.5, %v6351_v33  ;;  %9340 = vtanh.f32 %v6250_v30  ;;  %v6353_v49 = vadd.f32 1.0, %v11876_v53 }
0x1250   : > { %v6061_v37 = vmul.f32 %v5997_v11, %v11978_v14  ;;  %v6419_v34 = vmul.f32 0.5, %v6355_v0  ;;  %v9325_v54 = vpop.eup %9324  ;;  %9342 = vtanh.f32 %v6252_v31  ;;  %v6357_v51 = vadd.f32 1.0, %v11890_v26 }
0x1251   : > { %v6251_v21 = vmul.f32 0.7978846, %v6187_v47  ;;  %v6479_v6 = vmul.f32 %v6415_v61, %v11737_v16  ;;  %v6417_v15 = vmul.f32 0.5, %v6353_v49  ;;  %v6359_v18 = vadd.f32 1.0, %v11927_v29 }
0x1252   : > { %v6125_v1 = vmul.f32 0.044715, %v6061_v37  ;;  %v6483_v27 = vmul.f32 %v6419_v34, %v11759_v19  ;;  %v6421_v30 = vmul.f32 0.5, %v6357_v51  ;;  %v6363_v33 = vadd.f32 1.0, %v9315_v9 }
0x1253   : > { %9344 = vtanh.f32 %v6251_v21  ;;  %v6361_v7 = vadd.f32 1.0, %v11946_v20  ;;  %v9327_v11 = vpop.eup %9326  ;;  %v6481_v0 = vmul.f32 %v6417_v15, %v11740_v13  ;;  %v6423_v16 = vmul.f32 0.5, %v6359_v18 }
0x1254   : > { %v6189_v53 = vadd.f32 %v6125_v1, %v11978_v14  ;;  %v6543_v31 = vpack.c.bf16 %v6483_v27, %v6479_v6  ;;  %v9329_v47 = vpop.eup %9328  ;;  %v6485_v26 = vmul.f32 %v6421_v30, %v11762_v23  ;;  %v6427_v61 = vmul.f32 0.5, %v6363_v33 }
0x1255   : > { %v6365_v19 = vadd.f32 1.0, %v9317_v59  ;;  %v6425_v37 = vmul.f32 0.5, %v6361_v7  ;;  %v6360_v29 = vadd.f32 1.0, %v11905_v40  ;;  %v6428_v34 = vmul.f32 0.5, %v6364_v8 }
0x1256   : > { %9346 = vtanh.f32 %v6248_v5  ;;  %v6253_v9 = vmul.f32 0.7978846, %v6189_v53  ;;  %6869 = vmatprep.mubr.bf16.mxu1 %v6543_v31  ;;  %v9331_v20 = vpop.eup %9330  ;;  %v6545_v49 = vpack.c.bf16 %v6485_v26, %v6481_v0  ;;  %v12570_v21 = vpack.c.bf16 %v11893_v39, %v11864_v50 }
0x1257   : > { %v6487_v13 = vmul.f32 %v6423_v16, %v11790_v44  ;;  %v6491_v6 = vmul.f32 %v6427_v61, %v11814_v42  ;;  %v6429_v23 = vmul.f32 0.5, %v6365_v19  ;;  %v6490_v59 = vmul.f32 %v6426_v28, %v11796_v3 }
0x1258   : > { %6870 = vmatmul.mubr.bf16.vlgmr.msra.gmra.mxu1 %v12570_v21  ;;  %v6370_v51 = vadd.f32 1.0, %v9327_v11  ;;  %9348 = vtanh.f32 %v6253_v9  ;;  %v6367_v40 = vadd.f32 1.0, %v9323_v60  ;;  %v9333_v8 = vpop.eup %9332  ;;  %6966 = vmatprep.mubr.bf16.mxu0 %v6545_v49  ;;  %v6489_v1 = vmul.f32 %v6425_v37, %v11793_v17 }
0x1259   : > { %v6547_v5 = vpack.c.bf16 %v6491_v6, %v6487_v13  ;;  %v6493_v27 = vmul.f32 %v6429_v23, %v11822_v22  ;;  %v6371_v15 = vadd.f32 1.0, %v9329_v47  ;;  %v9335_v50 = vpop.eup %9334  ;;  %v6424_v39 = vmul.f32 0.5, %v6360_v29 }
0x125a   : > { %v12571_v44 = vpack.c.bf16 %v11901_v41, %v11879_v12  ;;  %v6431_v42 = vmul.f32 0.5, %v6367_v40  ;;  %v6369_v18 = vadd.f32 1.0, %v9325_v54  ;;  %v6373_v3 = vadd.f32 1.0, %v9331_v20  ;;  %v9337_v28 = vpop.eup %9336 }
0x125b   : > { %v6486_v60 = vmul.f32 %v11982_v36, %v11775_v57  ;;  %v6366_v30 = vadd.f32 1.0, %v11972_v52  ;;  %6877 = vmatprep.mubr.bf16.mxu1 %v6547_v5  ;;  %v6549_v17 = vpack.c.bf16 %v6493_v27, %v6489_v1  ;;  %v6435_v33 = vmul.f32 0.5, %v6371_v15  ;;  %v9339_v22 = vpop.eup %9338 }
0x125c   : > { %6967 = vmatmul.mubr.bf16.vlgmr.msra.gmra.mxu0 %v12571_v44  ;;  %v6492_v7 = vmul.f32 %v6428_v34, %v11808_v55  ;;  %v6434_v11 = vmul.f32 0.5, %v6370_v51  ;;  %v6372_v53 = vadd.f32 1.0, %v9333_v8  ;;  %v6433_v31 = vmul.f32 0.5, %v6369_v18  ;;  %v9341_v12 = vpop.eup %9340 }
0x125d   : > { %6974 = vmatprep.mubr.bf16.mxu0 %v6549_v17  ;;  %v6546_v41 = vpack.c.bf16 %v6490_v59, %v6486_v60  ;;  %v6495_v54 = vmul.f32 %v6431_v42, %v11845_v32  ;;  %v6499_v0 = vmul.f32 %v6435_v33, %v11888_v10  ;;  %v6437_v16 = vmul.f32 0.5, %v6373_v3  ;;  %v9343_v57 = vpop.eup %9342  ;;  %v12572_v3 = vld [vmem:[#allocation47_spill] sm:$0xff] }
0x125e   : > { %v6488_v52 = vmul.f32 %v6424_v39, %v11784_v58  ;;  %v6368_v36 = vadd.f32 1.0, %v11980_v46  ;;  %v6375_v47 = vadd.f32 1.0, %v9337_v28  ;;  %v6430_v26 = vmul.f32 0.5, %v6366_v30 }
0x125f   : > { %v6551_v55 = vpack.c.bf16 %v6499_v0, %v6495_v54  ;;  %v6497_v61 = vmul.f32 %v6433_v31, %v11849_v2  ;;  %v6501_v19 = vmul.f32 %v6437_v16, %v11896_v48  ;;  %v6498_v29 = vmul.f32 %v6434_v11, %v11858_v43  ;;  %v12576_v54 = vld [vmem:[#allocation46_spill] sm:$0xff] }
0x1260   : > { %6878 = vmatmul.mubr.bf16.gmra.mxu1 %v6546_v41  ;;  %v9345_v37 = vpop.eup %9344  ;;  %v6436_v32 = vmul.f32 0.5, %v6372_v53  ;;  %v6548_v34 = vpack.c.bf16 %v6492_v7, %v6488_v52  ;;  %v6378_v10 = vadd.f32 1.0, %v9341_v12  ;;  %v6439_v58 = vmul.f32 0.5, %v6375_v47  ;;  %v12573_v7 = vld [vmem:[#allocation43_spill] sm:$0xff]  ;;  %v12575_v12 = vld [vmem:[#allocation45_spill] sm:$0xff] }
0x1261   : > { %6885 = vmatprep.mubr.bf16.mxu1 %v6551_v55  ;;  %v6553_v9 = vpack.c.bf16 %v6501_v19, %v6497_v61  ;;  %v6379_v20 = vadd.f32 1.0, %v9345_v37  ;;  %v6432_v49 = vmul.f32 0.5, %v6368_v36  ;;  %v6377_v46 = vadd.f32 1.0, %v9339_v22 }
0x1262   : > { %v6494_v13 = vmul.f32 %v6430_v26, %v11831_v62  ;;  %v6374_v6 = vadd.f32 1.0, %v9335_v50  ;;  %v6500_v48 = vmul.f32 %v6436_v32, %v11868_v25  ;;  %v6380_v23 = vadd.f32 1.0, %v9343_v57 }
0x1263   : > { %v9347_v21 = vpop.eup %9346  ;;  %v6443_v2 = vmul.f32 0.5, %v6379_v20  ;;  %v6442_v59 = vmul.f32 0.5, %v6378_v10  ;;  %v6503_v40 = vmul.f32 %v6439_v58, %v11933_v38  ;;  %v6496_v5 = vmul.f32 %v6432_v49, %v11842_v63 }
0x1264   : > { %6975 = vmatmul.mubr.bf16.gmra.mxu0 %v6548_v34  ;;  %v6550_v51 = vpack.c.bf16 %v6498_v29, %v6494_v13  ;;  %v6376_v1 = vadd.f32 1.0, %v9347_v21  ;;  %v6441_v15 = vmul.f32 0.5, %v6377_v46  ;;  %v6438_v39 = vmul.f32 0.5, %v6374_v6 }
0x1265   : > { %6982 = vmatprep.mubr.bf16.mxu0 %v6553_v9  ;;  %v9349_v43 = vpop.eup %9348  ;;  %v6507_v8 = vmul.f32 %v6443_v2, %v11963_v56  ;;  %v6444_v50 = vmul.f32 0.5, %v6380_v23  ;;  %v6552_v44 = vpack.c.bf16 %v6500_v48, %v6496_v5  ;;  %v6506_v25 = vmul.f32 %v6442_v59, %v11941_v35 }
0x1266   : > { %v6381_v27 = vadd.f32 1.0, %v9349_v43  ;;  %v6440_v18 = vmul.f32 0.5, %v6376_v1  ;;  %v6505_v38 = vmul.f32 %v6441_v15, %v11936_v4  ;;  %v6502_v63 = vmul.f32 %v6438_v39, %v12572_v3  ;;  %v12574_v4 = vld [vmem:[#allocation44_spill] sm:$0xff] }
0x1267   : > { %v6555_v62 = vpack.c.bf16 %v6507_v8, %v6503_v40  ;;  %v6508_v28 = vmul.f32 %v6444_v50, %v11944_v24 }
0x1268   : > { %6886 = vmatmul.mubr.bf16.gmra.mxu1 %v6550_v51  ;;  %v6445_v42 = vmul.f32 0.5, %v6381_v27  ;;  %v6554_v30 = vpack.c.bf16 %v6506_v25, %v6502_v63  ;;  %v6504_v17 = vmul.f32 %v6440_v18, %v11922_v45 }
0x1269   : > { %6893 = vmatprep.mubr.bf16.mxu1 %v6555_v62 }
0x126a   : > { %v6509_v56 = vmul.f32 %v6445_v42, %v11978_v14  ;;  %v6556_v33 = vpack.c.bf16 %v6508_v28, %v6504_v17 }
0x126c   : > { %6983 = vmatmul.mubr.bf16.gmra.mxu0 %v6552_v44  ;;  %v6557_v60 = vpack.c.bf16 %v6509_v56, %v6505_v38 }
0x126e   : > { %6990 = vmatprep.mubr.bf16.mxu0 %v6557_v60 }
0x1270   : > { %6894 = vmatmul.mubr.bf16.gmra.mxu1 %v6554_v30 }
0x1274   : > { %6991 = vmatmul.mubr.bf16.gmra.mxu0 %v6556_v33 }
0x1286   : > { %v5814_v35 = vpop.f32.mrf.mxu1  ;;  %v5927_v22 = vpop.f32.mrf.mxu0 }
0x1287   : > { %v12034_v11 = vadd.f32 %v5814_v35, %v12573_v7  ;;  %v12037_v53 = vadd.f32 %v5927_v22, %v12574_v4 }
0x1288   : > { %v5816_v14 = vpop.f32.mrf.mxu1  ;;  %v5929_v31 = vpop.f32.mrf.mxu0 }
0x1289   : > { %v5998_v24 = vmul.f32 %v12034_v11, %v12034_v11  ;;  %v6000_v45 = vmul.f32 %v12037_v53, %v12037_v53  ;;  %v12044_v41 = vadd.f32 %v5816_v14, %v12575_v12  ;;  %v12047_v0 = vadd.f32 %v5929_v31, %v12576_v54 }
0x128a   : > { %v5818_v16 = vpop.f32.mrf.mxu1  ;;  %v5931_v57 = vpop.f32.mrf.mxu0 }
0x128b   : > { %v6062_v52 = vmul.f32 %v5998_v24, %v12034_v11  ;;  %v6064_v36 = vmul.f32 %v6000_v45, %v12037_v53  ;;  %v5999_v47 = vmul.f32 %v12044_v41, %v12044_v41  ;;  %v6001_v26 = vmul.f32 %v12047_v0, %v12047_v0 }
0x128c   : > { %v12056_v55 = vadd.f32 %v5818_v16, %v12573_v7  ;;  %v12059_v61 = vadd.f32 %v5931_v57, %v12574_v4  ;;  %v5820_v19 = vpop.f32.mrf.mxu1  ;;  %v5933_v37 = vpop.f32.mrf.mxu0 }
0x128d   : > { %v6126_v29 = vmul.f32 0.044715, %v6062_v52  ;;  %v6128_v32 = vmul.f32 0.044715, %v6064_v36  ;;  %v6063_v34 = vmul.f32 %v5999_v47, %v12044_v41  ;;  %v12067_v20 = vadd.f32 %v5820_v19, %v12575_v12 }
0x128e   : > { %v6002_v10 = vmul.f32 %v12056_v55, %v12056_v55  ;;  %v6004_v9 = vmul.f32 %v12059_v61, %v12059_v61  ;;  %v12070_v58 = vadd.f32 %v5933_v37, %v12576_v54  ;;  %v5824_v49 = vpop.f32.mrf.mxu1  ;;  %v5937_v46 = vpop.f32.mrf.mxu0  ;;  %v6065_v6 = vmul.f32 %v6001_v26, %v12047_v0 }
0x128f   : > { %v6190_v21 = vadd.f32 %v6126_v29, %v12034_v11  ;;  %v6192_v13 = vadd.f32 %v6128_v32, %v12037_v53  ;;  %v6003_v23 = vmul.f32 %v12067_v20, %v12067_v20  ;;  %v6127_v59 = vmul.f32 0.044715, %v6063_v34 }
0x1290   : > { %v6066_v2 = vmul.f32 %v6002_v10, %v12056_v55  ;;  %v6068_v48 = vmul.f32 %v6004_v9, %v12059_v61  ;;  %v6005_v51 = vmul.f32 %v12070_v58, %v12070_v58  ;;  %v5826_v40 = vpop.f32.mrf.mxu1  ;;  %v5939_v15 = vpop.f32.mrf.mxu0  ;;  %v12083_v39 = vadd.f32 %v5824_v49, %v12573_v7 }
0x1291   : > { %v6254_v43 = vmul.f32 0.7978846, %v6190_v21  ;;  %v6256_v8 = vmul.f32 0.7978846, %v6192_v13  ;;  %v6067_v27 = vmul.f32 %v6003_v23, %v12067_v20  ;;  %v6129_v62 = vmul.f32 0.044715, %v6065_v6 }
0x1292   : > { %v6130_v5 = vmul.f32 0.044715, %v6066_v2  ;;  %v6132_v1 = vmul.f32 0.044715, %v6068_v48  ;;  %v6191_v42 = vadd.f32 %v6127_v59, %v12044_v41  ;;  %v6006_v25 = vmul.f32 %v12083_v39, %v12083_v39  ;;  %v5828_v38 = vpop.f32.mrf.mxu1  ;;  %v5941_v63 = vpop.f32.mrf.mxu0 }
0x1293   : > { %9350 = vtanh.f32 %v6254_v43  ;;  %v12091_v18 = vadd.f32 %v5937_v46, %v12574_v4  ;;  %v6131_v56 = vmul.f32 0.044715, %v6067_v27  ;;  %v6069_v3 = vmul.f32 %v6005_v51, %v12070_v58 }
0x1294   : > { %v6194_v50 = vadd.f32 %v6130_v5, %v12056_v55  ;;  %v6196_v44 = vadd.f32 %v6132_v1, %v12059_v61  ;;  %9352 = vtanh.f32 %v6256_v8  ;;  %v6070_v60 = vmul.f32 %v6006_v25, %v12083_v39  ;;  %v5830_v16 = vpop.f32.mrf.mxu1  ;;  %v5943_v26 = vpop.f32.mrf.mxu0 }
0x1295   : > { %v6008_v30 = vmul.f32 %v12091_v18, %v12091_v18  ;;  %v12098_v17 = vadd.f32 %v5826_v40, %v12575_v12  ;;  %v12101_v35 = vadd.f32 %v5939_v15, %v12576_v54  ;;  %v12104_v22 = vadd.f32 %v5828_v38, %v12573_v7 }
0x1296   : > { %v6258_v28 = vmul.f32 0.7978846, %v6194_v50  ;;  %v6260_v33 = vmul.f32 0.7978846, %v6196_v44  ;;  %v6255_v14 = vmul.f32 0.7978846, %v6191_v42  ;;  %v6193_v31 = vadd.f32 %v6129_v62, %v12047_v0 }
0x1297   : > { %v6134_v24 = vmul.f32 0.044715, %v6070_v60  ;;  %v6072_v45 = vmul.f32 %v6008_v30, %v12091_v18  ;;  %v6133_v57 = vmul.f32 0.044715, %v6069_v3  ;;  %v6007_v52 = vmul.f32 %v12098_v17, %v12098_v17 }
0x1298   : > { %v6009_v36 = vmul.f32 %v12101_v35, %v12101_v35  ;;  %v6010_v47 = vmul.f32 %v12104_v22, %v12104_v22  ;;  %9354 = vtanh.f32 %v6258_v28  ;;  %v6195_v19 = vadd.f32 %v6131_v56, %v12067_v20 }
0x1299   : > { %v6136_v37 = vmul.f32 0.044715, %v6072_v45  ;;  %v12116_v29 = vadd.f32 %v5941_v63, %v12574_v4  ;;  %9356 = vtanh.f32 %v6260_v33  ;;  %v6071_v32 = vmul.f32 %v6007_v52, %v12098_v17  ;;  %v5834_v13 = vpop.f32.mrf.mxu1  ;;  %v5947_v5 = vpop.f32.mrf.mxu0 }
0x129a   : > { %v6074_v34 = vmul.f32 %v6010_v47, %v12104_v22  ;;  %v12121_v10 = vadd.f32 %v5830_v16, %v12575_v12  ;;  %v6198_v9 = vadd.f32 %v6134_v24, %v12083_v39  ;;  %v6073_v49 = vmul.f32 %v6009_v36, %v12101_v35 }
0x129b   : > { %v6012_v46 = vmul.f32 %v12116_v29, %v12116_v29  ;;  %v12128_v21 = vadd.f32 %v5943_v26, %v12576_v54  ;;  %v6200_v6 = vadd.f32 %v6136_v37, %v12091_v18  ;;  %v6257_v23 = vmul.f32 0.7978846, %v6193_v31  ;;  %v5836_v62 = vpop.f32.mrf.mxu1  ;;  %v5949_v30 = vpop.f32.mrf.mxu0 }
0x129c   : > { %v6138_v2 = vmul.f32 0.044715, %v6074_v34  ;;  %v6011_v48 = vmul.f32 %v12121_v10, %v12121_v10  ;;  %v6197_v43 = vadd.f32 %v6133_v57, %v12070_v58  ;;  %v6259_v51 = vmul.f32 0.7978846, %v6195_v19 }
0x129d   : > { %v6076_v59 = vmul.f32 %v6012_v46, %v12116_v29  ;;  %v6135_v40 = vmul.f32 0.044715, %v6071_v32  ;;  %9358 = vtanh.f32 %v6255_v14  ;;  %v6262_v1 = vmul.f32 0.7978846, %v6198_v9  ;;  %v5838_v24 = vpop.f32.mrf.mxu1  ;;  %v5951_v37 = vpop.f32.mrf.mxu0 }
0x129e   : > { %v6202_v8 = vadd.f32 %v6138_v2, %v12104_v22  ;;  %v6137_v27 = vmul.f32 0.044715, %v6073_v49  ;;  %v6013_v15 = vmul.f32 %v12128_v21, %v12128_v21  ;;  %v6264_v44 = vmul.f32 0.7978846, %v6200_v6 }
0x129f   : > { %v6140_v42 = vmul.f32 0.044715, %v6076_v59  ;;  %v6075_v25 = vmul.f32 %v6011_v48, %v12121_v10  ;;  %v12140_v38 = vadd.f32 %v5834_v13, %v12573_v7  ;;  %9360 = vtanh.f32 %v6257_v23  ;;  %v5840_v13 = vpop.f32.mrf.mxu1 }
0x12a0   : > { %v9351_v50 = vpop.eup %9350  ;;  %v6261_v3 = vmul.f32 0.7978846, %v6197_v43  ;;  %9362 = vtanh.f32 %v6259_v51  ;;  %v6199_v63 = vadd.f32 %v6135_v40, %v12098_v17  ;;  %v6266_v28 = vmul.f32 0.7978846, %v6202_v8 }
0x12a1   : > { %v9353_v56 = vpop.eup %9352  ;;  %v6014_v60 = vmul.f32 %v12140_v38, %v12140_v38  ;;  %v6382_v33 = vadd.f32 1.0, %v9351_v50  ;;  %9364 = vtanh.f32 %v6262_v1  ;;  %v6201_v14 = vadd.f32 %v6137_v27, %v12101_v35 }
0x12a2   : > { %v6077_v31 = vmul.f32 %v6013_v15, %v12128_v21  ;;  %9366 = vtanh.f32 %v6264_v44  ;;  %v6204_v45 = vadd.f32 %v6140_v42, %v12116_v29  ;;  %v6139_v16 = vmul.f32 0.044715, %v6075_v25  ;;  %v5953_v15 = vpop.f32.mrf.mxu0  ;;  %v5844_v25 = vpop.f32.mrf.mxu1 }
0x12a3   : > { %v6384_v57 = vadd.f32 1.0, %v9353_v56  ;;  %9368 = vtanh.f32 %v6261_v3  ;;  %v6078_v52 = vmul.f32 %v6014_v60, %v12140_v38  ;;  %v6263_v47 = vmul.f32 0.7978846, %v6199_v63 }
0x12a4   : > { %9370 = vtanh.f32 %v6266_v28  ;;  %v12150_v26 = vadd.f32 %v5947_v5, %v12574_v4  ;;  %v12153_v19 = vadd.f32 %v5836_v62, %v12575_v12  ;;  %v6446_v34 = vmul.f32 0.5, %v6382_v33 }
0x12a5   : > { %v9355_v36 = vpop.eup %9354  ;;  %v6265_v9 = vmul.f32 0.7978846, %v6201_v14  ;;  %v6141_v49 = vmul.f32 0.044715, %v6077_v31  ;;  %v12156_v46 = vadd.f32 %v5949_v30, %v12576_v54  ;;  %v6268_v6 = vmul.f32 0.7978846, %v6204_v45 }
0x12a6   : > { %12577 = vst [vmem:[#allocation47_spill] sm:$0xff] %v12150_v26  ;;  %v9357_v32 = vpop.eup %9356  ;;  %v6203_v2 = vadd.f32 %v6139_v16, %v12121_v10  ;;  %v6016_v48 = vmul.f32 %v12150_v26, %v12150_v26  ;;  %v6015_v23 = vmul.f32 %v12153_v19, %v12153_v19  ;;  %v6386_v43 = vadd.f32 1.0, %v9355_v36 }
0x12a7   : > { %v6142_v59 = vmul.f32 0.044715, %v6078_v52  ;;  %v6017_v51 = vmul.f32 %v12156_v46, %v12156_v46  ;;  %v12166_v40 = vadd.f32 %v5838_v24, %v12573_v7  ;;  %v12171_v1 = vadd.f32 %v5951_v37, %v12574_v4 }
0x12a8   : > { %v6080_v8 = vmul.f32 %v6016_v48, %v12150_v26  ;;  %v6079_v5 = vmul.f32 %v6015_v23, %v12153_v19  ;;  %v12174_v27 = vadd.f32 %v5840_v13, %v12575_v12  ;;  %v6388_v62 = vadd.f32 1.0, %v9357_v32 }
0x12a9   : > { %12578 = vst [vmem:[#allocation43_spill] sm:$0xff] %v12171_v1  ;;  %v6205_v50 = vadd.f32 %v6141_v49, %v12128_v21  ;;  %v6081_v44 = vmul.f32 %v6017_v51, %v12156_v46  ;;  %v6018_v42 = vmul.f32 %v12166_v40, %v12166_v40  ;;  %v6448_v3 = vmul.f32 0.5, %v6384_v57  ;;  %v5957_v57 = vpop.f32.mrf.mxu0  ;;  %v5846_v49 = vpop.f32.mrf.mxu1 }
0x12aa   : > { %v12180_v56 = vpop.eup %9358  ;;  %v6143_v63 = vmul.f32 0.044715, %v6079_v5  ;;  %v6020_v28 = vmul.f32 %v12171_v1, %v12171_v1  ;;  %v6019_v60 = vmul.f32 %v12174_v27, %v12174_v27  ;;  %9372 = vtanh.f32 %v6263_v47 }
0x12ab   : > { %v6206_v30 = vadd.f32 %v6142_v59, %v12140_v38  ;;  %v6144_v33 = vmul.f32 0.044715, %v6080_v8  ;;  %v6145_v14 = vmul.f32 0.044715, %v6081_v44  ;;  %v6450_v24 = vmul.f32 0.5, %v6386_v43 }
0x12ac   : > { %v12187_v31 = vpop.eup %9360  ;;  %9374 = vtanh.f32 %v6268_v6  ;;  %v6267_v45 = vmul.f32 0.7978846, %v6203_v2  ;;  %v6082_v16 = vmul.f32 %v6018_v42, %v12166_v40  ;;  %v6452_v36 = vmul.f32 0.5, %v6388_v62  ;;  %v5848_v42 = vpop.f32.mrf.mxu1 }
0x12ad   : > { %v12190_v52 = vpop.eup %9362  ;;  %v6269_v37 = vmul.f32 0.7978846, %v6205_v50  ;;  %v6207_v32 = vadd.f32 %v6143_v63, %v12153_v19  ;;  %v6084_v47 = vmul.f32 %v6020_v28, %v12171_v1  ;;  %v12195_v48 = vmul.f32 %v6446_v34, %v12034_v11 }
0x12ae   : > { %v9365_v13 = vpop.eup %9364  ;;  %9376 = vtanh.f32 %v6265_v9  ;;  %v6083_v6 = vmul.f32 %v6019_v60, %v12174_v27  ;;  %v12199_v2 = vadd.f32 %v5953_v15, %v12576_v54  ;;  %v12202_v43 = vmul.f32 %v6448_v3, %v12037_v53  ;;  %v5959_v15 = vpop.f32.mrf.mxu0 }
0x12af   : > { %v9367_v23 = vpop.eup %9366  ;;  %v6270_v59 = vmul.f32 0.7978846, %v6206_v30  ;;  %v6208_v51 = vadd.f32 %v6144_v33, %v12150_v26  ;;  %v6209_v8 = vadd.f32 %v6145_v14, %v12156_v46  ;;  %v12209_v11 = vmul.f32 %v6450_v24, %v12056_v55 }
0x12b0   : > { %v12206_v5 = vpop.eup %9368  ;;  %9378 = vtanh.f32 %v6267_v45  ;;  %v6146_v34 = vmul.f32 0.044715, %v6082_v16  ;;  %v6021_v9 = vmul.f32 %v12199_v2, %v12199_v2  ;;  %v12214_v53 = vmul.f32 %v6452_v36, %v12059_v61  ;;  %v5961_v16 = vpop.f32.mrf.mxu0 }
0x12b1   : > { %v9371_v62 = vpop.eup %9370  ;;  %9380 = vtanh.f32 %v6269_v37  ;;  %v6271_v50 = vmul.f32 0.7978846, %v6207_v32  ;;  %v6148_v44 = vmul.f32 0.044715, %v6084_v47  ;;  %v12216_v3 = vadd.f32 1.0, %v9365_v13 }
0x12b2   : > { %v12218_v63 = vadd.f32 1.0, %v9367_v23  ;;  %v6147_v55 = vmul.f32 0.044715, %v6083_v6  ;;  %v6085_v28 = vmul.f32 %v6021_v9, %v12199_v2  ;;  %9382 = vtanh.f32 %v6270_v59 }
0x12b3   : > { %v12221_v60 = vmul.f32 0.7978846, %v6208_v51  ;;  %v6273_v30 = vmul.f32 0.7978846, %v6209_v8  ;;  %v12224_v33 = vadd.f32 %v5844_v25, %v12573_v7  ;;  %v12226_v61 = vadd.f32 1.0, %v9371_v62  ;;  %v5850_v25 = vpop.f32.mrf.mxu1 }
0x12b4   : > { %v6210_v14 = vadd.f32 %v6146_v34, %v12166_v40  ;;  %v6149_v24 = vmul.f32 0.044715, %v6085_v28  ;;  %v12230_v45 = vadd.f32 %v5957_v57, %v12574_v4  ;;  %9384 = vtanh.f32 %v6271_v50 }
0x12b5   : > { %12579 = vst [vmem:[#allocation44_spill] sm:$0xff] %v12224_v33  ;;  %v6212_v36 = vadd.f32 %v6148_v44, %v12171_v1  ;;  %v6022_v37 = vmul.f32 %v12224_v33, %v12224_v33  ;;  %v12236_v32 = vadd.f32 %v5846_v49, %v12575_v12  ;;  %v6211_v47 = vadd.f32 %v6147_v55, %v12174_v27 }
0x12b6   : > { %v6213_v13 = vadd.f32 %v6149_v24, %v12199_v2  ;;  %v6024_v6 = vmul.f32 %v12230_v45, %v12230_v45  ;;  %v12243_v57 = vadd.f32 %v5959_v15, %v12576_v54  ;;  %v12249_v51 = vadd.f32 %v5848_v42, %v12573_v7 }
0x12b7   : > { %v6086_v23 = vmul.f32 %v6022_v37, %v12224_v33  ;;  %v6023_v59 = vmul.f32 %v12236_v32, %v12236_v32  ;;  %v12252_v49 = vadd.f32 %v5961_v16, %v12574_v4  ;;  %v12254_v8 = vpop.eup %9372  ;;  %9386 = vtanh.f32 %v6273_v30 }
0x12b8   : > { %v6088_v34 = vmul.f32 %v6024_v6, %v12230_v45  ;;  %v6025_v9 = vmul.f32 %v12243_v57, %v12243_v57  ;;  %v12260_v15 = vadd.f32 %v5850_v25, %v12575_v12  ;;  %v6274_v50 = vmul.f32 0.7978846, %v6210_v14 }
0x12b9   : > { %v9375_v62 = vpop.eup %9374  ;;  %v6150_v44 = vmul.f32 0.044715, %v6086_v23  ;;  %v6087_v7 = vmul.f32 %v6023_v59, %v12236_v32  ;;  %v6026_v4 = vmul.f32 %v12249_v51, %v12249_v51  ;;  %v6276_v42 = vmul.f32 0.7978846, %v6212_v36 }
0x12ba   : > { %v6275_v55 = vmul.f32 0.7978846, %v6211_v47  ;;  %v6089_v28 = vmul.f32 %v6025_v9, %v12243_v57  ;;  %v6028_v30 = vmul.f32 %v12252_v49, %v12252_v49  ;;  %v6277_v16 = vmul.f32 0.7978846, %v6213_v13 }
0x12bb   : > { %v12268_v24 = vpop.eup %9376  ;;  %v6214_v12 = vadd.f32 %v6150_v44, %v12224_v33  ;;  %v6151_v37 = vmul.f32 0.044715, %v6087_v7  ;;  %v6090_v14 = vmul.f32 %v6026_v4, %v12249_v51  ;;  %v6152_v25 = vmul.f32 0.044715, %v6088_v34  ;;  %v5963_v4 = vpop.f32.mrf.mxu0 }
0x12bc   : > { %v6153_v6 = vmul.f32 0.044715, %v6089_v28  ;;  %v6092_v23 = vmul.f32 %v6028_v30, %v12252_v49  ;;  %v6027_v36 = vmul.f32 %v12260_v15, %v12260_v15  ;;  %v6396_v59 = vadd.f32 1.0, %v9375_v62 }
0x12bd   : > { %v9379_v47 = vpop.eup %9378  ;;  %9388 = vtanh.f32 %v6274_v50  ;;  %v6215_v9 = vadd.f32 %v6151_v37, %v12236_v32  ;;  %v6154_v26 = vmul.f32 0.044715, %v6090_v14  ;;  %v6278_v13 = vmul.f32 0.7978846, %v6214_v12 }
0x12be   : > { %v9381_v1 = vpop.eup %9380  ;;  %9390 = vtanh.f32 %v6276_v42  ;;  %v6217_v44 = vadd.f32 %v6153_v6, %v12243_v57  ;;  %v6156_v7 = vmul.f32 0.044715, %v6092_v23  ;;  %v6091_v30 = vmul.f32 %v6027_v36, %v12260_v15 }
0x12bf   : > { %9392 = vtanh.f32 %v6275_v55  ;;  %v6279_v34 = vmul.f32 0.7978846, %v6215_v9  ;;  %v6218_v28 = vadd.f32 %v6154_v26, %v12249_v51  ;;  %v9383_v33 = vpop.eup %9382  ;;  %v12280_v62 = vmul.f32 0.5, %v12216_v3 }
0x12c0   : > { %9394 = vtanh.f32 %v6277_v16  ;;  %v6216_v50 = vadd.f32 %v6152_v25, %v12230_v45  ;;  %v6281_v37 = vmul.f32 0.7978846, %v6217_v44  ;;  %v6220_v42 = vadd.f32 %v6156_v7, %v12252_v49 }
0x12c1   : > { %9396 = vtanh.f32 %v12221_v60  ;;  %v6155_v12 = vmul.f32 0.044715, %v6091_v30  ;;  %v12286_v55 = vadd.f32 %v5963_v4, %v12576_v54  ;;  %v9385_v14 = vpop.eup %9384  ;;  %v12289_v26 = vmul.f32 0.5, %v12218_v63 }
0x12c2   : > { %v6458_v6 = vmul.f32 0.5, %v12226_v61  ;;  %9398 = vtanh.f32 %v6278_v13  ;;  %v6282_v3 = vmul.f32 0.7978846, %v6218_v28  ;;  %v6460_v16 = vmul.f32 0.5, %v6396_v59 }
0x12c3   : > { %9400 = vtanh.f32 %v6279_v34  ;;  %v6219_v25 = vadd.f32 %v6155_v12, %v12260_v15  ;;  %v6029_v60 = vmul.f32 %v12286_v55, %v12286_v55  ;;  %v6280_v23 = vmul.f32 0.7978846, %v6216_v50 }
0x12c4   : > { %9402 = vtanh.f32 %v6281_v37  ;;  %v6383_v54 = vadd.f32 1.0, %v12180_v56  ;;  %v6387_v36 = vadd.f32 1.0, %v12190_v52  ;;  %v9387_v9 = vpop.eup %9386  ;;  %v6284_v63 = vmul.f32 0.7978846, %v6220_v42 }
0x12c5   : > { %v6283_v44 = vmul.f32 0.7978846, %v6219_v25  ;;  %v6093_v61 = vmul.f32 %v6029_v60, %v12286_v55  ;;  %v6385_v13 = vadd.f32 1.0, %v12187_v31  ;;  %9404 = vtanh.f32 %v6282_v3 }
0x12c6   : > { %v6447_v59 = vmul.f32 0.5, %v6383_v54  ;;  %v6451_v7 = vmul.f32 0.5, %v6387_v36  ;;  %v6389_v4 = vadd.f32 1.0, %v12206_v5  ;;  %v12301_v34 = vmul.f32 %v6458_v6, %v12104_v22 }
0x12c7   : > { %9406 = vtanh.f32 %v6283_v44  ;;  %v6157_v28 = vmul.f32 0.044715, %v6093_v61  ;;  %v6449_v56 = vmul.f32 0.5, %v6385_v13  ;;  %v6391_v42 = vadd.f32 1.0, %v12254_v8 }
0x12c8   : > { %9408 = vtanh.f32 %v6280_v23  ;;  %v6511_v52 = vmul.f32 %v6447_v59, %v12044_v41  ;;  %v6515_v30 = vmul.f32 %v6451_v7, %v12067_v20  ;;  %v6453_v50 = vmul.f32 0.5, %v6389_v4 }
0x12c9   : > { %9410 = vtanh.f32 %v6284_v63  ;;  %v6221_v31 = vadd.f32 %v6157_v28, %v12286_v55  ;;  %v6513_v37 = vmul.f32 %v6449_v56, %v12047_v0  ;;  %v6395_v6 = vadd.f32 1.0, %v9379_v47 }
0x12ca   : > { %v9389_v5 = vpop.eup %9388  ;;  %v6559_v12 = vpack.c.bf16 %v6515_v30, %v6511_v52  ;;  %v6517_v22 = vmul.f32 %v6453_v50, %v12070_v58  ;;  %v6393_v3 = vadd.f32 1.0, %v12268_v24  ;;  %v6558_v41 = vpack.c.bf16 %v12209_v11, %v12195_v48 }
0x12cb   : > { %v9391_v25 = vpop.eup %9390  ;;  %v6285_v60 = vmul.f32 0.7978846, %v6221_v31  ;;  %v6455_v20 = vmul.f32 0.5, %v6391_v42  ;;  %v6397_v23 = vadd.f32 1.0, %v9381_v1  ;;  %v6524_v36 = vmul.f32 %v6460_v16, %v12116_v29 }
0x12cc   : > { %v9393_v54 = vpop.eup %9392  ;;  %6901 = vmatprep.mubr.bf16.mxu1 %v6559_v12  ;;  %v6561_v0 = vpack.c.bf16 %v6517_v22, %v6513_v37  ;;  %v6459_v8 = vmul.f32 0.5, %v6395_v6  ;;  %v6457_v63 = vmul.f32 0.5, %v6393_v3  ;;  %v6398_v61 = vadd.f32 1.0, %v9383_v33 }
0x12cd   : > { %v9395_v44 = vpop.eup %9394  ;;  %9412 = vtanh.f32 %v6285_v60  ;;  %6902 = vmatmul.mubr.bf16.gmra.mxu1 %v6558_v41  ;;  %v6560_v58 = vpack.c.bf16 %v12214_v53, %v12202_v43  ;;  %v6461_v24 = vmul.f32 0.5, %v6397_v23  ;;  %v6402_v13 = vadd.f32 1.0, %v9389_v5 }
0x12ce   : > { %v9397_v47 = vpop.eup %9396  ;;  %6998 = vmatprep.mubr.bf16.mxu0 %v6561_v0  ;;  %v6519_v1 = vmul.f32 %v6455_v20, %v12098_v17  ;;  %v6523_v48 = vmul.f32 %v6459_v8, %v12121_v10  ;;  %v6399_v29 = vadd.f32 1.0, %v9385_v14  ;;  %v6521_v16 = vmul.f32 %v6457_v63, %v12101_v35  ;;  %v12580_v8 = vld [vmem:[#allocation43_spill] sm:$0xff] }
0x12cf   : > { %v9399_v11 = vpop.eup %9398  ;;  %6999 = vmatmul.mubr.bf16.gmra.mxu0 %v6560_v58  ;;  %v6525_v33 = vmul.f32 %v6461_v24, %v12128_v21  ;;  %v6403_v59 = vadd.f32 1.0, %v9393_v54  ;;  %v6401_v7 = vadd.f32 1.0, %v9387_v9  ;;  %v6404_v28 = vadd.f32 1.0, %v9391_v25  ;;  %v12581_v24 = vld [vmem:[#allocation47_spill] sm:$0xff] }
0x12d0   : > { %v9401_v4 = vpop.eup %9400  ;;  %v6563_v43 = vpack.c.bf16 %v6523_v48, %v6519_v1  ;;  %v6463_v53 = vmul.f32 0.5, %v6399_v29  ;;  %v6405_v56 = vadd.f32 1.0, %v9395_v44  ;;  %v6518_v17 = vmul.f32 %v12280_v62, %v12083_v39 }
0x12d1   : > { %v9403_v52 = vpop.eup %9402  ;;  %v6565_v30 = vpack.c.bf16 %v6525_v33, %v6521_v16  ;;  %v6467_v10 = vmul.f32 0.5, %v6403_v59  ;;  %v6520_v14 = vmul.f32 %v12289_v26, %v12091_v18  ;;  %v6400_v50 = vadd.f32 1.0, %v9397_v47 }
0x12d2   : > { %v6466_v35 = vmul.f32 0.5, %v6402_v13  ;;  %6909 = vmatprep.mubr.bf16.mxu1 %v6563_v43  ;;  %v6465_v21 = vmul.f32 0.5, %v6401_v7  ;;  %v9405_v31 = vpop.eup %9404  ;;  %v6562_v9 = vpack.c.bf16 %v12301_v34, %v6518_v17  ;;  %v6527_v37 = vmul.f32 %v6463_v53, %v12153_v19 }
0x12d3   : > { %7006 = vmatprep.mubr.bf16.mxu0 %v6565_v30  ;;  %v6531_v42 = vmul.f32 %v6467_v10, %v12174_v27  ;;  %v6469_v5 = vmul.f32 0.5, %v6405_v56  ;;  %v6462_v39 = vmul.f32 0.5, %v6398_v61  ;;  %v6468_v62 = vmul.f32 0.5, %v6404_v28  ;;  %v12582_v28 = vld [vmem:[#allocation44_spill] sm:$0xff] }
0x12d4   : > { %v9407_v12 = vpop.eup %9406  ;;  %v6564_v22 = vpack.c.bf16 %v6524_v36, %v6520_v14  ;;  %v6407_v6 = vadd.f32 1.0, %v9401_v4  ;;  %v6529_v26 = vmul.f32 %v6465_v21, %v12156_v46  ;;  %v6464_v34 = vmul.f32 0.5, %v6400_v50 }
0x12d5   : > { %v9409_v3 = vpop.eup %9408  ;;  %6910 = vmatmul.mubr.bf16.gmra.mxu1 %v6562_v9  ;;  %v6567_v18 = vpack.c.bf16 %v6531_v42, %v6527_v37  ;;  %v6533_v25 = vmul.f32 %v6469_v5, %v12199_v2  ;;  %v6411_v60 = vadd.f32 1.0, %v9407_v12  ;;  %v6410_v20 = vadd.f32 1.0, %v9405_v31 }
0x12d6   : > { %v9411_v41 = vpop.eup %9410  ;;  %v6471_v19 = vmul.f32 0.5, %v6407_v6  ;;  %v6530_v27 = vmul.f32 %v6466_v35, %v12166_v40  ;;  %v6409_v36 = vadd.f32 1.0, %v9403_v52  ;;  %v6526_v0 = vmul.f32 %v6462_v39, %v12140_v38  ;;  %v12584_v39 = vld [vmem:[#allocation27_spill] sm:$0xff] }
0x12d7   : > { %7007 = vmatmul.mubr.bf16.gmra.mxu0 %v6564_v22  ;;  %6917 = vmatprep.mubr.bf16.mxu1 %v6567_v18  ;;  %v6569_v23 = vpack.c.bf16 %v6533_v25, %v6529_v26  ;;  %v6475_v54 = vmul.f32 0.5, %v6411_v60  ;;  %v6532_v63 = vmul.f32 %v6468_v62, %v12580_v8  ;;  %v6406_v44 = vadd.f32 1.0, %v9399_v11 }
0x12d8   : > { %v6412_v46 = vadd.f32 1.0, %v9411_v41  ;;  %v6535_v2 = vmul.f32 %v6471_v19, %v12236_v32  ;;  %v6528_v47 = vmul.f32 %v6464_v34, %v12581_v24  ;;  %v6408_v40 = vadd.f32 1.0, %v9409_v3  ;;  %v12585_v34 = vld [vmem:[#allocation30_spill] sm:$0xff] }
0x12d9   : > { %7014 = vmatprep.mubr.bf16.mxu0 %v6569_v23  ;;  %v6539_v61 = vmul.f32 %v6475_v54, %v12260_v15  ;;  %v6474_v13 = vmul.f32 0.5, %v6410_v20  ;;  %v6566_v1 = vpack.c.bf16 %v6530_v27, %v6526_v0  ;;  %v6473_v16 = vmul.f32 0.5, %v6409_v36 }
0x12da   : > { %v9413_v58 = vpop.eup %9412  ;;  %v6470_v33 = vmul.f32 0.5, %v6406_v44  ;;  %v6476_v38 = vmul.f32 0.5, %v6412_v46  ;;  %v6568_v59 = vpack.c.bf16 %v6532_v63, %v6528_v47  ;;  %v6472_v7 = vmul.f32 0.5, %v6408_v40  ;;  %v12586_v44 = vld [vmem:[#allocation28_spill] sm:$0xff] }
0x12db   : > { %v6571_v48 = vpack.c.bf16 %v6539_v61, %v6535_v2  ;;  %v6413_v29 = vadd.f32 1.0, %v9413_v58  ;;  %v6538_v32 = vmul.f32 %v6474_v13, %v12249_v51  ;;  %v6537_v15 = vmul.f32 %v6473_v16, %v12243_v57  ;;  %v12343_v51 = vld [vmem:[%s12583_s8] ss:$0 sm:$0xff] }
0x12dc   : > { %v6534_v43 = vmul.f32 %v6470_v33, %v12582_v28  ;;  %v6540_v53 = vmul.f32 %v6476_v38, %v12252_v49  ;;  %v6536_v52 = vmul.f32 %v6472_v7, %v12230_v45 }
0x12dd   : > { %6918 = vmatmul.mubr.bf16.gmra.mxu1 %v6566_v1  ;;  %v6477_v11 = vmul.f32 0.5, %v6413_v29 }
0x12de   : > { %6925 = vmatprep.mubr.bf16.mxu1 %v6571_v48  ;;  %v6570_v17 = vpack.c.bf16 %v6538_v32, %v6534_v43  ;;  %v6572_v30 = vpack.c.bf16 %v6540_v53, %v6536_v52  ;;  %v12587_v48 = vld [vmem:[#allocation29_spill] sm:$0xff] }
0x12df   : > { %7015 = vmatmul.mubr.bf16.gmra.mxu0 %v6568_v59  ;;  %v6541_v4 = vmul.f32 %v6477_v11, %v12286_v55 }
0x12e1   : > { %v6573_v56 = vpack.c.bf16 %v6541_v4, %v6537_v15  ;;  %v12588_v4 = vld [vmem:[#allocation31_spill] sm:$0xff] }
0x12e3   : > { %7022 = vmatprep.mubr.bf16.mxu0 %v6573_v56 }
0x12e5   : > { %6926 = vmatmul.mubr.bf16.gmra.mxu1 %v6570_v17 }
0x12e7   : > { %7023 = vmatmul.mubr.bf16.gmra.mxu0 %v6572_v30 }
0x1318   : > { %v8093_v10 = vpop.f32.mrf.mxu1 }
0x131a   : > { %v8094_v57 = vpop.f32.mrf.mxu1 }
0x131b   : > { %v8095_v14 = vadd.f32 %v8094_v57, %v8093_v10 }
0x131c   : > { %v8157_v55 = vpop.f32.mrf.mxu0  ;;  %v8096_v50 = vpop.f32.mrf.mxu1 }
0x131d   : > { %v6872_v49 = vadd.f32 %v8095_v14, %v12343_v51 }
0x131e   : > { %v8158_v35 = vpop.f32.mrf.mxu0  ;;  %v8097_v21 = vpop.f32.mrf.mxu1 }
0x131f   : > { %v8159_v45 = vadd.f32 %v8158_v35, %v8157_v55  ;;  %v8098_v9 = vadd.f32 %v8097_v21, %v8096_v50  ;;  %v12589_v55 = vld [vmem:[#allocation32_spill] sm:$0xff] }
0x1320   : > { %v8160_v31 = vpop.f32.mrf.mxu0  ;;  %v8099_v42 = vpop.f32.mrf.mxu1 }
0x1321   : > { %v6969_v37 = vadd.f32 %v8159_v45, %v6872_v49  ;;  %v6875_v5 = vadd.f32 %v8098_v9, %v12343_v51 }
0x1322   : > { %v8161_v12 = vpop.f32.mrf.mxu0  ;;  %v8100_v6 = vpop.f32.mrf.mxu1 }
0x1323   : > { %v7031_v62 = vadd.f32 %v6969_v37, %v12584_v39  ;;  %v8162_v22 = vadd.f32 %v8161_v12, %v8160_v31  ;;  %v8101_v18 = vadd.f32 %v8100_v6, %v8099_v42  ;;  %v12590_v37 = vld [vmem:[#allocation33_spill] sm:$0xff]  ;;  %v12591_v39 = vld [vmem:[#allocation34_spill] sm:$0xff] }
0x1324   : > { %v8163_v3 = vpop.f32.mrf.mxu0  ;;  %v8102_v25 = vpop.f32.mrf.mxu1 }
0x1325   : > { %7047 = vst [vmem:[%s12350_s20] sm:$0xff] %v7031_v62  ;;  %v6972_v26 = vadd.f32 %v8162_v22, %v6875_v5  ;;  %v6880_v60 = vadd.f32 %v8101_v18, %v12343_v51 }
0x1326   : > { %v8164_v41 = vpop.f32.mrf.mxu0  ;;  %v8103_v27 = vpop.f32.mrf.mxu1 }
0x1327   : > { %v7032_v20 = vadd.f32 %v6972_v26, %v12585_v34  ;;  %v8165_v19 = vadd.f32 %v8164_v41, %v8163_v3  ;;  %v8104_v54 = vadd.f32 %v8103_v27, %v8102_v25 }
0x1328   : > { %v8166_v23 = vpop.f32.mrf.mxu0  ;;  %v8105_v0 = vpop.f32.mrf.mxu1 }
0x1329   : > { %7048 = vst [vmem:[%s12350_s20 + $0x8] sm:$0xff] %v7032_v20  ;;  %v6977_v36 = vadd.f32 %v8165_v19, %v6880_v60  ;;  %v6883_v8 = vadd.f32 %v8104_v54, %v12343_v51 }
0x132a   : > { %v8167_v63 = vpop.f32.mrf.mxu0  ;;  %v8106_v61 = vpop.f32.mrf.mxu1 }
0x132b   : > { %v7033_v46 = vadd.f32 %v6977_v36, %v12586_v44  ;;  %v8168_v2 = vadd.f32 %v8167_v63, %v8166_v23  ;;  %v8107_v24 = vadd.f32 %v8106_v61, %v8105_v0  ;;  %v12592_v36 = vld [vmem:[#allocation35_spill] sm:$0xff] }
0x132c   : > { %v8169_v58 = vpop.f32.mrf.mxu0  ;;  %v8108_v40 = vpop.f32.mrf.mxu1 }
0x132d   : > { %7049 = vst [vmem:[%s12350_s20 + $0x10] sm:$0xff] %v7033_v46  ;;  %v6980_v47 = vadd.f32 %v8168_v2, %v6883_v8  ;;  %v6888_v13 = vadd.f32 %v8107_v24, %v12343_v51 }
0x132e   : > { %v8170_v1 = vpop.f32.mrf.mxu0  ;;  %v8109_v33 = vpop.f32.mrf.mxu1 }
0x132f   : > { %v7034_v29 = vadd.f32 %v6980_v47, %v12587_v48  ;;  %v8171_v16 = vadd.f32 %v8170_v1, %v8169_v58  ;;  %v8110_v59 = vadd.f32 %v8109_v33, %v8108_v40  ;;  %v12593_v47 = vld [vmem:[#allocation37_spill] sm:$0xff] }
0x1330   : > { %v8172_v38 = vpop.f32.mrf.mxu0  ;;  %v8111_v7 = vpop.f32.mrf.mxu1 }
0x1331   : > { %7050 = vst [vmem:[%s12350_s20 + $0x18] sm:$0xff] %v7034_v29  ;;  %v6985_v11 = vadd.f32 %v8171_v16, %v6888_v13  ;;  %v6891_v32 = vadd.f32 %v8110_v59, %v12343_v51 }
0x1332   : > { %v8173_v15 = vpop.f32.mrf.mxu0  ;;  %v8112_v53 = vpop.f32.mrf.mxu1 }
0x1333   : > { %v7035_v28 = vadd.f32 %v6985_v11, %v12588_v4  ;;  %v8174_v43 = vadd.f32 %v8173_v15, %v8172_v38  ;;  %v8113_v52 = vadd.f32 %v8112_v53, %v8111_v7  ;;  %v12594_v11 = vld [vmem:[#allocation36_spill] sm:$0xff] }
0x1334   : > { %v8175_v56 = vpop.f32.mrf.mxu0  ;;  %v8114_v30 = vpop.f32.mrf.mxu1 }
0x1335   : > { %7051 = vst [vmem:[%s12350_s20 + $0x20] sm:$0xff] %v7035_v28  ;;  %v6988_v17 = vadd.f32 %v8174_v43, %v6891_v32  ;;  %v6896_v10 = vadd.f32 %v8113_v52, %v12343_v51 }
0x1336   : > { %v8176_v57 = vpop.f32.mrf.mxu0  ;;  %v8115_v49 = vpop.f32.mrf.mxu1 }
0x1337   : > { %v7036_v14 = vadd.f32 %v6988_v17, %v12589_v55  ;;  %v8177_v50 = vadd.f32 %v8176_v57, %v8175_v56  ;;  %v8116_v45 = vadd.f32 %v8115_v49, %v8114_v30  ;;  %v12595_v17 = vld [vmem:[#allocation38_spill] sm:$0xff] }
0x1338   : > { %v8178_v35 = vpop.f32.mrf.mxu0 }
0x1339   : > { %7052 = vst [vmem:[%s12350_s20 + $0x28] sm:$0xff] %v7036_v14  ;;  %v6993_v21 = vadd.f32 %v8177_v50, %v6896_v10  ;;  %v6899_v31 = vadd.f32 %v8116_v45, %v12343_v51 }
0x133a   : > { %v8179_v9 = vpop.f32.mrf.mxu0 }
0x133b   : > { %v7037_v42 = vadd.f32 %v6993_v21, %v12590_v37  ;;  %v8180_v5 = vadd.f32 %v8179_v9, %v8178_v35  ;;  %v12596_v21 = vld [vmem:[#allocation39_spill] sm:$0xff] }
0x133d   : > { %7053 = vst [vmem:[%s12350_s20 + $0x30] sm:$0xff] %v7037_v42  ;;  %v6996_v12 = vadd.f32 %v8180_v5, %v6899_v31 }
0x133f   : > { %v7038_v62 = vadd.f32 %v6996_v12, %v12591_v39 }
0x1341   : > { %7054 = vst [vmem:[%s12350_s20 + $0x38] sm:$0xff] %v7038_v62 }
0x138d   : > { %v8117_v22 = vpop.f32.mrf.mxu1 }
0x138f   : > { %v8181_v6 = vpop.f32.mrf.mxu0  ;;  %v8118_v3 = vpop.f32.mrf.mxu1 }
0x1390   : > { %v8119_v18 = vadd.f32 %v8118_v3, %v8117_v22 }
0x1391   : > { %v8182_v26 = vpop.f32.mrf.mxu0  ;;  %v8120_v25 = vpop.f32.mrf.mxu1 }
0x1392   : > { %v6904_v60 = vadd.f32 %v8119_v18, %v12343_v51  ;;  %v8183_v41 = vadd.f32 %v8182_v26, %v8181_v6  ;;  %v12597_v6 = vld [vmem:[#allocation41_spill] sm:$0xff] }
0x1393   : > { %v8184_v34 = vpop.f32.mrf.mxu0  ;;  %v8121_v20 = vpop.f32.mrf.mxu1 }
0x1394   : > { %v7001_v19 = vadd.f32 %v8183_v41, %v6904_v60  ;;  %v8122_v27 = vadd.f32 %v8121_v20, %v8120_v25 }
0x1395   : > { %v8185_v23 = vpop.f32.mrf.mxu0  ;;  %v8123_v54 = vpop.f32.mrf.mxu1 }
0x1396   : > { %v7039_v0 = vadd.f32 %v7001_v19, %v12592_v36  ;;  %v6907_v8 = vadd.f32 %v8122_v27, %v12343_v51  ;;  %v8186_v63 = vadd.f32 %v8185_v23, %v8184_v34  ;;  %v12598_v19 = vld [vmem:[#allocation40_spill] sm:$0xff] }
0x1397   : > { %v8187_v44 = vpop.f32.mrf.mxu0  ;;  %v8124_v46 = vpop.f32.mrf.mxu1 }
0x1398   : > { %7055 = vst [vmem:[%s12350_s20 + $0x40] sm:$0xff] %v7039_v0  ;;  %v7004_v2 = vadd.f32 %v8186_v63, %v6907_v8  ;;  %v8125_v61 = vadd.f32 %v8124_v46, %v8123_v54  ;;  %v12600_v0 = vld [vmem:[#allocation42_spill] sm:$0xff] }
0x1399   : > { %v8188_v58 = vpop.f32.mrf.mxu0  ;;  %v8126_v24 = vpop.f32.mrf.mxu1 }
0x139a   : > { %v7040_v40 = vadd.f32 %v7004_v2, %v12593_v47  ;;  %v6912_v13 = vadd.f32 %v8125_v61, %v12343_v51  ;;  %v8189_v1 = vadd.f32 %v8188_v58, %v8187_v44 }
0x139b   : > { %v8190_v48 = vpop.f32.mrf.mxu0  ;;  %v8127_v29 = vpop.f32.mrf.mxu1 }
0x139c   : > { %7056 = vst [vmem:[%s12350_s20 + $0x48] sm:$0xff] %v7040_v40  ;;  %v7009_v16 = vadd.f32 %v8189_v1, %v6912_v13  ;;  %v8128_v33 = vadd.f32 %v8127_v29, %v8126_v24 }
0x139d   : > { %v8191_v38 = vpop.f32.mrf.mxu0  ;;  %v8129_v59 = vpop.f32.mrf.mxu1 }
0x139e   : > { %v7041_v7 = vadd.f32 %v7009_v16, %v12594_v11  ;;  %v6915_v32 = vadd.f32 %v8128_v33, %v12343_v51  ;;  %v8192_v15 = vadd.f32 %v8191_v38, %v8190_v48 }
0x139f   : > { %v8193_v4 = vpop.f32.mrf.mxu0  ;;  %v8130_v28 = vpop.f32.mrf.mxu1 }
0x13a0   : > { %7057 = vst [vmem:[%s12350_s20 + $0x50] sm:$0xff] %v7041_v7  ;;  %v7012_v43 = vadd.f32 %v8192_v15, %v6915_v32  ;;  %v8131_v53 = vadd.f32 %v8130_v28, %v8129_v59 }
0x13a1   : > { %v8194_v56 = vpop.f32.mrf.mxu0  ;;  %v8132_v52 = vpop.f32.mrf.mxu1 }
0x13a2   : > { %v7042_v30 = vadd.f32 %v7012_v43, %v12595_v17  ;;  %v6920_v10 = vadd.f32 %v8131_v53, %v12343_v51  ;;  %v8195_v57 = vadd.f32 %v8194_v56, %v8193_v4 }
0x13a3   : > { %v8196_v55 = vpop.f32.mrf.mxu0  ;;  %v8133_v14 = vpop.f32.mrf.mxu1 }
0x13a4   : > { %7058 = vst [vmem:[%s12350_s20 + $0x58] sm:$0xff] %v7042_v30  ;;  %v7017_v50 = vadd.f32 %v8195_v57, %v6920_v10  ;;  %v8134_v49 = vadd.f32 %v8133_v14, %v8132_v52 }
0x13a5   : > { %v8197_v35 = vpop.f32.mrf.mxu0  ;;  %v8135_v45 = vpop.f32.mrf.mxu1 }
0x13a6   : > { %v7043_v31 = vadd.f32 %v7017_v50, %v12596_v21  ;;  %v6923_v9 = vadd.f32 %v8134_v49, %v12343_v51  ;;  %v8198_v37 = vadd.f32 %v8197_v35, %v8196_v55 }
0x13a7   : > { %v8199_v42 = vpop.f32.mrf.mxu0  ;;  %v8136_v5 = vpop.f32.mrf.mxu1 }
0x13a8   : > { %7059 = vst [vmem:[%s12350_s20 + $0x60] sm:$0xff] %v7043_v31  ;;  %v7020_v12 = vadd.f32 %v8198_v37, %v6923_v9  ;;  %v8137_v39 = vadd.f32 %v8136_v5, %v8135_v45 }
0x13a9   : > { %v8200_v62 = vpop.f32.mrf.mxu0  ;;  %v8138_v22 = vpop.f32.mrf.mxu1 }
0x13aa   : > { %v7044_v3 = vadd.f32 %v7020_v12, %v12597_v6  ;;  %v6928_v18 = vadd.f32 %v8137_v39, %v12343_v51  ;;  %v8201_v26 = vadd.f32 %v8200_v62, %v8199_v42 }
0x13ab   : > { %v8202_v25 = vpop.f32.mrf.mxu0  ;;  %v8139_v60 = vpop.f32.mrf.mxu1 }
0x13ac   : > { %7060 = vst [vmem:[%s12350_s20 + $0x68] sm:$0xff] %v7044_v3  ;;  %v7025_v41 = vadd.f32 %v8201_v26, %v6928_v18  ;;  %v8140_v34 = vadd.f32 %v8139_v60, %v8138_v22 }
0x13ad   : > { %v8203_v20 = vpop.f32.mrf.mxu0 }
0x13ae   : > { %v7045_v27 = vadd.f32 %v7025_v41, %v12598_v19  ;;  %v6931_v23 = vadd.f32 %v8140_v34, %v12343_v51  ;;  %v8204_v54 = vadd.f32 %v8203_v20, %v8202_v25 }
0x13b0   : > { %7061 = vst [vmem:[%s12350_s20 + $0x70] sm:$0xff] %v7045_v27  ;;  %v7028_v36 = vadd.f32 %v8204_v54, %v6931_v23 }
0x13b2   : > { %v7046_v8 = vadd.f32 %v7028_v36, %v12600_v0 }
0x13b4   : > { %7062 = vst [vmem:[%s12350_s20 + $0x78] sm:$0xff] %v7046_v8 }
0x13b5   : > { %9668 = shalt.err (!%p9665_p8)
}
0x13b6   : > { %s9669_s23 = scalar_lea.hbm %s12400_s17, 2048  ;;  %s9673_s20 = scalar_lea.hbm %s12599_s4, 4096 }
0x13b7   : > { %p9670_p6 = scmp.ne.s32.totalorder %s12400_s17, %s9669_s23  ;;  %p9674_p0 = scmp.lt.s32.totalorder %s12400_s17, %s12599_s4 }
0x13b8   : > { %p9675_p2 = scmp.lt.s32.totalorder %s9673_s20, %s9669_s23 }
0x13b9   : > { %p9671_p11 = pnand %p9670_p6, %p12601_p10 }
0x13ba   : > { %p9676_p5 = por %p9675_p2, %p9674_p0 }
0x13bb   : > { %p9672_p7 = pneg %p9671_p11 }
0x13bd   : > { %p9677_p9 = pnand %p9676_p5, %p9672_p7 }
0x13bf   : > { %9680 = shalt.err (!%p9677_p9)
}
0x13c0   : > { %s9756_s19 = smov 128   ;;  %s9757_s2 = smov 8  }
0x13c1   : > { %8651 = dma.vmem_to_hbm [thread:$0]  (%p12601_p10), %s12402_s0, 2048, %s12400_s17, %s7064_s26, %s9756_s19, %s9756_s19, %s9757_s2  }
0x13c2 PF: > { %s7092_s1 = sand.u32 1, %s9723_s27   ;;  %p12602_p12 = scmp.ne.s32.totalorder %s12527_s22, 0 }
0x13c3   : > { %p12603_p13 = scmp.ge.s32.totalorder %s9735_s30, 2  ;;  %s7093_s10 = scalar_lea.sflag [#allocation8], %s7092_s1 }
0x13c5   : > { %p8680_p1 = pnand %p12603_p13, %p12602_p12 }
0x13c7   : > { %p8681_p3 = pneg %p8680_p1 }
0x13c9   : > { %9718 = dma.done.wait (%p8681_p3), %s7093_s10, 2048  }
0x13ca   : > { %9720 = vsyncadd (%p8681_p3), %s7093_s10, 4294965248  ;;  %p35_p4 = scmp.ge.s32.totalorder %s9977_s25, 4   ;;  %s12604_s27 = smov %s9727_s28 }
0x13cb   : > { %s12605_s28 = smov %s9731_s29  ;;  %s12606_s29 = smov %s9989_s15 }
0x13cc   : > { %s12607_s30 = smov %s9977_s25  ;;  %37 = sbr.rel (!%p35_p4) target bundleno = 23 (0x17), region = 165 }
0x13d1   :  { %7098 = vsyncpa [#allocation7], 1 }
0x13d2   :  { %7100 = vsyncpa [#allocation7 + $0x1], 1 }
0x13d3   :  { %7101 = vsyncpa [#allocation10], 1 }
0x13d4   :  { %7102 = vsyncpa [#allocation13], 1 }
0x13d5   :  { %7103 = vsyncpa [#allocation16], 1 }
0x13d6   :  { %7104 = vsyncpa [#allocation19], 1 }
0x13d7   :  { %7105 = vsyncpa [#allocation8], 1 }
0x13d8   :  { %7107 = vsyncpa [#allocation8 + $0x1], 1 }

</bundles_post_ra>
